<compile_context>
chip_gen: v6e
topology: v6e:2x2x1
jax: 0.10.0
libtpu: 0.0.40
codegen_flags: <defaults>
</compile_context>

<pallas_src>
import functools
import numpy as np
import jax
import jax.numpy as jnp
from jax.experimental import pallas as pl
from jax.experimental.pallas import tpu as pltpu

# ----------------------------- small config (consistent with ReCon2/MaskTransformer) --
B = 2              # batch
N_PTS = 128        # points per cloud
G = 8              # config.num_group
S = 16             # config.group_size
D = 64             # config.embed_dim
H = 4              # config.num_heads
DH = D // H
DEPTH = 2          # config.depth
DEC_DEPTH = 1      # config.decoder_depth
IMG_Q = 2          # config.img_queries
TXT_Q = 2          # config.text_queries
Q = IMG_Q + TXT_Q  # global_query_num
MASK_RATIO = 0.5   # config.mask_ratio
NUM_MASK = int(MASK_RATIO * G)
G_VIS = G - NUM_MASK
PROJ_DIM = 1280    # img_proj / text_proj out dim
# with_color = False -> input_channel = 3; mask_type != 'causal' -> MAE branch

# ----------------------------- static random mask (replaces _mask_center_rand) --------
# TODO(synk): original uses np.random.shuffle at every forward; made deterministic/static
_rng = np.random.RandomState(0)
_mask_np = np.zeros((B, G), dtype=bool)
for _i in range(B):
    _perm = _rng.permutation(G)
    _mask_np[_i, _perm[:NUM_MASK]] = True
VIS_IDX = jnp.asarray(np.stack([np.nonzero(~_mask_np[i])[0] for i in range(B)]), jnp.int32)
MSK_IDX = jnp.asarray(np.stack([np.nonzero(_mask_np[i])[0] for i in range(B)]), jnp.int32)


# ====================================== Pallas plumbing ================================
def _full_spec(shape):
    n = len(shape)
    return pl.BlockSpec(shape, lambda i, _n=n: (0,) * _n)


def _call(kernel, out_shape, out_dtype, *args):
    """Single-grid-step pallas_call: every operand is one full VMEM block."""
    return pl.pallas_call(
        kernel,
        out_shape=jax.ShapeDtypeStruct(out_shape, out_dtype),
        grid=(1,),
        in_specs=[_full_spec(a.shape) for a in args],
        out_specs=_full_spec(out_shape),
        compiler_params=pltpu.CompilerParams(dimension_semantics=("arbitrary",)),
    )(*args)


# ------------------------------ in-kernel helpers -------------------------------------
def _ln(x, g, b, eps):
    mu = jnp.mean(x, axis=-1, keepdims=True)
    var = jnp.mean(jnp.square(x - mu), axis=-1, keepdims=True)
    return (x - mu) * jax.lax.rsqrt(var + eps) * g + b


def _gelu(x):
    # TODO(synk): tanh-approx GELU (jax.nn.gelu default); PyTorch nn.GELU default is erf.
    return jax.nn.gelu(x)


# ====================================== kernels ========================================
def _block_kernel(x_ref, ln1g, ln1b, qkvw, qkvb, projw, projb,
                  ln2g, ln2b, fc1w, fc1b, fc2w, fc2b, o_ref, *, num_heads, scale):
    """Fused pre-LN transformer block: attention + MLP, residuals included."""
    x3 = x_ref[...]                                   # (B, T, D)
    Bx, T, Dm = x3.shape
    Dh = Dm // num_heads
    x = x3.reshape(Bx * T, Dm)

    # ---- multi-head self-attention ----------------------------------------------------
    h = _ln(x, ln1g[...], ln1b[...], 1e-5)
    qkv = jnp.dot(h, qkvw[...], preferred_element_type=jnp.float32) + qkvb[...]   # (BT, 3D)
    q = qkv[:, 0 * Dm:1 * Dm].reshape(Bx, T, Dm)
    k = qkv[:, 1 * Dm:2 * Dm].reshape(Bx, T, Dm)
    v = qkv[:, 2 * Dm:3 * Dm].reshape(Bx, T, Dm)
    pw = projw[...]                                   # (D, D)

    attn = jnp.zeros((Bx * T, Dm), jnp.float32)
    for hh in range(num_heads):                       # static unroll, heads sliced on lanes
        sl = slice(hh * Dh, (hh + 1) * Dh)
        qh, kh, vh = q[:, :, sl], k[:, :, sl], v[:, :, sl]
        s = jnp.einsum('bqd,bkd->bqk', qh, kh, preferred_element_type=jnp.float32) * scale
        s = s - jnp.max(s, axis=-1, keepdims=True)
        p = jnp.exp(s)
        p = p * pl.reciprocal(jnp.sum(p, axis=-1, keepdims=True), approx=True)
        oh = jnp.einsum('bqk,bkd->bqd', p, vh, preferred_element_type=jnp.float32)
        # fold the output projection per head: concat(heads) @ Wp == sum_h oh @ Wp[h-rows]
        attn = attn + jnp.dot(oh.reshape(Bx * T, Dh), pw[sl, :],
                              preferred_element_type=jnp.float32)
    attn = attn + projb[...]
    x = x + attn

    # ---- MLP ---------------------------------------------------------------------------
    h = _ln(x, ln2g[...], ln2b[...], 1e-5)
    h = _gelu(jnp.dot(h, fc1w[...], preferred_element_type=jnp.float32) + fc1b[...])
    h = jnp.dot(h, fc2w[...], preferred_element_type=jnp.float32) + fc2b[...]
    x = x + h
    o_ref[...] = x.reshape(Bx, T, Dm)


def _patch_embed_kernel(nbr_ref, w1, b1, w2, b2, w3, b3, w4, b4, o_ref):
    """Fused mini-PointNet: fc1+relu, fc2, maxpool, (implicit concat), fc3+relu, fc4, maxpool."""
    x = nbr_ref[...]                                  # (BG, S, 3)
    BGx, Sx, _ = x.shape
    xf = x.reshape(BGx * Sx, 3)

    f = jnp.maximum(jnp.dot(xf, w1[...], preferred_element_type=jnp.float32) + b1[...], 0.0)
    f = jnp.dot(f, w2[...], preferred_element_type=jnp.float32) + b2[...]          # (BG*S, 256)
    C2 = f.shape[-1]
    f3 = f.reshape(BGx, Sx, C2)
    g = jnp.max(f3, axis=1)                                                         # (BG, 256)

    w3full = w3[...]                                  # (512, 512)
    w3g = w3full[:C2, :]                              # multiplies the broadcast global half
    w3f = w3full[C2:, :]                              # multiplies the per-point half
    hg = jnp.dot(g, w3g, preferred_element_type=jnp.float32)                        # (BG, 512)
    hf = jnp.dot(f, w3f, preferred_element_type=jnp.float32)                        # (BG*S, 512)
    h = hf.reshape(BGx, Sx, -1) + hg[:, None, :] + b3[...]
    h = jnp.maximum(h, 0.0)

    h = jnp.dot(h.reshape(BGx * Sx, -1), w4[...], preferred_element_type=jnp.float32) + b4[...]
    tok = jnp.max(h.reshape(BGx, Sx, -1), axis=1)                                    # (BG, D)
    o_ref[...] = tok


def _mlp2_kernel(x_ref, w1, b1, w2, b2, o_ref):
    """Linear -> GELU -> Linear (pos_embed / decoder_pos_embed)."""
    h = _gelu(jnp.dot(x_ref[...], w1[...], preferred_element_type=jnp.float32) + b1[...])
    o_ref[...] = jnp.dot(h, w2[...], preferred_element_type=jnp.float32) + b2[...]


def _ln_kernel(x_ref, g_ref, b_ref, o_ref, *, eps):
    o_ref[...] = _ln(x_ref[...], g_ref[...], b_ref[...], eps)


def _ln_linear_kernel(x_ref, g_ref, b_ref, w_ref, bias_ref, o_ref, *, eps):
    h = _ln(x_ref[...], g_ref[...], b_ref[...], eps)
    o_ref[...] = jnp.dot(h, w_ref[...], preferred_element_type=jnp.float32) + bias_ref[...]


def _proj_norm_kernel(x_ref, w_ref, b_ref, o_ref, *, eps):
    y = jnp.dot(x_ref[...], w_ref[...], preferred_element_type=jnp.float32) + b_ref[...]
    n = jnp.sqrt(jnp.sum(y * y, axis=-1, keepdims=True))
    o_ref[...] = y * pl.reciprocal(jnp.maximum(n, eps), approx=True)


def _pdist_kernel(c_ref, p_ref, o_ref):
    c = c_ref[...]                                    # (B, G, 3)
    p = p_ref[...]                                    # (B, N, 3)
    cc = jnp.sum(c * c, axis=-1, keepdims=True)       # (B, G, 1)
    pp = jnp.sum(p * p, axis=-1)[:, None, :]          # (B, 1, N)
    cross = jnp.einsum('bgc,bnc->bgn', c, p, preferred_element_type=jnp.float32)
    o_ref[...] = cc + pp - 2.0 * cross


def _chamfer_kernel(a_ref, b_ref, o_ref):
    """Batched chamfer; writes [d1 | d2] as one (Nb, 2S) slab. No idx (unused)."""
    a = a_ref[...]                                    # (Nb, S, 3)
    b = b_ref[...]                                    # (Nb, S, 3)
    aa = jnp.sum(a * a, axis=-1, keepdims=True)       # (Nb, S, 1)
    bb = jnp.sum(b * b, axis=-1)[:, None, :]          # (Nb, 1, S)
    d = aa + bb - 2.0 * jnp.einsum('nsc,ntc->nst', a, b, preferred_element_type=jnp.float32)
    d = jnp.maximum(d, 0.0)
    d1 = jnp.min(d, axis=2)                           # per generated point (Nb, S)
    d2 = jnp.min(d, axis=1)                           # per gt point        (Nb, S)
    o_ref[...] = jnp.concatenate([d1, d2], axis=-1)


# ====================================== wrappers =======================================
def pallas_block(x, bp):
    Bx, T, Dm = x.shape
    kern = functools.partial(_block_kernel, num_heads=H, scale=1.0 / float(np.sqrt(DH)))
    return _call(kern, (Bx, T, Dm), jnp.float32,
                 x,
                 bp["ln1_g"].reshape(1, Dm), bp["ln1_b"].reshape(1, Dm),
                 bp["qkv"]["w"], bp["qkv"]["b"].reshape(1, -1),
                 bp["proj"]["w"], bp["proj"]["b"].reshape(1, -1),
                 bp["ln2_g"].reshape(1, Dm), bp["ln2_b"].reshape(1, Dm),
                 bp["fc1"]["w"], bp["fc1"]["b"].reshape(1, -1),
                 bp["fc2"]["w"], bp["fc2"]["b"].reshape(1, -1))


def pallas_layernorm(x2, g, b):
    M, Dm = x2.shape
    return _call(functools.partial(_ln_kernel, eps=1e-5), (M, Dm), jnp.float32,
                 x2, g.reshape(1, Dm), b.reshape(1, Dm))


def pallas_ln_linear(x2, g, b, w, bias):
    M = x2.shape[0]
    N = w.shape[1]
    return _call(functools.partial(_ln_linear_kernel, eps=1e-5), (M, N), jnp.float32,
                 x2, g.reshape(1, -1), b.reshape(1, -1), w, bias.reshape(1, N))


def pallas_proj_l2norm(x2, w, b):
    M = x2.shape[0]
    N = w.shape[1]
    return _call(functools.partial(_proj_norm_kernel, eps=1e-12), (M, N), jnp.float32,
                 x2, w, b.reshape(1, N))


def pallas_chamfer(a, b):
    Nb, Sx, _ = a.shape
    out = _call(_chamfer_kernel, (Nb, 2 * Sx), jnp.float32, a, b)
    return out[:, :Sx], out[:, Sx:]


# ====================================== parameters =====================================
def _lin(key, fin, fout):
    # matches _init_weights: nn.init.normal_(weight, 0.02, 0.01) i.e. mean 0.02, std 0.01
    return {"w": 0.02 + 0.01 * jax.random.normal(key, (fin, fout), jnp.float32),
            "b": jnp.zeros((fout,), jnp.float32)}


def _block_params(key, d, mlp_ratio=4):
    ks = jax.random.split(key, 4)
    return {
        "ln1_g": jnp.ones((d,), jnp.float32), "ln1_b": jnp.zeros((d,), jnp.float32),
        "qkv": _lin(ks[0], d, 3 * d),
        "proj": _lin(ks[1], d, d),
        "ln2_g": jnp.ones((d,), jnp.float32), "ln2_b": jnp.zeros((d,), jnp.float32),
        "fc1": _lin(ks[2], d, mlp_ratio * d),
        "fc2": _lin(ks[3], mlp_ratio * d, d),
    }


def init_params(key):
    ks = iter(jax.random.split(key, 32))
    p = {}
    # PatchEmbedding (mini-PointNet; BatchNorm1d folded to identity)
    p["embed_fc1"] = _lin(next(ks), 3, 128)
    p["embed_fc2"] = _lin(next(ks), 128, 256)
    p["embed_fc3"] = _lin(next(ks), 512, 512)
    p["embed_fc4"] = _lin(next(ks), 512, D)
    # pos_embed / decoder_pos_embed: Linear(3,128) GELU Linear(128, D)
    p["pos1"] = _lin(next(ks), 3, 128)
    p["pos2"] = _lin(next(ks), 128, D)
    p["dpos1"] = _lin(next(ks), 3, 128)
    p["dpos2"] = _lin(next(ks), 128, D)
    p["global_query"] = jnp.zeros((1, Q, D), jnp.float32)     # nn.Parameter(torch.zeros)
    p["mask_token"] = 0.01 * jax.random.normal(next(ks), (1, 1, D), jnp.float32)
    p["enc_blocks"] = [_block_params(next(ks), D) for _ in range(DEPTH)]
    p["enc_norm_g"] = jnp.ones((D,), jnp.float32)
    p["enc_norm_b"] = jnp.zeros((D,), jnp.float32)
    p["dec_blocks"] = [_block_params(next(ks), D) for _ in range(DEC_DEPTH)]
    p["dec_norm_g"] = jnp.ones((D,), jnp.float32)
    p["dec_norm_b"] = jnp.zeros((D,), jnp.float32)
    p["dec_head"] = _lin(next(ks), D, 3 * S)                  # MAEGenerator increase_dim
    p["img_proj"] = _lin(next(ks), D, PROJ_DIM)
    p["text_proj"] = _lin(next(ks), D, PROJ_DIM)
    return p


# ====================================== model pieces ===================================
def group_divider(pts):
    # TODO(synk): FPS is inherently sequential (no clean Pallas equivalent);
    #             deterministic stride-subsampled centers used instead, KNN done with a
    #             batched Pallas pairwise-distance kernel + top_k.
    centers = pts[:, :: (N_PTS // G), :]                       # (B, G, 3)
    d = _call(_pdist_kernel, (B, G, N_PTS), jnp.float32, centers, pts)   # (B, G, N)
    _, knn_idx = jax.lax.top_k(-d, S)                          # S nearest points per center
    nbr = jax.vmap(lambda p, i: p[i])(pts, knn_idx)            # (B, G, S, 3)
    nbr = nbr - centers[:, :, None, :]                         # center-relative (as in Group)
    return nbr, centers


def patch_embed(neighborhood, p):
    x = neighborhood.reshape(B * G, S, 3)
    tok = _call(_patch_embed_kernel, (B * G, D), jnp.float32,
                x,
                p["embed_fc1"]["w"], p["embed_fc1"]["b"].reshape(1, -1),
                p["embed_fc2"]["w"], p["embed_fc2"]["b"].reshape(1, -1),
                p["embed_fc3"]["w"], p["embed_fc3"]["b"].reshape(1, -1),
                p["embed_fc4"]["w"], p["embed_fc4"]["b"].reshape(1, -1))
    return tok.reshape(B, G, D)


def pos_mlp(center, w1, w2):
    x = center.reshape(-1, 3)
    out = _call(_mlp2_kernel, (x.shape[0], D), jnp.float32,
                x, w1["w"], w1["b"].reshape(1, -1), w2["w"], w2["b"].reshape(1, -1))
    return out.reshape(center.shape[0], -1, D)


def _gather_tokens(a, idx):                      # a: (B, G, D), idx: (B, K) -> (B, K, D)
    idx_b = jnp.broadcast_to(idx[:, :, None], (a.shape[0], idx.shape[1], a.shape[2]))
    return jnp.take_along_axis(a, idx_b, axis=1)


def forward_features(pts, p):
    nbr, centers = group_divider(pts)
    tokens = patch_embed(nbr, p)                                   # (B, G, D)
    pos = pos_mlp(centers, p["pos1"], p["pos2"])                   # (B, G, D)
    dpos = pos_mlp(centers, p["dpos1"], p["dpos2"])                # (B, G, D)

    tok_vis = _gather_tokens(tokens, VIS_IDX)
    pos_vis = _gather_tokens(pos, VIS_IDX)
    dpos_vis = _gather_tokens(dpos, VIS_IDX)
    dpos_msk = _gather_tokens(dpos, MSK_IDX)

    # ---- MAEExtractor: visible tokens + pos, global queries appended, transformer -----
    gq = jnp.broadcast_to(p["global_query"], (B, Q, D))
    x = jnp.concatenate([tok_vis + pos_vis, gq], axis=1)           # (B, G_VIS + Q, D)
    for bp in p["enc_blocks"]:
        x = pallas_block(x, bp)
    x = pallas_layernorm(x.reshape(-1, D), p["enc_norm_g"], p["enc_norm_b"])
    x = x.reshape(B, G_VIS + Q, D)
    x_vis = x[:, :G_VIS]
    global_feat = x[:, G_VIS:]                                     # (B, Q, D)

    # ---- MAEGenerator: visible latents + mask tokens, transformer, fused LN+head ------
    mtok = jnp.broadcast_to(p["mask_token"], (B, NUM_MASK, D))
    y = jnp.concatenate([x_vis + dpos_vis, mtok + dpos_msk], axis=1)   # (B, G, D)
    for bp in p["dec_blocks"]:
        y = pallas_block(y, bp)
    y_msk = y[:, -NUM_MASK:].reshape(B * NUM_MASK, D)              # LN is per-token: safe
    gen = pallas_ln_linear(y_msk, p["dec_norm_g"], p["dec_norm_b"],
                           p["dec_head"]["w"], p["dec_head"]["b"])
    generated_points = gen.reshape(B * NUM_MASK, S, 3)

    # gt_points = neighborhood[mask]
    idx4 = jnp.broadcast_to(MSK_IDX[:, :, None, None], (B, NUM_MASK, S, 3))
    gt_points = jnp.take_along_axis(nbr, idx4, axis=1).reshape(B * NUM_MASK, S, 3)

    # ---- ReCon2 img/text projections fused with L2 normalize --------------------------
    img_tok = pallas_proj_l2norm(global_feat[:, :IMG_Q].reshape(B * IMG_Q, D),
                                 p["img_proj"]["w"], p["img_proj"]["b"])
    img_tok = img_tok.reshape(B, IMG_Q, PROJ_DIM)
    txt_tok = pallas_proj_l2norm(global_feat[:, IMG_Q:].reshape(B * TXT_Q, D),
                                 p["text_proj"]["w"], p["text_proj"]["b"])
    txt_tok = txt_tok.reshape(B, TXT_Q, PROJ_DIM)
    return img_tok, txt_tok, gt_points, generated_points


def forward_reconstruct(pts, p):
    # ReCon2.forward(pts, img, text, type='reconstruct')
    # TODO(synk): contrast losses need torch.distributed all_gather / scipy
    #             linear_sum_assignment -> not translated; reconstruction path only.
    img_tok, txt_tok, gt_points, generated_points = forward_features(pts, p)
    d1, d2 = pallas_chamfer(generated_points[:, :, :3], gt_points[:, :, :3])
    cd_l2_loss = jnp.mean(d1) + jnp.mean(d2)
    cd_l1_loss = (jnp.mean(jnp.sqrt(d1)) + jnp.mean(jnp.sqrt(d2))) / 2.0
    color_l1_loss = 0.0                                   # with_color == False
    loss = cd_l1_loss + cd_l2_loss + color_l1_loss
    return loss, img_tok, txt_tok


# ====================================== main ===========================================
if __name__ == "__main__":
    key = jax.random.PRNGKey(0)
    kp, kx = jax.random.split(key)
    params = init_params(kp)
    pts = jax.random.uniform(kx, (B, N_PTS, 3), jnp.float32, minval=-1.0, maxval=1.0)

    fwd = jax.jit(forward_reconstruct)
    loss, img_tok, txt_tok = fwd(pts, params)
    jax.block_until_ready((loss, img_tok, txt_tok))

    assert loss.shape == ()
    assert bool(jnp.isfinite(loss))
    assert img_tok.shape == (B, IMG_Q, PROJ_DIM)
    assert txt_tok.shape == (B, TXT_Q, PROJ_DIM)
    print("KERNEL_OK")
</pallas_src>

<mosaic_0001>
module attributes {stable_mosaic.version = 11 : i64} {
  func.func @_pdist_kernel(%arg0: i32, %arg1: memref<2x8x3xf32, #tpu.memory_space<vmem>>, %arg2: memref<2x128x3xf32, #tpu.memory_space<vmem>>, %arg3: memref<2x8x128xf32, #tpu.memory_space<vmem>>) attributes {dimension_semantics = [#tpu.dimension_semantics<arbitrary>], iteration_bounds = array<i64: 1>, scalar_prefetch = 0 : i64, scratch_operands = 0 : i64, tpu.core_type = #tpu.core_type<tc>, window_params = [{pipeline_mode = #tpu.pipeline_mode<synchronous>, transform_indices = @transform_0, window_bounds = array<i64: 2, 8, 3>}, {pipeline_mode = #tpu.pipeline_mode<synchronous>, transform_indices = @transform_1, window_bounds = array<i64: 2, 128, 3>}, {pipeline_mode = #tpu.pipeline_mode<synchronous>, transform_indices = @transform_2, window_bounds = array<i64: 2, 8, 128>}]} {
    %c0 = arith.constant 0 : index
    %c0_0 = arith.constant 0 : index
    %c0_1 = arith.constant 0 : index
    %0 = vector.load %arg1[%c0, %c0_0, %c0_1] : memref<2x8x3xf32, #tpu.memory_space<vmem>>, vector<2x8x3xf32>
    %c0_2 = arith.constant 0 : index
    %c0_3 = arith.constant 0 : index
    %c0_4 = arith.constant 0 : index
    %1 = vector.load %arg2[%c0_2, %c0_3, %c0_4] : memref<2x128x3xf32, #tpu.memory_space<vmem>>, vector<2x128x3xf32>
    %2 = arith.mulf %0, %0 : vector<2x8x3xf32>
    %cst = arith.constant dense<0.000000e+00> : vector<2x8xf32>
    %3 = vector.multi_reduction <add>, %2, %cst [2] : vector<2x8x3xf32> to vector<2x8xf32>
    %4 = vector.shape_cast %3 : vector<2x8xf32> to vector<2x8x1xf32>
    %5 = arith.mulf %1, %1 : vector<2x128x3xf32>
    %cst_5 = arith.constant dense<0.000000e+00> : vector<2x128xf32>
    %6 = vector.multi_reduction <add>, %5, %cst_5 [2] : vector<2x128x3xf32> to vector<2x128xf32>
    %7 = vector.shape_cast %6 : vector<2x128xf32> to vector<2x1x128xf32>
    "tpu.trace_start"() <{level = 10 : i32, message = "bgc,bnc->bgn"}> : () -> ()
    %cst_6 = arith.constant dense<0.000000e+00> : vector<2x8x128xf32>
    %8 = tpu.matmul %0, %1, %cst_6 {dimension_numbers = #tpu.dot_dimension_numbers<[2], [2], [1], [1], [0, 0, 0, 1, 1, 1], [0], [0]>} : vector<2x8x3xf32>, vector<2x128x3xf32>, vector<2x8x128xf32> -> vector<2x8x128xf32>
    "tpu.trace_stop"() : () -> ()
    %9 = vector.broadcast %4 : vector<2x8x1xf32> to vector<2x8x128xf32>
    %10 = vector.broadcast %7 : vector<2x1x128xf32> to vector<2x8x128xf32>
    %11 = arith.addf %9, %10 : vector<2x8x128xf32>
    %cst_7 = arith.constant 2.000000e+00 : f32
    %12 = vector.broadcast %cst_7 : f32 to vector<2x8x128xf32>
    %13 = arith.mulf %12, %8 : vector<2x8x128xf32>
    %14 = arith.subf %11, %13 : vector<2x8x128xf32>
    %c0_8 = arith.constant 0 : index
    %c0_9 = arith.constant 0 : index
    %c0_10 = arith.constant 0 : index
    %15 = vector.load %arg3[%c0_8, %c0_9, %c0_10] : memref<2x8x128xf32, #tpu.memory_space<vmem>>, vector<2x8x128xf32>
    tpu.vector_store %arg3[%c0_8, %c0_9, %c0_10], %14 {strides = array<i32>} : memref<2x8x128xf32, #tpu.memory_space<vmem>>, vector<2x8x128xf32>,
    return
  }
  func.func @transform_0(%arg0: i32) -> (i32, i32, i32) {
    %c0_i32 = arith.constant 0 : i32
    %c0_i32_0 = arith.constant 0 : i32
    %c0_i32_1 = arith.constant 0 : i32
    %c0_i32_2 = arith.constant 0 : i32
    return %c0_i32, %c0_i32_0, %c0_i32_1 : i32, i32, i32
  }
  func.func @transform_1(%arg0: i32) -> (i32, i32, i32) {
    %c0_i32 = arith.constant 0 : i32
    %c0_i32_0 = arith.constant 0 : i32
    %c0_i32_1 = arith.constant 0 : i32
    %c0_i32_2 = arith.constant 0 : i32
    return %c0_i32, %c0_i32_0, %c0_i32_1 : i32, i32, i32
  }
  func.func @transform_2(%arg0: i32) -> (i32, i32, i32) {
    %c0_i32 = arith.constant 0 : i32
    %c0_i32_0 = arith.constant 0 : i32
    %c0_i32_1 = arith.constant 0 : i32
    %c0_i32_2 = arith.constant 0 : i32
    return %c0_i32, %c0_i32_0, %c0_i32_1 : i32, i32, i32
  }
}

module attributes {stable_mosaic.version = 11 : i64} {
  func.func @_patch_embed_kernel(%arg0: i32, %arg1: memref<16x16x3xf32, #tpu.memory_space<vmem>>, %arg2: memref<3x128xf32, #tpu.memory_space<vmem>>, %arg3: memref<1x128xf32, #tpu.memory_space<vmem>>, %arg4: memref<128x256xf32, #tpu.memory_space<vmem>>, %arg5: memref<1x256xf32, #tpu.memory_space<vmem>>, %arg6: memref<512x512xf32, #tpu.memory_space<vmem>>, %arg7: memref<1x512xf32, #tpu.memory_space<vmem>>, %arg8: memref<512x64xf32, #tpu.memory_space<vmem>>, %arg9: memref<1x64xf32, #tpu.memory_space<vmem>>, %arg10: memref<16x64xf32, #tpu.memory_space<vmem>>) attributes {dimension_semantics = [#tpu.dimension_semantics<arbitrary>], iteration_bounds = array<i64: 1>, scalar_prefetch = 0 : i64, scratch_operands = 0 : i64, tpu.core_type = #tpu.core_type<tc>, window_params = [{pipeline_mode = #tpu.pipeline_mode<synchronous>, transform_indices = @transform_0, window_bounds = array<i64: 16, 16, 3>}, {pipeline_mode = #tpu.pipeline_mode<synchronous>, transform_indices = @transform_1, window_bounds = array<i64: 3, 128>}, {pipeline_mode = #tpu.pipeline_mode<synchronous>, transform_indices = @transform_2, window_bounds = array<i64: 1, 128>}, {pipeline_mode = #tpu.pipeline_mode<synchronous>, transform_indices = @transform_3, window_bounds = array<i64: 128, 256>}, {pipeline_mode = #tpu.pipeline_mode<synchronous>, transform_indices = @transform_4, window_bounds = array<i64: 1, 256>}, {pipeline_mode = #tpu.pipeline_mode<synchronous>, transform_indices = @transform_5, window_bounds = array<i64: 512, 512>}, {pipeline_mode = #tpu.pipeline_mode<synchronous>, transform_indices = @transform_6, window_bounds = array<i64: 1, 512>}, {pipeline_mode = #tpu.pipeline_mode<synchronous>, transform_indices = @transform_7, window_bounds = array<i64: 512, 64>}, {pipeline_mode = #tpu.pipeline_mode<synchronous>, transform_indices = @transform_8, window_bounds = array<i64: 1, 64>}, {pipeline_mode = #tpu.pipeline_mode<synchronous>, transform_indices = @transform_9, window_bounds = array<i64: 16, 64>}]} {
    %c0 = arith.constant 0 : index
    %c0_0 = arith.constant 0 : index
    %c0_1 = arith.constant 0 : index
    %0 = vector.load %arg1[%c0, %c0_0, %c0_1] : memref<16x16x3xf32, #tpu.memory_space<vmem>>, vector<16x16x3xf32>
    %1 = vector.shape_cast %0 : vector<16x16x3xf32> to vector<256x3xf32>
    %c0_2 = arith.constant 0 : index
    %c0_3 = arith.constant 0 : index
    %2 = vector.load %arg2[%c0_2, %c0_3] : memref<3x128xf32, #tpu.memory_space<vmem>>, vector<3x128xf32>
    %cst = arith.constant dense<0.000000e+00> : vector<256x128xf32>
    %3 = tpu.matmul %1, %2, %cst {dimension_numbers = #tpu.dot_dimension_numbers<[1], [0], [0], [1], [0, 0, 1, 1], [], []>} : vector<256x3xf32>, vector<3x128xf32>, vector<256x128xf32> -> vector<256x128xf32>
    %c0_4 = arith.constant 0 : index
    %c0_5 = arith.constant 0 : index
    %4 = vector.load %arg3[%c0_4, %c0_5] : memref<1x128xf32, #tpu.memory_space<vmem>>, vector<1x128xf32>
    %5 = vector.broadcast %4 : vector<1x128xf32> to vector<256x128xf32>
    %6 = arith.addf %3, %5 : vector<256x128xf32>
    %cst_6 = arith.constant 0.000000e+00 : f32
    %7 = vector.broadcast %cst_6 : f32 to vector<256x128xf32>
    %8 = arith.maximumf %6, %7 : vector<256x128xf32>
    %c0_7 = arith.constant 0 : index
    %c0_8 = arith.constant 0 : index
    %9 = vector.load %arg4[%c0_7, %c0_8] : memref<128x256xf32, #tpu.memory_space<vmem>>, vector<128x256xf32>
    %cst_9 = arith.constant dense<0.000000e+00> : vector<256x256xf32>
    %10 = tpu.matmul %8, %9, %cst_9 {dimension_numbers = #tpu.dot_dimension_numbers<[1], [0], [0], [1], [0, 0, 1, 1], [], []>} : vector<256x128xf32>, vector<128x256xf32>, vector<256x256xf32> -> vector<256x256xf32>
    %c0_10 = arith.constant 0 : index
    %c0_11 = arith.constant 0 : index
    %11 = vector.load %arg5[%c0_10, %c0_11] : memref<1x256xf32, #tpu.memory_space<vmem>>, vector<1x256xf32>
    %12 = vector.broadcast %11 : vector<1x256xf32> to vector<256x256xf32>
    %13 = arith.addf %10, %12 : vector<256x256xf32>
    %14 = vector.shape_cast %13 : vector<256x256xf32> to vector<16x16x256xf32>
    %cst_12 = arith.constant dense<0xFF800000> : vector<16x256xf32>
    %15 = vector.multi_reduction <maximumf>, %14, %cst_12 [1] : vector<16x16x256xf32> to vector<16x256xf32>
    %c0_13 = arith.constant 0 : index
    %c0_14 = arith.constant 0 : index
    %16 = vector.load %arg6[%c0_13, %c0_14] : memref<512x512xf32, #tpu.memory_space<vmem>>, vector<512x512xf32>
    %17 = vector.extract_strided_slice %16 {offsets = [0, 0], sizes = [256, 512], strides = [1, 1]} : vector<512x512xf32> to vector<256x512xf32>
    %18 = vector.extract_strided_slice %16 {offsets = [256, 0], sizes = [256, 512], strides = [1, 1]} : vector<512x512xf32> to vector<256x512xf32>
    %cst_15 = arith.constant dense<0.000000e+00> : vector<16x512xf32>
    %19 = tpu.matmul %15, %17, %cst_15 {dimension_numbers = #tpu.dot_dimension_numbers<[1], [0], [0], [1], [0, 0, 1, 1], [], []>} : vector<16x256xf32>, vector<256x512xf32>, vector<16x512xf32> -> vector<16x512xf32>
    %cst_16 = arith.constant dense<0.000000e+00> : vector<256x512xf32>
    %20 = tpu.matmul %13, %18, %cst_16 {dimension_numbers = #tpu.dot_dimension_numbers<[1], [0], [0], [1], [0, 0, 1, 1], [], []>} : vector<256x256xf32>, vector<256x512xf32>, vector<256x512xf32> -> vector<256x512xf32>
    %21 = vector.shape_cast %20 : vector<256x512xf32> to vector<16x16x512xf32>
    %22 = vector.shape_cast %19 : vector<16x512xf32> to vector<16x1x512xf32>
    %23 = vector.broadcast %22 : vector<16x1x512xf32> to vector<16x16x512xf32>
    %24 = arith.addf %21, %23 : vector<16x16x512xf32>
    %c0_17 = arith.constant 0 : index
    %c0_18 = arith.constant 0 : index
    %25 = vector.load %arg7[%c0_17, %c0_18] : memref<1x512xf32, #tpu.memory_space<vmem>>, vector<1x512xf32>
    %26 = vector.shape_cast %25 : vector<1x512xf32> to vector<1x1x512xf32>
    %27 = vector.broadcast %26 : vector<1x1x512xf32> to vector<16x16x512xf32>
    %28 = arith.addf %24, %27 : vector<16x16x512xf32>
    %cst_19 = arith.constant 0.000000e+00 : f32
    %29 = vector.broadcast %cst_19 : f32 to vector<16x16x512xf32>
    %30 = arith.maximumf %28, %29 : vector<16x16x512xf32>
    %31 = vector.shape_cast %30 : vector<16x16x512xf32> to vector<256x512xf32>
    %c0_20 = arith.constant 0 : index
    %c0_21 = arith.constant 0 : index
    %32 = vector.load %arg8[%c0_20, %c0_21] : memref<512x64xf32, #tpu.memory_space<vmem>>, vector<512x64xf32>
    %cst_22 = arith.constant dense<0.000000e+00> : vector<256x64xf32>
    %33 = tpu.matmul %31, %32, %cst_22 {dimension_numbers = #tpu.dot_dimension_numbers<[1], [0], [0], [1], [0, 0, 1, 1], [], []>} : vector<256x512xf32>, vector<512x64xf32>, vector<256x64xf32> -> vector<256x64xf32>
    %c0_23 = arith.constant 0 : index
    %c0_24 = arith.constant 0 : index
    %34 = vector.load %arg9[%c0_23, %c0_24] : memref<1x64xf32, #tpu.memory_space<vmem>>, vector<1x64xf32>
    %35 = vector.broadcast %34 : vector<1x64xf32> to vector<256x64xf32>
    %36 = arith.addf %33, %35 : vector<256x64xf32>
    %37 = vector.shape_cast %36 : vector<256x64xf32> to vector<16x16x64xf32>
    %cst_25 = arith.constant dense<0xFF800000> : vector<16x64xf32>
    %38 = vector.multi_reduction <maximumf>, %37, %cst_25 [1] : vector<16x16x64xf32> to vector<16x64xf32>
    %c0_26 = arith.constant 0 : index
    %c0_27 = arith.constant 0 : index
    %39 = vector.load %arg10[%c0_26, %c0_27] : memref<16x64xf32, #tpu.memory_space<vmem>>, vector<16x64xf32>
    tpu.vector_store %arg10[%c0_26, %c0_27], %38 {strides = array<i32>} : memref<16x64xf32, #tpu.memory_space<vmem>>, vector<16x64xf32>,
    return
  }
  func.func @transform_0(%arg0: i32) -> (i32, i32, i32) {
    %c0_i32 = arith.constant 0 : i32
    %c0_i32_0 = arith.constant 0 : i32
    %c0_i32_1 = arith.constant 0 : i32
    %c0_i32_2 = arith.constant 0 : i32
    return %c0_i32, %c0_i32_0, %c0_i32_1 : i32, i32, i32
  }
  func.func @transform_1(%arg0: i32) -> (i32, i32) {
    %c0_i32 = arith.constant 0 : i32
    %c0_i32_0 = arith.constant 0 : i32
    %c0_i32_1 = arith.constant 0 : i32
    return %c0_i32, %c0_i32_0 : i32, i32
  }
  func.func @transform_2(%arg0: i32) -> (i32, i32) {
    %c0_i32 = arith.constant 0 : i32
    %c0_i32_0 = arith.constant 0 : i32
    %c0_i32_1 = arith.constant 0 : i32
    return %c0_i32, %c0_i32_0 : i32, i32
  }
  func.func @transform_3(%arg0: i32) -> (i32, i32) {
    %c0_i32 = arith.constant 0 : i32
    %c0_i32_0 = arith.constant 0 : i32
    %c0_i32_1 = arith.constant 0 : i32
    return %c0_i32, %c0_i32_0 : i32, i32
  }
  func.func @transform_4(%arg0: i32) -> (i32, i32) {
    %c0_i32 = arith.constant 0 : i32
    %c0_i32_0 = arith.constant 0 : i32
    %c0_i32_1 = arith.constant 0 : i32
    return %c0_i32, %c0_i32_0 : i32, i32
  }
  func.func @transform_5(%arg0: i32) -> (i32, i32) {
    %c0_i32 = arith.constant 0 : i32
    %c0_i32_0 = arith.constant 0 : i32
    %c0_i32_1 = arith.constant 0 : i32
    return %c0_i32, %c0_i32_0 : i32, i32
  }
  func.func @transform_6(%arg0: i32) -> (i32, i32) {
    %c0_i32 = arith.constant 0 : i32
    %c0_i32_0 = arith.constant 0 : i32
    %c0_i32_1 = arith.constant 0 : i32
    return %c0_i32, %c0_i32_0 : i32, i32
  }
  func.func @transform_7(%arg0: i32) -> (i32, i32) {
    %c0_i32 = arith.constant 0 : i32
    %c0_i32_0 = arith.constant 0 : i32
    %c0_i32_1 = arith.constant 0 : i32
    return %c0_i32, %c0_i32_0 : i32, i32
  }
  func.func @transform_8(%arg0: i32) -> (i32, i32) {
    %c0_i32 = arith.constant 0 : i32
    %c0_i32_0 = arith.constant 0 : i32
    %c0_i32_1 = arith.constant 0 : i32
    return %c0_i32, %c0_i32_0 : i32, i32
  }
  func.func @transform_9(%arg0: i32) -> (i32, i32) {
    %c0_i32 = arith.constant 0 : i32
    %c0_i32_0 = arith.constant 0 : i32
    %c0_i32_1 = arith.constant 0 : i32
    return %c0_i32, %c0_i32_0 : i32, i32
  }
}

module attributes {stable_mosaic.version = 11 : i64} {
  func.func @_mlp2_kernel(%arg0: i32, %arg1: memref<16x3xf32, #tpu.memory_space<vmem>>, %arg2: memref<3x128xf32, #tpu.memory_space<vmem>>, %arg3: memref<1x128xf32, #tpu.memory_space<vmem>>, %arg4: memref<128x64xf32, #tpu.memory_space<vmem>>, %arg5: memref<1x64xf32, #tpu.memory_space<vmem>>, %arg6: memref<16x64xf32, #tpu.memory_space<vmem>>) attributes {dimension_semantics = [#tpu.dimension_semantics<arbitrary>], iteration_bounds = array<i64: 1>, scalar_prefetch = 0 : i64, scratch_operands = 0 : i64, tpu.core_type = #tpu.core_type<tc>, window_params = [{pipeline_mode = #tpu.pipeline_mode<synchronous>, transform_indices = @transform_0, window_bounds = array<i64: 16, 3>}, {pipeline_mode = #tpu.pipeline_mode<synchronous>, transform_indices = @transform_1, window_bounds = array<i64: 3, 128>}, {pipeline_mode = #tpu.pipeline_mode<synchronous>, transform_indices = @transform_2, window_bounds = array<i64: 1, 128>}, {pipeline_mode = #tpu.pipeline_mode<synchronous>, transform_indices = @transform_3, window_bounds = array<i64: 128, 64>}, {pipeline_mode = #tpu.pipeline_mode<synchronous>, transform_indices = @transform_4, window_bounds = array<i64: 1, 64>}, {pipeline_mode = #tpu.pipeline_mode<synchronous>, transform_indices = @transform_5, window_bounds = array<i64: 16, 64>}]} {
    %c0 = arith.constant 0 : index
    %c0_0 = arith.constant 0 : index
    %0 = vector.load %arg1[%c0, %c0_0] : memref<16x3xf32, #tpu.memory_space<vmem>>, vector<16x3xf32>
    %c0_1 = arith.constant 0 : index
    %c0_2 = arith.constant 0 : index
    %1 = vector.load %arg2[%c0_1, %c0_2] : memref<3x128xf32, #tpu.memory_space<vmem>>, vector<3x128xf32>
    %cst = arith.constant dense<0.000000e+00> : vector<16x128xf32>
    %2 = tpu.matmul %0, %1, %cst {dimension_numbers = #tpu.dot_dimension_numbers<[1], [0], [0], [1], [0, 0, 1, 1], [], []>} : vector<16x3xf32>, vector<3x128xf32>, vector<16x128xf32> -> vector<16x128xf32>
    %c0_3 = arith.constant 0 : index
    %c0_4 = arith.constant 0 : index
    %3 = vector.load %arg3[%c0_3, %c0_4] : memref<1x128xf32, #tpu.memory_space<vmem>>, vector<1x128xf32>
    %4 = vector.broadcast %3 : vector<1x128xf32> to vector<16x128xf32>
    %5 = arith.addf %2, %4 : vector<16x128xf32>
    %6 = arith.mulf %5, %5 : vector<16x128xf32>
    %7 = arith.mulf %5, %6 : vector<16x128xf32>
    %cst_5 = arith.constant 4.471500e-02 : f32
    %8 = vector.broadcast %cst_5 : f32 to vector<16x128xf32>
    %9 = arith.mulf %8, %7 : vector<16x128xf32>
    %10 = arith.addf %5, %9 : vector<16x128xf32>
    %cst_6 = arith.constant 0.797884583 : f32
    %11 = vector.broadcast %cst_6 : f32 to vector<16x128xf32>
    %12 = arith.mulf %11, %10 : vector<16x128xf32>
    %13 = math.tanh %12 : vector<16x128xf32>
    %cst_7 = arith.constant 1.000000e+00 : f32
    %14 = vector.broadcast %cst_7 : f32 to vector<16x128xf32>
    %15 = arith.addf %14, %13 : vector<16x128xf32>
    %cst_8 = arith.constant 5.000000e-01 : f32
    %16 = vector.broadcast %cst_8 : f32 to vector<16x128xf32>
    %17 = arith.mulf %16, %15 : vector<16x128xf32>
    %18 = arith.mulf %5, %17 : vector<16x128xf32>
    %c0_9 = arith.constant 0 : index
    %c0_10 = arith.constant 0 : index
    %19 = vector.load %arg4[%c0_9, %c0_10] : memref<128x64xf32, #tpu.memory_space<vmem>>, vector<128x64xf32>
    %cst_11 = arith.constant dense<0.000000e+00> : vector<16x64xf32>
    %20 = tpu.matmul %18, %19, %cst_11 {dimension_numbers = #tpu.dot_dimension_numbers<[1], [0], [0], [1], [0, 0, 1, 1], [], []>} : vector<16x128xf32>, vector<128x64xf32>, vector<16x64xf32> -> vector<16x64xf32>
    %c0_12 = arith.constant 0 : index
    %c0_13 = arith.constant 0 : index
    %21 = vector.load %arg5[%c0_12, %c0_13] : memref<1x64xf32, #tpu.memory_space<vmem>>, vector<1x64xf32>
    %22 = vector.broadcast %21 : vector<1x64xf32> to vector<16x64xf32>
    %23 = arith.addf %20, %22 : vector<16x64xf32>
    %c0_14 = arith.constant 0 : index
    %c0_15 = arith.constant 0 : index
    %24 = vector.load %arg6[%c0_14, %c0_15] : memref<16x64xf32, #tpu.memory_space<vmem>>, vector<16x64xf32>
    tpu.vector_store %arg6[%c0_14, %c0_15], %23 {strides = array<i32>} : memref<16x64xf32, #tpu.memory_space<vmem>>, vector<16x64xf32>,
    return
  }
  func.func @transform_0(%arg0: i32) -> (i32, i32) {
    %c0_i32 = arith.constant 0 : i32
    %c0_i32_0 = arith.constant 0 : i32
    %c0_i32_1 = arith.constant 0 : i32
    return %c0_i32, %c0_i32_0 : i32, i32
  }
  func.func @transform_1(%arg0: i32) -> (i32, i32) {
    %c0_i32 = arith.constant 0 : i32
    %c0_i32_0 = arith.constant 0 : i32
    %c0_i32_1 = arith.constant 0 : i32
    return %c0_i32, %c0_i32_0 : i32, i32
  }
  func.func @transform_2(%arg0: i32) -> (i32, i32) {
    %c0_i32 = arith.constant 0 : i32
    %c0_i32_0 = arith.constant 0 : i32
    %c0_i32_1 = arith.constant 0 : i32
    return %c0_i32, %c0_i32_0 : i32, i32
  }
  func.func @transform_3(%arg0: i32) -> (i32, i32) {
    %c0_i32 = arith.constant 0 : i32
    %c0_i32_0 = arith.constant 0 : i32
    %c0_i32_1 = arith.constant 0 : i32
    return %c0_i32, %c0_i32_0 : i32, i32
  }
  func.func @transform_4(%arg0: i32) -> (i32, i32) {
    %c0_i32 = arith.constant 0 : i32
    %c0_i32_0 = arith.constant 0 : i32
    %c0_i32_1 = arith.constant 0 : i32
    return %c0_i32, %c0_i32_0 : i32, i32
  }
  func.func @transform_5(%arg0: i32) -> (i32, i32) {
    %c0_i32 = arith.constant 0 : i32
    %c0_i32_0 = arith.constant 0 : i32
    %c0_i32_1 = arith.constant 0 : i32
    return %c0_i32, %c0_i32_0 : i32, i32
  }
}

module attributes {stable_mosaic.version = 11 : i64} {
  func.func @_block_kernel(%arg0: i32, %arg1: memref<2x8x64xf32, #tpu.memory_space<vmem>>, %arg2: memref<1x64xf32, #tpu.memory_space<vmem>>, %arg3: memref<1x64xf32, #tpu.memory_space<vmem>>, %arg4: memref<64x192xf32, #tpu.memory_space<vmem>>, %arg5: memref<1x192xf32, #tpu.memory_space<vmem>>, %arg6: memref<64x64xf32, #tpu.memory_space<vmem>>, %arg7: memref<1x64xf32, #tpu.memory_space<vmem>>, %arg8: memref<1x64xf32, #tpu.memory_space<vmem>>, %arg9: memref<1x64xf32, #tpu.memory_space<vmem>>, %arg10: memref<64x256xf32, #tpu.memory_space<vmem>>, %arg11: memref<1x256xf32, #tpu.memory_space<vmem>>, %arg12: memref<256x64xf32, #tpu.memory_space<vmem>>, %arg13: memref<1x64xf32, #tpu.memory_space<vmem>>, %arg14: memref<2x8x64xf32, #tpu.memory_space<vmem>>) attributes {dimension_semantics = [#tpu.dimension_semantics<arbitrary>], iteration_bounds = array<i64: 1>, scalar_prefetch = 0 : i64, scratch_operands = 0 : i64, tpu.core_type = #tpu.core_type<tc>, window_params = [{pipeline_mode = #tpu.pipeline_mode<synchronous>, transform_indices = @transform_0, window_bounds = array<i64: 2, 8, 64>}, {pipeline_mode = #tpu.pipeline_mode<synchronous>, transform_indices = @transform_1, window_bounds = array<i64: 1, 64>}, {pipeline_mode = #tpu.pipeline_mode<synchronous>, transform_indices = @transform_2, window_bounds = array<i64: 1, 64>}, {pipeline_mode = #tpu.pipeline_mode<synchronous>, transform_indices = @transform_3, window_bounds = array<i64: 64, 192>}, {pipeline_mode = #tpu.pipeline_mode<synchronous>, transform_indices = @transform_4, window_bounds = array<i64: 1, 192>}, {pipeline_mode = #tpu.pipeline_mode<synchronous>, transform_indices = @transform_5, window_bounds = array<i64: 64, 64>}, {pipeline_mode = #tpu.pipeline_mode<synchronous>, transform_indices = @transform_6, window_bounds = array<i64: 1, 64>}, {pipeline_mode = #tpu.pipeline_mode<synchronous>, transform_indices = @transform_7, window_bounds = array<i64: 1, 64>}, {pipeline_mode = #tpu.pipeline_mode<synchronous>, transform_indices = @transform_8, window_bounds = array<i64: 1, 64>}, {pipeline_mode = #tpu.pipeline_mode<synchronous>, transform_indices = @transform_9, window_bounds = array<i64: 64, 256>}, {pipeline_mode = #tpu.pipeline_mode<synchronous>, transform_indices = @transform_10, window_bounds = array<i64: 1, 256>}, {pipeline_mode = #tpu.pipeline_mode<synchronous>, transform_indices = @transform_11, window_bounds = array<i64: 256, 64>}, {pipeline_mode = #tpu.pipeline_mode<synchronous>, transform_indices = @transform_12, window_bounds = array<i64: 1, 64>}, {pipeline_mode = #tpu.pipeline_mode<synchronous>, transform_indices = @transform_13, window_bounds = array<i64: 2, 8, 64>}]} {
    %c0 = arith.constant 0 : index
    %c0_0 = arith.constant 0 : index
    %c0_1 = arith.constant 0 : index
    %0 = vector.load %arg1[%c0, %c0_0, %c0_1] : memref<2x8x64xf32, #tpu.memory_space<vmem>>, vector<2x8x64xf32>
    %1 = vector.shape_cast %0 : vector<2x8x64xf32> to vector<16x64xf32>
    %c0_2 = arith.constant 0 : index
    %c0_3 = arith.constant 0 : index
    %2 = vector.load %arg2[%c0_2, %c0_3] : memref<1x64xf32, #tpu.memory_space<vmem>>, vector<1x64xf32>
    %c0_4 = arith.constant 0 : index
    %c0_5 = arith.constant 0 : index
    %3 = vector.load %arg3[%c0_4, %c0_5] : memref<1x64xf32, #tpu.memory_space<vmem>>, vector<1x64xf32>
    %cst = arith.constant dense<0.000000e+00> : vector<16xf32>
    %4 = vector.multi_reduction <add>, %1, %cst [1] : vector<16x64xf32> to vector<16xf32>
    %5 = vector.shape_cast %4 : vector<16xf32> to vector<16x1xf32>
    %cst_6 = arith.constant 6.400000e+01 : f32
    %6 = vector.broadcast %cst_6 : f32 to vector<16x1xf32>
    %7 = arith.divf %5, %6 : vector<16x1xf32>
    %8 = vector.broadcast %7 : vector<16x1xf32> to vector<16x64xf32>
    %9 = arith.subf %1, %8 : vector<16x64xf32>
    %10 = arith.mulf %9, %9 : vector<16x64xf32>
    %cst_7 = arith.constant dense<0.000000e+00> : vector<16xf32>
    %11 = vector.multi_reduction <add>, %10, %cst_7 [1] : vector<16x64xf32> to vector<16xf32>
    %12 = vector.shape_cast %11 : vector<16xf32> to vector<16x1xf32>
    %cst_8 = arith.constant 6.400000e+01 : f32
    %13 = vector.broadcast %cst_8 : f32 to vector<16x1xf32>
    %14 = arith.divf %12, %13 : vector<16x1xf32>
    %15 = vector.broadcast %7 : vector<16x1xf32> to vector<16x64xf32>
    %16 = arith.subf %1, %15 : vector<16x64xf32>
    %cst_9 = arith.constant 9.99999974E-6 : f32
    %17 = vector.broadcast %cst_9 : f32 to vector<16x1xf32>
    %18 = arith.addf %14, %17 : vector<16x1xf32>
    %19 = math.rsqrt %18 : vector<16x1xf32>
    %20 = vector.broadcast %19 : vector<16x1xf32> to vector<16x64xf32>
    %21 = arith.mulf %16, %20 : vector<16x64xf32>
    %22 = vector.broadcast %2 : vector<1x64xf32> to vector<16x64xf32>
    %23 = arith.mulf %21, %22 : vector<16x64xf32>
    %24 = vector.broadcast %3 : vector<1x64xf32> to vector<16x64xf32>
    %25 = arith.addf %23, %24 : vector<16x64xf32>
    %c0_10 = arith.constant 0 : index
    %c0_11 = arith.constant 0 : index
    %26 = vector.load %arg4[%c0_10, %c0_11] : memref<64x192xf32, #tpu.memory_space<vmem>>, vector<64x192xf32>
    %cst_12 = arith.constant dense<0.000000e+00> : vector<16x192xf32>
    %27 = tpu.matmul %25, %26, %cst_12 {dimension_numbers = #tpu.dot_dimension_numbers<[1], [0], [0], [1], [0, 0, 1, 1], [], []>} : vector<16x64xf32>, vector<64x192xf32>, vector<16x192xf32> -> vector<16x192xf32>
    %c0_13 = arith.constant 0 : index
    %c0_14 = arith.constant 0 : index
    %28 = vector.load %arg5[%c0_13, %c0_14] : memref<1x192xf32, #tpu.memory_space<vmem>>, vector<1x192xf32>
    %29 = vector.broadcast %28 : vector<1x192xf32> to vector<16x192xf32>
    %30 = arith.addf %27, %29 : vector<16x192xf32>
    %31 = vector.extract_strided_slice %30 {offsets = [0, 0], sizes = [16, 64], strides = [1, 1]} : vector<16x192xf32> to vector<16x64xf32>
    %32 = vector.shape_cast %31 : vector<16x64xf32> to vector<2x8x64xf32>
    %33 = vector.extract_strided_slice %30 {offsets = [0, 64], sizes = [16, 64], strides = [1, 1]} : vector<16x192xf32> to vector<16x64xf32>
    %34 = vector.shape_cast %33 : vector<16x64xf32> to vector<2x8x64xf32>
    %35 = vector.extract_strided_slice %30 {offsets = [0, 128], sizes = [16, 64], strides = [1, 1]} : vector<16x192xf32> to vector<16x64xf32>
    %36 = vector.shape_cast %35 : vector<16x64xf32> to vector<2x8x64xf32>
    %c0_15 = arith.constant 0 : index
    %c0_16 = arith.constant 0 : index
    %37 = vector.load %arg6[%c0_15, %c0_16] : memref<64x64xf32, #tpu.memory_space<vmem>>, vector<64x64xf32>
    %cst_17 = arith.constant 0.000000e+00 : f32
    %38 = vector.broadcast %cst_17 : f32 to vector<16x64xf32>
    %39 = vector.extract_strided_slice %32 {offsets = [0, 0, 0], sizes = [2, 8, 16], strides = [1, 1, 1]} : vector<2x8x64xf32> to vector<2x8x16xf32>
    %40 = vector.extract_strided_slice %34 {offsets = [0, 0, 0], sizes = [2, 8, 16], strides = [1, 1, 1]} : vector<2x8x64xf32> to vector<2x8x16xf32>
    %41 = vector.extract_strided_slice %36 {offsets = [0, 0, 0], sizes = [2, 8, 16], strides = [1, 1, 1]} : vector<2x8x64xf32> to vector<2x8x16xf32>
    "tpu.trace_start"() <{level = 10 : i32, message = "bqd,bkd->bqk"}> : () -> ()
    %cst_18 = arith.constant dense<0.000000e+00> : vector<2x8x8xf32>
    %42 = tpu.matmul %39, %40, %cst_18 {dimension_numbers = #tpu.dot_dimension_numbers<[2], [2], [1], [1], [0, 0, 0, 1, 1, 1], [0], [0]>} : vector<2x8x16xf32>, vector<2x8x16xf32>, vector<2x8x8xf32> -> vector<2x8x8xf32>
    "tpu.trace_stop"() : () -> ()
    %cst_19 = arith.constant 2.500000e-01 : f32
    %43 = vector.broadcast %cst_19 : f32 to vector<2x8x8xf32>
    %44 = arith.mulf %42, %43 : vector<2x8x8xf32>
    %cst_20 = arith.constant dense<0xFF800000> : vector<2x8xf32>
    %45 = vector.multi_reduction <maximumf>, %44, %cst_20 [2] : vector<2x8x8xf32> to vector<2x8xf32>
    %46 = vector.shape_cast %45 : vector<2x8xf32> to vector<2x8x1xf32>
    %47 = vector.broadcast %46 : vector<2x8x1xf32> to vector<2x8x8xf32>
    %48 = arith.subf %44, %47 : vector<2x8x8xf32>
    %49 = math.exp %48 : vector<2x8x8xf32>
    %cst_21 = arith.constant dense<0.000000e+00> : vector<2x8xf32>
    %50 = vector.multi_reduction <add>, %49, %cst_21 [2] : vector<2x8x8xf32> to vector<2x8xf32>
    %51 = vector.shape_cast %50 : vector<2x8xf32> to vector<2x8x1xf32>
    %52 = tpu.reciprocal %51 {approx = true} : vector<2x8x1xf32> -> vector<2x8x1xf32>
    %53 = vector.broadcast %52 : vector<2x8x1xf32> to vector<2x8x8xf32>
    %54 = arith.mulf %49, %53 : vector<2x8x8xf32>
    "tpu.trace_start"() <{level = 10 : i32, message = "bqk,bkd->bqd"}> : () -> ()
    %cst_22 = arith.constant dense<0.000000e+00> : vector<2x8x16xf32>
    %55 = tpu.matmul %54, %41, %cst_22 {dimension_numbers = #tpu.dot_dimension_numbers<[2], [1], [1], [2], [0, 0, 0, 1, 1, 2], [0], [0]>} : vector<2x8x8xf32>, vector<2x8x16xf32>, vector<2x8x16xf32> -> vector<2x8x16xf32>
    "tpu.trace_stop"() : () -> ()
    %56 = vector.shape_cast %55 : vector<2x8x16xf32> to vector<16x16xf32>
    %57 = vector.extract_strided_slice %37 {offsets = [0, 0], sizes = [16, 64], strides = [1, 1]} : vector<64x64xf32> to vector<16x64xf32>
    %cst_23 = arith.constant dense<0.000000e+00> : vector<16x64xf32>
    %58 = tpu.matmul %56, %57, %cst_23 {dimension_numbers = #tpu.dot_dimension_numbers<[1], [0], [0], [1], [0, 0, 1, 1], [], []>} : vector<16x16xf32>, vector<16x64xf32>, vector<16x64xf32> -> vector<16x64xf32>
    %59 = arith.addf %38, %58 : vector<16x64xf32>
    %60 = vector.extract_strided_slice %32 {offsets = [0, 0, 16], sizes = [2, 8, 16], strides = [1, 1, 1]} : vector<2x8x64xf32> to vector<2x8x16xf32>
    %61 = vector.extract_strided_slice %34 {offsets = [0, 0, 16], sizes = [2, 8, 16], strides = [1, 1, 1]} : vector<2x8x64xf32> to vector<2x8x16xf32>
    %62 = vector.extract_strided_slice %36 {offsets = [0, 0, 16], sizes = [2, 8, 16], strides = [1, 1, 1]} : vector<2x8x64xf32> to vector<2x8x16xf32>
    "tpu.trace_start"() <{level = 10 : i32, message = "bqd,bkd->bqk"}> : () -> ()
    %cst_24 = arith.constant dense<0.000000e+00> : vector<2x8x8xf32>
    %63 = tpu.matmul %60, %61, %cst_24 {dimension_numbers = #tpu.dot_dimension_numbers<[2], [2], [1], [1], [0, 0, 0, 1, 1, 1], [0], [0]>} : vector<2x8x16xf32>, vector<2x8x16xf32>, vector<2x8x8xf32> -> vector<2x8x8xf32>
    "tpu.trace_stop"() : () -> ()
    %cst_25 = arith.constant 2.500000e-01 : f32
    %64 = vector.broadcast %cst_25 : f32 to vector<2x8x8xf32>
    %65 = arith.mulf %63, %64 : vector<2x8x8xf32>
    %cst_26 = arith.constant dense<0xFF800000> : vector<2x8xf32>
    %66 = vector.multi_reduction <maximumf>, %65, %cst_26 [2] : vector<2x8x8xf32> to vector<2x8xf32>
    %67 = vector.shape_cast %66 : vector<2x8xf32> to vector<2x8x1xf32>
    %68 = vector.broadcast %67 : vector<2x8x1xf32> to vector<2x8x8xf32>
    %69 = arith.subf %65, %68 : vector<2x8x8xf32>
    %70 = math.exp %69 : vector<2x8x8xf32>
    %cst_27 = arith.constant dense<0.000000e+00> : vector<2x8xf32>
    %71 = vector.multi_reduction <add>, %70, %cst_27 [2] : vector<2x8x8xf32> to vector<2x8xf32>
    %72 = vector.shape_cast %71 : vector<2x8xf32> to vector<2x8x1xf32>
    %73 = tpu.reciprocal %72 {approx = true} : vector<2x8x1xf32> -> vector<2x8x1xf32>
    %74 = vector.broadcast %73 : vector<2x8x1xf32> to vector<2x8x8xf32>
    %75 = arith.mulf %70, %74 : vector<2x8x8xf32>
    "tpu.trace_start"() <{level = 10 : i32, message = "bqk,bkd->bqd"}> : () -> ()
    %cst_28 = arith.constant dense<0.000000e+00> : vector<2x8x16xf32>
    %76 = tpu.matmul %75, %62, %cst_28 {dimension_numbers = #tpu.dot_dimension_numbers<[2], [1], [1], [2], [0, 0, 0, 1, 1, 2], [0], [0]>} : vector<2x8x8xf32>, vector<2x8x16xf32>, vector<2x8x16xf32> -> vector<2x8x16xf32>
    "tpu.trace_stop"() : () -> ()
    %77 = vector.shape_cast %76 : vector<2x8x16xf32> to vector<16x16xf32>
    %78 = vector.extract_strided_slice %37 {offsets = [16, 0], sizes = [16, 64], strides = [1, 1]} : vector<64x64xf32> to vector<16x64xf32>
    %cst_29 = arith.constant dense<0.000000e+00> : vector<16x64xf32>
    %79 = tpu.matmul %77, %78, %cst_29 {dimension_numbers = #tpu.dot_dimension_numbers<[1], [0], [0], [1], [0, 0, 1, 1], [], []>} : vector<16x16xf32>, vector<16x64xf32>, vector<16x64xf32> -> vector<16x64xf32>
    %80 = arith.addf %59, %79 : vector<16x64xf32>
    %81 = vector.extract_strided_slice %32 {offsets = [0, 0, 32], sizes = [2, 8, 16], strides = [1, 1, 1]} : vector<2x8x64xf32> to vector<2x8x16xf32>
    %82 = vector.extract_strided_slice %34 {offsets = [0, 0, 32], sizes = [2, 8, 16], strides = [1, 1, 1]} : vector<2x8x64xf32> to vector<2x8x16xf32>
    %83 = vector.extract_strided_slice %36 {offsets = [0, 0, 32], sizes = [2, 8, 16], strides = [1, 1, 1]} : vector<2x8x64xf32> to vector<2x8x16xf32>
    "tpu.trace_start"() <{level = 10 : i32, message = "bqd,bkd->bqk"}> : () -> ()
    %cst_30 = arith.constant dense<0.000000e+00> : vector<2x8x8xf32>
    %84 = tpu.matmul %81, %82, %cst_30 {dimension_numbers = #tpu.dot_dimension_numbers<[2], [2], [1], [1], [0, 0, 0, 1, 1, 1], [0], [0]>} : vector<2x8x16xf32>, vector<2x8x16xf32>, vector<2x8x8xf32> -> vector<2x8x8xf32>
    "tpu.trace_stop"() : () -> ()
    %cst_31 = arith.constant 2.500000e-01 : f32
    %85 = vector.broadcast %cst_31 : f32 to vector<2x8x8xf32>
    %86 = arith.mulf %84, %85 : vector<2x8x8xf32>
    %cst_32 = arith.constant dense<0xFF800000> : vector<2x8xf32>
    %87 = vector.multi_reduction <maximumf>, %86, %cst_32 [2] : vector<2x8x8xf32> to vector<2x8xf32>
    %88 = vector.shape_cast %87 : vector<2x8xf32> to vector<2x8x1xf32>
    %89 = vector.broadcast %88 : vector<2x8x1xf32> to vector<2x8x8xf32>
    %90 = arith.subf %86, %89 : vector<2x8x8xf32>
    %91 = math.exp %90 : vector<2x8x8xf32>
    %cst_33 = arith.constant dense<0.000000e+00> : vector<2x8xf32>
    %92 = vector.multi_reduction <add>, %91, %cst_33 [2] : vector<2x8x8xf32> to vector<2x8xf32>
    %93 = vector.shape_cast %92 : vector<2x8xf32> to vector<2x8x1xf32>
    %94 = tpu.reciprocal %93 {approx = true} : vector<2x8x1xf32> -> vector<2x8x1xf32>
    %95 = vector.broadcast %94 : vector<2x8x1xf32> to vector<2x8x8xf32>
    %96 = arith.mulf %91, %95 : vector<2x8x8xf32>
    "tpu.trace_start"() <{level = 10 : i32, message = "bqk,bkd->bqd"}> : () -> ()
    %cst_34 = arith.constant dense<0.000000e+00> : vector<2x8x16xf32>
    %97 = tpu.matmul %96, %83, %cst_34 {dimension_numbers = #tpu.dot_dimension_numbers<[2], [1], [1], [2], [0, 0, 0, 1, 1, 2], [0], [0]>} : vector<2x8x8xf32>, vector<2x8x16xf32>, vector<2x8x16xf32> -> vector<2x8x16xf32>
    "tpu.trace_stop"() : () -> ()
    %98 = vector.shape_cast %97 : vector<2x8x16xf32> to vector<16x16xf32>
    %99 = vector.extract_strided_slice %37 {offsets = [32, 0], sizes = [16, 64], strides = [1, 1]} : vector<64x64xf32> to vector<16x64xf32>
    %cst_35 = arith.constant dense<0.000000e+00> : vector<16x64xf32>
    %100 = tpu.matmul %98, %99, %cst_35 {dimension_numbers = #tpu.dot_dimension_numbers<[1], [0], [0], [1], [0, 0, 1, 1], [], []>} : vector<16x16xf32>, vector<16x64xf32>, vector<16x64xf32> -> vector<16x64xf32>
    %101 = arith.addf %80, %100 : vector<16x64xf32>
    %102 = vector.extract_strided_slice %32 {offsets = [0, 0, 48], sizes = [2, 8, 16], strides = [1, 1, 1]} : vector<2x8x64xf32> to vector<2x8x16xf32>
    %103 = vector.extract_strided_slice %34 {offsets = [0, 0, 48], sizes = [2, 8, 16], strides = [1, 1, 1]} : vector<2x8x64xf32> to vector<2x8x16xf32>
    %104 = vector.extract_strided_slice %36 {offsets = [0, 0, 48], sizes = [2, 8, 16], strides = [1, 1, 1]} : vector<2x8x64xf32> to vector<2x8x16xf32>
    "tpu.trace_start"() <{level = 10 : i32, message = "bqd,bkd->bqk"}> : () -> ()
    %cst_36 = arith.constant dense<0.000000e+00> : vector<2x8x8xf32>
    %105 = tpu.matmul %102, %103, %cst_36 {dimension_numbers = #tpu.dot_dimension_numbers<[2], [2], [1], [1], [0, 0, 0, 1, 1, 1], [0], [0]>} : vector<2x8x16xf32>, vector<2x8x16xf32>, vector<2x8x8xf32> -> vector<2x8x8xf32>
    "tpu.trace_stop"() : () -> ()
    %cst_37 = arith.constant 2.500000e-01 : f32
    %106 = vector.broadcast %cst_37 : f32 to vector<2x8x8xf32>
    %107 = arith.mulf %105, %106 : vector<2x8x8xf32>
    %cst_38 = arith.constant dense<0xFF800000> : vector<2x8xf32>
    %108 = vector.multi_reduction <maximumf>, %107, %cst_38 [2] : vector<2x8x8xf32> to vector<2x8xf32>
    %109 = vector.shape_cast %108 : vector<2x8xf32> to vector<2x8x1xf32>
    %110 = vector.broadcast %109 : vector<2x8x1xf32> to vector<2x8x8xf32>
    %111 = arith.subf %107, %110 : vector<2x8x8xf32>
    %112 = math.exp %111 : vector<2x8x8xf32>
    %cst_39 = arith.constant dense<0.000000e+00> : vector<2x8xf32>
    %113 = vector.multi_reduction <add>, %112, %cst_39 [2] : vector<2x8x8xf32> to vector<2x8xf32>
    %114 = vector.shape_cast %113 : vector<2x8xf32> to vector<2x8x1xf32>
    %115 = tpu.reciprocal %114 {approx = true} : vector<2x8x1xf32> -> vector<2x8x1xf32>
    %116 = vector.broadcast %115 : vector<2x8x1xf32> to vector<2x8x8xf32>
    %117 = arith.mulf %112, %116 : vector<2x8x8xf32>
    "tpu.trace_start"() <{level = 10 : i32, message = "bqk,bkd->bqd"}> : () -> ()
    %cst_40 = arith.constant dense<0.000000e+00> : vector<2x8x16xf32>
    %118 = tpu.matmul %117, %104, %cst_40 {dimension_numbers = #tpu.dot_dimension_numbers<[2], [1], [1], [2], [0, 0, 0, 1, 1, 2], [0], [0]>} : vector<2x8x8xf32>, vector<2x8x16xf32>, vector<2x8x16xf32> -> vector<2x8x16xf32>
    "tpu.trace_stop"() : () -> ()
    %119 = vector.shape_cast %118 : vector<2x8x16xf32> to vector<16x16xf32>
    %120 = vector.extract_strided_slice %37 {offsets = [48, 0], sizes = [16, 64], strides = [1, 1]} : vector<64x64xf32> to vector<16x64xf32>
    %cst_41 = arith.constant dense<0.000000e+00> : vector<16x64xf32>
    %121 = tpu.matmul %119, %120, %cst_41 {dimension_numbers = #tpu.dot_dimension_numbers<[1], [0], [0], [1], [0, 0, 1, 1], [], []>} : vector<16x16xf32>, vector<16x64xf32>, vector<16x64xf32> -> vector<16x64xf32>
    %122 = arith.addf %101, %121 : vector<16x64xf32>
    %c0_42 = arith.constant 0 : index
    %c0_43 = arith.constant 0 : index
    %123 = vector.load %arg7[%c0_42, %c0_43] : memref<1x64xf32, #tpu.memory_space<vmem>>, vector<1x64xf32>
    %124 = vector.broadcast %123 : vector<1x64xf32> to vector<16x64xf32>
    %125 = arith.addf %122, %124 : vector<16x64xf32>
    %126 = arith.addf %1, %125 : vector<16x64xf32>
    %c0_44 = arith.constant 0 : index
    %c0_45 = arith.constant 0 : index
    %127 = vector.load %arg8[%c0_44, %c0_45] : memref<1x64xf32, #tpu.memory_space<vmem>>, vector<1x64xf32>
    %c0_46 = arith.constant 0 : index
    %c0_47 = arith.constant 0 : index
    %128 = vector.load %arg9[%c0_46, %c0_47] : memref<1x64xf32, #tpu.memory_space<vmem>>, vector<1x64xf32>
    %cst_48 = arith.constant dense<0.000000e+00> : vector<16xf32>
    %129 = vector.multi_reduction <add>, %126, %cst_48 [1] : vector<16x64xf32> to vector<16xf32>
    %130 = vector.shape_cast %129 : vector<16xf32> to vector<16x1xf32>
    %cst_49 = arith.constant 6.400000e+01 : f32
    %131 = vector.broadcast %cst_49 : f32 to vector<16x1xf32>
    %132 = arith.divf %130, %131 : vector<16x1xf32>
    %133 = vector.broadcast %132 : vector<16x1xf32> to vector<16x64xf32>
    %134 = arith.subf %126, %133 : vector<16x64xf32>
    %135 = arith.mulf %134, %134 : vector<16x64xf32>
    %cst_50 = arith.constant dense<0.000000e+00> : vector<16xf32>
    %136 = vector.multi_reduction <add>, %135, %cst_50 [1] : vector<16x64xf32> to vector<16xf32>
    %137 = vector.shape_cast %136 : vector<16xf32> to vector<16x1xf32>
    %cst_51 = arith.constant 6.400000e+01 : f32
    %138 = vector.broadcast %cst_51 : f32 to vector<16x1xf32>
    %139 = arith.divf %137, %138 : vector<16x1xf32>
    %140 = vector.broadcast %132 : vector<16x1xf32> to vector<16x64xf32>
    %141 = arith.subf %126, %140 : vector<16x64xf32>
    %cst_52 = arith.constant 9.99999974E-6 : f32
    %142 = vector.broadcast %cst_52 : f32 to vector<16x1xf32>
    %143 = arith.addf %139, %142 : vector<16x1xf32>
    %144 = math.rsqrt %143 : vector<16x1xf32>
    %145 = vector.broadcast %144 : vector<16x1xf32> to vector<16x64xf32>
    %146 = arith.mulf %141, %145 : vector<16x64xf32>
    %147 = vector.broadcast %127 : vector<1x64xf32> to vector<16x64xf32>
    %148 = arith.mulf %146, %147 : vector<16x64xf32>
    %149 = vector.broadcast %128 : vector<1x64xf32> to vector<16x64xf32>
    %150 = arith.addf %148, %149 : vector<16x64xf32>
    %c0_53 = arith.constant 0 : index
    %c0_54 = arith.constant 0 : index
    %151 = vector.load %arg10[%c0_53, %c0_54] : memref<64x256xf32, #tpu.memory_space<vmem>>, vector<64x256xf32>
    %cst_55 = arith.constant dense<0.000000e+00> : vector<16x256xf32>
    %152 = tpu.matmul %150, %151, %cst_55 {dimension_numbers = #tpu.dot_dimension_numbers<[1], [0], [0], [1], [0, 0, 1, 1], [], []>} : vector<16x64xf32>, vector<64x256xf32>, vector<16x256xf32> -> vector<16x256xf32>
    %c0_56 = arith.constant 0 : index
    %c0_57 = arith.constant 0 : index
    %153 = vector.load %arg11[%c0_56, %c0_57] : memref<1x256xf32, #tpu.memory_space<vmem>>, vector<1x256xf32>
    %154 = vector.broadcast %153 : vector<1x256xf32> to vector<16x256xf32>
    %155 = arith.addf %152, %154 : vector<16x256xf32>
    %156 = arith.mulf %155, %155 : vector<16x256xf32>
    %157 = arith.mulf %155, %156 : vector<16x256xf32>
    %cst_58 = arith.constant 4.471500e-02 : f32
    %158 = vector.broadcast %cst_58 : f32 to vector<16x256xf32>
    %159 = arith.mulf %158, %157 : vector<16x256xf32>
    %160 = arith.addf %155, %159 : vector<16x256xf32>
    %cst_59 = arith.constant 0.797884583 : f32
    %161 = vector.broadcast %cst_59 : f32 to vector<16x256xf32>
    %162 = arith.mulf %161, %160 : vector<16x256xf32>
    %163 = math.tanh %162 : vector<16x256xf32>
    %cst_60 = arith.constant 1.000000e+00 : f32
    %164 = vector.broadcast %cst_60 : f32 to vector<16x256xf32>
    %165 = arith.addf %164, %163 : vector<16x256xf32>
    %cst_61 = arith.constant 5.000000e-01 : f32
    %166 = vector.broadcast %cst_61 : f32 to vector<16x256xf32>
    %167 = arith.mulf %166, %165 : vector<16x256xf32>
    %168 = arith.mulf %155, %167 : vector<16x256xf32>
    %c0_62 = arith.constant 0 : index
    %c0_63 = arith.constant 0 : index
    %169 = vector.load %arg12[%c0_62, %c0_63] : memref<256x64xf32, #tpu.memory_space<vmem>>, vector<256x64xf32>
    %cst_64 = arith.constant dense<0.000000e+00> : vector<16x64xf32>
    %170 = tpu.matmul %168, %169, %cst_64 {dimension_numbers = #tpu.dot_dimension_numbers<[1], [0], [0], [1], [0, 0, 1, 1], [], []>} : vector<16x256xf32>, vector<256x64xf32>, vector<16x64xf32> -> vector<16x64xf32>
    %c0_65 = arith.constant 0 : index
    %c0_66 = arith.constant 0 : index
    %171 = vector.load %arg13[%c0_65, %c0_66] : memref<1x64xf32, #tpu.memory_space<vmem>>, vector<1x64xf32>
    %172 = vector.broadcast %171 : vector<1x64xf32> to vector<16x64xf32>
    %173 = arith.addf %170, %172 : vector<16x64xf32>
    %174 = arith.addf %126, %173 : vector<16x64xf32>
    %175 = vector.shape_cast %174 : vector<16x64xf32> to vector<2x8x64xf32>
    %c0_67 = arith.constant 0 : index
    %c0_68 = arith.constant 0 : index
    %c0_69 = arith.constant 0 : index
    %176 = vector.load %arg14[%c0_67, %c0_68, %c0_69] : memref<2x8x64xf32, #tpu.memory_space<vmem>>, vector<2x8x64xf32>
    tpu.vector_store %arg14[%c0_67, %c0_68, %c0_69], %175 {strides = array<i32>} : memref<2x8x64xf32, #tpu.memory_space<vmem>>, vector<2x8x64xf32>,
    return
  }
  func.func @transform_0(%arg0: i32) -> (i32, i32, i32) {
    %c0_i32 = arith.constant 0 : i32
    %c0_i32_0 = arith.constant 0 : i32
    %c0_i32_1 = arith.constant 0 : i32
    %c0_i32_2 = arith.constant 0 : i32
    return %c0_i32, %c0_i32_0, %c0_i32_1 : i32, i32, i32
  }
  func.func @transform_1(%arg0: i32) -> (i32, i32) {
    %c0_i32 = arith.constant 0 : i32
    %c0_i32_0 = arith.constant 0 : i32
    %c0_i32_1 = arith.constant 0 : i32
    return %c0_i32, %c0_i32_0 : i32, i32
  }
  func.func @transform_2(%arg0: i32) -> (i32, i32) {
    %c0_i32 = arith.constant 0 : i32
    %c0_i32_0 = arith.constant 0 : i32
    %c0_i32_1 = arith.constant 0 : i32
    return %c0_i32, %c0_i32_0 : i32, i32
  }
  func.func @transform_3(%arg0: i32) -> (i32, i32) {
    %c0_i32 = arith.constant 0 : i32
    %c0_i32_0 = arith.constant 0 : i32
    %c0_i32_1 = arith.constant 0 : i32
    return %c0_i32, %c0_i32_0 : i32, i32
  }
  func.func @transform_4(%arg0: i32) -> (i32, i32) {
    %c0_i32 = arith.constant 0 : i32
    %c0_i32_0 = arith.constant 0 : i32
    %c0_i32_1 = arith.constant 0 : i32
    return %c0_i32, %c0_i32_0 : i32, i32
  }
  func.func @transform_5(%arg0: i32) -> (i32, i32) {
    %c0_i32 = arith.constant 0 : i32
    %c0_i32_0 = arith.constant 0 : i32
    %c0_i32_1 = arith.constant 0 : i32
    return %c0_i32, %c0_i32_0 : i32, i32
  }
  func.func @transform_6(%arg0: i32) -> (i32, i32) {
    %c0_i32 = arith.constant 0 : i32
    %c0_i32_0 = arith.constant 0 : i32
    %c0_i32_1 = arith.constant 0 : i32
    return %c0_i32, %c0_i32_0 : i32, i32
  }
  func.func @transform_7(%arg0: i32) -> (i32, i32) {
    %c0_i32 = arith.constant 0 : i32
    %c0_i32_0 = arith.constant 0 : i32
    %c0_i32_1 = arith.constant 0 : i32
    return %c0_i32, %c0_i32_0 : i32, i32
  }
  func.func @transform_8(%arg0: i32) -> (i32, i32) {
    %c0_i32 = arith.constant 0 : i32
    %c0_i32_0 = arith.constant 0 : i32
    %c0_i32_1 = arith.constant 0 : i32
    return %c0_i32, %c0_i32_0 : i32, i32
  }
  func.func @transform_9(%arg0: i32) -> (i32, i32) {
    %c0_i32 = arith.constant 0 : i32
    %c0_i32_0 = arith.constant 0 : i32
    %c0_i32_1 = arith.constant 0 : i32
    return %c0_i32, %c0_i32_0 : i32, i32
  }
  func.func @transform_10(%arg0: i32) -> (i32, i32) {
    %c0_i32 = arith.constant 0 : i32
    %c0_i32_0 = arith.constant 0 : i32
    %c0_i32_1 = arith.constant 0 : i32
    return %c0_i32, %c0_i32_0 : i32, i32
  }
  func.func @transform_11(%arg0: i32) -> (i32, i32) {
    %c0_i32 = arith.constant 0 : i32
    %c0_i32_0 = arith.constant 0 : i32
    %c0_i32_1 = arith.constant 0 : i32
    return %c0_i32, %c0_i32_0 : i32, i32
  }
  func.func @transform_12(%arg0: i32) -> (i32, i32) {
    %c0_i32 = arith.constant 0 : i32
    %c0_i32_0 = arith.constant 0 : i32
    %c0_i32_1 = arith.constant 0 : i32
    return %c0_i32, %c0_i32_0 : i32, i32
  }
  func.func @transform_13(%arg0: i32) -> (i32, i32, i32) {
    %c0_i32 = arith.constant 0 : i32
    %c0_i32_0 = arith.constant 0 : i32
    %c0_i32_1 = arith.constant 0 : i32
    %c0_i32_2 = arith.constant 0 : i32
    return %c0_i32, %c0_i32_0, %c0_i32_1 : i32, i32, i32
  }
}

module attributes {stable_mosaic.version = 11 : i64} {
  func.func @_ln_kernel(%arg0: i32, %arg1: memref<16x64xf32, #tpu.memory_space<vmem>>, %arg2: memref<1x64xf32, #tpu.memory_space<vmem>>, %arg3: memref<1x64xf32, #tpu.memory_space<vmem>>, %arg4: memref<16x64xf32, #tpu.memory_space<vmem>>) attributes {dimension_semantics = [#tpu.dimension_semantics<arbitrary>], iteration_bounds = array<i64: 1>, scalar_prefetch = 0 : i64, scratch_operands = 0 : i64, tpu.core_type = #tpu.core_type<tc>, window_params = [{pipeline_mode = #tpu.pipeline_mode<synchronous>, transform_indices = @transform_0, window_bounds = array<i64: 16, 64>}, {pipeline_mode = #tpu.pipeline_mode<synchronous>, transform_indices = @transform_1, window_bounds = array<i64: 1, 64>}, {pipeline_mode = #tpu.pipeline_mode<synchronous>, transform_indices = @transform_2, window_bounds = array<i64: 1, 64>}, {pipeline_mode = #tpu.pipeline_mode<synchronous>, transform_indices = @transform_3, window_bounds = array<i64: 16, 64>}]} {
    %c0 = arith.constant 0 : index
    %c0_0 = arith.constant 0 : index
    %0 = vector.load %arg1[%c0, %c0_0] : memref<16x64xf32, #tpu.memory_space<vmem>>, vector<16x64xf32>
    %c0_1 = arith.constant 0 : index
    %c0_2 = arith.constant 0 : index
    %1 = vector.load %arg2[%c0_1, %c0_2] : memref<1x64xf32, #tpu.memory_space<vmem>>, vector<1x64xf32>
    %c0_3 = arith.constant 0 : index
    %c0_4 = arith.constant 0 : index
    %2 = vector.load %arg3[%c0_3, %c0_4] : memref<1x64xf32, #tpu.memory_space<vmem>>, vector<1x64xf32>
    %cst = arith.constant dense<0.000000e+00> : vector<16xf32>
    %3 = vector.multi_reduction <add>, %0, %cst [1] : vector<16x64xf32> to vector<16xf32>
    %4 = vector.shape_cast %3 : vector<16xf32> to vector<16x1xf32>
    %cst_5 = arith.constant 6.400000e+01 : f32
    %5 = vector.broadcast %cst_5 : f32 to vector<16x1xf32>
    %6 = arith.divf %4, %5 : vector<16x1xf32>
    %7 = vector.broadcast %6 : vector<16x1xf32> to vector<16x64xf32>
    %8 = arith.subf %0, %7 : vector<16x64xf32>
    %9 = arith.mulf %8, %8 : vector<16x64xf32>
    %cst_6 = arith.constant dense<0.000000e+00> : vector<16xf32>
    %10 = vector.multi_reduction <add>, %9, %cst_6 [1] : vector<16x64xf32> to vector<16xf32>
    %11 = vector.shape_cast %10 : vector<16xf32> to vector<16x1xf32>
    %cst_7 = arith.constant 6.400000e+01 : f32
    %12 = vector.broadcast %cst_7 : f32 to vector<16x1xf32>
    %13 = arith.divf %11, %12 : vector<16x1xf32>
    %14 = vector.broadcast %6 : vector<16x1xf32> to vector<16x64xf32>
    %15 = arith.subf %0, %14 : vector<16x64xf32>
    %cst_8 = arith.constant 9.99999974E-6 : f32
    %16 = vector.broadcast %cst_8 : f32 to vector<16x1xf32>
    %17 = arith.addf %13, %16 : vector<16x1xf32>
    %18 = math.rsqrt %17 : vector<16x1xf32>
    %19 = vector.broadcast %18 : vector<16x1xf32> to vector<16x64xf32>
    %20 = arith.mulf %15, %19 : vector<16x64xf32>
    %21 = vector.broadcast %1 : vector<1x64xf32> to vector<16x64xf32>
    %22 = arith.mulf %20, %21 : vector<16x64xf32>
    %23 = vector.broadcast %2 : vector<1x64xf32> to vector<16x64xf32>
    %24 = arith.addf %22, %23 : vector<16x64xf32>
    %c0_9 = arith.constant 0 : index
    %c0_10 = arith.constant 0 : index
    %25 = vector.load %arg4[%c0_9, %c0_10] : memref<16x64xf32, #tpu.memory_space<vmem>>, vector<16x64xf32>
    tpu.vector_store %arg4[%c0_9, %c0_10], %24 {strides = array<i32>} : memref<16x64xf32, #tpu.memory_space<vmem>>, vector<16x64xf32>,
    return
  }
  func.func @transform_0(%arg0: i32) -> (i32, i32) {
    %c0_i32 = arith.constant 0 : i32
    %c0_i32_0 = arith.constant 0 : i32
    %c0_i32_1 = arith.constant 0 : i32
    return %c0_i32, %c0_i32_0 : i32, i32
  }
  func.func @transform_1(%arg0: i32) -> (i32, i32) {
    %c0_i32 = arith.constant 0 : i32
    %c0_i32_0 = arith.constant 0 : i32
    %c0_i32_1 = arith.constant 0 : i32
    return %c0_i32, %c0_i32_0 : i32, i32
  }
  func.func @transform_2(%arg0: i32) -> (i32, i32) {
    %c0_i32 = arith.constant 0 : i32
    %c0_i32_0 = arith.constant 0 : i32
    %c0_i32_1 = arith.constant 0 : i32
    return %c0_i32, %c0_i32_0 : i32, i32
  }
  func.func @transform_3(%arg0: i32) -> (i32, i32) {
    %c0_i32 = arith.constant 0 : i32
    %c0_i32_0 = arith.constant 0 : i32
    %c0_i32_1 = arith.constant 0 : i32
    return %c0_i32, %c0_i32_0 : i32, i32
  }
}

module attributes {stable_mosaic.version = 11 : i64} {
  func.func @_ln_linear_kernel(%arg0: i32, %arg1: memref<8x64xf32, #tpu.memory_space<vmem>>, %arg2: memref<1x64xf32, #tpu.memory_space<vmem>>, %arg3: memref<1x64xf32, #tpu.memory_space<vmem>>, %arg4: memref<64x48xf32, #tpu.memory_space<vmem>>, %arg5: memref<1x48xf32, #tpu.memory_space<vmem>>, %arg6: memref<8x48xf32, #tpu.memory_space<vmem>>) attributes {dimension_semantics = [#tpu.dimension_semantics<arbitrary>], iteration_bounds = array<i64: 1>, scalar_prefetch = 0 : i64, scratch_operands = 0 : i64, tpu.core_type = #tpu.core_type<tc>, window_params = [{pipeline_mode = #tpu.pipeline_mode<synchronous>, transform_indices = @transform_0, window_bounds = array<i64: 8, 64>}, {pipeline_mode = #tpu.pipeline_mode<synchronous>, transform_indices = @transform_1, window_bounds = array<i64: 1, 64>}, {pipeline_mode = #tpu.pipeline_mode<synchronous>, transform_indices = @transform_2, window_bounds = array<i64: 1, 64>}, {pipeline_mode = #tpu.pipeline_mode<synchronous>, transform_indices = @transform_3, window_bounds = array<i64: 64, 48>}, {pipeline_mode = #tpu.pipeline_mode<synchronous>, transform_indices = @transform_4, window_bounds = array<i64: 1, 48>}, {pipeline_mode = #tpu.pipeline_mode<synchronous>, transform_indices = @transform_5, window_bounds = array<i64: 8, 48>}]} {
    %c0 = arith.constant 0 : index
    %c0_0 = arith.constant 0 : index
    %0 = vector.load %arg1[%c0, %c0_0] : memref<8x64xf32, #tpu.memory_space<vmem>>, vector<8x64xf32>
    %c0_1 = arith.constant 0 : index
    %c0_2 = arith.constant 0 : index
    %1 = vector.load %arg2[%c0_1, %c0_2] : memref<1x64xf32, #tpu.memory_space<vmem>>, vector<1x64xf32>
    %c0_3 = arith.constant 0 : index
    %c0_4 = arith.constant 0 : index
    %2 = vector.load %arg3[%c0_3, %c0_4] : memref<1x64xf32, #tpu.memory_space<vmem>>, vector<1x64xf32>
    %cst = arith.constant dense<0.000000e+00> : vector<8xf32>
    %3 = vector.multi_reduction <add>, %0, %cst [1] : vector<8x64xf32> to vector<8xf32>
    %4 = vector.shape_cast %3 : vector<8xf32> to vector<8x1xf32>
    %cst_5 = arith.constant 6.400000e+01 : f32
    %5 = vector.broadcast %cst_5 : f32 to vector<8x1xf32>
    %6 = arith.divf %4, %5 : vector<8x1xf32>
    %7 = vector.broadcast %6 : vector<8x1xf32> to vector<8x64xf32>
    %8 = arith.subf %0, %7 : vector<8x64xf32>
    %9 = arith.mulf %8, %8 : vector<8x64xf32>
    %cst_6 = arith.constant dense<0.000000e+00> : vector<8xf32>
    %10 = vector.multi_reduction <add>, %9, %cst_6 [1] : vector<8x64xf32> to vector<8xf32>
    %11 = vector.shape_cast %10 : vector<8xf32> to vector<8x1xf32>
    %cst_7 = arith.constant 6.400000e+01 : f32
    %12 = vector.broadcast %cst_7 : f32 to vector<8x1xf32>
    %13 = arith.divf %11, %12 : vector<8x1xf32>
    %14 = vector.broadcast %6 : vector<8x1xf32> to vector<8x64xf32>
    %15 = arith.subf %0, %14 : vector<8x64xf32>
    %cst_8 = arith.constant 9.99999974E-6 : f32
    %16 = vector.broadcast %cst_8 : f32 to vector<8x1xf32>
    %17 = arith.addf %13, %16 : vector<8x1xf32>
    %18 = math.rsqrt %17 : vector<8x1xf32>
    %19 = vector.broadcast %18 : vector<8x1xf32> to vector<8x64xf32>
    %20 = arith.mulf %15, %19 : vector<8x64xf32>
    %21 = vector.broadcast %1 : vector<1x64xf32> to vector<8x64xf32>
    %22 = arith.mulf %20, %21 : vector<8x64xf32>
    %23 = vector.broadcast %2 : vector<1x64xf32> to vector<8x64xf32>
    %24 = arith.addf %22, %23 : vector<8x64xf32>
    %c0_9 = arith.constant 0 : index
    %c0_10 = arith.constant 0 : index
    %25 = vector.load %arg4[%c0_9, %c0_10] : memref<64x48xf32, #tpu.memory_space<vmem>>, vector<64x48xf32>
    %cst_11 = arith.constant dense<0.000000e+00> : vector<8x48xf32>
    %26 = tpu.matmul %24, %25, %cst_11 {dimension_numbers = #tpu.dot_dimension_numbers<[1], [0], [0], [1], [0, 0, 1, 1], [], []>} : vector<8x64xf32>, vector<64x48xf32>, vector<8x48xf32> -> vector<8x48xf32>
    %c0_12 = arith.constant 0 : index
    %c0_13 = arith.constant 0 : index
    %27 = vector.load %arg5[%c0_12, %c0_13] : memref<1x48xf32, #tpu.memory_space<vmem>>, vector<1x48xf32>
    %28 = vector.broadcast %27 : vector<1x48xf32> to vector<8x48xf32>
    %29 = arith.addf %26, %28 : vector<8x48xf32>
    %c0_14 = arith.constant 0 : index
    %c0_15 = arith.constant 0 : index
    %30 = vector.load %arg6[%c0_14, %c0_15] : memref<8x48xf32, #tpu.memory_space<vmem>>, vector<8x48xf32>
    tpu.vector_store %arg6[%c0_14, %c0_15], %29 {strides = array<i32>} : memref<8x48xf32, #tpu.memory_space<vmem>>, vector<8x48xf32>,
    return
  }
  func.func @transform_0(%arg0: i32) -> (i32, i32) {
    %c0_i32 = arith.constant 0 : i32
    %c0_i32_0 = arith.constant 0 : i32
    %c0_i32_1 = arith.constant 0 : i32
    return %c0_i32, %c0_i32_0 : i32, i32
  }
  func.func @transform_1(%arg0: i32) -> (i32, i32) {
    %c0_i32 = arith.constant 0 : i32
    %c0_i32_0 = arith.constant 0 : i32
    %c0_i32_1 = arith.constant 0 : i32
    return %c0_i32, %c0_i32_0 : i32, i32
  }
  func.func @transform_2(%arg0: i32) -> (i32, i32) {
    %c0_i32 = arith.constant 0 : i32
    %c0_i32_0 = arith.constant 0 : i32
    %c0_i32_1 = arith.constant 0 : i32
    return %c0_i32, %c0_i32_0 : i32, i32
  }
  func.func @transform_3(%arg0: i32) -> (i32, i32) {
    %c0_i32 = arith.constant 0 : i32
    %c0_i32_0 = arith.constant 0 : i32
    %c0_i32_1 = arith.constant 0 : i32
    return %c0_i32, %c0_i32_0 : i32, i32
  }
  func.func @transform_4(%arg0: i32) -> (i32, i32) {
    %c0_i32 = arith.constant 0 : i32
    %c0_i32_0 = arith.constant 0 : i32
    %c0_i32_1 = arith.constant 0 : i32
    return %c0_i32, %c0_i32_0 : i32, i32
  }
  func.func @transform_5(%arg0: i32) -> (i32, i32) {
    %c0_i32 = arith.constant 0 : i32
    %c0_i32_0 = arith.constant 0 : i32
    %c0_i32_1 = arith.constant 0 : i32
    return %c0_i32, %c0_i32_0 : i32, i32
  }
}

module attributes {stable_mosaic.version = 11 : i64} {
  func.func @_chamfer_kernel(%arg0: i32, %arg1: memref<8x16x3xf32, #tpu.memory_space<vmem>>, %arg2: memref<8x16x3xf32, #tpu.memory_space<vmem>>, %arg3: memref<8x32xf32, #tpu.memory_space<vmem>>) attributes {dimension_semantics = [#tpu.dimension_semantics<arbitrary>], iteration_bounds = array<i64: 1>, scalar_prefetch = 0 : i64, scratch_operands = 0 : i64, tpu.core_type = #tpu.core_type<tc>, window_params = [{pipeline_mode = #tpu.pipeline_mode<synchronous>, transform_indices = @transform_0, window_bounds = array<i64: 8, 16, 3>}, {pipeline_mode = #tpu.pipeline_mode<synchronous>, transform_indices = @transform_1, window_bounds = array<i64: 8, 16, 3>}, {pipeline_mode = #tpu.pipeline_mode<synchronous>, transform_indices = @transform_2, window_bounds = array<i64: 8, 32>}]} {
    %c0 = arith.constant 0 : index
    %c0_0 = arith.constant 0 : index
    %c0_1 = arith.constant 0 : index
    %0 = vector.load %arg1[%c0, %c0_0, %c0_1] : memref<8x16x3xf32, #tpu.memory_space<vmem>>, vector<8x16x3xf32>
    %c0_2 = arith.constant 0 : index
    %c0_3 = arith.constant 0 : index
    %c0_4 = arith.constant 0 : index
    %1 = vector.load %arg2[%c0_2, %c0_3, %c0_4] : memref<8x16x3xf32, #tpu.memory_space<vmem>>, vector<8x16x3xf32>
    %2 = arith.mulf %0, %0 : vector<8x16x3xf32>
    %cst = arith.constant dense<0.000000e+00> : vector<8x16xf32>
    %3 = vector.multi_reduction <add>, %2, %cst [2] : vector<8x16x3xf32> to vector<8x16xf32>
    %4 = vector.shape_cast %3 : vector<8x16xf32> to vector<8x16x1xf32>
    %5 = arith.mulf %1, %1 : vector<8x16x3xf32>
    %cst_5 = arith.constant dense<0.000000e+00> : vector<8x16xf32>
    %6 = vector.multi_reduction <add>, %5, %cst_5 [2] : vector<8x16x3xf32> to vector<8x16xf32>
    %7 = vector.shape_cast %6 : vector<8x16xf32> to vector<8x1x16xf32>
    %8 = vector.broadcast %4 : vector<8x16x1xf32> to vector<8x16x16xf32>
    %9 = vector.broadcast %7 : vector<8x1x16xf32> to vector<8x16x16xf32>
    %10 = arith.addf %8, %9 : vector<8x16x16xf32>
    "tpu.trace_start"() <{level = 10 : i32, message = "nsc,ntc->nst"}> : () -> ()
    %cst_6 = arith.constant dense<0.000000e+00> : vector<8x16x16xf32>
    %11 = tpu.matmul %0, %1, %cst_6 {dimension_numbers = #tpu.dot_dimension_numbers<[2], [2], [1], [1], [0, 0, 0, 1, 1, 1], [0], [0]>} : vector<8x16x3xf32>, vector<8x16x3xf32>, vector<8x16x16xf32> -> vector<8x16x16xf32>
    "tpu.trace_stop"() : () -> ()
    %cst_7 = arith.constant 2.000000e+00 : f32
    %12 = vector.broadcast %cst_7 : f32 to vector<8x16x16xf32>
    %13 = arith.mulf %12, %11 : vector<8x16x16xf32>
    %14 = arith.subf %10, %13 : vector<8x16x16xf32>
    %cst_8 = arith.constant 0.000000e+00 : f32
    %15 = vector.broadcast %cst_8 : f32 to vector<8x16x16xf32>
    %16 = arith.maximumf %14, %15 : vector<8x16x16xf32>
    %cst_9 = arith.constant dense<0x7F800000> : vector<8x16xf32>
    %17 = vector.multi_reduction <minimumf>, %16, %cst_9 [2] : vector<8x16x16xf32> to vector<8x16xf32>
    %cst_10 = arith.constant dense<0x7F800000> : vector<8x16xf32>
    %18 = vector.multi_reduction <minimumf>, %16, %cst_10 [1] : vector<8x16x16xf32> to vector<8x16xf32>
    %19 = tpu.concatenate %17, %18 in 1 : vector<8x16xf32>, vector<8x16xf32> -> vector<8x32xf32>
    %c0_11 = arith.constant 0 : index
    %c0_12 = arith.constant 0 : index
    %20 = vector.load %arg3[%c0_11, %c0_12] : memref<8x32xf32, #tpu.memory_space<vmem>>, vector<8x32xf32>
    tpu.vector_store %arg3[%c0_11, %c0_12], %19 {strides = array<i32>} : memref<8x32xf32, #tpu.memory_space<vmem>>, vector<8x32xf32>,
    return
  }
  func.func @transform_0(%arg0: i32) -> (i32, i32, i32) {
    %c0_i32 = arith.constant 0 : i32
    %c0_i32_0 = arith.constant 0 : i32
    %c0_i32_1 = arith.constant 0 : i32
    %c0_i32_2 = arith.constant 0 : i32
    return %c0_i32, %c0_i32_0, %c0_i32_1 : i32, i32, i32
  }
  func.func @transform_1(%arg0: i32) -> (i32, i32, i32) {
    %c0_i32 = arith.constant 0 : i32
    %c0_i32_0 = arith.constant 0 : i32
    %c0_i32_1 = arith.constant 0 : i32
    %c0_i32_2 = arith.constant 0 : i32
    return %c0_i32, %c0_i32_0, %c0_i32_1 : i32, i32, i32
  }
  func.func @transform_2(%arg0: i32) -> (i32, i32) {
    %c0_i32 = arith.constant 0 : i32
    %c0_i32_0 = arith.constant 0 : i32
    %c0_i32_1 = arith.constant 0 : i32
    return %c0_i32, %c0_i32_0 : i32, i32
  }
}

module attributes {stable_mosaic.version = 11 : i64} {
  func.func @_proj_norm_kernel(%arg0: i32, %arg1: memref<4x64xf32, #tpu.memory_space<vmem>>, %arg2: memref<64x1280xf32, #tpu.memory_space<vmem>>, %arg3: memref<1x1280xf32, #tpu.memory_space<vmem>>, %arg4: memref<4x1280xf32, #tpu.memory_space<vmem>>) attributes {dimension_semantics = [#tpu.dimension_semantics<arbitrary>], iteration_bounds = array<i64: 1>, scalar_prefetch = 0 : i64, scratch_operands = 0 : i64, tpu.core_type = #tpu.core_type<tc>, window_params = [{pipeline_mode = #tpu.pipeline_mode<synchronous>, transform_indices = @transform_0, window_bounds = array<i64: 4, 64>}, {pipeline_mode = #tpu.pipeline_mode<synchronous>, transform_indices = @transform_1, window_bounds = array<i64: 64, 1280>}, {pipeline_mode = #tpu.pipeline_mode<synchronous>, transform_indices = @transform_2, window_bounds = array<i64: 1, 1280>}, {pipeline_mode = #tpu.pipeline_mode<synchronous>, transform_indices = @transform_3, window_bounds = array<i64: 4, 1280>}]} {
    %c0 = arith.constant 0 : index
    %c0_0 = arith.constant 0 : index
    %0 = vector.load %arg1[%c0, %c0_0] : memref<4x64xf32, #tpu.memory_space<vmem>>, vector<4x64xf32>
    %c0_1 = arith.constant 0 : index
    %c0_2 = arith.constant 0 : index
    %1 = vector.load %arg2[%c0_1, %c0_2] : memref<64x1280xf32, #tpu.memory_space<vmem>>, vector<64x1280xf32>
    %cst = arith.constant dense<0.000000e+00> : vector<4x1280xf32>
    %2 = tpu.matmul %0, %1, %cst {dimension_numbers = #tpu.dot_dimension_numbers<[1], [0], [0], [1], [0, 0, 1, 1], [], []>} : vector<4x64xf32>, vector<64x1280xf32>, vector<4x1280xf32> -> vector<4x1280xf32>
    %c0_3 = arith.constant 0 : index
    %c0_4 = arith.constant 0 : index
    %3 = vector.load %arg3[%c0_3, %c0_4] : memref<1x1280xf32, #tpu.memory_space<vmem>>, vector<1x1280xf32>
    %4 = vector.broadcast %3 : vector<1x1280xf32> to vector<4x1280xf32>
    %5 = arith.addf %2, %4 : vector<4x1280xf32>
    %6 = arith.mulf %5, %5 : vector<4x1280xf32>
    %cst_5 = arith.constant dense<0.000000e+00> : vector<4xf32>
    %7 = vector.multi_reduction <add>, %6, %cst_5 [1] : vector<4x1280xf32> to vector<4xf32>
    %8 = vector.shape_cast %7 : vector<4xf32> to vector<4x1xf32>
    %9 = math.sqrt %8 : vector<4x1xf32>
    %cst_6 = arith.constant 9.99999996E-13 : f32
    %10 = vector.broadcast %cst_6 : f32 to vector<4x1xf32>
    %11 = arith.maximumf %9, %10 : vector<4x1xf32>
    %12 = tpu.reciprocal %11 {approx = true} : vector<4x1xf32> -> vector<4x1xf32>
    %13 = vector.broadcast %12 : vector<4x1xf32> to vector<4x1280xf32>
    %14 = arith.mulf %5, %13 : vector<4x1280xf32>
    %c0_7 = arith.constant 0 : index
    %c0_8 = arith.constant 0 : index
    %15 = vector.load %arg4[%c0_7, %c0_8] : memref<4x1280xf32, #tpu.memory_space<vmem>>, vector<4x1280xf32>
    tpu.vector_store %arg4[%c0_7, %c0_8], %14 {strides = array<i32>} : memref<4x1280xf32, #tpu.memory_space<vmem>>, vector<4x1280xf32>,
    return
  }
  func.func @transform_0(%arg0: i32) -> (i32, i32) {
    %c0_i32 = arith.constant 0 : i32
    %c0_i32_0 = arith.constant 0 : i32
    %c0_i32_1 = arith.constant 0 : i32
    return %c0_i32, %c0_i32_0 : i32, i32
  }
  func.func @transform_1(%arg0: i32) -> (i32, i32) {
    %c0_i32 = arith.constant 0 : i32
    %c0_i32_0 = arith.constant 0 : i32
    %c0_i32_1 = arith.constant 0 : i32
    return %c0_i32, %c0_i32_0 : i32, i32
  }
  func.func @transform_2(%arg0: i32) -> (i32, i32) {
    %c0_i32 = arith.constant 0 : i32
    %c0_i32_0 = arith.constant 0 : i32
    %c0_i32_1 = arith.constant 0 : i32
    return %c0_i32, %c0_i32_0 : i32, i32
  }
  func.func @transform_3(%arg0: i32) -> (i32, i32) {
    %c0_i32 = arith.constant 0 : i32
    %c0_i32_0 = arith.constant 0 : i32
    %c0_i32_1 = arith.constant 0 : i32
    return %c0_i32, %c0_i32_0 : i32, i32
  }
}

</mosaic_0001>

<bundles_post_ra>
// kernel: neg.1
= control target key start
LH: loop header
LB: loop body
LE: loop exit
PB: predicated region body
PF: predicated region fallthrough
CT: control target
= control target key end

     0   :  { %s40_s0 = inlined_call_operand.vmem [shape: f32[2,8,128], index: 0, kind: input, shape index: {}]   ;;  %s41_s1 = inlined_call_operand.vmem [shape: f32[2,8,128], index: 1, kind: output, shape index: {}]  }
   0x1   :  { %v2_v0 = vld [vmem:[%s40_s0] sm:$0xff]  ;;  %v16_v1 = vld [vmem:[%s40_s0 + $0x8] sm:$0xff] }
   0x2   :  { %v5_v2 = vxor.u32 2147483648, %v2_v0  ;;  %v12_v3 = vxor.u32 2147483648, %v16_v1 }
   0x4   :  { %7 = vst [vmem:[%s41_s1] sm:$0xff] %v5_v2  ;;  %17 = vst [vmem:[%s41_s1 + $0x8] sm:$0xff] %v12_v3 }

// kernel: forward_reconstruct.12
= control target key start
LH: loop header
LB: loop body
LE: loop exit
PB: predicated region body
PF: predicated region fallthrough
CT: control target
= control target key end

     0   :  { %vm47_vm0 = vcmask 23552   ;;  %v818_v0 = vmov 0.0   ;;  %vm819_vm1 = vmmov 0   ;;  %vm467_vm2 = vcmask 130112   ;;  %s1220_s1 = inlined_call_operand.vmem [shape: f32[2,128,3], index: 1, kind: input, shape index: {}]   ;;  %s1221_s0 = inlined_call_operand.vmem [shape: f32[2,8,3], index: 0, kind: input, shape index: {}]   ;;  %s1222_s2 = inlined_call_operand.vmem [shape: f32[2,8,128], index: 2, kind: output, shape index: {}]  }
   0x1   :  { %746 = vmatprep.subr.mxu0 %v818_v0  ;;  %781 = vmatprep.subr.mxu1 %v818_v0  ;;  %v840_v1 = vld [vmem:[%s1220_s1 + $0x78] sm:$0xff]  ;;  %v854_v3 = vld [vmem:[%s1220_s1 + $0x80] sm:$0xff]  ;;  %v866_v5 = vld [vmem:[%s1220_s1 + $0x70] sm:$0xff]  ;;  %vm474_vm3 = vcmask 195712   ;;  %vm481_vm4 = vcmask 261312   ;;  %vm488_vm5 = vcmask 326912  }
   0x2   :  { %v845_v2 = vld [vmem:[%s1220_s1 + $0xf8] sm:$0xff]  ;;  %747 = vmatpush3.xpose.msk.msra.mxu0 %vm47_vm0, %v840_v1  ;;  %v859_v4 = vld [vmem:[%s1220_s1] sm:$0xff]  ;;  %v871_v6 = vld [vmem:[%s1220_s1 + $0xf0] sm:$0xff]  ;;  %v70_v7 = vmul.f32 %v854_v3, %v854_v3  ;;  %778 = vmatprep.mubr.msk.f32.mxu0 %vm819_vm1, %v818_v0  ;;  %vm495_vm6 = vcmask 392512   ;;  %vm502_vm7 = vcmask 458112   ;;  %vm509_vm8 = vcmask 523712  }
   0x3   :  { %782 = vmatpush3.xpose.msk.msra.mxu1 %vm47_vm0, %v845_v2  ;;  %748 = vmatprep.subr.mxu0 %v818_v0  ;;  %v54_v8 = vmul.f32 %v859_v4, %v859_v4  ;;  %v880_v9 = vld [vmem:[%s1220_s1 + $0x88] sm:$0xff]  ;;  %v898_v15 = vld [vmem:[%s1220_s1 + $0x90] sm:$0xff]  ;;  %v930_v23 = vld [vmem:[%s1220_s1 + $0x98] sm:$0xff]  ;;  %vm516_vm9 = vcmask 589312   ;;  %vm523_vm10 = vcmask 654912   ;;  %vm530_vm11 = vcmask 720512  }
   0x4   :  { %783 = vmatprep.subr.mxu1 %v818_v0  ;;  %v71_v10 = vmul.f32 %v880_v9, %v880_v9  ;;  %v887_v11 = vld [vmem:[%s1220_s1 + $0x8] sm:$0xff]  ;;  %813 = vmatprep.mubr.msk.f32.mxu1 %vm819_vm1, %v818_v0  ;;  %v134_v12 = vsel %vm47_vm0, %v70_v7, 0.0  ;;  %v907_v16 = vld [vmem:[%s1220_s1 + $0x10] sm:$0xff]  ;;  %v72_v20 = vmul.f32 %v898_v15, %v898_v15  ;;  %v939_v24 = vld [vmem:[%s1220_s1 + $0x18] sm:$0xff]  ;;  %v73_v28 = vmul.f32 %v930_v23, %v930_v23 }
   0x5   :  { %v86_v13 = vsel %vm47_vm0, %v54_v8, 0.0  ;;  %v55_v14 = vmul.f32 %v887_v11, %v887_v11  ;;  %135 = vadd.xlane.f32.xlu1 %v134_v12  ;;  %v913_v17 = vld [vmem:[%s1220_s1 + $0x68] sm:$0xff]  ;;  %v56_v22 = vmul.f32 %v907_v16, %v907_v16  ;;  %v945_v25 = vld [vmem:[%s1220_s1 + $0x60] sm:$0xff]  ;;  %v57_v30 = vmul.f32 %v939_v24, %v939_v24  ;;  %v977_v33 = vld [vmem:[%s1220_s1 + $0x58] sm:$0xff] }
   0x6   :  { %749 = vmatpush3.xpose.msk.msra.mxu0 %vm47_vm0, %v866_v5  ;;  %v918_v18 = vld [vmem:[%s1220_s1 + $0xe8] sm:$0xff]  ;;  %87 = vadd.xlane.f32.xlu0 %v86_v13  ;;  %v137_v19 = vsel %vm47_vm0, %v71_v10, 0.0  ;;  %v950_v26 = vld [vmem:[%s1220_s1 + $0xe0] sm:$0xff]  ;;  %v140_v27 = vsel %vm47_vm0, %v72_v20, 0.0  ;;  %v982_v34 = vld [vmem:[%s1220_s1 + $0xd8] sm:$0xff]  ;;  %v143_v35 = vsel %vm47_vm0, %v73_v28, 0.0 }
   0x7   :  { %784 = vmatpush3.xpose.msk.msra.mxu1 %vm47_vm0, %v871_v6  ;;  %750 = vmatprep.subr.mxu0 %v818_v0  ;;  %v89_v21 = vsel %vm47_vm0, %v55_v14, 0.0  ;;  %v92_v29 = vsel %vm47_vm0, %v56_v22, 0.0  ;;  %v962_v31 = vld [vmem:[%s1220_s1 + $0xa0] sm:$0xff]  ;;  %v95_v37 = vsel %vm47_vm0, %v57_v30, 0.0  ;;  %v994_v39 = vld [vmem:[%s1220_s1 + $0xa8] sm:$0xff]  ;;  %v1009_v41 = vld [vmem:[%s1220_s1 + $0x50] sm:$0xff] }
   0x8   :  { %785 = vmatprep.subr.mxu1 %v818_v0  ;;  %v971_v32 = vld [vmem:[%s1220_s1 + $0x20] sm:$0xff]  ;;  %v74_v36 = vmul.f32 %v962_v31, %v962_v31  ;;  %v1003_v40 = vld [vmem:[%s1220_s1 + $0x28] sm:$0xff]  ;;  %v39_v42 = vld [vmem:[%s1220_s1 + $0xd0] sm:$0xff]  ;;  %v75_v44 = vmul.f32 %v994_v39, %v994_v39  ;;  %vm537_vm12 = vcmask 786112   ;;  %vm544_vm13 = vcmask 851712  }
   0x9   :  { %138 = vadd.xlane.f32.xlu1 %v137_v19  ;;  %v58_v38 = vmul.f32 %v971_v32, %v971_v32  ;;  %v59_v46 = vmul.f32 %v1003_v40, %v1003_v40  ;;  %v35_v47 = vld [vmem:[%s1220_s1 + $0xb0] sm:$0xff]  ;;  %v22_v49 = vld [vmem:[%s1220_s1 + $0x48] sm:$0xff]  ;;  %v36_v55 = vld [vmem:[%s1220_s1 + $0xb8] sm:$0xff]  ;;  %vm551_vm14 = vcmask 917312   ;;  %vm558_vm15 = vcmask 982912  }
   0xa   :  { %751 = vmatpush3.xpose.msk.msra.mxu0 %vm47_vm0, %v913_v17  ;;  %90 = vadd.xlane.f32.xlu0 %v89_v21  ;;  %v146_v43 = vsel %vm47_vm0, %v74_v36, 0.0  ;;  %v19_v48 = vld [vmem:[%s1220_s1 + $0x30] sm:$0xff]  ;;  %v38_v50 = vld [vmem:[%s1220_s1 + $0xc8] sm:$0xff]  ;;  %v149_v51 = vsel %vm47_vm0, %v75_v44, 0.0  ;;  %v76_v52 = vmul.f32 %v35_v47, %v35_v47  ;;  %v20_v56 = vld [vmem:[%s1220_s1 + $0x38] sm:$0xff]  ;;  %v77_v60 = vmul.f32 %v36_v55, %v36_v55 }
   0xb   :  { %786 = vmatpush3.xpose.msk.msra.mxu1 %vm47_vm0, %v918_v18  ;;  %752 = vmatprep.subr.mxu0 %v818_v0  ;;  %v98_v45 = vsel %vm47_vm0, %v58_v38, 0.0  ;;  %v101_v53 = vsel %vm47_vm0, %v59_v46, 0.0  ;;  %v60_v54 = vmul.f32 %v19_v48, %v19_v48  ;;  %v21_v57 = vld [vmem:[%s1220_s1 + $0x40] sm:$0xff]  ;;  %v61_v62 = vmul.f32 %v20_v56, %v20_v56 }
   0xc   :  { %787 = vmatprep.subr.mxu1 %v818_v0  ;;  %v37_v58 = vld [vmem:[%s1220_s1 + $0xc0] sm:$0xff]  ;;  %v152_v59 = vsel %vm47_vm0, %v76_v52, 0.0  ;;  %v155_v63 = vsel %vm47_vm0, %v77_v60, 0.0  ;;  %v62_v10 = vmul.f32 %v21_v57, %v21_v57  ;;  %v79_v13 = vmul.f32 %v38_v50, %v38_v50 }
   0xd   :  { %141 = vadd.xlane.f32.xlu1 %v140_v27  ;;  %v104_v61 = vsel %vm47_vm0, %v60_v54, 0.0  ;;  %v78_v7 = vmul.f32 %v37_v58, %v37_v58  ;;  %v107_v8 = vsel %vm47_vm0, %v61_v62, 0.0  ;;  %v63_v19 = vmul.f32 %v22_v49, %v22_v49 }
   0xe   :  { %753 = vmatpush3.xpose.msk.msra.mxu0 %vm47_vm0, %v945_v25  ;;  %93 = vadd.xlane.f32.xlu0 %v92_v29  ;;  %v110_v14 = vsel %vm47_vm0, %v62_v10, 0.0  ;;  %v161_v20 = vsel %vm47_vm0, %v79_v13, 0.0  ;;  %v80_v21 = vmul.f32 %v39_v42, %v39_v42  ;;  %v64_v27 = vmul.f32 %v1009_v41, %v1009_v41 }
   0xf   :  { %788 = vmatpush3.xpose.msk.msra.mxu1 %vm47_vm0, %v950_v26  ;;  %754 = vmatprep.subr.mxu0 %v818_v0  ;;  %v158_v12 = vsel %vm47_vm0, %v78_v7, 0.0  ;;  %v113_v22 = vsel %vm47_vm0, %v63_v19, 0.0  ;;  %v81_v29 = vmul.f32 %v982_v34, %v982_v34 }
  0x10   :  { %789 = vmatprep.subr.mxu1 %v818_v0  ;;  %v164_v28 = vsel %vm47_vm0, %v80_v21, 0.0  ;;  %v116_v30 = vsel %vm47_vm0, %v64_v27, 0.0 }
  0x11   :  { %144 = vadd.xlane.f32.xlu1 %v143_v35  ;;  %v65_v35 = vmul.f32 %v977_v33, %v977_v33  ;;  %v167_v36 = vsel %vm47_vm0, %v81_v29, 0.0 }
  0x12   :  { %755 = vmatpush3.xpose.msk.msra.mxu0 %vm47_vm0, %v977_v33  ;;  %96 = vadd.xlane.f32.xlu0 %v95_v37  ;;  %v66_v33 = vmul.f32 %v945_v25, %v945_v25  ;;  %v67_v25 = vmul.f32 %v913_v17, %v913_v17  ;;  %v68_v17 = vmul.f32 %v866_v5, %v866_v5 }
  0x13   :  { %790 = vmatpush3.xpose.msk.msra.mxu1 %vm47_vm0, %v982_v34  ;;  %756 = vmatprep.subr.mxu0 %v818_v0  ;;  %v82_v34 = vmul.f32 %v950_v26, %v950_v26  ;;  %v119_v37 = vsel %vm47_vm0, %v65_v35, 0.0  ;;  %v83_v26 = vmul.f32 %v918_v18, %v918_v18  ;;  %v84_v18 = vmul.f32 %v871_v6, %v871_v6 }
  0x14   :  { %791 = vmatprep.subr.mxu1 %v818_v0  ;;  %v85_v6 = vmul.f32 %v845_v2, %v845_v2  ;;  %v69_v5 = vmul.f32 %v840_v1, %v840_v1 }
  0x15   :  { %147 = vadd.xlane.f32.xlu1 %v146_v43 }
  0x16   :  { %757 = vmatpush3.xpose.msk.msra.mxu0 %vm47_vm0, %v1009_v41  ;;  %99 = vadd.xlane.f32.xlu0 %v98_v45  ;;  %v179_v2 = vsel %vm47_vm0, %v85_v6, 0.0  ;;  %v131_v1 = vsel %vm47_vm0, %v69_v5, 0.0 }
  0x17   :  { %792 = vmatpush3.xpose.msk.msra.mxu1 %vm47_vm0, %v39_v42  ;;  %758 = vmatprep.subr.mxu0 %v818_v0 }
  0x18   :  { %793 = vmatprep.subr.mxu1 %v818_v0 }
  0x19   :  { %150 = vadd.xlane.f32.xlu1 %v149_v51  ;;  %v456_v51 = vlaneseq }
  0x1a   :  { %759 = vmatpush3.xpose.msk.msra.mxu0 %vm47_vm0, %v22_v49  ;;  %102 = vadd.xlane.f32.xlu0 %v101_v53 }
  0x1b   :  { %794 = vmatpush3.xpose.msk.msra.mxu1 %vm47_vm0, %v38_v50  ;;  %760 = vmatprep.subr.mxu0 %v818_v0  ;;  %v1158_v54 = vand.u32 127, %v456_v51 }
  0x1c   :  { %795 = vmatprep.subr.mxu1 %v818_v0 }
  0x1d   :  { %153 = vadd.xlane.f32.xlu1 %v152_v59  ;;  %v469_v59 = vadd.s32 4294967280, %v1158_v54  ;;  %v476_v7 = vadd.s32 4294967272, %v1158_v54  ;;  %v483_v19 = vadd.s32 4294967264, %v1158_v54  ;;  %v490_v35 = vadd.s32 4294967256, %v1158_v54 }
  0x1e   :  { %761 = vmatpush3.xpose.msk.msra.mxu0 %vm47_vm0, %v21_v57  ;;  %105 = vadd.xlane.f32.xlu0 %v104_v61  ;;  %v1164_v57 = vshrl.u32 %v456_v51, 7  ;;  %v504_v6 = vadd.s32 4294967240, %v1158_v54 }
  0x1f   :  { %796 = vmatpush3.xpose.msk.msra.mxu1 %vm47_vm0, %v37_v58  ;;  %762 = vmatprep.subr.mxu0 %v818_v0  ;;  %v462_v58 = vadd.s32 4294967288, %v1158_v54 }
  0x20   :  { %797 = vmatprep.subr.mxu1 %v818_v0  ;;  %v460_v60 = vsub.s32 %v1158_v54, %v1164_v57 }
  0x21   :  { %156 = vadd.xlane.f32.xlu1 %v155_v63  ;;  %v465_v61 = vsub.s32 %v462_v58, %v1164_v57 }
  0x22   :  { %763 = vmatpush3.xpose.msk.msra.mxu0 %vm47_vm0, %v20_v56  ;;  %108 = vadd.xlane.f32.xlu0 %v107_v8  ;;  %v472_v8 = vsub.s32 %v469_v59, %v1164_v57 }
  0x23   :  { %798 = vmatpush3.xpose.msk.msra.mxu1 %vm47_vm0, %v36_v55  ;;  %764 = vmatprep.subr.mxu0 %v818_v0 }
  0x24   :  { %799 = vmatprep.subr.mxu1 %v818_v0 }
  0x25   :  { %159 = vadd.xlane.f32.xlu1 %v158_v12 }
  0x26   :  { %765 = vmatpush3.xpose.msk.msra.mxu0 %vm47_vm0, %v19_v48  ;;  %111 = vadd.xlane.f32.xlu0 %v110_v14 }
  0x27   :  { %800 = vmatpush3.xpose.msk.msra.mxu1 %vm47_vm0, %v35_v47  ;;  %766 = vmatprep.subr.mxu0 %v818_v0 }
  0x28   :  { %801 = vmatprep.subr.mxu1 %v818_v0 }
  0x29   :  { %162 = vadd.xlane.f32.xlu1 %v161_v20  ;;  %v479_v20 = vsub.s32 %v476_v7, %v1164_v57 }
  0x2a   :  { %767 = vmatpush3.xpose.msk.msra.mxu0 %vm47_vm0, %v1003_v40  ;;  %114 = vadd.xlane.f32.xlu0 %v113_v22 }
  0x2b   :  { %802 = vmatpush3.xpose.msk.msra.mxu1 %vm47_vm0, %v994_v39  ;;  %768 = vmatprep.subr.mxu0 %v818_v0 }
  0x2c   :  { %803 = vmatprep.subr.mxu1 %v818_v0 }
  0x2d   :  { %165 = vadd.xlane.f32.xlu1 %v164_v28 }
  0x2e   :  { %769 = vmatpush3.xpose.msk.msra.mxu0 %vm47_vm0, %v971_v32  ;;  %117 = vadd.xlane.f32.xlu0 %v116_v30  ;;  %v122_v32 = vsel %vm47_vm0, %v66_v33, 0.0 }
  0x2f   :  { %804 = vmatpush3.xpose.msk.msra.mxu1 %vm47_vm0, %v962_v31  ;;  %770 = vmatprep.subr.mxu0 %v818_v0  ;;  %v170_v31 = vsel %vm47_vm0, %v82_v34, 0.0 }
  0x30   :  { %805 = vmatprep.subr.mxu1 %v818_v0 }
  0x31   :  { %168 = vadd.xlane.f32.xlu1 %v167_v36  ;;  %v486_v36 = vsub.s32 %v483_v19, %v1164_v57 }
  0x32   :  { %771 = vmatpush3.xpose.msk.msra.mxu0 %vm47_vm0, %v939_v24  ;;  %120 = vadd.xlane.f32.xlu0 %v119_v37  ;;  %v125_v24 = vsel %vm47_vm0, %v67_v25, 0.0 }
  0x33   :  { %806 = vmatpush3.xpose.msk.msra.mxu1 %vm47_vm0, %v930_v23  ;;  %772 = vmatprep.subr.mxu0 %v818_v0  ;;  %v173_v23 = vsel %vm47_vm0, %v83_v26, 0.0  ;;  %v497_v26 = vadd.s32 4294967248, %v1158_v54 }
  0x34   :  { %807 = vmatprep.subr.mxu1 %v818_v0 }
  0x35   :  { %171 = vadd.xlane.f32.xlu1 %v170_v31 }
  0x36   :  { %773 = vmatpush3.xpose.msk.msra.mxu0 %vm47_vm0, %v907_v16  ;;  %123 = vadd.xlane.f32.xlu0 %v122_v32  ;;  %v128_v16 = vsel %vm47_vm0, %v68_v17, 0.0  ;;  %v493_v32 = vsub.s32 %v490_v35, %v1164_v57  ;;  %v553_v35 = vadd.s32 4294967184, %v1158_v54 }
  0x37   :  { %808 = vmatpush3.xpose.msk.msra.mxu1 %vm47_vm0, %v898_v15  ;;  %774 = vmatprep.subr.mxu0 %v818_v0  ;;  %v176_v15 = vsel %vm47_vm0, %v84_v18, 0.0 }
  0x38   :  { %809 = vmatprep.subr.mxu1 %v818_v0 }
  0x39   :  { %174 = vadd.xlane.f32.xlu1 %v173_v23 }
  0x3a   :  { %775 = vmatpush3.xpose.msk.msra.mxu0 %vm47_vm0, %v887_v11  ;;  %126 = vadd.xlane.f32.xlu0 %v125_v24 }
  0x3b   :  { %810 = vmatpush3.xpose.msk.msra.mxu1 %vm47_vm0, %v880_v9  ;;  %776 = vmatprep.subr.mxu0 %v818_v0  ;;  %v12_v9 = vld [vmem:[%s1221_s0 + $0x8] sm:$0xff] }
  0x3c   :  { %811 = vmatprep.subr.mxu1 %v818_v0  ;;  %v11_v0 = vld [vmem:[%s1221_s0] sm:$0xff]  ;;  %v46_v11 = vmul.f32 %v12_v9, %v12_v9 }
  0x3d   :  { %177 = vadd.xlane.f32.xlu1 %v176_v15 }
  0x3e   :  { %777 = vmatpush3.xpose.msk.msra.mxu0 %vm47_vm0, %v859_v4  ;;  %129 = vadd.xlane.f32.xlu0 %v128_v16  ;;  %v51_v4 = vsel %vm47_vm0, %v46_v11, 0.0  ;;  %v500_v16 = vsub.s32 %v497_v26, %v1164_v57  ;;  %v511_v11 = vadd.s32 4294967232, %v1158_v54 }
  0x3f   :  { %812 = vmatpush3.xpose.msk.msra.mxu1 %vm47_vm0, %v854_v3  ;;  %v45_v3 = vmul.f32 %v11_v0, %v11_v0 }
  0x41   :  { %779 = vmatmul.mubr.msk.f32.vlgmr.msra.gmra.mxu0 %vm47_vm0, %v11_v0  ;;  %180 = vadd.xlane.f32.xlu1 %v179_v2  ;;  %v48_v38 = vsel %vm47_vm0, %v45_v3, 0.0 }
  0x42   :  { %814 = vmatmul.mubr.msk.f32.vlgmr.msra.gmra.mxu1 %vm47_vm0, %v12_v9  ;;  %132 = vadd.xlane.f32.xlu0 %v131_v1  ;;  %v507_v1 = vsub.s32 %v504_v6, %v1164_v57  ;;  %vm565_vm0 = vcmask 1048512  }
  0x45   :  { %52 = vadd.xlane.f32.xlu1 %v51_v4 }
  0x46   :  { %49 = vadd.xlane.f32.xlu0 %v48_v38 }
  0x8e   :  { %v136_v39 = vpop.xlane.xlu1 %135 }
  0x8f   :  { %v88_v40 = vpop.xlane.xlu0 %87  ;;  %v570_v10 = vrot.slane %v136_v39, %v460_v60 }
  0x90   :  { %v461_v12 = vrot.slane %v88_v40, %v460_v60 }
  0x92   :  { %v139_v41 = vpop.xlane.xlu1 %138 }
  0x93   :  { %v91_v42 = vpop.xlane.xlu0 %90  ;;  %v574_v13 = vrot.slane %v139_v41, %v465_v61 }
  0x94   :  { %v466_v14 = vrot.slane %v91_v42, %v465_v61  ;;  %v518_v42 = vadd.s32 4294967224, %v1158_v54 }
  0x95   :  { %v575_v29 = vsel %vm467_vm2, %v574_v13, %v570_v10 }
  0x96   :  { %v142_v43 = vpop.xlane.xlu1 %141  ;;  %v468_v30 = vsel %vm467_vm2, %v466_v14, %v461_v12 }
  0x97   :  { %v94_v44 = vpop.xlane.xlu0 %93  ;;  %v579_v21 = vrot.slane %v142_v43, %v472_v8  ;;  %v514_v43 = vsub.s32 %v511_v11, %v1164_v57 }
  0x98   :  { %v473_v22 = vrot.slane %v94_v44, %v472_v8 }
  0x99   :  { %v580_v33 = vsel %vm474_vm3, %v579_v21, %v575_v29  ;;  %v546_v21 = vadd.s32 4294967192, %v1158_v54 }
  0x9a   :  { %v145_v45 = vpop.xlane.xlu1 %144  ;;  %v475_v31 = vsel %vm474_vm3, %v473_v22, %v468_v30 }
  0x9b   :  { %v97_v46 = vpop.xlane.xlu0 %96  ;;  %v584_v34 = vrot.slane %v145_v45, %v479_v20 }
  0x9c   :  { %v480_v37 = vrot.slane %v97_v46, %v479_v20 }
  0x9d   :  { %v585_v17 = vsel %vm481_vm4, %v584_v34, %v580_v33 }
  0x9e   :  { %v148_v47 = vpop.xlane.xlu1 %147  ;;  %v482_v15 = vsel %vm481_vm4, %v480_v37, %v475_v31 }
  0x9f   :  { %v100_v48 = vpop.xlane.xlu0 %99  ;;  %v589_v25 = vrot.slane %v148_v47, %v486_v36 }
  0xa0   :  { %v487_v23 = vrot.slane %v100_v48, %v486_v36  ;;  %v525_v48 = vadd.s32 4294967216, %v1158_v54  ;;  %v549_v36 = vsub.s32 %v546_v21, %v1164_v57 }
  0xa1   :  { %v590_v9 = vsel %vm488_vm5, %v589_v25, %v585_v17  ;;  %v560_v25 = vadd.s32 4294967176, %v1158_v54 }
  0xa2   :  { %v151_v49 = vpop.xlane.xlu1 %150  ;;  %v489_v2 = vsel %vm488_vm5, %v487_v23, %v482_v15  ;;  %v556_v23 = vsub.s32 %v553_v35, %v1164_v57 }
  0xa3   :  { %v103_v50 = vpop.xlane.xlu0 %102  ;;  %v594_v5 = vrot.slane %v151_v49, %v493_v32  ;;  %v521_v49 = vsub.s32 %v518_v42, %v1164_v57  ;;  %v563_v6 = vsub.s32 %v560_v25, %v1164_v57 }
  0xa4   :  { %v494_v0 = vrot.slane %v103_v50, %v493_v32 }
  0xa5   :  { %v595_v40 = vsel %vm495_vm6, %v594_v5, %v590_v9 }
  0xa6   :  { %v1154_v52 = vpop.xlane.xlu1 %153  ;;  %v496_v41 = vsel %vm495_vm6, %v494_v0, %v489_v2 }
  0xa7   :  { %v1156_v53 = vpop.xlane.xlu0 %105  ;;  %v599_v3 = vrot.slane %v1154_v52, %v500_v16 }
  0xa8   :  { %v501_v4 = vrot.slane %v1156_v53, %v500_v16 }
  0xa9   :  { %v600_v46 = vsel %vm502_vm7, %v599_v3, %v595_v40 }
  0xaa   :  { %v1160_v55 = vpop.xlane.xlu1 %156  ;;  %v503_v47 = vsel %vm502_vm7, %v501_v4, %v496_v41 }
  0xab   :  { %v1162_v56 = vpop.xlane.xlu0 %108  ;;  %v604_v44 = vrot.slane %v1160_v55, %v507_v1  ;;  %v532_v55 = vadd.s32 4294967208, %v1158_v54 }
  0xac   :  { %v508_v45 = vrot.slane %v1162_v56, %v507_v1  ;;  %v528_v56 = vsub.s32 %v525_v48, %v1164_v57 }
  0xad   :  { %v605_v58 = vsel %vm509_vm8, %v604_v44, %v600_v46 }
  0xae   :  { %v1171_v62 = vpop.xlane.xlu1 %159  ;;  %v510_v59 = vsel %vm509_vm8, %v508_v45, %v503_v47 }
  0xaf   :  { %v1173_v63 = vpop.xlane.xlu0 %111  ;;  %v609_v50 = vrot.slane %v1171_v62, %v514_v43  ;;  %v539_v62 = vadd.s32 4294967200, %v1158_v54 }
  0xb0   :  { %v515_v51 = vrot.slane %v1173_v63, %v514_v43  ;;  %v535_v63 = vsub.s32 %v532_v55, %v1164_v57 }
  0xb1   :  { %v610_v7 = vsel %vm516_vm9, %v609_v50, %v605_v58  ;;  %v542_v22 = vsub.s32 %v539_v62, %v1164_v57 }
  0xb2   :  { %v1179_v27 = vpop.xlane.xlu1 %162  ;;  %v517_v8 = vsel %vm516_vm9, %v515_v51, %v510_v59 }
  0xb3   :  { %v1181_v28 = vpop.xlane.xlu0 %114  ;;  %v614_v60 = vrot.slane %v1179_v27, %v521_v49 }
  0xb4   :  { %v522_v61 = vrot.slane %v1181_v28, %v521_v49 }
  0xb5   :  { %v615_v19 = vsel %vm523_vm10, %v614_v60, %v610_v7 }
  0xb6   :  { %v166_v18 = vpop.xlane.xlu1 %165  ;;  %v524_v20 = vsel %vm523_vm10, %v522_v61, %v517_v8 }
  0xb7   :  { %v118_v24 = vpop.xlane.xlu0 %117  ;;  %v619_v10 = vrot.slane %v166_v18, %v528_v56 }
  0xb8   :  { %v529_v12 = vrot.slane %v118_v24, %v528_v56 }
  0xb9   :  { %v620_v29 = vsel %vm530_vm11, %v619_v10, %v615_v19 }
  0xba   :  { %v169_v38 = vpop.xlane.xlu1 %168  ;;  %v531_v30 = vsel %vm530_vm11, %v529_v12, %v524_v20 }
  0xbb   :  { %v121_v39 = vpop.xlane.xlu0 %120  ;;  %v624_v27 = vrot.slane %v169_v38, %v535_v63 }
  0xbc   :  { %v536_v28 = vrot.slane %v121_v39, %v535_v63 }
  0xbd   :  { %v625_v26 = vsel %vm537_vm12, %v624_v27, %v620_v29 }
  0xbe   :  { %v172_v52 = vpop.xlane.xlu1 %171  ;;  %v538_v32 = vsel %vm537_vm12, %v536_v28, %v531_v30 }
  0xbf   :  { %v124_v53 = vpop.xlane.xlu0 %123  ;;  %v629_v34 = vrot.slane %v172_v52, %v542_v22 }
  0xc0   :  { %v543_v37 = vrot.slane %v124_v53, %v542_v22 }
  0xc1   :  { %v630_v17 = vsel %vm544_vm13, %v629_v34, %v625_v26 }
  0xc2   :  { %v175_v13 = vpop.xlane.xlu1 %174  ;;  %v545_v15 = vsel %vm544_vm13, %v543_v37, %v538_v32 }
  0xc3   :  { %v127_v14 = vpop.xlane.xlu0 %126  ;;  %v634_v18 = vrot.slane %v175_v13, %v549_v36 }
  0xc4   :  { %v550_v24 = vrot.slane %v127_v14, %v549_v36 }
  0xc5   :  { %v635_v2 = vsel %vm551_vm14, %v634_v18, %v630_v17 }
  0xc6   :  { %v178_v33 = vpop.xlane.xlu1 %177  ;;  %v552_v11 = vsel %vm551_vm14, %v550_v24, %v545_v15 }
  0xc7   :  { %v130_v31 = vpop.xlane.xlu0 %129  ;;  %v639_v16 = vrot.slane %v178_v33, %v556_v23 }
  0xc8   :  { %v557_v5 = vrot.slane %v130_v31, %v556_v23 }
  0xc9   :  { %v640_v54 = vsel %vm558_vm15, %v639_v16, %v635_v2 }
  0xca   :  { %v181_v0 = vpop.xlane.xlu1 %180  ;;  %v559_v4 = vsel %vm558_vm15, %v557_v5, %v552_v11 }
  0xcb   :  { %v133_v9 = vpop.xlane.xlu0 %132  ;;  %v644_v1 = vrot.slane %v181_v0, %v563_v6 }
  0xcc   :  { %v564_v3 = vrot.slane %v133_v9, %v563_v6 }
  0xcd   :  { %v645_v38 = vsel %vm565_vm0, %v644_v1, %v640_v54 }
  0xce   :  { %v53_v39 = vpop.xlane.xlu1 %52  ;;  %v566_v40 = vsel %vm565_vm0, %v564_v3, %v559_v4 }
  0xcf   :  { %v50_v41 = vpop.xlane.xlu0 %49  ;;  %v667_v44 = vadd.f32 %v645_v38, %v53_v39 }
  0xd0   :  { %v666_v57 = vadd.f32 %v566_v40, %v50_v41 }
 0x101   :  { %v299_v42 = vpop.f32.mrf.mxu0 }
 0x102   :  { %v420_v43 = vpop.f32.mrf.mxu1  ;;  %v668_v45 = vmul.f32 2.0, %v299_v42 }
 0x103   :  { %v669_v46 = vmul.f32 2.0, %v420_v43  ;;  %v780_v47 = vpop.f32.mrf.mxu0 }
 0x104   :  { %v815_v48 = vpop.f32.mrf.mxu1  ;;  %v670_v49 = vsub.f32 %v666_v57, %v668_v45 }
 0x105   :  { %v671_v50 = vsub.f32 %v667_v44, %v669_v46 }
 0x106   :  { %672 = vst [vmem:[%s1222_s2] sm:$0xff] %v670_v49 }
 0x107   :  { %673 = vst [vmem:[%s1222_s2 + $0x8] sm:$0xff] %v671_v50 }

// kernel: forward_reconstruct.14
= control target key start
LH: loop header
LB: loop body
LE: loop exit
PB: predicated region body
PF: predicated region fallthrough
CT: control target
= control target key end

     0   :  { %vm37_vm0 = vcmask 1042432   ;;  %vm30_vm1 = vcmask 23552   ;;  %vm232_vm2 = vcmask 523264   ;;  %s408_s1 = inlined_call_operand.vmem [shape: f32[3,128], index: 1, kind: input, shape index: {}]   ;;  %s409_s0 = inlined_call_operand.vmem [shape: f32[16,3], index: 0, kind: input, shape index: {}]   ;;  %s410_s3 = inlined_call_operand.vmem [shape: f32[128,64], index: 3, kind: input, shape index: {}]   ;;  %s411_s2 = inlined_call_operand.vmem [shape: f32[1,128], index: 2, kind: input, shape index: {}]   ;;  %s412_s4 = inlined_call_operand.vmem [shape: f32[1,64], index: 4, kind: input, shape index: {}]   ;;  %s413_s5 = inlined_call_operand.vmem [shape: f32[16,64], index: 5, kind: output, shape index: {}]  }
   0x1   :  { %v22_v0 = vld [vmem:[%s408_s1] sm:$0x7]  ;;  %v21_v2 = vld [vmem:[%s409_s0 + $0x8] sm:$0xff]  ;;  %v149_v3 = vld [vmem:[%s410_s3 + $0x78] sm:$0xff] }
   0x2   :  { %v20_v1 = vld [vmem:[%s409_s0] sm:$0xff]  ;;  %265 = vmatprep.subr.msk.mxu0 %vm37_vm0, %v22_v0  ;;  %270 = vmatprep.subr.mxu1 %v149_v3  ;;  %v148_v4 = vld [vmem:[%s410_s3 + $0x70] sm:$0xff]  ;;  %v147_v5 = vld [vmem:[%s410_s3 + $0x68] sm:$0xff] }
   0x3   :  { %267 = vmatprep.mubr.msk.f32.mxu0 %vm30_vm1, %v20_v1  ;;  %266 = vmatpush3.msk.msra.mxu0 %vm37_vm0, %v22_v0  ;;  %v146_v6 = vld [vmem:[%s410_s3 + $0x60] sm:$0xff]  ;;  %v145_v7 = vld [vmem:[%s410_s3 + $0x58] sm:$0xff]  ;;  %v144_v8 = vld [vmem:[%s410_s3 + $0x50] sm:$0xff] }
   0x4   :  { %268 = vmatmul.mubr.msk.f32.vlgmr.msra.gmra.mxu0 %vm30_vm1, %v21_v2  ;;  %271 = vmatpush3.msra.mxu1 %v149_v3  ;;  %v143_v9 = vld [vmem:[%s410_s3 + $0x48] sm:$0xff]  ;;  %v142_v10 = vld [vmem:[%s410_s3 + $0x40] sm:$0xff]  ;;  %v141_v11 = vld [vmem:[%s410_s3 + $0x38] sm:$0xff] }
   0x5   :  { %272 = vmatprep.subr.mxu1 %v148_v4  ;;  %v140_v12 = vld [vmem:[%s410_s3 + $0x30] sm:$0xff]  ;;  %v139_v13 = vld [vmem:[%s410_s3 + $0x28] sm:$0xff]  ;;  %v138_v14 = vld [vmem:[%s410_s3 + $0x20] sm:$0xff] }
   0x6   :  { %273 = vmatpush3.msra.mxu1 %v148_v4  ;;  %v137_v15 = vld [vmem:[%s410_s3 + $0x18] sm:$0xff]  ;;  %v136_v16 = vld [vmem:[%s410_s3 + $0x10] sm:$0xff]  ;;  %v135_v17 = vld [vmem:[%s410_s3 + $0x8] sm:$0xff] }
   0x7   :  { %274 = vmatprep.subr.mxu1 %v147_v5  ;;  %v134_v18 = vld [vmem:[%s410_s3] sm:$0xff] }
   0x8   :  { %275 = vmatpush3.msra.mxu1 %v147_v5  ;;  %v239_v19 = vld [vmem:[%s411_s2] ss:$0 sm:$0xff] }
   0x9   :  { %276 = vmatprep.subr.mxu1 %v146_v6  ;;  %v243_v42 = vld [vmem:[%s412_s4] ss:$0 sm:$0xff] }
   0xa   :  { %277 = vmatpush3.msra.mxu1 %v146_v6 }
   0xb   :  { %278 = vmatprep.subr.mxu1 %v145_v7 }
   0xc   :  { %279 = vmatpush3.msra.mxu1 %v145_v7 }
   0xd   :  { %280 = vmatprep.subr.mxu1 %v144_v8 }
   0xe   :  { %281 = vmatpush3.msra.mxu1 %v144_v8 }
   0xf   :  { %282 = vmatprep.subr.mxu1 %v143_v9 }
  0x10   :  { %283 = vmatpush3.msra.mxu1 %v143_v9 }
  0x11   :  { %284 = vmatprep.subr.mxu1 %v142_v10 }
  0x12   :  { %285 = vmatpush3.msra.mxu1 %v142_v10 }
  0x13   :  { %286 = vmatprep.subr.mxu1 %v141_v11 }
  0x14   :  { %287 = vmatpush3.msra.mxu1 %v141_v11 }
  0x15   :  { %288 = vmatprep.subr.mxu1 %v140_v12 }
  0x16   :  { %289 = vmatpush3.msra.mxu1 %v140_v12 }
  0x17   :  { %290 = vmatprep.subr.mxu1 %v139_v13 }
  0x18   :  { %291 = vmatpush3.msra.mxu1 %v139_v13 }
  0x19   :  { %292 = vmatprep.subr.mxu1 %v138_v14 }
  0x1a   :  { %293 = vmatpush3.msra.mxu1 %v138_v14 }
  0x1b   :  { %294 = vmatprep.subr.mxu1 %v137_v15 }
  0x1c   :  { %295 = vmatpush3.msra.mxu1 %v137_v15 }
  0x1d   :  { %296 = vmatprep.subr.mxu1 %v136_v16 }
  0x1e   :  { %297 = vmatpush3.msra.mxu1 %v136_v16 }
  0x1f   :  { %298 = vmatprep.subr.mxu1 %v135_v17 }
  0x20   :  { %299 = vmatpush3.msra.mxu1 %v135_v17 }
  0x21   :  { %300 = vmatprep.subr.mxu1 %v134_v18 }
  0x22   :  { %301 = vmatpush3.msra.mxu1 %v134_v18 }
  0xc4   :  { %v269_v20 = vpop.f32.mrf.mxu0 }
  0xc5   :  { %v113_v21 = vadd.f32 %v269_v20, %v239_v19 }
  0xc6   :  { %v107_v22 = vpop.f32.mrf.mxu0 }
  0xc7   :  { %v117_v23 = vmul.f32 %v113_v21, %v113_v21  ;;  %v108_v24 = vadd.f32 %v239_v19, %v107_v22 }
  0xc9   :  { %v119_v25 = vmul.f32 %v117_v23, %v113_v21  ;;  %v116_v26 = vmul.f32 %v108_v24, %v108_v24 }
  0xcb   :  { %v121_v27 = vmul.f32 0.044715, %v119_v25  ;;  %v118_v28 = vmul.f32 %v116_v26, %v108_v24 }
  0xcd   :  { %v123_v29 = vadd.f32 %v121_v27, %v113_v21  ;;  %v120_v30 = vmul.f32 0.044715, %v118_v28 }
  0xcf   :  { %v125_v31 = vmul.f32 0.7978846, %v123_v29  ;;  %v122_v32 = vadd.f32 %v120_v30, %v108_v24 }
  0xd1   :  { %305 = vtanh.f32 %v125_v31  ;;  %v124_v33 = vmul.f32 0.7978846, %v122_v32 }
  0xd3   :  { %307 = vtanh.f32 %v124_v33 }
  0xde   :  { %v306_v34 = vpop.eup %305 }
  0xdf   :  { %v129_v35 = vadd.f32 1.0, %v306_v34 }
  0xe0   :  { %v308_v36 = vpop.eup %307 }
  0xe1   :  { %v128_v37 = vadd.f32 1.0, %v308_v36  ;;  %v131_v38 = vmul.f32 0.5, %v129_v35 }
  0xe3   :  { %v130_v39 = vmul.f32 0.5, %v128_v37  ;;  %v133_v41 = vmul.f32 %v131_v38, %v113_v21 }
  0xe5   :  { %v132_v40 = vmul.f32 %v130_v39, %v108_v24 }
  0xe7   :  { %302 = vmatprep.mubr.f32.mxu1 %v132_v40 }
  0xe8   :  { %303 = vmatmul.mubr.f32.vlgmr.msra.gmra.mxu1 %v133_v41 }
 0x1a8   :  { %v304_v43 = vpop.f32.mrf.mxu1 }
 0x1a9   :  { %v229_v44 = vadd.f32 %v304_v43, %v243_v42 }
 0x1aa   :  { %v223_v45 = vpop.f32.mrf.mxu1 }
 0x1ab   :  { %234 = vst.msk [vmem:[%s413_s5 + $0x8] sm:$0xff] %vm232_vm2, %v229_v44  ;;  %v224_v46 = vadd.f32 %v243_v42, %v223_v45 }
 0x1ad   :  { %233 = vst.msk [vmem:[%s413_s5] sm:$0xff] %vm232_vm2, %v224_v46 }

// kernel: forward_reconstruct.13
= control target key start
LH: loop header
LB: loop body
LE: loop exit
PB: predicated region body
PF: predicated region fallthrough
CT: control target
= control target key end

     0   :  { %vm169_vm0 = vcmask 1042432   ;;  %vm72_vm1 = vcmask 23552   ;;  %vm1243_vm2 = vcmask 1041409   ;;  %vm1245_vm3 = vcmask 1042434   ;;  %s6435_s1 = inlined_call_operand.vmem [shape: f32[3,128], index: 1, kind: input, shape index: {}]   ;;  %s6436_s0 = inlined_call_operand.vmem [shape: f32[16,16,3], index: 0, kind: input, shape index: {}]   ;;  %s6437_s3 = inlined_call_operand.vmem [shape: f32[128,256], index: 3, kind: input, shape index: {}]   ;;  %s6438_s2 = inlined_call_operand.vmem [shape: f32[1,128], index: 2, kind: input, shape index: {}]   ;;  %s6439_s5 = inlined_call_operand.vmem [shape: f32[512,512], index: 5, kind: input, shape index: {}]   ;;  %s6440_s4 = inlined_call_operand.vmem [shape: f32[1,256], index: 4, kind: input, shape index: {}]   ;;  %s6441_s7 = inlined_call_operand.vmem [shape: f32[512,64], index: 7, kind: input, shape index: {}]   ;;  %s6442_s6 = inlined_call_operand.vmem [shape: f32[1,512], index: 6, kind: input, shape index: {}]   ;;  %s6443_s8 = inlined_call_operand.vmem [shape: f32[1,64], index: 8, kind: input, shape index: {}]   ;;  %s6444_s9 = inlined_call_operand.vmem [shape: f32[16,64], index: 9, kind: output, shape index: {}]  }
   0x1   :  { %v64_v0 = vld [vmem:[%s6435_s1] sm:$0x7]  ;;  %v33_v2 = vld [vmem:[%s6436_s0 + $0x8] sm:$0xff]  ;;  %v34_v3 = vld [vmem:[%s6436_s0 + $0x10] sm:$0xff]  ;;  %vm1247_vm4 = vcmask 1043459   ;;  %vm1249_vm5 = vcmask 1044484  }
   0x2   :  { %v32_v1 = vld [vmem:[%s6436_s0] sm:$0xff]  ;;  %3592 = vmatprep.subr.msk.mxu0 %vm169_vm0, %v64_v0  ;;  %v35_v4 = vld [vmem:[%s6436_s0 + $0x18] sm:$0xff]  ;;  %v37_v6 = vld [vmem:[%s6436_s0 + $0x28] sm:$0xff]  ;;  %vm1251_vm6 = vcmask 1045509   ;;  %vm1253_vm7 = vcmask 1046534   ;;  %vm1255_vm8 = vcmask 1047559  }
   0x3   :  { %3594 = vmatprep.mubr.msk.f32.mxu0 %vm72_vm1, %v32_v1  ;;  %3593 = vmatpush3.msk.msra.mxu0 %vm169_vm0, %v64_v0  ;;  %v36_v5 = vld [vmem:[%s6436_s0 + $0x20] sm:$0xff]  ;;  %v38_v7 = vld [vmem:[%s6436_s0 + $0x30] sm:$0xff]  ;;  %v461_v8 = vld [vmem:[%s6437_s3 + $0xf8] sm:$0xff]  ;;  %v6445_v1 = vmov 0.0   ;;  %vm3341_vm9 = vcmask 523264  }
   0x4   :  { %3595 = vmatmul.mubr.msk.f32.vlgmr.msra.gmra.mxu0 %vm72_vm1, %v33_v2  ;;  %v460_v9 = vld [vmem:[%s6437_s3 + $0xf0] sm:$0xff]  ;;  %v459_v10 = vld [vmem:[%s6437_s3 + $0xe8] sm:$0xff]  ;;  %v39_v11 = vld [vmem:[%s6436_s0 + $0x38] sm:$0xff]  ;;  %474 = vmatprep.subr.mxu1 %v461_v8 }
   0x5   :  { %3597 = vmatprep.mubr.msk.f32.mxu0 %vm72_vm1, %v34_v3  ;;  %v458_v12 = vld [vmem:[%s6437_s3 + $0xe0] sm:$0xff]  ;;  %475 = vmatpush1.msra.mxu1 %v460_v9  ;;  %v457_v14 = vld [vmem:[%s6437_s3 + $0xd8] sm:$0xff]  ;;  %v456_v15 = vld [vmem:[%s6437_s3 + $0xd0] sm:$0xff] }
   0x6   :  { %v40_v13 = vld [vmem:[%s6436_s0 + $0x40] sm:$0xff]  ;;  %476 = vmatprep.subr.mxu1 %v459_v10  ;;  %v455_v16 = vld [vmem:[%s6437_s3 + $0xc8] sm:$0xff]  ;;  %v42_v19 = vld [vmem:[%s6436_s0 + $0x50] sm:$0xff]  ;;  %538 = vmatprep.mubr.f32.mxu1 %v6445_v1 }
   0x7   :  { %477 = vmatpush1.msra.mxu1 %v458_v12  ;;  %v41_v17 = vld [vmem:[%s6436_s0 + $0x48] sm:$0xff]  ;;  %v454_v18 = vld [vmem:[%s6437_s3 + $0xc0] sm:$0xff]  ;;  %v453_v20 = vld [vmem:[%s6437_s3 + $0xb8] sm:$0xff] }
   0x8   :  { %3598 = vmatmul.mubr.msk.f32.gmra.mxu0 %vm72_vm1, %v35_v4  ;;  %478 = vmatprep.subr.mxu1 %v457_v14  ;;  %v452_v21 = vld [vmem:[%s6437_s3 + $0xb0] sm:$0xff]  ;;  %v451_v22 = vld [vmem:[%s6437_s3 + $0xa8] sm:$0xff]  ;;  %v43_v23 = vld [vmem:[%s6436_s0 + $0x58] sm:$0xff] }
   0x9   :  { %3600 = vmatprep.mubr.msk.f32.mxu0 %vm72_vm1, %v36_v5  ;;  %479 = vmatpush1.msra.mxu1 %v456_v15  ;;  %v450_v24 = vld [vmem:[%s6437_s3 + $0xa0] sm:$0xff]  ;;  %v449_v26 = vld [vmem:[%s6437_s3 + $0x98] sm:$0xff]  ;;  %v448_v27 = vld [vmem:[%s6437_s3 + $0x90] sm:$0xff] }
   0xa   :  { %480 = vmatprep.subr.mxu1 %v455_v16  ;;  %v44_v25 = vld [vmem:[%s6436_s0 + $0x60] sm:$0xff]  ;;  %v447_v28 = vld [vmem:[%s6437_s3 + $0x88] sm:$0xff]  ;;  %v46_v31 = vld [vmem:[%s6436_s0 + $0x70] sm:$0xff] }
   0xb   :  { %481 = vmatpush1.msra.mxu1 %v454_v18  ;;  %v45_v29 = vld [vmem:[%s6436_s0 + $0x68] sm:$0xff]  ;;  %v446_v30 = vld [vmem:[%s6437_s3 + $0x80] sm:$0xff]  ;;  %v445_v32 = vld [vmem:[%s6437_s3 + $0x78] sm:$0xff] }
   0xc   :  { %3601 = vmatmul.mubr.msk.f32.gmra.mxu0 %vm72_vm1, %v37_v6  ;;  %482 = vmatprep.subr.mxu1 %v453_v20  ;;  %v444_v33 = vld [vmem:[%s6437_s3 + $0x70] sm:$0xff]  ;;  %v443_v34 = vld [vmem:[%s6437_s3 + $0x68] sm:$0xff]  ;;  %v47_v35 = vld [vmem:[%s6436_s0 + $0x78] sm:$0xff] }
   0xd   :  { %3603 = vmatprep.mubr.msk.f32.mxu0 %vm72_vm1, %v38_v7  ;;  %483 = vmatpush1.msra.mxu1 %v452_v21  ;;  %v442_v36 = vld [vmem:[%s6437_s3 + $0x60] sm:$0xff]  ;;  %v441_v38 = vld [vmem:[%s6437_s3 + $0x58] sm:$0xff]  ;;  %v440_v39 = vld [vmem:[%s6437_s3 + $0x50] sm:$0xff] }
   0xe   :  { %484 = vmatprep.subr.mxu1 %v451_v22  ;;  %v48_v37 = vld [vmem:[%s6436_s0 + $0x80] sm:$0xff]  ;;  %v439_v40 = vld [vmem:[%s6437_s3 + $0x48] sm:$0xff]  ;;  %v50_v43 = vld [vmem:[%s6436_s0 + $0x90] sm:$0xff] }
   0xf   :  { %485 = vmatpush1.msra.mxu1 %v450_v24  ;;  %v49_v41 = vld [vmem:[%s6436_s0 + $0x88] sm:$0xff]  ;;  %v438_v42 = vld [vmem:[%s6437_s3 + $0x40] sm:$0xff]  ;;  %v437_v44 = vld [vmem:[%s6437_s3 + $0x38] sm:$0xff] }
  0x10   :  { %3604 = vmatmul.mubr.msk.f32.gmra.mxu0 %vm72_vm1, %v39_v11  ;;  %486 = vmatprep.subr.mxu1 %v449_v26  ;;  %v51_v45 = vld [vmem:[%s6436_s0 + $0x98] sm:$0xff]  ;;  %v52_v46 = vld [vmem:[%s6436_s0 + $0xa0] sm:$0xff]  ;;  %v53_v47 = vld [vmem:[%s6436_s0 + $0xa8] sm:$0xff] }
  0x11   :  { %3606 = vmatprep.mubr.msk.f32.mxu0 %vm72_vm1, %v40_v13  ;;  %487 = vmatpush1.msra.mxu1 %v448_v27  ;;  %v54_v48 = vld [vmem:[%s6436_s0 + $0xb0] sm:$0xff]  ;;  %v55_v49 = vld [vmem:[%s6436_s0 + $0xb8] sm:$0xff]  ;;  %v56_v50 = vld [vmem:[%s6436_s0 + $0xc0] sm:$0xff] }
  0x12   :  { %488 = vmatprep.subr.mxu1 %v447_v28  ;;  %v57_v51 = vld [vmem:[%s6436_s0 + $0xc8] sm:$0xff]  ;;  %v58_v52 = vld [vmem:[%s6436_s0 + $0xd0] sm:$0xff]  ;;  %v59_v53 = vld [vmem:[%s6436_s0 + $0xd8] sm:$0xff] }
  0x13   :  { %489 = vmatpush1.msra.mxu1 %v446_v30  ;;  %v60_v54 = vld [vmem:[%s6436_s0 + $0xe0] sm:$0xff]  ;;  %v61_v55 = vld [vmem:[%s6436_s0 + $0xe8] sm:$0xff]  ;;  %v62_v56 = vld [vmem:[%s6436_s0 + $0xf0] sm:$0xff] }
  0x14   :  { %3607 = vmatmul.mubr.msk.f32.gmra.mxu0 %vm72_vm1, %v41_v17  ;;  %490 = vmatprep.subr.mxu1 %v445_v32  ;;  %v63_v57 = vld [vmem:[%s6436_s0 + $0xf8] sm:$0xff]  ;;  %v436_v58 = vld [vmem:[%s6437_s3 + $0x30] sm:$0xff]  ;;  %v435_v59 = vld [vmem:[%s6437_s3 + $0x28] sm:$0xff] }
  0x15   :  { %3609 = vmatprep.mubr.msk.f32.mxu0 %vm72_vm1, %v42_v19  ;;  %491 = vmatpush1.msra.mxu1 %v444_v33  ;;  %v434_v60 = vld [vmem:[%s6437_s3 + $0x20] sm:$0xff]  ;;  %v433_v61 = vld [vmem:[%s6437_s3 + $0x18] sm:$0xff]  ;;  %v432_v62 = vld [vmem:[%s6437_s3 + $0x10] sm:$0xff] }
  0x16   :  { %492 = vmatprep.subr.mxu1 %v443_v34  ;;  %v431_v63 = vld [vmem:[%s6437_s3 + $0x8] sm:$0xff]  ;;  %v430_v0 = vld [vmem:[%s6437_s3] sm:$0xff] }
  0x17   :  { %493 = vmatpush1.msra.mxu1 %v442_v36  ;;  %v3995_v3 = vld [vmem:[%s6438_s2] ss:$0 sm:$0xff]  ;;  %v1144_v7 = vld [vmem:[%s6439_s5 + $0x5e8] sm:$0xff] }
  0x18   :  { %3610 = vmatmul.mubr.msk.f32.gmra.mxu0 %vm72_vm1, %v43_v23  ;;  %494 = vmatprep.subr.mxu1 %v441_v38  ;;  %v1143_v10 = vld [vmem:[%s6439_s5 + $0x5e0] sm:$0xff]  ;;  %v1140_v12 = vld [vmem:[%s6439_s5 + $0x5c8] sm:$0xff] }
  0x19   :  { %3612 = vmatprep.mubr.msk.f32.mxu0 %vm72_vm1, %v44_v25  ;;  %495 = vmatpush1.msra.mxu1 %v440_v39  ;;  %v1139_v13 = vld [vmem:[%s6439_s5 + $0x5c0] sm:$0xff]  ;;  %v1136_v14 = vld [vmem:[%s6439_s5 + $0x5a8] sm:$0xff] }
  0x1a   :  { %496 = vmatprep.subr.mxu1 %v439_v40  ;;  %v1135_v17 = vld [vmem:[%s6439_s5 + $0x5a0] sm:$0xff]  ;;  %v1132_v19 = vld [vmem:[%s6439_s5 + $0x588] sm:$0xff] }
  0x1b   :  { %497 = vmatpush1.msra.mxu1 %v438_v42  ;;  %v1131_v20 = vld [vmem:[%s6439_s5 + $0x580] sm:$0xff]  ;;  %v1128_v21 = vld [vmem:[%s6439_s5 + $0x568] sm:$0xff] }
  0x1c   :  { %3613 = vmatmul.mubr.msk.f32.gmra.mxu0 %vm72_vm1, %v45_v29  ;;  %498 = vmatprep.subr.mxu1 %v437_v44  ;;  %v1127_v24 = vld [vmem:[%s6439_s5 + $0x560] sm:$0xff]  ;;  %v1124_v26 = vld [vmem:[%s6439_s5 + $0x548] sm:$0xff] }
  0x1d   :  { %3615 = vmatprep.mubr.msk.f32.mxu0 %vm72_vm1, %v46_v31  ;;  %499 = vmatpush1.msra.mxu1 %v436_v58  ;;  %v1123_v27 = vld [vmem:[%s6439_s5 + $0x540] sm:$0xff]  ;;  %v1120_v28 = vld [vmem:[%s6439_s5 + $0x528] sm:$0xff] }
  0x1e   :  { %500 = vmatprep.subr.mxu1 %v435_v59  ;;  %v1119_v31 = vld [vmem:[%s6439_s5 + $0x520] sm:$0xff]  ;;  %v1116_v33 = vld [vmem:[%s6439_s5 + $0x508] sm:$0xff] }
  0x1f   :  { %501 = vmatpush1.msra.mxu1 %v434_v60  ;;  %v1115_v34 = vld [vmem:[%s6439_s5 + $0x500] sm:$0xff]  ;;  %v1108_v40 = vld [vmem:[%s6439_s5 + $0x4c8] sm:$0xff] }
  0x20   :  { %3616 = vmatmul.mubr.msk.f32.gmra.mxu0 %vm72_vm1, %v47_v35  ;;  %502 = vmatprep.subr.mxu1 %v433_v61  ;;  %v1112_v35 = vld [vmem:[%s6439_s5 + $0x4e8] sm:$0xff]  ;;  %v1111_v38 = vld [vmem:[%s6439_s5 + $0x4e0] sm:$0xff] }
  0x21   :  { %3618 = vmatprep.mubr.msk.f32.mxu0 %vm72_vm1, %v48_v37  ;;  %503 = vmatpush1.msra.mxu1 %v432_v62  ;;  %v1104_v42 = vld [vmem:[%s6439_s5 + $0x4a8] sm:$0xff]  ;;  %v1087_v59 = vld [vmem:[%s6439_s5 + $0x420] sm:$0xff] }
  0x22   :  { %504 = vmatprep.subr.mxu1 %v431_v63  ;;  %v1084_v61 = vld [vmem:[%s6439_s5 + $0x408] sm:$0xff]  ;;  %v1083_v62 = vld [vmem:[%s6439_s5 + $0x400] sm:$0xff] }
  0x23   :  { %505 = vmatpush1.msra.mxu1 %v430_v0  ;;  %v1208_v63 = vld [vmem:[%s6439_s5 + $0x7e8] sm:$0xff] }
  0x24   :  { %3619 = vmatmul.mubr.msk.f32.gmra.mxu0 %vm72_vm1, %v49_v41  ;;  %1436 = vmatprep.subr.mxu1 %v1144_v7  ;;  %v1107_v41 = vld [vmem:[%s6439_s5 + $0x4c0] sm:$0xff] }
  0x25   :  { %3621 = vmatprep.mubr.msk.f32.mxu0 %vm72_vm1, %v50_v43  ;;  %v1203_v7 = vld [vmem:[%s6439_s5 + $0x7c0] sm:$0xff] }
  0x28   :  { %3622 = vmatmul.mubr.msk.f32.gmra.mxu0 %vm72_vm1, %v51_v45  ;;  %v1103_v45 = vld [vmem:[%s6439_s5 + $0x4a0] sm:$0xff] }
  0x29   :  { %3624 = vmatprep.mubr.msk.f32.mxu0 %vm72_vm1, %v52_v46 }
  0x2c   :  { %3625 = vmatmul.mubr.msk.f32.gmra.mxu0 %vm72_vm1, %v53_v47  ;;  %v1100_v47 = vld [vmem:[%s6439_s5 + $0x488] sm:$0xff] }
  0x2d   :  { %3627 = vmatprep.mubr.msk.f32.mxu0 %vm72_vm1, %v54_v48  ;;  %v1099_v48 = vld [vmem:[%s6439_s5 + $0x480] sm:$0xff] }
  0x30   :  { %3628 = vmatmul.mubr.msk.f32.gmra.mxu0 %vm72_vm1, %v55_v49  ;;  %v1096_v49 = vld [vmem:[%s6439_s5 + $0x468] sm:$0xff] }
  0x31   :  { %3630 = vmatprep.mubr.msk.f32.mxu0 %vm72_vm1, %v56_v50 }
  0x34   :  { %3631 = vmatmul.mubr.msk.f32.gmra.mxu0 %vm72_vm1, %v57_v51 }
  0x35   :  { %3633 = vmatprep.mubr.msk.f32.mxu0 %vm72_vm1, %v58_v52  ;;  %v1095_v52 = vld [vmem:[%s6439_s5 + $0x460] sm:$0xff] }
  0x38   :  { %3634 = vmatmul.mubr.msk.f32.gmra.mxu0 %vm72_vm1, %v59_v53 }
  0x39   :  { %3636 = vmatprep.mubr.msk.f32.mxu0 %vm72_vm1, %v60_v54  ;;  %v1092_v54 = vld [vmem:[%s6439_s5 + $0x448] sm:$0xff] }
  0x3c   :  { %3637 = vmatmul.mubr.msk.f32.gmra.mxu0 %vm72_vm1, %v61_v55  ;;  %v1091_v55 = vld [vmem:[%s6439_s5 + $0x440] sm:$0xff] }
  0x3d   :  { %3639 = vmatprep.mubr.msk.f32.mxu0 %vm72_vm1, %v62_v56  ;;  %v1088_v56 = vld [vmem:[%s6439_s5 + $0x428] sm:$0xff] }
  0x40   :  { %3640 = vmatmul.mubr.msk.f32.gmra.mxu0 %vm72_vm1, %v63_v57 }
  0xc4   :  { %v3596_v2 = vpop.f32.mrf.mxu0 }
  0xc5   :  { %v245_v8 = vadd.f32 %v3596_v2, %v3995_v3 }
  0xc6   :  { %v239_v4 = vpop.f32.mrf.mxu0 }
  0xc7   :  { %v240_v5 = vadd.f32 %v3995_v3, %v239_v4  ;;  %v399_v15 = vmax.f32 %v245_v8, 0.0  ;;  %v1207_v4 = vld [vmem:[%s6439_s5 + $0x7e0] sm:$0xff]  ;;  %v1200_v8 = vld [vmem:[%s6439_s5 + $0x7a8] sm:$0xff] }
  0xc8   :  { %v3599_v6 = vpop.f32.mrf.mxu0 }
  0xc9   :  { %v398_v9 = vmax.f32 %v240_v5, 0.0  ;;  %v255_v22 = vadd.f32 %v3599_v6, %v3995_v3  ;;  %v1204_v6 = vld [vmem:[%s6439_s5 + $0x7c8] sm:$0xff] }
  0xca   :  { %v249_v11 = vpop.f32.mrf.mxu0 }
  0xcb   :  { %539 = vmatmul.mubr.f32.vlgmr.msra.gmra.mxu1 %v398_v9  ;;  %v250_v16 = vadd.f32 %v3995_v3, %v249_v11  ;;  %v401_v29 = vmax.f32 %v255_v22, 0.0  ;;  %v1199_v11 = vld [vmem:[%s6439_s5 + $0x7a0] sm:$0xff]  ;;  %v1184_v22 = vld [vmem:[%s6439_s5 + $0x728] sm:$0xff] }
  0xcc   :  { %544 = vmatprep.mubr.f32.mxu1 %v6445_v1  ;;  %1437 = vmatpush1.msra.mxu1 %v1143_v10  ;;  %v3602_v18 = vpop.f32.mrf.mxu0 }
  0xcd   :  { %1438 = vmatprep.subr.mxu1 %v1140_v12  ;;  %v400_v23 = vmax.f32 %v250_v16, 0.0  ;;  %v265_v36 = vadd.f32 %v3602_v18, %v3995_v3  ;;  %v1191_v18 = vld [vmem:[%s6439_s5 + $0x760] sm:$0xff] }
  0xce   :  { %1439 = vmatpush1.msra.mxu1 %v1139_v13  ;;  %v259_v25 = vpop.f32.mrf.mxu0  ;;  %v1196_v13 = vld [vmem:[%s6439_s5 + $0x788] sm:$0xff] }
  0xcf   :  { %545 = vmatmul.mubr.f32.gmra.mxu1 %v399_v15  ;;  %1440 = vmatprep.subr.mxu1 %v1136_v14  ;;  %v260_v30 = vadd.f32 %v3995_v3, %v259_v25  ;;  %v403_v43 = vmax.f32 %v265_v36, 0.0  ;;  %v1195_v14 = vld [vmem:[%s6439_s5 + $0x780] sm:$0xff]  ;;  %v1192_v15 = vld [vmem:[%s6439_s5 + $0x768] sm:$0xff] }
  0xd0   :  { %550 = vmatprep.mubr.f32.mxu1 %v6445_v1  ;;  %1441 = vmatpush1.msra.mxu1 %v1135_v17  ;;  %v3605_v32 = vpop.f32.mrf.mxu0  ;;  %v1183_v25 = vld [vmem:[%s6439_s5 + $0x720] sm:$0xff]  ;;  %v1168_v36 = vld [vmem:[%s6439_s5 + $0x6a8] sm:$0xff] }
  0xd1   :  { %1442 = vmatprep.subr.mxu1 %v1132_v19  ;;  %v402_v37 = vmax.f32 %v260_v30, 0.0  ;;  %v275_v50 = vadd.f32 %v3605_v32, %v3995_v3  ;;  %v1175_v32 = vld [vmem:[%s6439_s5 + $0x6e0] sm:$0xff] }
  0xd2   :  { %1443 = vmatpush1.msra.mxu1 %v1131_v20  ;;  %v269_v39 = vpop.f32.mrf.mxu0  ;;  %v1188_v20 = vld [vmem:[%s6439_s5 + $0x748] sm:$0xff] }
  0xd3   :  { %551 = vmatmul.mubr.f32.gmra.mxu1 %v400_v23  ;;  %1444 = vmatprep.subr.mxu1 %v1128_v21  ;;  %v270_v44 = vadd.f32 %v3995_v3, %v269_v39  ;;  %v405_v57 = vmax.f32 %v275_v50, 0.0  ;;  %v1187_v21 = vld [vmem:[%s6439_s5 + $0x740] sm:$0xff] }
  0xd4   :  { %556 = vmatprep.mubr.f32.mxu1 %v6445_v1  ;;  %1445 = vmatpush1.msra.mxu1 %v1127_v24  ;;  %v3608_v46 = vpop.f32.mrf.mxu0  ;;  %v1167_v39 = vld [vmem:[%s6439_s5 + $0x6a0] sm:$0xff] }
  0xd5   :  { %1446 = vmatprep.subr.mxu1 %v1124_v26  ;;  %v404_v51 = vmax.f32 %v270_v44, 0.0  ;;  %v285_v0 = vadd.f32 %v3608_v46, %v3995_v3  ;;  %v1159_v46 = vld [vmem:[%s6439_s5 + $0x660] sm:$0xff] }
  0xd6   :  { %1447 = vmatpush1.msra.mxu1 %v1123_v27  ;;  %v279_v53 = vpop.f32.mrf.mxu0  ;;  %v1180_v27 = vld [vmem:[%s6439_s5 + $0x708] sm:$0xff] }
  0xd7   :  { %557 = vmatmul.mubr.f32.gmra.mxu1 %v401_v29  ;;  %1448 = vmatprep.subr.mxu1 %v1120_v28  ;;  %v280_v58 = vadd.f32 %v3995_v3, %v279_v53  ;;  %v407_v9 = vmax.f32 %v285_v0, 0.0  ;;  %v1179_v28 = vld [vmem:[%s6439_s5 + $0x700] sm:$0xff]  ;;  %v1176_v29 = vld [vmem:[%s6439_s5 + $0x6e8] sm:$0xff] }
  0xd8   :  { %562 = vmatprep.mubr.f32.mxu1 %v6445_v1  ;;  %1449 = vmatpush1.msra.mxu1 %v1119_v31  ;;  %v3611_v60 = vpop.f32.mrf.mxu0 }
  0xd9   :  { %1450 = vmatprep.subr.mxu1 %v1116_v33  ;;  %v406_v2 = vmax.f32 %v280_v58, 0.0  ;;  %v295_v16 = vadd.f32 %v3611_v60, %v3995_v3 }
  0xda   :  { %1451 = vmatpush1.msra.mxu1 %v1115_v34  ;;  %v289_v5 = vpop.f32.mrf.mxu0  ;;  %v1172_v34 = vld [vmem:[%s6439_s5 + $0x6c8] sm:$0xff] }
  0xdb   :  { %563 = vmatmul.mubr.f32.gmra.mxu1 %v402_v37  ;;  %1452 = vmatprep.subr.mxu1 %v1112_v35  ;;  %v290_v10 = vadd.f32 %v3995_v3, %v289_v5  ;;  %v409_v23 = vmax.f32 %v295_v16, 0.0  ;;  %v1171_v35 = vld [vmem:[%s6439_s5 + $0x6c0] sm:$0xff] }
  0xdc   :  { %568 = vmatprep.mubr.f32.mxu1 %v6445_v1  ;;  %1453 = vmatpush1.msra.mxu1 %v1111_v38  ;;  %v3614_v12 = vpop.f32.mrf.mxu0  ;;  %v1011_v16 = vld [vmem:[%s6439_s5 + $0x1c0] sm:$0xff] }
  0xdd   :  { %1454 = vmatprep.subr.mxu1 %v1108_v40  ;;  %v408_v17 = vmax.f32 %v290_v10, 0.0  ;;  %v305_v30 = vadd.f32 %v3614_v12, %v3995_v3  ;;  %v1016_v10 = vld [vmem:[%s6439_s5 + $0x1e8] sm:$0xff] }
  0xde   :  { %1455 = vmatpush1.msra.mxu1 %v1107_v41  ;;  %v299_v19 = vpop.f32.mrf.mxu0  ;;  %v1164_v41 = vld [vmem:[%s6439_s5 + $0x688] sm:$0xff]  ;;  %1282 = vmatprep.subr.mxu0 %v1016_v10 }
  0xdf   :  { %569 = vmatmul.mubr.f32.gmra.mxu1 %v403_v43  ;;  %1456 = vmatprep.subr.mxu1 %v1104_v42  ;;  %v300_v24 = vadd.f32 %v3995_v3, %v299_v19  ;;  %v411_v37 = vmax.f32 %v305_v30, 0.0  ;;  %v1163_v42 = vld [vmem:[%s6439_s5 + $0x680] sm:$0xff]  ;;  %v1160_v43 = vld [vmem:[%s6439_s5 + $0x668] sm:$0xff] }
  0xe0   :  { %574 = vmatprep.mubr.f32.mxu1 %v6445_v1  ;;  %1457 = vmatpush1.msra.mxu1 %v1103_v45  ;;  %v3617_v26 = vpop.f32.mrf.mxu0  ;;  %v995_v30 = vld [vmem:[%s6439_s5 + $0x140] sm:$0xff]  ;;  %v1072_v10 = vld [vmem:[%s6439_s5 + $0x3a8] sm:$0xff] }
  0xe1   :  { %1458 = vmatprep.subr.mxu1 %v1100_v47  ;;  %v410_v31 = vmax.f32 %v300_v24, 0.0  ;;  %v315_v44 = vadd.f32 %v3617_v26, %v3995_v3  ;;  %v1000_v24 = vld [vmem:[%s6439_s5 + $0x168] sm:$0xff] }
  0xe2   :  { %1459 = vmatpush1.msra.mxu1 %v1099_v48  ;;  %v309_v33 = vpop.f32.mrf.mxu0 }
  0xe3   :  { %575 = vmatmul.mubr.f32.gmra.mxu1 %v404_v51  ;;  %1460 = vmatprep.subr.mxu1 %v1096_v49  ;;  %v310_v38 = vadd.f32 %v3995_v3, %v309_v33  ;;  %v413_v48 = vmax.f32 %v315_v44, 0.0  ;;  %v979_v44 = vld [vmem:[%s6439_s5 + $0xc0] sm:$0xff] }
  0xe4   :  { %580 = vmatprep.mubr.f32.mxu1 %v6445_v1  ;;  %1461 = vmatpush1.msra.mxu1 %v1095_v52  ;;  %v3620_v40 = vpop.f32.mrf.mxu0 }
  0xe5   :  { %1462 = vmatprep.subr.mxu1 %v1092_v54  ;;  %v412_v45 = vmax.f32 %v310_v38, 0.0  ;;  %v325_v51 = vadd.f32 %v3620_v40, %v3995_v3  ;;  %v1156_v54 = vld [vmem:[%s6439_s5 + $0x648] sm:$0xff] }
  0xe6   :  { %1463 = vmatpush1.msra.mxu1 %v1091_v55  ;;  %v319_v47 = vpop.f32.mrf.mxu0  ;;  %v1155_v55 = vld [vmem:[%s6439_s5 + $0x640] sm:$0xff]  ;;  %v984_v38 = vld [vmem:[%s6439_s5 + $0xe8] sm:$0xff] }
  0xe7   :  { %581 = vmatmul.mubr.f32.gmra.mxu1 %v405_v57  ;;  %1464 = vmatprep.subr.mxu1 %v1088_v56  ;;  %v320_v49 = vadd.f32 %v3995_v3, %v319_v47  ;;  %v1152_v56 = vld [vmem:[%s6439_s5 + $0x628] sm:$0xff]  ;;  %v415_v57 = vmax.f32 %v325_v51, 0.0  ;;  %v971_v51 = vld [vmem:[%s6439_s5 + $0x80] sm:$0xff] }
  0xe8   :  { %586 = vmatprep.mubr.f32.mxu1 %v6445_v1  ;;  %1465 = vmatpush1.msra.mxu1 %v1087_v59  ;;  %v3623_v50 = vpop.f32.mrf.mxu0  ;;  %v1151_v59 = vld [vmem:[%s6439_s5 + $0x620] sm:$0xff] }
  0xe9   :  { %1466 = vmatprep.subr.mxu1 %v1084_v61  ;;  %v414_v52 = vmax.f32 %v320_v49, 0.0  ;;  %v1148_v61 = vld [vmem:[%s6439_s5 + $0x608] sm:$0xff] }
  0xea   :  { %1467 = vmatpush1.msra.mxu1 %v1083_v62  ;;  %v329_v53 = vpop.f32.mrf.mxu0  ;;  %v1147_v62 = vld [vmem:[%s6439_s5 + $0x600] sm:$0xff] }
  0xeb   :  { %587 = vmatmul.mubr.f32.gmra.mxu1 %v406_v2  ;;  %1468 = vmatprep.subr.mxu1 %v1208_v63  ;;  %v330_v58 = vadd.f32 %v3995_v3, %v329_v53  ;;  %v335_v63 = vadd.f32 %v3623_v50, %v3995_v3  ;;  %v972_v50 = vld [vmem:[%s6439_s5 + $0x88] sm:$0xff] }
  0xec   :  { %592 = vmatprep.mubr.f32.mxu1 %v6445_v1  ;;  %1469 = vmatpush2.msra.mxu1 %v1207_v4  ;;  %v3626_v60 = vpop.f32.mrf.mxu0 }
  0xed   :  { %1470 = vmatprep.subr.mxu1 %v1204_v6  ;;  %v416_v0 = vmax.f32 %v330_v58, 0.0  ;;  %v417_v4 = vmax.f32 %v335_v63, 0.0  ;;  %v963_v58 = vld [vmem:[%s6439_s5 + $0x40] sm:$0xff] }
  0xee   :  { %1471 = vmatpush2.msra.mxu1 %v1203_v7  ;;  %v339_v2 = vpop.f32.mrf.mxu0  ;;  %v345_v7 = vadd.f32 %v3626_v60, %v3995_v3 }
  0xef   :  { %593 = vmatmul.mubr.f32.gmra.mxu1 %v407_v9  ;;  %1472 = vmatprep.subr.mxu1 %v1200_v8  ;;  %v340_v5 = vadd.f32 %v3995_v3, %v339_v2  ;;  %v955_v2 = vld [vmem:[%s6439_s5] sm:$0xff] }
  0xf0   :  { %598 = vmatprep.mubr.f32.mxu1 %v6445_v1  ;;  %1473 = vmatpush2.msra.mxu1 %v1199_v11  ;;  %v3629_v6 = vpop.f32.mrf.mxu0  ;;  %v419_v11 = vmax.f32 %v345_v7, 0.0  ;;  %v1079_v7 = vld [vmem:[%s6439_s5 + $0x3e0] sm:$0xff] }
  0xf1   :  { %1474 = vmatprep.subr.mxu1 %v1196_v13  ;;  %v418_v8 = vmax.f32 %v340_v5, 0.0  ;;  %v1015_v13 = vld [vmem:[%s6439_s5 + $0x1e0] sm:$0xff] }
  0xf2   :  { %1475 = vmatpush2.msra.mxu1 %v1195_v14  ;;  %v349_v9 = vpop.f32.mrf.mxu0  ;;  %1283 = vmatpush1.msra.mxu0 %v1015_v13  ;;  %v1071_v13 = vld [vmem:[%s6439_s5 + $0x3a0] sm:$0xff] }
  0xf3   :  { %599 = vmatmul.mubr.f32.gmra.mxu1 %v408_v17  ;;  %1476 = vmatprep.subr.mxu1 %v1192_v15  ;;  %v350_v12 = vadd.f32 %v3995_v3, %v349_v9  ;;  %v1012_v15 = vld [vmem:[%s6439_s5 + $0x1c8] sm:$0xff]  ;;  %v1075_v9 = vld [vmem:[%s6439_s5 + $0x3c0] sm:$0xff] }
  0xf4   :  { %604 = vmatprep.mubr.f32.mxu1 %v6445_v1  ;;  %1477 = vmatpush2.msra.mxu1 %v1191_v18  ;;  %v3632_v14 = vpop.f32.mrf.mxu0  ;;  %v1008_v17 = vld [vmem:[%s6439_s5 + $0x1a8] sm:$0xff]  ;;  %v355_v18 = vadd.f32 %v3629_v6, %v3995_v3 }
  0xf5   :  { %1478 = vmatprep.subr.mxu1 %v1188_v20  ;;  %1284 = vmatprep.subr.mxu0 %v1012_v15  ;;  %v420_v19 = vmax.f32 %v350_v12, 0.0  ;;  %v1007_v20 = vld [vmem:[%s6439_s5 + $0x1a0] sm:$0xff] }
  0xf6   :  { %1479 = vmatpush2.msra.mxu1 %v1187_v21  ;;  %1285 = vmatpush1.msra.mxu0 %v1011_v16  ;;  %v359_v21 = vpop.f32.mrf.mxu0  ;;  %v1067_v15 = vld [vmem:[%s6439_s5 + $0x380] sm:$0xff] }
  0xf7   :  { %605 = vmatmul.mubr.f32.gmra.mxu1 %v409_v23  ;;  %1480 = vmatprep.subr.mxu1 %v1184_v22  ;;  %v1004_v22 = vld [vmem:[%s6439_s5 + $0x188] sm:$0xff]  ;;  %v1003_v23 = vld [vmem:[%s6439_s5 + $0x180] sm:$0xff]  ;;  %v360_v26 = vadd.f32 %v3995_v3, %v359_v21 }
  0xf8   :  { %610 = vmatprep.mubr.f32.mxu1 %v6445_v1  ;;  %1481 = vmatpush2.msra.mxu1 %v1183_v25  ;;  %v421_v25 = vmax.f32 %v355_v18, 0.0  ;;  %v1060_v18 = vld [vmem:[%s6439_s5 + $0x348] sm:$0xff]  ;;  %v1055_v21 = vld [vmem:[%s6439_s5 + $0x320] sm:$0xff] }
  0xf9   :  { %1482 = vmatprep.subr.mxu1 %v1180_v27  ;;  %1286 = vmatprep.subr.mxu0 %v1008_v17  ;;  %v999_v27 = vld [vmem:[%s6439_s5 + $0x160] sm:$0xff]  ;;  %v422_v33 = vmax.f32 %v360_v26, 0.0  ;;  %v1044_v26 = vld [vmem:[%s6439_s5 + $0x2c8] sm:$0xff] }
  0xfa   :  { %1483 = vmatpush2.msra.mxu1 %v1179_v28  ;;  %1287 = vmatpush1.msra.mxu0 %v1007_v20  ;;  %v3635_v28 = vpop.f32.mrf.mxu0  ;;  %v1063_v17 = vld [vmem:[%s6439_s5 + $0x360] sm:$0xff]  ;;  %v1056_v20 = vld [vmem:[%s6439_s5 + $0x328] sm:$0xff] }
  0xfb   :  { %611 = vmatmul.mubr.f32.gmra.mxu1 %v410_v31  ;;  %1484 = vmatprep.subr.mxu1 %v1176_v29  ;;  %v996_v29 = vld [vmem:[%s6439_s5 + $0x148] sm:$0xff] }
  0xfc   :  { %616 = vmatprep.mubr.f32.mxu1 %v6445_v1  ;;  %1485 = vmatpush2.msra.mxu1 %v1175_v32  ;;  %v992_v31 = vld [vmem:[%s6439_s5 + $0x128] sm:$0xff]  ;;  %v365_v32 = vadd.f32 %v3632_v14, %v3995_v3 }
  0xfd   :  { %1486 = vmatprep.subr.mxu1 %v1172_v34  ;;  %1288 = vmatprep.subr.mxu0 %v1004_v22  ;;  %v991_v34 = vld [vmem:[%s6439_s5 + $0x120] sm:$0xff]  ;;  %v1068_v14 = vld [vmem:[%s6439_s5 + $0x388] sm:$0xff] }
  0xfe   :  { %1487 = vmatpush2.msra.mxu1 %v1171_v35  ;;  %1289 = vmatpush1.msra.mxu0 %v1003_v23  ;;  %v369_v35 = vpop.f32.mrf.mxu0  ;;  %v1052_v22 = vld [vmem:[%s6439_s5 + $0x308] sm:$0xff]  ;;  %v1051_v23 = vld [vmem:[%s6439_s5 + $0x300] sm:$0xff] }
  0xff   :  { %617 = vmatmul.mubr.f32.gmra.mxu1 %v411_v37  ;;  %1488 = vmatprep.subr.mxu1 %v1168_v36  ;;  %v988_v36 = vld [vmem:[%s6439_s5 + $0x108] sm:$0xff]  ;;  %v987_v37 = vld [vmem:[%s6439_s5 + $0x100] sm:$0xff]  ;;  %v370_v40 = vadd.f32 %v3995_v3, %v369_v35 }
 0x100   :  { %622 = vmatprep.mubr.f32.mxu1 %v6445_v1  ;;  %1489 = vmatpush2.msra.mxu1 %v1167_v39  ;;  %v423_v39 = vmax.f32 %v365_v32, 0.0  ;;  %v1032_v32 = vld [vmem:[%s6439_s5 + $0x268] sm:$0xff]  ;;  %v1027_v35 = vld [vmem:[%s6439_s5 + $0x240] sm:$0xff] }
 0x101   :  { %1490 = vmatprep.subr.mxu1 %v1164_v41  ;;  %1290 = vmatprep.subr.mxu0 %v1000_v24  ;;  %v983_v41 = vld [vmem:[%s6439_s5 + $0xe0] sm:$0xff]  ;;  %v424_v47 = vmax.f32 %v370_v40, 0.0  ;;  %v1048_v24 = vld [vmem:[%s6439_s5 + $0x2e8] sm:$0xff]  ;;  %v1018_v40 = vld [vmem:[%s6439_s5 + $0x1f8] sm:$0xff] }
 0x102   :  { %1491 = vmatpush2.msra.mxu1 %v1163_v42  ;;  %1291 = vmatpush1.msra.mxu0 %v999_v27  ;;  %v3638_v42 = vpop.f32.mrf.mxu0  ;;  %v1043_v27 = vld [vmem:[%s6439_s5 + $0x2c0] sm:$0xff] }
 0x103   :  { %623 = vmatmul.mubr.f32.gmra.mxu1 %v412_v45  ;;  %1492 = vmatprep.subr.mxu1 %v1160_v43  ;;  %v980_v43 = vld [vmem:[%s6439_s5 + $0xc8] sm:$0xff]  ;;  %v385_v60 = vadd.f32 %v3638_v42, %v3995_v3 }
 0x104   :  { %628 = vmatprep.mubr.f32.mxu1 %v6445_v1  ;;  %1493 = vmatpush2.msra.mxu1 %v1159_v46  ;;  %v976_v45 = vld [vmem:[%s6439_s5 + $0xa8] sm:$0xff]  ;;  %v375_v46 = vadd.f32 %v3635_v28, %v3995_v3  ;;  %v379_v49 = vpop.f32.mrf.mxu0 }
 0x105   :  { %1494 = vmatprep.subr.mxu1 %v1156_v54  ;;  %1292 = vmatprep.subr.mxu0 %v996_v29  ;;  %v380_v54 = vadd.f32 %v3995_v3, %v379_v49  ;;  %v427_v5 = vmax.f32 %v385_v60, 0.0  ;;  %v1040_v28 = vld [vmem:[%s6439_s5 + $0x2a8] sm:$0xff]  ;;  %v1039_v29 = vld [vmem:[%s6439_s5 + $0x2a0] sm:$0xff] }
 0x106   :  { %1495 = vmatpush2.msra.mxu1 %v1155_v55  ;;  %1293 = vmatpush1.msra.mxu0 %v995_v30  ;;  %v425_v53 = vmax.f32 %v375_v46, 0.0  ;;  %v967_v55 = vld [vmem:[%s6439_s5 + $0x60] sm:$0xff]  ;;  %v1036_v30 = vld [vmem:[%s6439_s5 + $0x288] sm:$0xff] }
 0x107   :  { %629 = vmatmul.mubr.f32.gmra.mxu1 %v413_v48  ;;  %1496 = vmatprep.subr.mxu1 %v1152_v56  ;;  %v975_v48 = vld [vmem:[%s6439_s5 + $0xa0] sm:$0xff]  ;;  %v3641_v56 = vpop.f32.mrf.mxu0 }
 0x108   :  { %634 = vmatprep.mubr.f32.mxu1 %v6445_v1  ;;  %1497 = vmatpush2.msra.mxu1 %v1151_v59  ;;  %v960_v59 = vld [vmem:[%s6439_s5 + $0x28] sm:$0xff] }
 0x109   :  { %1498 = vmatprep.subr.mxu1 %v1148_v61  ;;  %1294 = vmatprep.subr.mxu0 %v992_v31  ;;  %v426_v61 = vmax.f32 %v380_v54, 0.0  ;;  %v389_v63 = vpop.f32.mrf.mxu0  ;;  %v1035_v31 = vld [vmem:[%s6439_s5 + $0x280] sm:$0xff] }
 0x10a   :  { %1499 = vmatpush2.msra.mxu1 %v1147_v62  ;;  %1295 = vmatpush1.msra.mxu0 %v991_v34  ;;  %v959_v62 = vld [vmem:[%s6439_s5 + $0x20] sm:$0xff]  ;;  %v390_v6 = vadd.f32 %v3995_v3, %v389_v63  ;;  %v1028_v34 = vld [vmem:[%s6439_s5 + $0x248] sm:$0xff] }
 0x10b   :  { %635 = vmatmul.mubr.f32.gmra.mxu1 %v414_v52  ;;  %2891 = vmatprep.subr.mxu1 %v6445_v1  ;;  %v968_v52 = vld [vmem:[%s6439_s5 + $0x68] sm:$0xff] }
 0x10c   :  { %640 = vmatprep.mubr.f32.mxu1 %v6445_v1  ;;  %1296 = vmatprep.subr.mxu0 %v988_v36  ;;  %v428_v12 = vmax.f32 %v390_v6, 0.0  ;;  %v1024_v36 = vld [vmem:[%s6439_s5 + $0x228] sm:$0xff] }
 0x10d   :  { %1297 = vmatpush1.msra.mxu0 %v987_v37  ;;  %v1023_v37 = vld [vmem:[%s6439_s5 + $0x220] sm:$0xff] }
 0x10e   :  { %1298 = vmatprep.subr.mxu0 %v984_v38  ;;  %v1020_v38 = vld [vmem:[%s6439_s5 + $0x208] sm:$0xff] }
 0x10f   :  { %641 = vmatmul.mubr.f32.gmra.mxu1 %v415_v57  ;;  %1299 = vmatpush1.msra.mxu0 %v983_v41  ;;  %v964_v57 = vld [vmem:[%s6439_s5 + $0x48] sm:$0xff]  ;;  %v464_v41 = vlaneseq }
 0x110   :  { %646 = vmatprep.mubr.f32.mxu1 %v6445_v1  ;;  %1300 = vmatprep.subr.mxu0 %v980_v43 }
 0x111   :  { %1301 = vmatpush1.msra.mxu0 %v979_v44  ;;  %v4448_v42 = vshrl.u32 %v464_v41, 7 }
 0x112   :  { %1302 = vmatprep.subr.mxu0 %v976_v45  ;;  %v462_v45 = vld [vmem:[%s6440_s4] sm:$0x3] }
 0x113   :  { %647 = vmatmul.mubr.f32.gmra.mxu1 %v416_v0  ;;  %1303 = vmatpush1.msra.mxu0 %v975_v48  ;;  %v956_v0 = vld [vmem:[%s6439_s5 + $0x8] sm:$0xff]  ;;  %6511 = vst [vmem:[#allocation2_spill] sm:$0xff] %v4448_v42  ;;  %v4451_v43 = vsub.s32 1, %v4448_v42  ;;  %v4454_v44 = vsub.s32 0, %v4448_v42 }
 0x114   :  { %652 = vmatprep.mubr.f32.mxu1 %v6445_v1  ;;  %1304 = vmatprep.subr.mxu0 %v972_v50 }
 0x115   :  { %1305 = vmatpush1.msra.mxu0 %v971_v51  ;;  %6512 = vst [vmem:[#allocation3_spill] sm:$0xff] %v4451_v43  ;;  %6513 = vst [vmem:[#allocation4_spill] sm:$0xff] %v4454_v44  ;;  %v4460_v46 = vrot.slane %v462_v45, %v4451_v43 }
 0x116   :  { %1306 = vmatprep.subr.mxu0 %v968_v52 }
 0x117   :  { %653 = vmatmul.mubr.f32.gmra.mxu1 %v417_v4  ;;  %1307 = vmatpush1.msra.mxu0 %v967_v55  ;;  %v1080_v4 = vld [vmem:[%s6439_s5 + $0x3e8] sm:$0xff] }
 0x118   :  { %658 = vmatprep.mubr.f32.mxu1 %v6445_v1  ;;  %1308 = vmatprep.subr.mxu0 %v964_v57 }
 0x119   :  { %1309 = vmatpush1.msra.mxu0 %v963_v58 }
 0x11a   :  { %1310 = vmatprep.subr.mxu0 %v960_v59 }
 0x11b   :  { %659 = vmatmul.mubr.f32.gmra.mxu1 %v418_v8  ;;  %1311 = vmatpush1.msra.mxu0 %v959_v62  ;;  %v1076_v8 = vld [vmem:[%s6439_s5 + $0x3c8] sm:$0xff] }
 0x11c   :  { %664 = vmatprep.mubr.f32.mxu1 %v6445_v1  ;;  %1312 = vmatprep.subr.mxu0 %v956_v0 }
 0x11d   :  { %1313 = vmatpush1.msra.mxu0 %v955_v2 }
 0x11e   :  { %1314 = vmatprep.subr.mxu0 %v1080_v4 }
 0x11f   :  { %665 = vmatmul.mubr.f32.gmra.mxu1 %v419_v11  ;;  %1315 = vmatpush2.msra.mxu0 %v1079_v7  ;;  %v395_v11 = vadd.f32 %v3641_v56, %v3995_v3  ;;  %v1064_v3 = vld [vmem:[%s6439_s5 + $0x368] sm:$0xff] }
 0x120   :  { %670 = vmatprep.mubr.f32.mxu1 %v6445_v1  ;;  %1316 = vmatprep.subr.mxu0 %v1076_v8 }
 0x121   :  { %1317 = vmatpush2.msra.mxu0 %v1075_v9  ;;  %v429_v16 = vmax.f32 %v395_v11, 0.0 }
 0x122   :  { %1318 = vmatprep.subr.mxu0 %v1072_v10 }
 0x123   :  { %671 = vmatmul.mubr.f32.gmra.mxu1 %v420_v19  ;;  %1319 = vmatpush2.msra.mxu0 %v1071_v13  ;;  %v1059_v19 = vld [vmem:[%s6439_s5 + $0x340] sm:$0xff] }
 0x124   :  { %676 = vmatprep.mubr.f32.mxu1 %v6445_v1  ;;  %1320 = vmatprep.subr.mxu0 %v1068_v14 }
 0x125   :  { %1321 = vmatpush2.msra.mxu0 %v1067_v15 }
 0x126   :  { %1322 = vmatprep.subr.mxu0 %v1064_v3 }
 0x127   :  { %677 = vmatmul.mubr.f32.gmra.mxu1 %v421_v25  ;;  %1323 = vmatpush2.msra.mxu0 %v1063_v17  ;;  %v1047_v25 = vld [vmem:[%s6439_s5 + $0x2e0] sm:$0xff] }
 0x128   :  { %682 = vmatprep.mubr.f32.mxu1 %v6445_v1  ;;  %1324 = vmatprep.subr.mxu0 %v1060_v18 }
 0x129   :  { %1325 = vmatpush2.msra.mxu0 %v1059_v19 }
 0x12a   :  { %1326 = vmatprep.subr.mxu0 %v1056_v20 }
 0x12b   :  { %683 = vmatmul.mubr.f32.gmra.mxu1 %v422_v33  ;;  %1327 = vmatpush2.msra.mxu0 %v1055_v21  ;;  %v1031_v33 = vld [vmem:[%s6439_s5 + $0x260] sm:$0xff] }
 0x12c   :  { %688 = vmatprep.mubr.f32.mxu1 %v6445_v1  ;;  %1328 = vmatprep.subr.mxu0 %v1052_v22 }
 0x12d   :  { %1329 = vmatpush2.msra.mxu0 %v1051_v23 }
 0x12e   :  { %1330 = vmatprep.subr.mxu0 %v1048_v24 }
 0x12f   :  { %689 = vmatmul.mubr.f32.gmra.mxu1 %v423_v39  ;;  %1331 = vmatpush2.msra.mxu0 %v1047_v25  ;;  %v1019_v39 = vld [vmem:[%s6439_s5 + $0x200] sm:$0xff] }
 0x130   :  { %694 = vmatprep.mubr.f32.mxu1 %v6445_v1  ;;  %1332 = vmatprep.subr.mxu0 %v1044_v26 }
 0x131   :  { %1333 = vmatpush2.msra.mxu0 %v1043_v27 }
 0x132   :  { %1334 = vmatprep.subr.mxu0 %v1040_v28 }
 0x133   :  { %695 = vmatmul.mubr.f32.gmra.mxu1 %v424_v47  ;;  %1335 = vmatpush2.msra.mxu0 %v1039_v29  ;;  %v4463_v47 = vrot.slane %v462_v45, %v4454_v44 }
 0x134   :  { %700 = vmatprep.mubr.f32.mxu1 %v6445_v1  ;;  %1336 = vmatprep.subr.mxu0 %v1036_v30 }
 0x135   :  { %1337 = vmatpush2.msra.mxu0 %v1035_v31 }
 0x136   :  { %1338 = vmatprep.subr.mxu0 %v1032_v32 }
 0x137   :  { %701 = vmatmul.mubr.f32.gmra.mxu1 %v425_v53  ;;  %1339 = vmatpush2.msra.mxu0 %v1031_v33 }
 0x138   :  { %706 = vmatprep.mubr.f32.mxu1 %v6445_v1  ;;  %1340 = vmatprep.subr.mxu0 %v1028_v34 }
 0x139   :  { %1341 = vmatpush2.msra.mxu0 %v1027_v35 }
 0x13a   :  { %1342 = vmatprep.subr.mxu0 %v1024_v36 }
 0x13b   :  { %707 = vmatmul.mubr.f32.gmra.mxu1 %v426_v61  ;;  %1343 = vmatpush2.msra.mxu0 %v1023_v37 }
 0x13c   :  { %712 = vmatprep.mubr.f32.mxu1 %v6445_v1  ;;  %1344 = vmatprep.subr.mxu0 %v1020_v38 }
 0x13d   :  { %1345 = vmatpush2.msra.mxu0 %v1019_v39 }
 0x13e   :  { %1359 = vmatprep.subr.mxu0 %v1018_v40 }
 0x13f   :  { %713 = vmatmul.mubr.f32.gmra.mxu1 %v427_v5 }
 0x140   :  { %718 = vmatprep.mubr.f32.mxu1 %v6445_v1 }
 0x143   :  { %719 = vmatmul.mubr.f32.gmra.mxu1 %v428_v12 }
 0x144   :  { %724 = vmatprep.mubr.f32.mxu1 %v6445_v1 }
 0x147   :  { %725 = vmatmul.mubr.f32.gmra.mxu1 %v429_v16 }
 0x18b   :  { %v540_v48 = vpop.f32.mrf.mxu1 }
 0x18c   :  { %v4469_v51 = vadd.f32 %v540_v48, %v4463_v47 }
 0x18d   :  { %v542_v49 = vpop.f32.mrf.mxu1 }
 0x18e   :  { %v4466_v50 = vadd.f32 %v542_v49, %v4460_v46 }
 0x18f   :  { %v546_v52 = vpop.f32.mrf.mxu1 }
 0x190   :  { %1500 = vmatprep.mubr.f32.mxu1 %v4466_v50  ;;  %v4477_v55 = vadd.f32 %v546_v52, %v4463_v47 }
 0x191   :  { %v548_v53 = vpop.f32.mrf.mxu1  ;;  %1501 = vmatmul.mubr.f32.vlgmr.msra.gmra.mxu1 %v4469_v51 }
 0x192   :  { %v4474_v54 = vadd.f32 %v548_v53, %v4460_v46  ;;  %v731_v3 = vmax.f32 %v4469_v51, %v4477_v55 }
 0x193   :  { %v552_v56 = vpop.f32.mrf.mxu1 }
 0x194   :  { %1506 = vmatprep.mubr.f32.mxu1 %v4474_v54  ;;  %v4485_v59 = vadd.f32 %v552_v56, %v4463_v47  ;;  %v738_v17 = vmax.f32 %v4466_v50, %v4474_v54  ;;  %v732_v21 = vrot.slane %v731_v3, 4 }
 0x195   :  { %v554_v57 = vpop.f32.mrf.mxu1  ;;  %1507 = vmatmul.mubr.f32.gmra.mxu1 %v4477_v55 }
 0x196   :  { %v4482_v58 = vadd.f32 %v554_v57, %v4460_v46  ;;  %v739_v23 = vrot.slane %v738_v17, 4  ;;  %v733_v28 = vmax.f32 %v731_v3, %v732_v21 }
 0x197   :  { %v558_v60 = vpop.f32.mrf.mxu1 }
 0x198   :  { %1512 = vmatprep.mubr.f32.mxu1 %v4482_v58  ;;  %v4493_v63 = vadd.f32 %v558_v60, %v4463_v47  ;;  %v740_v31 = vmax.f32 %v738_v17, %v739_v23  ;;  %v734_v36 = vrot.slane %v733_v28, 2 }
 0x199   :  { %v560_v61 = vpop.f32.mrf.mxu1  ;;  %1513 = vmatmul.mubr.f32.gmra.mxu1 %v4485_v59 }
 0x19a   :  { %v4490_v62 = vadd.f32 %v560_v61, %v4460_v46  ;;  %v745_v25 = vmax.f32 %v4485_v59, %v4493_v63  ;;  %v741_v39 = vrot.slane %v740_v31, 2  ;;  %v735_v53 = vmax.f32 %v733_v28, %v734_v36 }
 0x19b   :  { %v564_v0 = vpop.f32.mrf.mxu1 }
 0x19c   :  { %1518 = vmatprep.mubr.f32.mxu1 %v4490_v62  ;;  %v4501_v6 = vadd.f32 %v564_v0, %v4463_v47  ;;  %v752_v29 = vmax.f32 %v4482_v58, %v4490_v62  ;;  %v746_v33 = vrot.slane %v745_v25, 4  ;;  %v742_v61 = vmax.f32 %v740_v31, %v741_v39 }
 0x19d   :  { %v566_v2 = vpop.f32.mrf.mxu1  ;;  %1519 = vmatmul.mubr.f32.gmra.mxu1 %v4493_v63 }
 0x19e   :  { %v4498_v4 = vadd.f32 %v566_v2, %v4460_v46  ;;  %v753_v37 = vrot.slane %v752_v29, 4  ;;  %v747_v41 = vmax.f32 %v745_v25, %v746_v33  ;;  %v743_v23 = vrot.slane %v742_v61, 1 }
 0x19f   :  { %v570_v5 = vpop.f32.mrf.mxu1 }
 0x1a0   :  { %1524 = vmatprep.mubr.f32.mxu1 %v4498_v4  ;;  %v4509_v10 = vadd.f32 %v570_v5, %v4463_v47  ;;  %v754_v56 = vmax.f32 %v752_v29, %v753_v37 }
 0x1a1   :  { %v572_v7 = vpop.f32.mrf.mxu1  ;;  %1525 = vmatmul.mubr.f32.gmra.mxu1 %v4501_v6 }
 0x1a2   :  { %v4505_v8 = vadd.f32 %v572_v7, %v4460_v46  ;;  %v759_v57 = vmax.f32 %v4501_v6, %v4509_v10  ;;  %v748_v7 = vrot.slane %v747_v41, 2 }
 0x1a3   :  { %v576_v9 = vpop.f32.mrf.mxu1 }
 0x1a4   :  { %1530 = vmatprep.mubr.f32.mxu1 %v4505_v8  ;;  %v4517_v14 = vadd.f32 %v576_v9, %v4463_v47  ;;  %v766_v48 = vmax.f32 %v4498_v4, %v4505_v8  ;;  %v760_v21 = vrot.slane %v759_v57, 4  ;;  %v749_v29 = vmax.f32 %v747_v41, %v748_v7 }
 0x1a5   :  { %v578_v11 = vpop.f32.mrf.mxu1  ;;  %1531 = vmatmul.mubr.f32.gmra.mxu1 %v4509_v10 }
 0x1a6   :  { %v4514_v12 = vadd.f32 %v578_v11, %v4460_v46  ;;  %v767_v11 = vrot.slane %v766_v48, 4  ;;  %v761_v1 = vmax.f32 %v759_v57, %v760_v21 }
 0x1a7   :  { %v582_v13 = vpop.f32.mrf.mxu1 }
 0x1a8   :  { %1536 = vmatprep.mubr.f32.mxu1 %v4514_v12  ;;  %v4529_v19 = vadd.f32 %v582_v13, %v4463_v47 }
 0x1a9   :  { %v584_v15 = vpop.f32.mrf.mxu1  ;;  %1537 = vmatmul.mubr.f32.gmra.mxu1 %v4517_v14 }
 0x1aa   :  { %v4523_v16 = vadd.f32 %v584_v15, %v4460_v46  ;;  %v773_v0 = vmax.f32 %v4517_v14, %v4529_v19 }
 0x1ab   :  { %v588_v18 = vpop.f32.mrf.mxu1 }
 0x1ac   :  { %1542 = vmatprep.mubr.f32.mxu1 %v4523_v16  ;;  %v4539_v26 = vadd.f32 %v588_v18, %v4463_v47  ;;  %v780_v2 = vmax.f32 %v4514_v12, %v4523_v16  ;;  %v736_v18 = vrot.slane %v735_v53, 1 }
 0x1ad   :  { %v590_v20 = vpop.f32.mrf.mxu1  ;;  %1543 = vmatmul.mubr.f32.gmra.mxu1 %v4529_v19 }
 0x1ae   :  { %v4533_v22 = vadd.f32 %v590_v20, %v4460_v46  ;;  %v755_v20 = vrot.slane %v754_v56, 2  ;;  %v781_v25 = vrot.slane %v780_v2, 4 }
 0x1af   :  { %v594_v24 = vpop.f32.mrf.mxu1 }
 0x1b0   :  { %1548 = vmatprep.mubr.f32.mxu1 %v4533_v22  ;;  %v4549_v34 = vadd.f32 %v594_v24, %v4463_v47  ;;  %v774_v24 = vrot.slane %v773_v0, 4 }
 0x1b1   :  { %v596_v27 = vpop.f32.mrf.mxu1  ;;  %1549 = vmatmul.mubr.f32.gmra.mxu1 %v4539_v26 }
 0x1b2   :  { %v4545_v30 = vadd.f32 %v596_v27, %v4460_v46  ;;  %6514 = vst [vmem:[#allocation5_spill] sm:$0xff] %v4549_v34  ;;  %v787_v13 = vmax.f32 %v4539_v26, %v4549_v34  ;;  %v775_v7 = vmax.f32 %v773_v0, %v774_v24 }
 0x1b3   :  { %v600_v32 = vpop.f32.mrf.mxu1 }
 0x1b4   :  { %1554 = vmatprep.mubr.f32.mxu1 %v4545_v30  ;;  %v4557_v45 = vadd.f32 %v600_v32, %v4463_v47  ;;  %v794_v9 = vmax.f32 %v4533_v22, %v4545_v30  ;;  %v788_v36 = vrot.slane %v787_v13, 4 }
 0x1b5   :  { %v602_v35 = vpop.f32.mrf.mxu1  ;;  %1555 = vmatmul.mubr.f32.gmra.mxu1 %v4549_v34 }
 0x1b6   :  { %v4553_v38 = vadd.f32 %v602_v35, %v4460_v46  ;;  %6516 = vst [vmem:[#allocation7_spill] sm:$0xff] %v4557_v45  ;;  %v795_v31 = vrot.slane %v794_v9, 4  ;;  %v768_v35 = vmax.f32 %v766_v48, %v767_v11  ;;  %v782_v48 = vmax.f32 %v780_v2, %v781_v25 }
 0x1b7   :  { %v606_v40 = vpop.f32.mrf.mxu1 }
 0x1b8   :  { %6515 = vst [vmem:[#allocation6_spill] sm:$0xff] %v4553_v38  ;;  %1560 = vmatprep.mubr.f32.mxu1 %v4553_v38  ;;  %v4563_v49 = vadd.f32 %v606_v40, %v4463_v47  ;;  %v796_v44 = vmax.f32 %v794_v9, %v795_v31  ;;  %v769_v57 = vrot.slane %v768_v35, 2  ;;  %v783_v2 = vrot.slane %v782_v48, 2 }
 0x1b9   :  { %v608_v52 = vpop.f32.mrf.mxu1  ;;  %1561 = vmatmul.mubr.f32.gmra.mxu1 %v4557_v45 }
 0x1ba   :  { %6517 = vst [vmem:[#allocation8_spill] sm:$0xff] %v4563_v49  ;;  %v4568_v60 = vadd.f32 %v608_v52, %v4460_v46  ;;  %v801_v15 = vmax.f32 %v4557_v45, %v4563_v49  ;;  %v756_v52 = vmax.f32 %v754_v56, %v755_v20  ;;  %v789_v20 = vmax.f32 %v787_v13, %v788_v36 }
 0x1bb   :  { %v612_v5 = vpop.f32.mrf.mxu1  ;;  %v797_v25 = vrot.slane %v796_v44, 2 }
 0x1bc   :  { %6518 = vst [vmem:[#allocation9_spill] sm:$0xff] %v4568_v60  ;;  %1566 = vmatprep.mubr.f32.mxu1 %v4568_v60  ;;  %v808_v3 = vmax.f32 %v4553_v38, %v4568_v60  ;;  %v4589_v32 = vadd.f32 %v612_v5, %v4463_v47  ;;  %v802_v37 = vrot.slane %v801_v15, 4  ;;  %v4601_v5 = vmax.f32 %v735_v53, %v736_v18 }
 0x1bd   :  { %v614_v17 = vpop.f32.mrf.mxu1  ;;  %1567 = vmatmul.mubr.f32.gmra.mxu1 %v4563_v49  ;;  %v757_v53 = vrot.slane %v756_v52, 1  ;;  %v762_v18 = vrot.slane %v761_v1, 2  ;;  %v790_v36 = vrot.slane %v789_v20, 2 }
 0x1be   :  { %v4586_v27 = vadd.f32 %v614_v17, %v4460_v46  ;;  %6520 = vst [vmem:[#allocation11_spill] sm:$0xff] %v4589_v32  ;;  %v809_v39 = vrot.slane %v808_v3, 4  ;;  %v803_v21 = vmax.f32 %v801_v15, %v802_v37 }
 0x1bf   :  { %v618_v28 = vpop.f32.mrf.mxu1  ;;  %v791_v60 = vmax.f32 %v789_v20, %v790_v36 }
 0x1c0   :  { %6519 = vst [vmem:[#allocation10_spill] sm:$0xff] %v4586_v27  ;;  %v4592_v33 = vadd.f32 %v618_v28, %v4463_v47  ;;  %1572 = vmatprep.mubr.f32.mxu1 %v4586_v27  ;;  %v4603_v28 = vmax.f32 %v742_v61, %v743_v23  ;;  %v776_v61 = vrot.slane %v775_v7, 2  ;;  %v804_v37 = vrot.slane %v803_v21, 2 }
 0x1c1   :  { %v620_v40 = vpop.f32.mrf.mxu1  ;;  %1573 = vmatmul.mubr.f32.gmra.mxu1 %v4589_v32 }
 0x1c2   :  { %6521 = vst [vmem:[#allocation12_spill] sm:$0xff] %v4592_v33  ;;  %v815_v17 = vmax.f32 %v4589_v32, %v4592_v33  ;;  %v4598_v41 = vadd.f32 %v620_v40, %v4460_v46  ;;  %v810_v40 = vmax.f32 %v808_v3, %v809_v39  ;;  %v750_v32 = vrot.slane %v749_v29, 1 }
 0x1c3   :  { %v624_v11 = vpop.f32.mrf.mxu1  ;;  %v770_v3 = vmax.f32 %v768_v35, %v769_v57 }
 0x1c4   :  { %6522 = vst [vmem:[#allocation13_spill] sm:$0xff] %v4598_v41  ;;  %v816_v43 = vrot.slane %v815_v17, 4  ;;  %v822_v56 = vmax.f32 %v4586_v27, %v4598_v41  ;;  %1578 = vmatprep.mubr.f32.mxu1 %v4598_v41  ;;  %v4613_v13 = vadd.f32 %v624_v11, %v4463_v47  ;;  %v811_v39 = vrot.slane %v810_v40, 2 }
 0x1c5   :  { %v626_v42 = vpop.f32.mrf.mxu1  ;;  %1579 = vmatmul.mubr.f32.gmra.mxu1 %v4592_v33  ;;  %v763_v11 = vmax.f32 %v761_v1, %v762_v18  ;;  %v758_v41 = vmax.f32 %v756_v52, %v757_v53  ;;  %v798_v27 = vmax.f32 %v796_v44, %v797_v25 }
 0x1c6   :  { %v823_v0 = vrot.slane %v822_v56, 4  ;;  %v817_v9 = vmax.f32 %v815_v17, %v816_v43  ;;  %v4610_v23 = vadd.f32 %v626_v42, %v4460_v46  ;;  %6524 = vst [vmem:[#allocation15_spill] sm:$0xff] %v4613_v13  ;;  %v751_v17 = vmax.f32 %v749_v29, %v750_v32 }
 0x1c7   :  { %v630_v24 = vpop.f32.mrf.mxu1  ;;  %v771_v32 = vrot.slane %v770_v3, 1  ;;  %v812_v45 = vmax.f32 %v810_v40, %v811_v39  ;;  %v764_v44 = vrot.slane %v763_v11, 1  ;;  %v799_v20 = vrot.slane %v798_v27, 1 }
 0x1c8   :  { %6523 = vst [vmem:[#allocation14_spill] sm:$0xff] %v4610_v23  ;;  %v824_v31 = vmax.f32 %v822_v56, %v823_v0  ;;  %v4616_v15 = vadd.f32 %v630_v24, %v4463_v47  ;;  %1584 = vmatprep.mubr.f32.mxu1 %v4610_v23  ;;  %v777_v0 = vmax.f32 %v775_v7, %v776_v61  ;;  %v818_v35 = vrot.slane %v817_v9, 2 }
 0x1c9   :  { %v632_v43 = vpop.f32.mrf.mxu1  ;;  %1585 = vmatmul.mubr.f32.gmra.mxu1 %v4613_v13  ;;  %v784_v24 = vmax.f32 %v782_v48, %v783_v2  ;;  %v1257_v34 = vsel %vm1243_vm2, %v758_v41, %v4603_v28 }
 0x1ca   :  { %6525 = vst [vmem:[#allocation16_spill] sm:$0xff] %v4616_v15  ;;  %v825_v42 = vrot.slane %v824_v31, 2  ;;  %v829_v33 = vmax.f32 %v4613_v13, %v4616_v15  ;;  %v4622_v56 = vadd.f32 %v632_v43, %v4460_v46  ;;  %v805_v43 = vmax.f32 %v803_v21, %v804_v37 }
 0x1cb   :  { %v636_v57 = vpop.f32.mrf.mxu1  ;;  %v778_v52 = vrot.slane %v777_v0, 1  ;;  %v785_v53 = vrot.slane %v784_v24, 1  ;;  %v819_v61 = vmax.f32 %v817_v9, %v818_v35  ;;  %v1244_v35 = vsel %vm1243_vm2, %v751_v17, %v4601_v5 }
 0x1cc   :  { %6526 = vst [vmem:[#allocation17_spill] sm:$0xff] %v4622_v56  ;;  %v830_v49 = vrot.slane %v829_v33, 4  ;;  %v836_v29 = vmax.f32 %v4610_v23, %v4622_v56  ;;  %1590 = vmatprep.mubr.f32.mxu1 %v4622_v56  ;;  %v826_v1 = vmax.f32 %v824_v31, %v825_v42  ;;  %v4633_v25 = vadd.f32 %v636_v57, %v4463_v47 }
 0x1cd   :  { %v638_v38 = vpop.f32.mrf.mxu1  ;;  %1591 = vmatmul.mubr.f32.gmra.mxu1 %v4616_v15  ;;  %v813_v31 = vrot.slane %v812_v45, 1  ;;  %v765_v57 = vmax.f32 %v763_v11, %v764_v44 }
 0x1ce   :  { %v831_v7 = vmax.f32 %v829_v33, %v830_v49  ;;  %v837_v48 = vrot.slane %v836_v29, 4  ;;  %v4629_v18 = vadd.f32 %v638_v38, %v4460_v46  ;;  %v772_v38 = vmax.f32 %v770_v3, %v771_v32 }
 0x1cf   :  { %v642_v2 = vpop.f32.mrf.mxu1  ;;  %v792_v49 = vrot.slane %v791_v60, 1  ;;  %v806_v33 = vrot.slane %v805_v43, 1  ;;  %v827_v9 = vrot.slane %v826_v1, 1  ;;  %v779_v3 = vmax.f32 %v777_v0, %v778_v52 }
 0x1d0   :  { %v832_v21 = vrot.slane %v831_v7, 2  ;;  %v838_v40 = vmax.f32 %v836_v29, %v837_v48  ;;  %1596 = vmatprep.mubr.f32.mxu1 %v4629_v18  ;;  %v786_v29 = vmax.f32 %v784_v24, %v785_v53  ;;  %v820_v48 = vrot.slane %v819_v61, 1 }
 0x1d1   :  { %v644_v36 = vpop.f32.mrf.mxu1  ;;  %1597 = vmatmul.mubr.f32.gmra.mxu1 %v4633_v25  ;;  %v800_v32 = vmax.f32 %v798_v27, %v799_v20  ;;  %v4643_v13 = vadd.f32 %v642_v2, %v4463_v47  ;;  %v807_v5 = vmax.f32 %v805_v43, %v806_v33  ;;  %v828_v27 = vmax.f32 %v826_v1, %v827_v9  ;;  %v1013_v9 = vld [vmem:[%s6439_s5 + $0x1d0] sm:$0xff] }
 0x1d2   :  { %v833_v37 = vmax.f32 %v831_v7, %v832_v21  ;;  %v4637_v39 = vadd.f32 %v644_v36, %v4460_v46  ;;  %v839_v42 = vrot.slane %v838_v40, 2  ;;  %v793_v7 = vmax.f32 %v791_v60, %v792_v49 }
 0x1d3   :  { %v648_v15 = vpop.f32.mrf.mxu1  ;;  %v814_v36 = vmax.f32 %v812_v45, %v813_v31  ;;  %v1258_v11 = vsel %vm1245_vm3, %v772_v38, %v1257_v34  ;;  %v1246_v0 = vsel %vm1245_vm3, %v765_v57, %v1244_v35  ;;  %v821_v24 = vmax.f32 %v819_v61, %v820_v48  ;;  %v1017_v38 = vld [vmem:[%s6439_s5 + $0x1f0] sm:$0xff]  ;;  %v1014_v31 = vld [vmem:[%s6439_s5 + $0x1d8] sm:$0xff] }
 0x1d4   :  { %v834_v56 = vrot.slane %v833_v37, 1  ;;  %1602 = vmatprep.mubr.f32.mxu1 %v4637_v39  ;;  %v840_v23 = vmax.f32 %v838_v40, %v839_v42  ;;  %v1259_v45 = vsel %vm1247_vm4, %v786_v29, %v1258_v11  ;;  %v4656_v52 = vadd.f32 %v648_v15, %v4463_v47  ;;  %v1010_v42 = vld [vmem:[%s6439_s5 + $0x1b8] sm:$0xff]  ;;  %v1009_v29 = vld [vmem:[%s6439_s5 + $0x1b0] sm:$0xff] }
 0x1d5   :  { %v650_v21 = vpop.f32.mrf.mxu1  ;;  %1603 = vmatmul.mubr.f32.gmra.mxu1 %v4643_v13  ;;  %v1260_v41 = vsel %vm1249_vm5, %v800_v32, %v1259_v45  ;;  %v1248_v43 = vsel %vm1247_vm4, %v779_v3, %v1246_v0  ;;  %v1006_v3 = vld [vmem:[%s6439_s5 + $0x198] sm:$0xff] }
 0x1d6   :  { %v4649_v17 = vadd.f32 %v650_v21, %v4460_v46  ;;  %v841_v60 = vrot.slane %v840_v23, 1  ;;  %6528 = vst [vmem:[#allocation19_spill] sm:$0xff] %v4656_v52  ;;  %v835_v28 = vmax.f32 %v833_v37, %v834_v56  ;;  %v1261_v34 = vsel %vm1251_vm6, %v814_v36, %v1260_v41  ;;  %v1002_v36 = vld [vmem:[%s6439_s5 + $0x178] sm:$0xff] }
 0x1d7   :  { %v654_v44 = vpop.f32.mrf.mxu1  ;;  %v1250_v61 = vsel %vm1249_vm5, %v793_v7, %v1248_v43  ;;  %v1262_v15 = vsel %vm1253_vm7, %v828_v27, %v1261_v34  ;;  %v1005_v7 = vld [vmem:[%s6439_s5 + $0x190] sm:$0xff]  ;;  %v998_v0 = vld [vmem:[%s6439_s5 + $0x158] sm:$0xff] }
 0x1d8   :  { %6527 = vst [vmem:[#allocation18_spill] sm:$0xff] %v4649_v17  ;;  %1608 = vmatprep.mubr.f32.mxu1 %v4649_v17  ;;  %v842_v53 = vmax.f32 %v840_v23, %v841_v60  ;;  %v1252_v20 = vsel %vm1251_vm6, %v807_v5, %v1250_v61  ;;  %v4677_v49 = vadd.f32 %v654_v44, %v4463_v47  ;;  %v1001_v27 = vld [vmem:[%s6439_s5 + $0x170] sm:$0xff]  ;;  %v994_v60 = vld [vmem:[%s6439_s5 + $0x138] sm:$0xff] }
 0x1d9   :  { %v656_v1 = vpop.f32.mrf.mxu1  ;;  %1609 = vmatmul.mubr.f32.gmra.mxu1 %v4656_v52  ;;  %v1254_v23 = vsel %vm1253_vm7, %v821_v24, %v1252_v20  ;;  %v997_v44 = vld [vmem:[%s6439_s5 + $0x150] sm:$0xff] }
 0x1da   :  { %v4664_v2 = vadd.f32 %v656_v1, %v4460_v46  ;;  %v4670_v56 = vsel %vm1255_vm8, %v842_v53, %v1262_v15  ;;  %6530 = vst [vmem:[#allocation21_spill] sm:$0xff] %v4677_v49  ;;  %v4681_v33 = vsel %vm1255_vm8, %v835_v28, %v1254_v23  ;;  %v993_v28 = vld [vmem:[%s6439_s5 + $0x130] sm:$0xff]  ;;  %v990_v1 = vld [vmem:[%s6439_s5 + $0x118] sm:$0xff]  ;;  %v850_v23 = vmax.f32 %v4629_v18, %v4637_v39 }
 0x1db   :  { %v660_v40 = vpop.f32.mrf.mxu1  ;;  %1346 = vmatprep.mubr.f32.mxu0 %v4670_v56  ;;  %v989_v34 = vld [vmem:[%s6439_s5 + $0x110] sm:$0xff]  ;;  %v986_v15 = vld [vmem:[%s6439_s5 + $0xf8] sm:$0xff] }
 0x1dc   :  { %6529 = vst [vmem:[#allocation20_spill] sm:$0xff] %v4664_v2  ;;  %1614 = vmatprep.mubr.f32.mxu1 %v4664_v2  ;;  %1347 = vmatmul.mubr.f32.vlgmr.msra.gmra.mxu0 %v4681_v33  ;;  %v4702_v48 = vadd.f32 %v660_v40, %v4463_v47  ;;  %v985_v40 = vld [vmem:[%s6439_s5 + $0xf0] sm:$0xff] }
 0x1dd   :  { %v662_v37 = vpop.f32.mrf.mxu1  ;;  %1615 = vmatmul.mubr.f32.gmra.mxu1 %v4677_v49  ;;  %1360 = vmatpush1.msra.mxu0 %v1017_v38 }
 0x1de   :  { %v4696_v35 = vadd.f32 %v662_v37, %v4460_v46  ;;  %1361 = vmatprep.subr.mxu0 %v1014_v31  ;;  %6532 = vst [vmem:[#allocation23_spill] sm:$0xff] %v4702_v48  ;;  %v982_v31 = vld [vmem:[%s6439_s5 + $0xd8] sm:$0xff] }
 0x1df   :  { %v666_v57 = vpop.f32.mrf.mxu1  ;;  %1362 = vmatpush1.msra.mxu0 %v1013_v9  ;;  %v981_v9 = vld [vmem:[%s6439_s5 + $0xd0] sm:$0xff] }
 0x1e0   :  { %6531 = vst [vmem:[#allocation22_spill] sm:$0xff] %v4696_v35  ;;  %1620 = vmatprep.mubr.f32.mxu1 %v4696_v35  ;;  %1363 = vmatprep.subr.mxu0 %v1010_v42  ;;  %v4722_v11 = vadd.f32 %v666_v57, %v4463_v47  ;;  %v843_v42 = vmax.f32 %v4633_v25, %v4643_v13  ;;  %v978_v57 = vld [vmem:[%s6439_s5 + $0xb8] sm:$0xff] }
 0x1e1   :  { %v668_v32 = vpop.f32.mrf.mxu1  ;;  %1621 = vmatmul.mubr.f32.gmra.mxu1 %v4702_v48  ;;  %1364 = vmatpush1.msra.mxu0 %v1009_v29 }
 0x1e2   :  { %v4712_v21 = vadd.f32 %v668_v32, %v4460_v46  ;;  %1365 = vmatprep.subr.mxu0 %v1006_v3  ;;  %6534 = vst [vmem:[#allocation25_spill] sm:$0xff] %v4722_v11  ;;  %v977_v32 = vld [vmem:[%s6439_s5 + $0xb0] sm:$0xff] }
 0x1e3   :  { %v672_v5 = vpop.f32.mrf.mxu1  ;;  %1366 = vmatpush1.msra.mxu0 %v1005_v7  ;;  %v851_v7 = vrot.slane %v850_v23, 4 }
 0x1e4   :  { %6533 = vst [vmem:[#allocation24_spill] sm:$0xff] %v4712_v21  ;;  %1626 = vmatprep.mubr.f32.mxu1 %v4712_v21  ;;  %1367 = vmatprep.subr.mxu0 %v1002_v36  ;;  %v4742_v43 = vadd.f32 %v672_v5, %v4463_v47  ;;  %v974_v5 = vld [vmem:[%s6439_s5 + $0x98] sm:$0xff] }
 0x1e5   :  { %v674_v24 = vpop.f32.mrf.mxu1  ;;  %1627 = vmatmul.mubr.f32.gmra.mxu1 %v4722_v11  ;;  %1368 = vmatpush1.msra.mxu0 %v1001_v27 }
 0x1e6   :  { %v4736_v45 = vadd.f32 %v674_v24, %v4460_v46  ;;  %1369 = vmatprep.subr.mxu0 %v998_v0  ;;  %6536 = vst [vmem:[#allocation27_spill] sm:$0xff] %v4742_v43  ;;  %v973_v0 = vld [vmem:[%s6439_s5 + $0x90] sm:$0xff]  ;;  %v844_v24 = vrot.slane %v843_v42, 4 }
 0x1e7   :  { %v678_v41 = vpop.f32.mrf.mxu1  ;;  %1370 = vmatpush1.msra.mxu0 %v997_v44 }
 0x1e8   :  { %6535 = vst [vmem:[#allocation26_spill] sm:$0xff] %v4736_v45  ;;  %1632 = vmatprep.mubr.f32.mxu1 %v4736_v45  ;;  %1371 = vmatprep.subr.mxu0 %v994_v60  ;;  %v4764_v38 = vadd.f32 %v678_v41, %v4463_v47  ;;  %v970_v60 = vld [vmem:[%s6439_s5 + $0x78] sm:$0xff] }
 0x1e9   :  { %v680_v53 = vpop.f32.mrf.mxu1  ;;  %1633 = vmatmul.mubr.f32.gmra.mxu1 %v4742_v43  ;;  %1372 = vmatpush1.msra.mxu0 %v993_v28  ;;  %v969_v28 = vld [vmem:[%s6439_s5 + $0x70] sm:$0xff] }
 0x1ea   :  { %v4752_v61 = vadd.f32 %v680_v53, %v4460_v46  ;;  %1373 = vmatprep.subr.mxu0 %v990_v1  ;;  %6538 = vst [vmem:[#allocation29_spill] sm:$0xff] %v4764_v38  ;;  %v852_v1 = vmax.f32 %v850_v23, %v851_v7  ;;  %v857_v23 = vmax.f32 %v4656_v52, %v4677_v49 }
 0x1eb   :  { %v684_v20 = vpop.f32.mrf.mxu1  ;;  %1374 = vmatpush1.msra.mxu0 %v989_v34  ;;  %v966_v34 = vld [vmem:[%s6439_s5 + $0x58] sm:$0xff] }
 0x1ec   :  { %6537 = vst [vmem:[#allocation28_spill] sm:$0xff] %v4752_v61  ;;  %1638 = vmatprep.mubr.f32.mxu1 %v4752_v61  ;;  %1375 = vmatprep.subr.mxu0 %v986_v15  ;;  %v4786_v36 = vadd.f32 %v684_v20, %v4463_v47  ;;  %v965_v20 = vld [vmem:[%s6439_s5 + $0x50] sm:$0xff] }
 0x1ed   :  { %v686_v37 = vpop.f32.mrf.mxu1  ;;  %1639 = vmatmul.mubr.f32.gmra.mxu1 %v4764_v38  ;;  %1376 = vmatpush1.msra.mxu0 %v985_v40  ;;  %v845_v40 = vmax.f32 %v843_v42, %v844_v24  ;;  %v961_v42 = vld [vmem:[%s6439_s5 + $0x30] sm:$0xff] }
 0x1ee   :  { %v4780_v29 = vadd.f32 %v686_v37, %v4460_v46  ;;  %1377 = vmatprep.subr.mxu0 %v982_v31  ;;  %6540 = vst [vmem:[#allocation31_spill] sm:$0xff] %v4786_v36  ;;  %v864_v31 = vmax.f32 %v4649_v17, %v4664_v2  ;;  %v962_v37 = vld [vmem:[%s6439_s5 + $0x38] sm:$0xff] }
 0x1ef   :  { %v690_v3 = vpop.f32.mrf.mxu1  ;;  %1378 = vmatpush1.msra.mxu0 %v981_v9 }
 0x1f0   :  { %6539 = vst [vmem:[#allocation30_spill] sm:$0xff] %v4780_v29  ;;  %1644 = vmatprep.mubr.f32.mxu1 %v4780_v29  ;;  %1379 = vmatprep.subr.mxu0 %v978_v57  ;;  %v4806_v53 = vadd.f32 %v690_v3, %v4463_v47  ;;  %v853_v3 = vrot.slane %v852_v1, 2 }
 0x1f1   :  { %v692_v27 = vpop.f32.mrf.mxu1  ;;  %1645 = vmatmul.mubr.f32.gmra.mxu1 %v4786_v36  ;;  %1380 = vmatpush1.msra.mxu0 %v977_v32  ;;  %v871_v32 = vmax.f32 %v4702_v48, %v4722_v11 }
 0x1f2   :  { %v4796_v44 = vadd.f32 %v692_v27, %v4460_v46  ;;  %1381 = vmatprep.subr.mxu0 %v974_v5  ;;  %6542 = vst [vmem:[#allocation33_spill] sm:$0xff] %v4806_v53  ;;  %v958_v5 = vld [vmem:[%s6439_s5 + $0x18] sm:$0xff]  ;;  %v878_v27 = vmax.f32 %v4696_v35, %v4712_v21 }
 0x1f3   :  { %v696_v41 = vpop.f32.mrf.mxu1  ;;  %1382 = vmatpush1.msra.mxu0 %v973_v0  ;;  %v892_v0 = vmax.f32 %v4736_v45, %v4752_v61  ;;  %v899_v61 = vmax.f32 %v4786_v36, %v4806_v53  ;;  %v872_v36 = vrot.slane %v871_v32, 4 }
 0x1f4   :  { %6541 = vst [vmem:[#allocation32_spill] sm:$0xff] %v4796_v44  ;;  %1650 = vmatprep.mubr.f32.mxu1 %v4796_v44  ;;  %1383 = vmatprep.subr.mxu0 %v970_v60  ;;  %v4832_v7 = vadd.f32 %v696_v41, %v4463_v47  ;;  %v957_v41 = vld [vmem:[%s6439_s5 + $0x10] sm:$0xff]  ;;  %v906_v45 = vmax.f32 %v4780_v29, %v4796_v44 }
 0x1f5   :  { %v698_v15 = vpop.f32.mrf.mxu1  ;;  %1651 = vmatmul.mubr.f32.gmra.mxu1 %v4806_v53  ;;  %1384 = vmatpush1.msra.mxu0 %v969_v28  ;;  %v846_v28 = vrot.slane %v845_v40, 2  ;;  %v1078_v53 = vld [vmem:[%s6439_s5 + $0x3d8] sm:$0xff]  ;;  %v893_v44 = vrot.slane %v892_v0, 4  ;;  %v900_v48 = vrot.slane %v899_v61, 4 }
 0x1f6   :  { %v4824_v9 = vadd.f32 %v698_v15, %v4460_v46  ;;  %1385 = vmatprep.subr.mxu0 %v966_v34  ;;  %6544 = vst [vmem:[#allocation35_spill] sm:$0xff] %v4832_v7  ;;  %v858_v34 = vrot.slane %v857_v23, 4  ;;  %v865_v15 = vrot.slane %v864_v31, 4 }
 0x1f7   :  { %v702_v57 = vpop.f32.mrf.mxu1  ;;  %1386 = vmatpush1.msra.mxu0 %v965_v20 }
 0x1f8   :  { %6543 = vst [vmem:[#allocation34_spill] sm:$0xff] %v4824_v9  ;;  %v4842_v24 = vadd.f32 %v702_v57, %v4463_v47  ;;  %1656 = vmatprep.mubr.f32.mxu1 %v4824_v9  ;;  %1387 = vmatprep.subr.mxu0 %v962_v37  ;;  %v1082_v57 = vld [vmem:[%s6439_s5 + $0x3f8] sm:$0xff]  ;;  %v885_v37 = vmax.f32 %v4742_v43, %v4764_v38  ;;  %v879_v38 = vrot.slane %v878_v27, 4 }
 0x1f9   :  { %v704_v60 = vpop.f32.mrf.mxu1  ;;  %1657 = vmatmul.mubr.f32.gmra.mxu1 %v4832_v7  ;;  %1388 = vmatpush1.msra.mxu0 %v961_v42  ;;  %v854_v42 = vmax.f32 %v852_v1, %v853_v3  ;;  %v1077_v1 = vld [vmem:[%s6439_s5 + $0x3d0] sm:$0xff]  ;;  %v4875_v3 = vmax.f32 %v845_v40, %v846_v28 }
 0x1fa   :  { %6545 = vst [vmem:[#allocation36_spill] sm:$0xff] %v4842_v24  ;;  %v4849_v20 = vadd.f32 %v704_v60, %v4460_v46  ;;  %1389 = vmatprep.subr.mxu0 %v958_v5  ;;  %v1081_v60 = vld [vmem:[%s6439_s5 + $0x3f0] sm:$0xff]  ;;  %v913_v5 = vmax.f32 %v4832_v7, %v4842_v24  ;;  %v886_v43 = vrot.slane %v885_v37, 4  ;;  %v907_v7 = vrot.slane %v906_v45, 4 }
 0x1fb   :  { %v708_v11 = vpop.f32.mrf.mxu1  ;;  %1390 = vmatpush1.msra.mxu0 %v957_v41  ;;  %v866_v41 = vmax.f32 %v864_v31, %v865_v15  ;;  %v1073_v40 = vld [vmem:[%s6439_s5 + $0x3b0] sm:$0xff]  ;;  %v873_v15 = vmax.f32 %v871_v32, %v872_v36 }
 0x1fc   :  { %6546 = vst [vmem:[#allocation37_spill] sm:$0xff] %v4849_v20  ;;  %v920_v21 = vmax.f32 %v4824_v9, %v4849_v20  ;;  %1662 = vmatprep.mubr.f32.mxu1 %v4849_v20  ;;  %1391 = vmatprep.subr.mxu0 %v1082_v57  ;;  %v859_v20 = vmax.f32 %v857_v23, %v858_v34  ;;  %v1074_v9 = vld [vmem:[%s6439_s5 + $0x3b8] sm:$0xff]  ;;  %v855_v23 = vrot.slane %v854_v42, 1 }
 0x1fd   :  { %v710_v29 = vpop.f32.mrf.mxu1  ;;  %1663 = vmatmul.mubr.f32.gmra.mxu1 %v4842_v24  ;;  %1392 = vmatpush2.msra.mxu0 %v1081_v60  ;;  %v4888_v28 = vadd.f32 %v708_v11, %v4463_v47  ;;  %v880_v60 = vmax.f32 %v878_v27, %v879_v38  ;;  %v914_v24 = vrot.slane %v913_v5, 4  ;;  %v1069_v11 = vld [vmem:[%s6439_s5 + $0x390] sm:$0xff]  ;;  %v1066_v38 = vld [vmem:[%s6439_s5 + $0x378] sm:$0xff]  ;;  %v867_v36 = vrot.slane %v866_v41, 2 }
 0x1fe   :  { %v4882_v57 = vadd.f32 %v710_v29, %v4460_v46  ;;  %1393 = vmatprep.subr.mxu0 %v1078_v53  ;;  %v921_v31 = vrot.slane %v920_v21, 4  ;;  %v1070_v29 = vld [vmem:[%s6439_s5 + $0x398] sm:$0xff]  ;;  %v894_v53 = vmax.f32 %v892_v0, %v893_v44  ;;  %v860_v2 = vrot.slane %v859_v20, 2  ;;  %v1065_v0 = vld [vmem:[%s6439_s5 + $0x370] sm:$0xff] }
 0x1ff   :  { %v714_v35 = vpop.f32.mrf.mxu1  ;;  %6548 = vst [vmem:[#allocation39_spill] sm:$0xff] %v4888_v28  ;;  %1394 = vmatpush2.msra.mxu0 %v1077_v1  ;;  %v887_v44 = vmax.f32 %v885_v37, %v886_v43  ;;  %v908_v32 = vmax.f32 %v906_v45, %v907_v7  ;;  %v874_v45 = vrot.slane %v873_v15, 2  ;;  %v881_v43 = vrot.slane %v880_v60, 2 }
 0x200   :  { %6547 = vst [vmem:[#allocation38_spill] sm:$0xff] %v4882_v57  ;;  %v4891_v34 = vadd.f32 %v714_v35, %v4463_v47  ;;  %1668 = vmatprep.mubr.f32.mxu1 %v4882_v57  ;;  %1395 = vmatprep.subr.mxu0 %v1074_v9  ;;  %v901_v9 = vmax.f32 %v899_v61, %v900_v48  ;;  %v1062_v48 = vld [vmem:[%s6439_s5 + $0x358] sm:$0xff]  ;;  %v895_v61 = vrot.slane %v894_v53, 2 }
 0x201   :  { %v716_v49 = vpop.f32.mrf.mxu1  ;;  %1669 = vmatmul.mubr.f32.gmra.mxu1 %v4888_v28  ;;  %1396 = vmatpush2.msra.mxu0 %v1073_v40  ;;  %v4913_v35 = vmax.f32 %v854_v42, %v855_v23  ;;  %v915_v7 = vmax.f32 %v913_v5, %v914_v24  ;;  %v861_v42 = vmax.f32 %v859_v20, %v860_v2  ;;  %v888_v5 = vrot.slane %v887_v44, 2 }
 0x202   :  { %6549 = vst [vmem:[#allocation40_spill] sm:$0xff] %v4891_v34  ;;  %v927_v1 = vmax.f32 %v4888_v28, %v4891_v34  ;;  %v4904_v52 = vadd.f32 %v716_v49, %v4460_v46  ;;  %1397 = vmatprep.subr.mxu0 %v1070_v29  ;;  %v922_v49 = vmax.f32 %v920_v21, %v921_v31  ;;  %v1061_v21 = vld [vmem:[%s6439_s5 + $0x350] sm:$0xff] }
 0x203   :  { %v720_v27 = vpop.f32.mrf.mxu1  ;;  %1398 = vmatpush2.msra.mxu0 %v1069_v11  ;;  %v1058_v11 = vld [vmem:[%s6439_s5 + $0x338] sm:$0xff]  ;;  %v868_v24 = vmax.f32 %v866_v41, %v867_v36  ;;  %v875_v36 = vmax.f32 %v873_v15, %v874_v45  ;;  %v889_v45 = vmax.f32 %v887_v44, %v888_v5 }
 0x204   :  { %6550 = vst [vmem:[#allocation41_spill] sm:$0xff] %v4904_v52  ;;  %v928_v17 = vrot.slane %v927_v1, 4  ;;  %v934_v40 = vmax.f32 %v4882_v57, %v4904_v52  ;;  %1674 = vmatprep.mubr.f32.mxu1 %v4904_v52  ;;  %1399 = vmatprep.subr.mxu0 %v1066_v38  ;;  %v902_v38 = vrot.slane %v901_v9, 2  ;;  %v909_v52 = vrot.slane %v908_v32, 2  ;;  %v1054_v41 = vld [vmem:[%s6439_s5 + $0x318] sm:$0xff] }
 0x205   :  { %v722_v37 = vpop.f32.mrf.mxu1  ;;  %1675 = vmatmul.mubr.f32.gmra.mxu1 %v4891_v34  ;;  %1400 = vmatpush2.msra.mxu0 %v1065_v0  ;;  %v923_v2 = vrot.slane %v922_v49, 2  ;;  %v916_v34 = vrot.slane %v915_v7, 2  ;;  %v1050_v15 = vld [vmem:[%s6439_s5 + $0x2f8] sm:$0xff]  ;;  %v876_v44 = vrot.slane %v875_v36, 1 }
 0x206   :  { %v929_v23 = vmax.f32 %v927_v1, %v928_v17  ;;  %v935_v31 = vrot.slane %v934_v40, 4  ;;  %v4925_v29 = vadd.f32 %v722_v37, %v4460_v46  ;;  %1401 = vmatprep.subr.mxu0 %v1062_v48  ;;  %v1057_v17 = vld [vmem:[%s6439_s5 + $0x330] sm:$0xff]  ;;  %v4935_v1 = vadd.f32 %v720_v27, %v4463_v47 }
 0x207   :  { %v726_v28 = vpop.f32.mrf.mxu1  ;;  %1402 = vmatpush2.msra.mxu0 %v1061_v21  ;;  %v882_v48 = vmax.f32 %v880_v60, %v881_v43  ;;  %v896_v37 = vmax.f32 %v894_v53, %v895_v61  ;;  %v1053_v27 = vld [vmem:[%s6439_s5 + $0x310] sm:$0xff]  ;;  %v862_v60 = vrot.slane %v861_v42, 1  ;;  %v869_v53 = vrot.slane %v868_v24, 1 }
 0x208   :  { %v936_v20 = vmax.f32 %v934_v40, %v935_v31  ;;  %6551 = vst [vmem:[#allocation42_spill] sm:$0xff] %v4935_v1  ;;  %v4938_v0 = vadd.f32 %v726_v28, %v4463_v47  ;;  %1680 = vmatprep.mubr.f32.mxu1 %v4925_v29  ;;  %1403 = vmatprep.subr.mxu0 %v1058_v11  ;;  %v930_v40 = vrot.slane %v929_v23, 2  ;;  %v1049_v61 = vld [vmem:[%s6439_s5 + $0x2f0] sm:$0xff] }
 0x209   :  { %v728_v57 = vpop.f32.mrf.mxu1  ;;  %1681 = vmatmul.mubr.f32.gmra.mxu1 %v4935_v1  ;;  %1404 = vmatpush2.msra.mxu0 %v1057_v17  ;;  %v910_v43 = vmax.f32 %v908_v32, %v909_v52  ;;  %v903_v31 = vmax.f32 %v901_v9, %v902_v38  ;;  %v924_v11 = vmax.f32 %v922_v49, %v923_v2  ;;  %v1046_v17 = vld [vmem:[%s6439_s5 + $0x2d8] sm:$0xff]  ;;  %v883_v52 = vrot.slane %v882_v48, 1  ;;  %v1045_v9 = vld [vmem:[%s6439_s5 + $0x2d0] sm:$0xff] }
 0x20a   :  { %6552 = vst [vmem:[#allocation43_spill] sm:$0xff] %v4938_v0  ;;  %v937_v47 = vrot.slane %v936_v20, 2  ;;  %v941_v28 = vmax.f32 %v4935_v1, %v4938_v0  ;;  %v4950_v21 = vadd.f32 %v728_v57, %v4460_v46  ;;  %1405 = vmatprep.subr.mxu0 %v1054_v41  ;;  %v917_v32 = vmax.f32 %v915_v7, %v916_v34 }
 0x20b   :  { %1406 = vmatpush2.msra.mxu0 %v1053_v27  ;;  %v897_v49 = vrot.slane %v896_v37, 1  ;;  %v931_v38 = vmax.f32 %v929_v23, %v930_v40  ;;  %v1042_v27 = vld [vmem:[%s6439_s5 + $0x2b8] sm:$0xff]  ;;  %v870_v1 = vmax.f32 %v868_v24, %v869_v53  ;;  %v890_v34 = vrot.slane %v889_v45, 1  ;;  %v1037_v24 = vld [vmem:[%s6439_s5 + $0x290] sm:$0xff] }
 0x20c   :  { %6553 = vst [vmem:[#allocation44_spill] sm:$0xff] %v4950_v21  ;;  %v942_v46 = vrot.slane %v941_v28, 4  ;;  %v948_v57 = vmax.f32 %v4925_v29, %v4950_v21  ;;  %1686 = vmatprep.mubr.f32.mxu1 %v4950_v21  ;;  %v938_v5 = vmax.f32 %v936_v20, %v937_v47  ;;  %1407 = vmatprep.subr.mxu0 %v1050_v15  ;;  %v911_v7 = vrot.slane %v910_v43, 1  ;;  %v1041_v20 = vld [vmem:[%s6439_s5 + $0x2b0] sm:$0xff]  ;;  %v1038_v15 = vld [vmem:[%s6439_s5 + $0x298] sm:$0xff] }
 0x20d   :  { %1687 = vmatmul.mubr.f32.gmra.mxu1 %v4938_v0  ;;  %1408 = vmatpush2.msra.mxu0 %v1049_v61  ;;  %v863_v21 = vmax.f32 %v861_v42, %v862_v60  ;;  %v904_v47 = vrot.slane %v903_v31, 1  ;;  %v925_v23 = vrot.slane %v924_v11, 1  ;;  %v877_v61 = vmax.f32 %v875_v36, %v876_v44 }
 0x20e   :  { %v943_v2 = vmax.f32 %v941_v28, %v942_v46  ;;  %v949_v41 = vrot.slane %v948_v57, 4  ;;  %1409 = vmatprep.subr.mxu0 %v1046_v17  ;;  %v884_v46 = vmax.f32 %v882_v48, %v883_v52  ;;  %v918_v42 = vrot.slane %v917_v32, 1  ;;  %v1033_v52 = vld [vmem:[%s6439_s5 + $0x270] sm:$0xff] }
 0x20f   :  { %1410 = vmatpush2.msra.mxu0 %v1045_v9  ;;  %v939_v60 = vrot.slane %v938_v5, 1  ;;  %v898_v53 = vmax.f32 %v896_v37, %v897_v49  ;;  %v932_v9 = vrot.slane %v931_v38, 1  ;;  %v6554_v0 = vrot.slane %v4875_v3, 1 }
 0x210   :  { %v944_v40 = vrot.slane %v943_v2, 2  ;;  %v950_v28 = vmax.f32 %v948_v57, %v949_v41  ;;  %1411 = vmatprep.subr.mxu0 %v1042_v27  ;;  %v1034_v57 = vld [vmem:[%s6439_s5 + $0x278] sm:$0xff]  ;;  %v891_v48 = vmax.f32 %v889_v45, %v890_v34  ;;  %v912_v44 = vmax.f32 %v910_v43, %v911_v7 }
 0x211   :  { %1412 = vmatpush2.msra.mxu0 %v1041_v20  ;;  %v849_v36 = vmax.f32 %v4875_v3, %v6554_v0  ;;  %v1271_v37 = vsel %vm1243_vm2, %v870_v1, %v4913_v35  ;;  %v905_v49 = vmax.f32 %v903_v31, %v904_v47  ;;  %v926_v27 = vmax.f32 %v924_v11, %v925_v23  ;;  %v1029_v3 = vld [vmem:[%s6439_s5 + $0x250] sm:$0xff]  ;;  %v1026_v11 = vld [vmem:[%s6439_s5 + $0x238] sm:$0xff] }
 0x212   :  { %v951_v17 = vrot.slane %v950_v28, 2  ;;  %v945_v41 = vmax.f32 %v943_v2, %v944_v40  ;;  %1413 = vmatprep.subr.mxu0 %v1038_v15  ;;  %v1030_v2 = vld [vmem:[%s6439_s5 + $0x258] sm:$0xff]  ;;  %v940_v0 = vmax.f32 %v938_v5, %v939_v60  ;;  %v1272_v45 = vsel %vm1245_vm3, %v884_v46, %v1271_v37  ;;  %v1021_v60 = vld [vmem:[%s6439_s5 + $0x210] sm:$0xff] }
 0x213   :  { %1414 = vmatpush2.msra.mxu0 %v1037_v24  ;;  %v919_v43 = vmax.f32 %v917_v32, %v918_v42  ;;  %v1264_v35 = vsel %vm1243_vm2, %v863_v21, %v849_v36  ;;  %v1273_v31 = vsel %vm1247_vm4, %v898_v53, %v1272_v45  ;;  %v933_v34 = vmax.f32 %v931_v38, %v932_v9  ;;  %v1025_v21 = vld [vmem:[%s6439_s5 + $0x230] sm:$0xff]  ;;  %v1022_v38 = vld [vmem:[%s6439_s5 + $0x218] sm:$0xff] }
 0x214   :  { %v952_v20 = vmax.f32 %v950_v28, %v951_v17  ;;  %v946_v40 = vrot.slane %v945_v41, 1  ;;  %1415 = vmatprep.subr.mxu0 %v1034_v57  ;;  %v1265_v7 = vsel %vm1245_vm3, %v877_v61, %v1264_v35  ;;  %v1274_v47 = vsel %vm1249_vm5, %v912_v44, %v1273_v31  ;;  %v1146_v57 = vld [vmem:[%s6439_s5 + $0x5f8] sm:$0xff]  ;;  %v1145_v9 = vld [vmem:[%s6439_s5 + $0x5f0] sm:$0xff] }
 0x215   :  { %1416 = vmatpush2.msra.mxu0 %v1033_v52  ;;  %v1266_v23 = vsel %vm1247_vm4, %v891_v48, %v1265_v7  ;;  %v1275_v28 = vsel %vm1251_vm6, %v926_v27, %v1274_v47  ;;  %v2835_v17 = vld [vmem:[%s6441_s7 + $0x78] sm:$0xff]  ;;  %v2834_v36 = vld [vmem:[%s6441_s7 + $0x70] sm:$0xff] }
 0x216   :  { %v953_v1 = vrot.slane %v952_v20, 1  ;;  %1417 = vmatprep.subr.mxu0 %v1030_v2  ;;  %v947_v5 = vmax.f32 %v945_v41, %v946_v40  ;;  %v1267_v15 = vsel %vm1249_vm5, %v905_v49, %v1266_v23  ;;  %v1276_v61 = vsel %vm1253_vm7, %v940_v0, %v1275_v28  ;;  %2892 = vmatpush1.msra.mxu1 %v2835_v17  ;;  %v1142_v48 = vld [vmem:[%s6439_s5 + $0x5d8] sm:$0xff]  ;;  %v1137_v52 = vld [vmem:[%s6439_s5 + $0x5b0] sm:$0xff]  ;;  %v2829_v23 = vld [vmem:[%s6441_s7 + $0x48] sm:$0xff] }
 0x217   :  { %1418 = vmatpush2.msra.mxu0 %v1029_v3  ;;  %v1268_v46 = vsel %vm1251_vm6, %v919_v43, %v1267_v15  ;;  %v6555_v41 = vmov 0.0   ;;  %v1138_v44 = vld [vmem:[%s6439_s5 + $0x5b8] sm:$0xff]  ;;  %v1133_v49 = vld [vmem:[%s6439_s5 + $0x590] sm:$0xff] }
 0x218   :  { %v954_v32 = vmax.f32 %v952_v20, %v953_v1  ;;  %1419 = vmatprep.subr.mxu0 %v1026_v11  ;;  %v1269_v24 = vsel %vm1253_vm7, %v933_v34, %v1268_v46  ;;  %2893 = vmatprep.subr.mxu1 %v6555_v41  ;;  %v1134_v37 = vld [vmem:[%s6439_s5 + $0x598] sm:$0xff]  ;;  %v1129_v27 = vld [vmem:[%s6439_s5 + $0x570] sm:$0xff]  ;;  %v2832_v20 = vld [vmem:[%s6441_s7 + $0x60] sm:$0xff] }
 0x219   :  { %1420 = vmatpush2.msra.mxu0 %v1025_v21  ;;  %v1270_v53 = vsel %vm1255_vm8, %v947_v5, %v1269_v24  ;;  %2894 = vmatpush1.msra.mxu1 %v2834_v36  ;;  %v1130_v2 = vld [vmem:[%s6439_s5 + $0x578] sm:$0xff]  ;;  %v1125_v40 = vld [vmem:[%s6439_s5 + $0x550] sm:$0xff] }
 0x21a   :  { %v1277_v42 = vsel %vm1255_vm8, %v954_v32, %v1276_v61  ;;  %1421 = vmatprep.subr.mxu0 %v1022_v38  ;;  %2895 = vmatprep.subr.mxu1 %v6555_v41  ;;  %v1122_v3 = vld [vmem:[%s6439_s5 + $0x538] sm:$0xff]  ;;  %v1121_v0 = vld [vmem:[%s6439_s5 + $0x530] sm:$0xff]  ;;  %v2828_v38 = vld [vmem:[%s6441_s7 + $0x40] sm:$0xff] }
 0x21b   :  { %1352 = vmatprep.mubr.f32.mxu0 %v1277_v42  ;;  %1422 = vmatpush2.msra.mxu0 %v1021_v60  ;;  %v2831_v45 = vld [vmem:[%s6441_s7 + $0x58] sm:$0xff]  ;;  %v1117_v35 = vld [vmem:[%s6439_s5 + $0x510] sm:$0xff] }
 0x21c   :  { %1353 = vmatmul.mubr.f32.gmra.mxu0 %v1270_v53  ;;  %1693 = vmatprep.subr.mxu0 %v1146_v57  ;;  %v1118_v43 = vld [vmem:[%s6439_s5 + $0x518] sm:$0xff]  ;;  %v1113_v31 = vld [vmem:[%s6439_s5 + $0x4f0] sm:$0xff] }
 0x21d   :  { %1423 = vmatprep.mubr.f32.mxu0 %v4670_v56  ;;  %v1141_v56 = vld [vmem:[%s6439_s5 + $0x5d0] sm:$0xff]  ;;  %v1114_v1 = vld [vmem:[%s6439_s5 + $0x4f8] sm:$0xff] }
 0x21e   :  { %v2830_v11 = vld [vmem:[%s6441_s7 + $0x50] sm:$0xff]  ;;  %v1110_v34 = vld [vmem:[%s6439_s5 + $0x4d8] sm:$0xff] }
 0x21f   :  { %v1109_v7 = vld [vmem:[%s6439_s5 + $0x4d0] sm:$0xff]  ;;  %v1106_v47 = vld [vmem:[%s6439_s5 + $0x4b8] sm:$0xff] }
 0x220   :  { %1424 = vmatmul.mubr.f32.vlgmr.msra.gmra.mxu0 %v4681_v33  ;;  %v2833_v33 = vld [vmem:[%s6441_s7 + $0x68] sm:$0xff]  ;;  %v1105_v5 = vld [vmem:[%s6439_s5 + $0x4b0] sm:$0xff]  ;;  %v1102_v21 = vld [vmem:[%s6439_s5 + $0x498] sm:$0xff] }
 0x221   :  { %1694 = vmatpush1.msra.mxu0 %v1145_v9  ;;  %1429 = vmatprep.mubr.f32.mxu0 %v1277_v42  ;;  %v1101_v32 = vld [vmem:[%s6439_s5 + $0x490] sm:$0xff]  ;;  %v1098_v28 = vld [vmem:[%s6439_s5 + $0x478] sm:$0xff] }
 0x222   :  { %1695 = vmatprep.subr.mxu0 %v1142_v48  ;;  %2896 = vmatpush1.msra.mxu1 %v2833_v33  ;;  %v1097_v15 = vld [vmem:[%s6439_s5 + $0x470] sm:$0xff]  ;;  %v1094_v61 = vld [vmem:[%s6439_s5 + $0x458] sm:$0xff]  ;;  %v2825_v33 = vld [vmem:[%s6441_s7 + $0x28] sm:$0xff] }
 0x223   :  { %1696 = vmatpush1.msra.mxu0 %v1141_v56  ;;  %2897 = vmatprep.subr.mxu1 %v6555_v41  ;;  %v1093_v46 = vld [vmem:[%s6439_s5 + $0x450] sm:$0xff]  ;;  %v1090_v42 = vld [vmem:[%s6439_s5 + $0x438] sm:$0xff] }
 0x224   :  { %1697 = vmatprep.subr.mxu0 %v1138_v44  ;;  %1430 = vmatmul.mubr.f32.gmra.mxu0 %v1270_v53  ;;  %v1089_v24 = vld [vmem:[%s6439_s5 + $0x430] sm:$0xff]  ;;  %v2827_v60 = vld [vmem:[%s6441_s7 + $0x38] sm:$0xff] }
 0x225   :  { %1698 = vmatpush1.msra.mxu0 %v1137_v52  ;;  %1757 = vmatprep.mubr.f32.mxu0 %v4466_v50  ;;  %v1126_v50 = vld [vmem:[%s6439_s5 + $0x558] sm:$0xff]  ;;  %v1085_v57 = vld [vmem:[%s6439_s5 + $0x410] sm:$0xff] }
 0x226   :  { %1699 = vmatprep.subr.mxu0 %v1134_v37  ;;  %2898 = vmatpush1.msra.mxu1 %v2832_v20  ;;  %v1086_v53 = vld [vmem:[%s6439_s5 + $0x418] sm:$0xff]  ;;  %v1209_v9 = vld [vmem:[%s6439_s5 + $0x7f0] sm:$0xff]  ;;  %v2824_v20 = vld [vmem:[%s6441_s7 + $0x20] sm:$0xff] }
 0x227   :  { %1700 = vmatpush1.msra.mxu0 %v1133_v49  ;;  %2899 = vmatprep.subr.mxu1 %v6555_v41  ;;  %v1210_v17 = vld [vmem:[%s6439_s5 + $0x7f8] sm:$0xff]  ;;  %v2826_v36 = vld [vmem:[%s6441_s7 + $0x30] sm:$0xff] }
 0x228   :  { %1701 = vmatprep.subr.mxu0 %v1130_v2  ;;  %2900 = vmatpush1.msra.mxu1 %v2831_v45  ;;  %v1206_v48 = vld [vmem:[%s6439_s5 + $0x7d8] sm:$0xff]  ;;  %v1205_v56 = vld [vmem:[%s6439_s5 + $0x7d0] sm:$0xff] }
 0x229   :  { %1702 = vmatpush1.msra.mxu0 %v1129_v27  ;;  %2901 = vmatprep.subr.mxu1 %v6555_v41  ;;  %v1202_v44 = vld [vmem:[%s6439_s5 + $0x7b8] sm:$0xff]  ;;  %v1201_v52 = vld [vmem:[%s6439_s5 + $0x7b0] sm:$0xff] }
 0x22a   :  { %1703 = vmatprep.subr.mxu0 %v1126_v50  ;;  %2902 = vmatpush1.msra.mxu1 %v2830_v11  ;;  %v1198_v37 = vld [vmem:[%s6439_s5 + $0x798] sm:$0xff]  ;;  %v1197_v49 = vld [vmem:[%s6439_s5 + $0x790] sm:$0xff] }
 0x22b   :  { %1704 = vmatpush1.msra.mxu0 %v1125_v40  ;;  %2903 = vmatprep.subr.mxu1 %v6555_v41  ;;  %v1194_v2 = vld [vmem:[%s6439_s5 + $0x778] sm:$0xff]  ;;  %v1193_v27 = vld [vmem:[%s6439_s5 + $0x770] sm:$0xff] }
 0x22c   :  { %1705 = vmatprep.subr.mxu0 %v1122_v3  ;;  %2904 = vmatpush1.msra.mxu1 %v2829_v23  ;;  %v1190_v50 = vld [vmem:[%s6439_s5 + $0x758] sm:$0xff]  ;;  %v1189_v40 = vld [vmem:[%s6439_s5 + $0x750] sm:$0xff] }
 0x22d   :  { %1706 = vmatpush1.msra.mxu0 %v1121_v0  ;;  %2905 = vmatprep.subr.mxu1 %v6555_v41  ;;  %v1186_v3 = vld [vmem:[%s6439_s5 + $0x738] sm:$0xff]  ;;  %v1185_v0 = vld [vmem:[%s6439_s5 + $0x730] sm:$0xff] }
 0x22e   :  { %1707 = vmatprep.subr.mxu0 %v1118_v43  ;;  %2906 = vmatpush1.msra.mxu1 %v2828_v38  ;;  %v2823_v45 = vld [vmem:[%s6441_s7 + $0x18] sm:$0xff]  ;;  %v2822_v11 = vld [vmem:[%s6441_s7 + $0x10] sm:$0xff] }
 0x22f   :  { %1708 = vmatpush1.msra.mxu0 %v1117_v35  ;;  %2907 = vmatprep.subr.mxu1 %v6555_v41  ;;  %v1182_v43 = vld [vmem:[%s6439_s5 + $0x718] sm:$0xff]  ;;  %v1181_v35 = vld [vmem:[%s6439_s5 + $0x710] sm:$0xff] }
 0x230   :  { %1709 = vmatprep.subr.mxu0 %v1114_v1  ;;  %2908 = vmatpush1.msra.mxu1 %v2827_v60  ;;  %v1178_v1 = vld [vmem:[%s6439_s5 + $0x6f8] sm:$0xff]  ;;  %v1169_v23 = vld [vmem:[%s6439_s5 + $0x6b0] sm:$0xff] }
 0x231   :  { %1710 = vmatpush1.msra.mxu0 %v1113_v31  ;;  %2909 = vmatprep.subr.mxu1 %v6555_v41  ;;  %v1177_v31 = vld [vmem:[%s6439_s5 + $0x6f0] sm:$0xff]  ;;  %v2851_v38 = vld [vmem:[%s6441_s7 + $0xf8] sm:$0xff] }
 0x232   :  { %1711 = vmatprep.subr.mxu0 %v1110_v34  ;;  %2910 = vmatpush1.msra.mxu1 %v2826_v36  ;;  %v1174_v34 = vld [vmem:[%s6439_s5 + $0x6d8] sm:$0xff]  ;;  %v1149_v36 = vld [vmem:[%s6439_s5 + $0x610] sm:$0xff] }
 0x233   :  { %1712 = vmatpush1.msra.mxu0 %v1109_v7  ;;  %2911 = vmatprep.subr.mxu1 %v6555_v41  ;;  %v1173_v7 = vld [vmem:[%s6439_s5 + $0x6d0] sm:$0xff]  ;;  %v1154_v60 = vld [vmem:[%s6439_s5 + $0x638] sm:$0xff] }
 0x234   :  { %1713 = vmatprep.subr.mxu0 %v1106_v47  ;;  %2912 = vmatpush1.msra.mxu1 %v2825_v33  ;;  %v1170_v47 = vld [vmem:[%s6439_s5 + $0x6b8] sm:$0xff]  ;;  %v5323_v33 = vld [vmem:[%s6441_s7 + $0x168] sm:$0xff] }
 0x235   :  { %1714 = vmatpush1.msra.mxu0 %v1105_v5  ;;  %2913 = vmatprep.subr.mxu1 %v6555_v41  ;;  %v2821_v5 = vld [vmem:[%s6441_s7 + $0x8] sm:$0xff] }
 0x236   :  { %1715 = vmatprep.subr.mxu0 %v1102_v21  ;;  %2914 = vmatpush1.msra.mxu1 %v2824_v20  ;;  %v1166_v21 = vld [vmem:[%s6439_s5 + $0x698] sm:$0xff] }
 0x237   :  { %1716 = vmatpush1.msra.mxu0 %v1101_v32  ;;  %2915 = vmatprep.subr.mxu1 %v6555_v41  ;;  %v2820_v32 = vld [vmem:[%s6441_s7] sm:$0xff] }
 0x238   :  { %1717 = vmatprep.subr.mxu0 %v1098_v28  ;;  %2916 = vmatpush1.msra.mxu1 %v2823_v45  ;;  %v1165_v28 = vld [vmem:[%s6439_s5 + $0x690] sm:$0xff]  ;;  %v5433_v45 = vld [vmem:[%s6441_s7 + $0x118] sm:$0xff] }
 0x239   :  { %1718 = vmatpush1.msra.mxu0 %v1097_v15  ;;  %2917 = vmatprep.subr.mxu1 %v6555_v41  ;;  %v1162_v15 = vld [vmem:[%s6439_s5 + $0x678] sm:$0xff]  ;;  %6556 = vst [vmem:[#allocation45_spill] sm:$0xff] %v5433_v45 }
 0x23a   :  { %1719 = vmatprep.subr.mxu0 %v1094_v61  ;;  %2918 = vmatpush1.msra.mxu1 %v2822_v11  ;;  %v1161_v61 = vld [vmem:[%s6439_s5 + $0x670] sm:$0xff] }
 0x23b   :  { %1720 = vmatpush1.msra.mxu0 %v1093_v46  ;;  %2919 = vmatprep.subr.mxu1 %v6555_v41  ;;  %v1158_v46 = vld [vmem:[%s6439_s5 + $0x658] sm:$0xff] }
 0x23c   :  { %1721 = vmatprep.subr.mxu0 %v1090_v42  ;;  %2920 = vmatpush1.msra.mxu1 %v2821_v5  ;;  %v2850_v42 = vld [vmem:[%s6441_s7 + $0xf0] sm:$0xff]  ;;  %v5512_v5 = vld [vmem:[%s6441_s7 + $0x1e8] sm:$0xff] }
 0x23d   :  { %1722 = vmatpush1.msra.mxu0 %v1089_v24  ;;  %2921 = vmatprep.subr.mxu1 %v6555_v41  ;;  %v1157_v24 = vld [vmem:[%s6439_s5 + $0x650] sm:$0xff] }
 0x23e   :  { %1723 = vmatprep.subr.mxu0 %v1086_v53  ;;  %2922 = vmatpush1.msra.mxu1 %v2820_v32  ;;  %v2849_v53 = vld [vmem:[%s6441_s7 + $0xe8] sm:$0xff]  ;;  %v6567_v32 = vld [vmem:[#allocation9_spill] sm:$0xff] }
 0x23f   :  { %1724 = vmatpush1.msra.mxu0 %v1085_v57  ;;  %2923 = vmatprep.subr.mxu1 %v6555_v41  ;;  %v1153_v57 = vld [vmem:[%s6439_s5 + $0x630] sm:$0xff] }
 0x240   :  { %1725 = vmatprep.subr.mxu0 %v1210_v17  ;;  %2924 = vmatpush2.msra.mxu1 %v2851_v38  ;;  %v1150_v17 = vld [vmem:[%s6439_s5 + $0x618] sm:$0xff]  ;;  %v6569_v38 = vld [vmem:[#allocation8_spill] sm:$0xff] }
 0x241   :  { %1726 = vmatpush2.msra.mxu0 %v1209_v9  ;;  %2925 = vmatprep.subr.mxu1 %v6555_v41  ;;  %v2848_v9 = vld [vmem:[%s6441_s7 + $0xe0] sm:$0xff] }
 0x242   :  { %1727 = vmatprep.subr.mxu0 %v1206_v48  ;;  %2926 = vmatpush2.msra.mxu1 %v2850_v42  ;;  %v2847_v48 = vld [vmem:[%s6441_s7 + $0xd8] sm:$0xff] }
 0x243   :  { %1728 = vmatpush2.msra.mxu0 %v1205_v56  ;;  %2927 = vmatprep.subr.mxu1 %v6555_v41  ;;  %v5304_v56 = vld [vmem:[%s6441_s7 + $0x178] sm:$0xff] }
 0x244   :  { %1729 = vmatprep.subr.mxu0 %v1202_v44  ;;  %2928 = vmatpush2.msra.mxu1 %v2849_v53  ;;  %v2846_v44 = vld [vmem:[%s6441_s7 + $0xd0] sm:$0xff]  ;;  %v6574_v53 = vld [vmem:[#allocation13_spill] sm:$0xff] }
 0x245   :  { %1730 = vmatpush2.msra.mxu0 %v1201_v52  ;;  %2929 = vmatprep.subr.mxu1 %v6555_v41  ;;  %v5315_v52 = vld [vmem:[%s6441_s7 + $0x170] sm:$0xff] }
 0x246   :  { %1731 = vmatprep.subr.mxu0 %v1198_v37  ;;  %2930 = vmatpush2.msra.mxu1 %v2848_v9  ;;  %v6576_v9 = vld [vmem:[#allocation12_spill] sm:$0xff] }
 0x247   :  { %1732 = vmatpush2.msra.mxu0 %v1197_v49  ;;  %2931 = vmatprep.subr.mxu1 %v6555_v41  ;;  %v5345_v49 = vld [vmem:[%s6441_s7 + $0x158] sm:$0xff] }
 0x248   :  { %1733 = vmatprep.subr.mxu0 %v1194_v2  ;;  %2932 = vmatpush2.msra.mxu1 %v2847_v48  ;;  %v5570_v48 = vld [vmem:[%s6441_s7 + $0x1b8] sm:$0xff] }
 0x249   :  { %1734 = vmatpush2.msra.mxu0 %v1193_v27  ;;  %2933 = vmatprep.subr.mxu1 %v6555_v41  ;;  %v5367_v27 = vld [vmem:[%s6441_s7 + $0x148] sm:$0xff]  ;;  %6578 = vst [vmem:[#allocation13_spill] sm:$0xff] %v5570_v48 }
 0x24a   :  { %1735 = vmatprep.subr.mxu0 %v1190_v50  ;;  %2934 = vmatpush2.msra.mxu1 %v2846_v44  ;;  %v5389_v50 = vld [vmem:[%s6441_s7 + $0x138] sm:$0xff] }
 0x24b   :  { %1736 = vmatpush2.msra.mxu0 %v1189_v40  ;;  %2935 = vmatprep.subr.mxu1 %v6555_v41 }
 0x24c   :  { %1737 = vmatprep.subr.mxu0 %v1186_v3  ;;  %v5411_v3 = vld [vmem:[%s6441_s7 + $0x128] sm:$0xff] }
 0x24d   :  { %1738 = vmatpush2.msra.mxu0 %v1185_v0 }
 0x24e   :  { %1739 = vmatprep.subr.mxu0 %v1182_v43  ;;  %v2839_v43 = vld [vmem:[%s6441_s7 + $0x98] sm:$0xff] }
 0x24f   :  { %1740 = vmatpush2.msra.mxu0 %v1181_v35 }
 0x250   :  { %1741 = vmatprep.subr.mxu0 %v1178_v1  ;;  %v2837_v1 = vld [vmem:[%s6441_s7 + $0x88] sm:$0xff] }
 0x251   :  { %1742 = vmatpush2.msra.mxu0 %v1177_v31  ;;  %v5339_v37 = vpop.f32.mrf.mxu1 }
 0x252   :  { %1743 = vmatprep.subr.mxu0 %v1174_v34  ;;  %v5493_v34 = vld [vmem:[%s6441_s7 + $0x1f8] sm:$0xff] }
 0x253   :  { %1744 = vmatpush2.msra.mxu0 %v1173_v7  ;;  %v5361_v2 = vpop.f32.mrf.mxu1  ;;  %6560 = vst [vmem:[#allocation49_spill] sm:$0xff] %v5493_v34  ;;  %v6563_v7 = vld [vmem:[#allocation6_spill] sm:$0xff] }
 0x254   :  { %1745 = vmatprep.subr.mxu0 %v1170_v47  ;;  %6564 = vst [vmem:[#allocation6_spill] sm:$0xff] %v5512_v5 }
 0x255   :  { %1746 = vmatpush2.msra.mxu0 %v1169_v23  ;;  %v5383_v20 = vpop.f32.mrf.mxu1  ;;  %v6565_v23 = vld [vmem:[#allocation7_spill] sm:$0xff] }
 0x256   :  { %1747 = vmatprep.subr.mxu0 %v1166_v21  ;;  %v5520_v21 = vld [vmem:[%s6441_s7 + $0x1e0] sm:$0xff] }
 0x257   :  { %1748 = vmatpush2.msra.mxu0 %v1165_v28  ;;  %v5405_v40 = vpop.f32.mrf.mxu1  ;;  %6566 = vst [vmem:[#allocation7_spill] sm:$0xff] %v5520_v21 }
 0x258   :  { %1749 = vmatprep.subr.mxu0 %v1162_v15  ;;  %v5530_v15 = vld [vmem:[%s6441_s7 + $0x1d8] sm:$0xff] }
 0x259   :  { %1750 = vmatpush2.msra.mxu0 %v1161_v61  ;;  %v5427_v0 = vpop.f32.mrf.mxu1  ;;  %6568 = vst [vmem:[#allocation9_spill] sm:$0xff] %v5530_v15  ;;  %v5538_v61 = vld [vmem:[%s6441_s7 + $0x1d0] sm:$0xff] }
 0x25a   :  { %1751 = vmatprep.subr.mxu0 %v1158_v46  ;;  %6570 = vst [vmem:[#allocation8_spill] sm:$0xff] %v5538_v61  ;;  %v6571_v46 = vld [vmem:[#allocation10_spill] sm:$0xff] }
 0x25b   :  { %1752 = vmatpush2.msra.mxu0 %v1157_v24  ;;  %v5452_v35 = vpop.f32.mrf.mxu1  ;;  %v5548_v24 = vld [vmem:[%s6441_s7 + $0x1c8] sm:$0xff] }
 0x25c   :  { %1753 = vmatprep.subr.mxu0 %v1154_v60  ;;  %6572 = vst [vmem:[#allocation10_spill] sm:$0xff] %v5548_v24  ;;  %v6573_v60 = vld [vmem:[#allocation11_spill] sm:$0xff] }
 0x25d   :  { %1754 = vmatpush2.msra.mxu0 %v1153_v57  ;;  %v5471_v31 = vpop.f32.mrf.mxu1  ;;  %v5558_v57 = vld [vmem:[%s6441_s7 + $0x1c0] sm:$0xff] }
 0x25e   :  { %1755 = vmatprep.subr.mxu0 %v1150_v17  ;;  %6575 = vst [vmem:[#allocation11_spill] sm:$0xff] %v5558_v57 }
 0x25f   :  { %1756 = vmatpush2.msra.mxu0 %v1149_v36  ;;  %v5487_v11 = vpop.f32.mrf.mxu1  ;;  %v6577_v36 = vld [vmem:[#allocation14_spill] sm:$0xff] }
 0x260   :  { %1758 = vmatmul.mubr.f32.vlgmr.msra.gmra.mxu0 %v4469_v51  ;;  %3116 = vmatprep.subr.mxu0 %v6555_v41  ;;  %v2845_v51 = vld [vmem:[%s6441_s7 + $0xc8] sm:$0xff] }
 0x261   :  { %1763 = vmatprep.mubr.f32.mxu0 %v4474_v54  ;;  %3117 = vmatpush1.msra.mxu0 %v5304_v56  ;;  %v5335_v54 = vld [vmem:[%s6441_s7 + $0x160] sm:$0xff]  ;;  %v5506_v47 = vpop.f32.mrf.mxu1 }
 0x262   :  { %3118 = vmatprep.subr.mxu0 %v6555_v41  ;;  %2936 = vmatpush2.msra.mxu1 %v2845_v51  ;;  %v6579_v51 = vld [vmem:[#allocation15_spill] sm:$0xff] }
 0x263   :  { %3119 = vmatpush1.msra.mxu0 %v5315_v52  ;;  %2937 = vmatprep.subr.mxu1 %v6555_v41  ;;  %v5524_v28 = vpop.f32.mrf.mxu1 }
 0x264   :  { %1764 = vmatmul.mubr.f32.gmra.mxu0 %v4477_v55  ;;  %3120 = vmatprep.subr.mxu0 %v6555_v41  ;;  %v2844_v55 = vld [vmem:[%s6441_s7 + $0xc0] sm:$0xff] }
 0x265   :  { %1769 = vmatprep.mubr.f32.mxu0 %v4482_v58  ;;  %3121 = vmatpush1.msra.mxu0 %v5323_v33  ;;  %v5357_v58 = vld [vmem:[%s6441_s7 + $0x150] sm:$0xff]  ;;  %v5542_v42 = vpop.f32.mrf.mxu1 }
 0x266   :  { %3122 = vmatprep.subr.mxu0 %v6555_v41  ;;  %2938 = vmatpush2.msra.mxu1 %v2844_v55  ;;  %v6580_v55 = vld [vmem:[#allocation17_spill] sm:$0xff] }
 0x267   :  { %3123 = vmatpush1.msra.mxu0 %v5335_v54  ;;  %2939 = vmatprep.subr.mxu1 %v6555_v41  ;;  %v5560_v17 = vpop.f32.mrf.mxu1 }
 0x268   :  { %1770 = vmatmul.mubr.f32.gmra.mxu0 %v4485_v59  ;;  %3124 = vmatprep.subr.mxu0 %v6555_v41  ;;  %v2843_v59 = vld [vmem:[%s6441_s7 + $0xb8] sm:$0xff] }
 0x269   :  { %1775 = vmatprep.mubr.f32.mxu0 %v4490_v62  ;;  %3125 = vmatpush1.msra.mxu0 %v5345_v49  ;;  %v5379_v62 = vld [vmem:[%s6441_s7 + $0x140] sm:$0xff]  ;;  %v5572_v44 = vpop.f32.mrf.mxu1 }
 0x26a   :  { %3126 = vmatprep.subr.mxu0 %v6555_v41  ;;  %2940 = vmatpush2.msra.mxu1 %v2843_v59  ;;  %v5581_v59 = vld [vmem:[%s6441_s7 + $0x1b0] sm:$0xff] }
 0x26b   :  { %3127 = vmatpush1.msra.mxu0 %v5357_v58  ;;  %2941 = vmatprep.subr.mxu1 %v6555_v41  ;;  %6581 = vst [vmem:[#allocation12_spill] sm:$0xff] %v5581_v59 }
 0x26c   :  { %1776 = vmatmul.mubr.f32.gmra.mxu0 %v4493_v63  ;;  %3128 = vmatprep.subr.mxu0 %v6555_v41  ;;  %v2842_v63 = vld [vmem:[%s6441_s7 + $0xb0] sm:$0xff] }
 0x26d   :  { %1781 = vmatprep.mubr.f32.mxu0 %v4498_v4  ;;  %3129 = vmatpush1.msra.mxu0 %v5367_v27  ;;  %v5401_v4 = vld [vmem:[%s6441_s7 + $0x130] sm:$0xff] }
 0x26e   :  { %3130 = vmatprep.subr.mxu0 %v6555_v41  ;;  %2942 = vmatpush2.msra.mxu1 %v2842_v63  ;;  %v5583_v63 = vpop.f32.mrf.mxu1 }
 0x26f   :  { %3131 = vmatpush1.msra.mxu0 %v5379_v62  ;;  %2943 = vmatprep.subr.mxu1 %v6555_v41 }
 0x270   :  { %1782 = vmatmul.mubr.f32.gmra.mxu0 %v4501_v6  ;;  %3132 = vmatprep.subr.mxu0 %v6555_v41  ;;  %v2841_v6 = vld [vmem:[%s6441_s7 + $0xa8] sm:$0xff] }
 0x271   :  { %1787 = vmatprep.mubr.f32.mxu0 %v4505_v8  ;;  %3133 = vmatpush1.msra.mxu0 %v5389_v50  ;;  %v5423_v8 = vld [vmem:[%s6441_s7 + $0x120] sm:$0xff] }
 0x272   :  { %3134 = vmatprep.subr.mxu0 %v6555_v41  ;;  %2944 = vmatpush2.msra.mxu1 %v2841_v6  ;;  %v6582_v6 = vld [vmem:[#allocation16_spill] sm:$0xff] }
 0x273   :  { %3135 = vmatpush1.msra.mxu0 %v5401_v4  ;;  %2945 = vmatprep.subr.mxu1 %v6555_v41 }
 0x274   :  { %1788 = vmatmul.mubr.f32.gmra.mxu0 %v4509_v10  ;;  %3136 = vmatprep.subr.mxu0 %v6555_v41  ;;  %v2840_v10 = vld [vmem:[%s6441_s7 + $0xa0] sm:$0xff] }
 0x275   :  { %1793 = vmatprep.mubr.f32.mxu0 %v4514_v12  ;;  %3137 = vmatpush1.msra.mxu0 %v5411_v3  ;;  %v5445_v12 = vld [vmem:[%s6441_s7 + $0x110] sm:$0xff] }
 0x276   :  { %3138 = vmatprep.subr.mxu0 %v6555_v41  ;;  %6557 = vst [vmem:[#allocation46_spill] sm:$0xff] %v5445_v12  ;;  %2946 = vmatpush2.msra.mxu1 %v2840_v10  ;;  %v5592_v10 = vld [vmem:[%s6441_s7 + $0x1a8] sm:$0xff] }
 0x277   :  { %3139 = vmatpush1.msra.mxu0 %v5423_v8  ;;  %2947 = vmatprep.subr.mxu1 %v6555_v41  ;;  %6583 = vst [vmem:[#allocation14_spill] sm:$0xff] %v5592_v10 }
 0x278   :  { %1794 = vmatmul.mubr.f32.gmra.mxu0 %v4517_v14  ;;  %3140 = vmatprep.subr.mxu0 %v6555_v41  ;;  %v2838_v14 = vld [vmem:[%s6441_s7 + $0x90] sm:$0xff] }
 0x279   :  { %1799 = vmatprep.mubr.f32.mxu0 %v4523_v16  ;;  %3141 = vmatpush1.msra.mxu0 %v5433_v45  ;;  %v5464_v16 = vld [vmem:[%s6441_s7 + $0x108] sm:$0xff] }
 0x27a   :  { %3142 = vmatprep.subr.mxu0 %v6555_v41  ;;  %2948 = vmatpush2.msra.mxu1 %v2839_v43  ;;  %6558 = vst [vmem:[#allocation47_spill] sm:$0xff] %v5464_v16  ;;  %v5594_v43 = vpop.f32.mrf.mxu1 }
 0x27b   :  { %3143 = vmatpush1.msra.mxu0 %v5445_v12  ;;  %2949 = vmatprep.subr.mxu1 %v6555_v41 }
 0x27c   :  { %1800 = vmatmul.mubr.f32.gmra.mxu0 %v4529_v19  ;;  %3144 = vmatprep.subr.mxu0 %v6555_v41  ;;  %v2836_v19 = vld [vmem:[%s6441_s7 + $0x80] sm:$0xff] }
 0x27d   :  { %1805 = vmatprep.mubr.f32.mxu0 %v4533_v22  ;;  %2950 = vmatpush2.msra.mxu1 %v2838_v14  ;;  %v5483_v22 = vld [vmem:[%s6441_s7 + $0x100] sm:$0xff]  ;;  %v5600_v14 = vpop.f32.mrf.mxu1 }
 0x27e   :  { %3145 = vmatpush1.msra.mxu0 %v5464_v16  ;;  %2951 = vmatprep.subr.mxu1 %v6555_v41  ;;  %6559 = vst [vmem:[#allocation48_spill] sm:$0xff] %v5483_v22 }
 0x27f   :  { %2952 = vmatpush2.msra.mxu1 %v2837_v1  ;;  %3146 = vmatprep.subr.mxu0 %v6555_v41  ;;  %v5607_v1 = vld [vmem:[%s6441_s7 + $0x1a0] sm:$0xff] }
 0x280   :  { %1806 = vmatmul.mubr.f32.gmra.mxu0 %v4539_v26  ;;  %2953 = vmatprep.subr.mxu1 %v6555_v41  ;;  %v6561_v26 = vld [vmem:[#allocation5_spill] sm:$0xff]  ;;  %6585 = vst [vmem:[#allocation15_spill] sm:$0xff] %v5607_v1 }
 0x281   :  { %1811 = vmatprep.mubr.f32.mxu0 %v4545_v30  ;;  %2954 = vmatpush2.msra.mxu1 %v2836_v19  ;;  %v5502_v30 = vld [vmem:[%s6441_s7 + $0x1f0] sm:$0xff]  ;;  %v5609_v19 = vpop.f32.mrf.mxu1 }
 0x282   :  { %3147 = vmatpush1.msra.mxu0 %v5483_v22  ;;  %3642 = vmatprep.subr.mxu1 %v6555_v41  ;;  %6562 = vst [vmem:[#allocation5_spill] sm:$0xff] %v5502_v30 }
 0x283   :  { %3148 = vmatprep.subr.mxu0 %v6555_v41 }
 0x284   :  { %1812 = vmatmul.mubr.f32.gmra.mxu0 %v6561_v26  ;;  %v2870_v26 = vld [vmem:[%s6441_s7 + $0x190] sm:$0xff] }
 0x285   :  { %1817 = vmatprep.mubr.f32.mxu0 %v6563_v7  ;;  %3149 = vmatpush2.msra.mxu0 %v5493_v34  ;;  %v5621_v7 = vpop.f32.mrf.mxu1  ;;  %v5705_v34 = vld [vmem:[%s6442_s6] sm:$0xf] }
 0x286   :  { %3150 = vmatprep.subr.mxu0 %v6555_v41 }
 0x287   :  { %3151 = vmatpush2.msra.mxu0 %v5502_v30 }
 0x288   :  { %1818 = vmatmul.mubr.f32.gmra.mxu0 %v6565_v23  ;;  %3152 = vmatprep.subr.mxu0 %v6555_v41  ;;  %v2869_v23 = vld [vmem:[%s6441_s7 + $0x188] sm:$0xff] }
 0x289   :  { %1823 = vmatprep.mubr.f32.mxu0 %v6567_v32  ;;  %3153 = vmatpush2.msra.mxu0 %v5512_v5  ;;  %v6588_v32 = vld [vmem:[#allocation21_spill] sm:$0xff] }
 0x28a   :  { %3154 = vmatprep.subr.mxu0 %v6555_v41 }
 0x28b   :  { %3155 = vmatpush2.msra.mxu0 %v5520_v21 }
 0x28c   :  { %1824 = vmatmul.mubr.f32.gmra.mxu0 %v6569_v38  ;;  %3156 = vmatprep.subr.mxu0 %v6555_v41  ;;  %v6589_v38 = vld [vmem:[#allocation22_spill] sm:$0xff] }
 0x28d   :  { %1829 = vmatprep.mubr.f32.mxu0 %v6571_v46  ;;  %3157 = vmatpush2.msra.mxu0 %v5530_v15  ;;  %v2868_v46 = vld [vmem:[%s6441_s7 + $0x180] sm:$0xff] }
 0x28e   :  { %3158 = vmatprep.subr.mxu0 %v6555_v41 }
 0x28f   :  { %3159 = vmatpush2.msra.mxu0 %v5538_v61 }
 0x290   :  { %1830 = vmatmul.mubr.f32.gmra.mxu0 %v6573_v60  ;;  %3160 = vmatprep.subr.mxu0 %v6555_v41  ;;  %v5633_v60 = vpop.f32.mrf.mxu1 }
 0x291   :  { %1835 = vmatprep.mubr.f32.mxu0 %v6574_v53  ;;  %3161 = vmatpush2.msra.mxu0 %v5548_v24  ;;  %v6590_v53 = vld [vmem:[#allocation23_spill] sm:$0xff] }
 0x292   :  { %3162 = vmatprep.subr.mxu0 %v6555_v41 }
 0x293   :  { %3163 = vmatpush2.msra.mxu0 %v5558_v57 }
 0x294   :  { %1836 = vmatmul.mubr.f32.gmra.mxu0 %v6576_v9  ;;  %3164 = vmatprep.subr.mxu0 %v6555_v41  ;;  %v6591_v9 = vld [vmem:[#allocation24_spill] sm:$0xff] }
 0x295   :  { %1841 = vmatprep.mubr.f32.mxu0 %v6577_v36  ;;  %3165 = vmatpush2.msra.mxu0 %v5570_v48  ;;  %v5638_v36 = vpop.f32.mrf.mxu1 }
 0x296   :  { %3166 = vmatprep.subr.mxu0 %v6555_v41 }
 0x297   :  { %3167 = vmatpush2.msra.mxu0 %v5581_v59  ;;  %v6616_v59 = vld [vmem:[#allocation44_spill] sm:$0xff] }
 0x298   :  { %1842 = vmatmul.mubr.f32.gmra.mxu0 %v6579_v51  ;;  %3168 = vmatprep.subr.mxu0 %v6555_v41  ;;  %v6592_v51 = vld [vmem:[#allocation25_spill] sm:$0xff] }
 0x299   :  { %1847 = vmatprep.mubr.f32.mxu0 %v6580_v55  ;;  %3169 = vmatpush2.msra.mxu0 %v5592_v10  ;;  %v6593_v55 = vld [vmem:[#allocation26_spill] sm:$0xff] }
 0x29a   :  { %3170 = vmatprep.subr.mxu0 %v6555_v41  ;;  %v6615_v10 = vld [vmem:[#allocation42_spill] sm:$0xff]  ;;  %6623 = vst [vmem:[#allocation26_spill] sm:$0xff] %v5705_v34 }
 0x29b   :  { %3171 = vmatpush2.msra.mxu0 %v5607_v1  ;;  %v6611_v1 = vld [vmem:[#allocation41_spill] sm:$0xff] }
 0x29c   :  { %1848 = vmatmul.mubr.f32.gmra.mxu0 %v6582_v6  ;;  %3172 = vmatprep.subr.mxu0 %v6555_v41  ;;  %v5642_v6 = vpop.f32.mrf.mxu1 }
 0x29d   :  { %1853 = vmatprep.mubr.f32.mxu0 %v4629_v18  ;;  %v6584_v18 = vld [vmem:[#allocation18_spill] sm:$0xff] }
 0x2a0   :  { %1854 = vmatmul.mubr.f32.gmra.mxu0 %v4633_v25  ;;  %v2871_v25 = vld [vmem:[%s6441_s7 + $0x198] sm:$0xff] }
 0x2a1   :  { %1859 = vmatprep.mubr.f32.mxu0 %v4637_v39  ;;  %v6586_v39 = vld [vmem:[#allocation19_spill] sm:$0xff]  ;;  %3173 = vmatpush2.msra.mxu0 %v2871_v25  ;;  %v6595_v25 = vld [vmem:[#allocation28_spill] sm:$0xff] }
 0x2a2   :  { %3174 = vmatprep.subr.mxu0 %v6555_v41 }
 0x2a3   :  { %3175 = vmatpush2.msra.mxu0 %v2870_v26  ;;  %v6597_v26 = vld [vmem:[#allocation30_spill] sm:$0xff] }
 0x2a4   :  { %1860 = vmatmul.mubr.f32.gmra.mxu0 %v4643_v13  ;;  %v6587_v13 = vld [vmem:[#allocation20_spill] sm:$0xff]  ;;  %3176 = vmatprep.subr.mxu0 %v6555_v41 }
 0x2a5   :  { %1865 = vmatprep.mubr.f32.mxu0 %v6584_v18  ;;  %3177 = vmatpush2.msra.mxu0 %v2869_v23  ;;  %v6594_v18 = vld [vmem:[#allocation27_spill] sm:$0xff] }
 0x2a6   :  { %3178 = vmatprep.subr.mxu0 %v6555_v41 }
 0x2a7   :  { %3179 = vmatpush2.msra.mxu0 %v2868_v46 }
 0x2a8   :  { %1866 = vmatmul.mubr.f32.gmra.mxu0 %v6586_v39  ;;  %v5646_v39 = vpop.f32.mrf.mxu1 }
 0x2a9   :  { %1871 = vmatprep.mubr.f32.mxu0 %v6587_v13  ;;  %v6596_v13 = vld [vmem:[#allocation29_spill] sm:$0xff] }
 0x2aa   :  { %v5650_v23 = vpop.f32.mrf.mxu1 }
 0x2ab   :  { %6598 = vst [vmem:[#allocation17_spill] sm:$0xff] %v5650_v23 }
 0x2ac   :  { %1872 = vmatmul.mubr.f32.gmra.mxu0 %v6588_v32  ;;  %v6599_v32 = vld [vmem:[#allocation31_spill] sm:$0xff]  ;;  %v5654_v46 = vpop.f32.mrf.mxu1 }
 0x2ad   :  { %1877 = vmatprep.mubr.f32.mxu0 %v6589_v38  ;;  %v6600_v38 = vld [vmem:[#allocation32_spill] sm:$0xff] }
 0x2b0   :  { %1878 = vmatmul.mubr.f32.gmra.mxu0 %v6590_v53  ;;  %v6601_v53 = vld [vmem:[#allocation33_spill] sm:$0xff] }
 0x2b1   :  { %1883 = vmatprep.mubr.f32.mxu0 %v6591_v9  ;;  %v6602_v9 = vld [vmem:[#allocation34_spill] sm:$0xff] }
 0x2b4   :  { %1884 = vmatmul.mubr.f32.gmra.mxu0 %v6592_v51  ;;  %v5658_v51 = vpop.f32.mrf.mxu1 }
 0x2b5   :  { %1889 = vmatprep.mubr.f32.mxu0 %v6593_v55  ;;  %6603 = vst [vmem:[#allocation16_spill] sm:$0xff] %v5658_v51  ;;  %v6604_v55 = vld [vmem:[#allocation35_spill] sm:$0xff] }
 0x2b8   :  { %1890 = vmatmul.mubr.f32.gmra.mxu0 %v6594_v18  ;;  %v6605_v18 = vld [vmem:[#allocation37_spill] sm:$0xff] }
 0x2b9   :  { %1895 = vmatprep.mubr.f32.mxu0 %v6595_v25  ;;  %v5662_v25 = vpop.f32.mrf.mxu1 }
 0x2ba   :  { %6606 = vst [vmem:[#allocation18_spill] sm:$0xff] %v5662_v25 }
 0x2bc   :  { %1896 = vmatmul.mubr.f32.gmra.mxu0 %v6596_v13  ;;  %v6607_v13 = vld [vmem:[#allocation36_spill] sm:$0xff] }
 0x2bd   :  { %1901 = vmatprep.mubr.f32.mxu0 %v6597_v26  ;;  %v6608_v26 = vld [vmem:[#allocation38_spill] sm:$0xff] }
 0x2c0   :  { %1902 = vmatmul.mubr.f32.gmra.mxu0 %v6599_v32  ;;  %v5666_v32 = vpop.f32.mrf.mxu1 }
 0x2c1   :  { %1907 = vmatprep.mubr.f32.mxu0 %v6600_v38  ;;  %6609 = vst [vmem:[#allocation19_spill] sm:$0xff] %v5666_v32  ;;  %v6610_v38 = vld [vmem:[#allocation39_spill] sm:$0xff]  ;;  %v6626_v32 = vld [vmem:[#allocation4_spill] sm:$0xff] }
 0x2c4   :  { %1908 = vmatmul.mubr.f32.gmra.mxu0 %v6601_v53  ;;  %v5670_v53 = vpop.f32.mrf.mxu1 }
 0x2c5   :  { %1913 = vmatprep.mubr.f32.mxu0 %v6602_v9  ;;  %6612 = vst [vmem:[#allocation20_spill] sm:$0xff] %v5670_v53  ;;  %v6613_v9 = vld [vmem:[#allocation40_spill] sm:$0xff] }
 0x2c8   :  { %1914 = vmatmul.mubr.f32.gmra.mxu0 %v6604_v55  ;;  %v5674_v55 = vpop.f32.mrf.mxu1 }
 0x2c9   :  { %1919 = vmatprep.mubr.f32.mxu0 %v6605_v18  ;;  %6614 = vst [vmem:[#allocation21_spill] sm:$0xff] %v5674_v55  ;;  %v5676_v18 = vpop.f32.mrf.mxu0 }
 0x2ca   :  { %v5680_v48 = vpop.f32.mrf.mxu1 }
 0x2cb   :  { %6617 = vst [vmem:[#allocation22_spill] sm:$0xff] %v5680_v48 }
 0x2cc   :  { %1920 = vmatmul.mubr.f32.gmra.mxu0 %v6607_v13  ;;  %v3713_v13 = vmov 1966171168  }
 0x2cd   :  { %1925 = vmatprep.mubr.f32.mxu0 %v6608_v26  ;;  %v1963_v26 = vunpack.c.l.s4 %v3713_v13  ;;  %v6620_v13 = vld [vmem:[#allocation2_spill] sm:$0xff] }
 0x2d0   :  { %1926 = vmatmul.mubr.f32.gmra.mxu0 %v6610_v38  ;;  %v5682_v38 = vpop.f32.mrf.mxu0 }
 0x2d1   :  { %1931 = vmatprep.mubr.f32.mxu0 %v6611_v1  ;;  %v6618_v1 = vld [vmem:[#allocation43_spill] sm:$0xff] }
 0x2d4   :  { %1932 = vmatmul.mubr.f32.gmra.mxu0 %v6613_v9  ;;  %v1964_v9 = vunpack.c.0.s8 %v1963_v26 }
 0x2d5   :  { %1937 = vmatprep.mubr.f32.mxu0 %v4925_v29  ;;  %v5687_v29 = vpop.f32.mrf.mxu1 }
 0x2d6   :  { %6619 = vst [vmem:[#allocation23_spill] sm:$0xff] %v5687_v29  ;;  %v5694_v15 = vsub.s32 %v1964_v9, %v6620_v13 }
 0x2d8   :  { %1938 = vmatmul.mubr.f32.gmra.mxu0 %v6615_v10  ;;  %v1958_v10 = vcombine.low %v5676_v18, %v5682_v38 }
 0x2d9   :  { %1943 = vmatprep.mubr.f32.mxu0 %v6616_v59  ;;  %v5696_v59 = vpop.f32.mrf.mxu1 }
 0x2da   :  { %6621 = vst [vmem:[#allocation24_spill] sm:$0xff] %v5696_v59 }
 0x2db   :  { %v5700_v26 = vpop.f32.mrf.mxu1 }
 0x2dc   :  { %1944 = vmatmul.mubr.f32.gmra.mxu0 %v6618_v1  ;;  %v5685_v57 = vpop.f32.mrf.mxu0  ;;  %v1968_v1 = vrot.slane %v1958_v10, %v5694_v15  ;;  %6622 = vst [vmem:[#allocation25_spill] sm:$0xff] %v5700_v26  ;;  %v6625_v10 = vld [vmem:[#allocation3_spill] sm:$0xff]  ;;  %v5719_v26 = vrot.slane %v5705_v34, %v6626_v32 }
 0x2dd   :  { %v5713_v48 = vpop.f32.mrf.mxu1 }
 0x2de   :  { %v5689_v24 = vpop.f32.mrf.mxu0  ;;  %6624 = vst [vmem:[#allocation27_spill] sm:$0xff] %v5713_v48 }
 0x2df   :  { %v5732_v16 = vpop.f32.mrf.mxu1 }
 0x2e0   :  { %v1425_v61 = vpop.f32.mrf.mxu0 }
 0x2e1   :  { %v5741_v23 = vpop.f32.mrf.mxu1 }
 0x2e2   :  { %v1427_v21 = vpop.f32.mrf.mxu0 }
 0x2e3   :  { %v1960_v5 = vcombine.low %v1425_v61, %v1427_v21 }
 0x2e5   :  { %v1982_v55 = vrot.slane %v1960_v5, %v5694_v15 }
 0x2e7   :  { %v1990_v29 = vcombine.low %v1968_v1, %v1982_v55  ;;  %v1991_v30 = vcombine.high %v1968_v1, %v1982_v55  ;;  %v5723_v55 = vrot.slane %v5705_v34, %v6625_v10 }
 0x2e9   :  { %v5708_v9 = vrot.slane %v1990_v29, %v5694_v15  ;;  %v5711_v59 = vrot.slane %v1991_v30, %v5694_v15 }
 0x2eb   :  { %v2101_v5 = vrot.slane %v5708_v9, %v6625_v10  ;;  %v2097_v29 = vrot.slane %v5708_v9, %v6626_v32  ;;  %v2117_v30 = vrot.slane %v5711_v59, %v6625_v10  ;;  %v2113_v34 = vrot.slane %v5711_v59, %v6626_v32 }
 0x2ed   :  { %v2415_v1 = vadd.f32 %v2101_v5, %v5361_v2  ;;  %v2414_v48 = vadd.f32 %v2097_v29, %v5339_v37  ;;  %v2419_v22 = vadd.f32 %v2101_v5, %v5405_v40  ;;  %v2418_v53 = vadd.f32 %v2097_v29, %v5383_v20 }
 0x2ee   :  { %v2423_v45 = vadd.f32 %v2117_v30, %v5452_v35  ;;  %v1961_v2 = vcombine.high %v1425_v61, %v1427_v21  ;;  %v2422_v20 = vadd.f32 %v2113_v34, %v5427_v0  ;;  %v1959_v35 = vcombine.high %v5676_v18, %v5682_v38 }
 0x2ef   :  { %v2565_v51 = vadd.f32 %v5723_v55, %v2415_v1  ;;  %v2564_v13 = vadd.f32 %v5719_v26, %v2414_v48  ;;  %v2569_v12 = vadd.f32 %v5723_v55, %v2419_v22  ;;  %v2568_v40 = vadd.f32 %v5719_v26, %v2418_v53 }
 0x2f0   :  { %v2573_v29 = vadd.f32 %v5723_v55, %v2423_v45  ;;  %v2427_v1 = vadd.f32 %v2117_v30, %v5487_v11  ;;  %v5749_v22 = vcombine.high %v5708_v9, %v5708_v9  ;;  %v5754_v21 = vrot.slane %v1961_v2, %v5694_v15 }
 0x2f1   :  { %v2693_v25 = vmax.f32 %v2565_v51, 0.0  ;;  %v2692_v37 = vmax.f32 %v2564_v13, 0.0  ;;  %v2697_v5 = vmax.f32 %v2569_v12, 0.0  ;;  %v5758_v12 = vpop.f32.mrf.mxu1  ;;  %v2696_v45 = vmax.f32 %v2568_v40, 0.0 }
 0x2f2   :  { %v2133_v0 = vrot.slane %v5749_v22, %v6625_v10  ;;  %v2572_v11 = vadd.f32 %v5719_v26, %v2422_v20  ;;  %v2426_v61 = vadd.f32 %v2113_v34, %v5471_v31  ;;  %v2129_v48 = vrot.slane %v5749_v22, %v6626_v32 }
 0x2f3   :  { %2955 = vmatprep.mubr.f32.mxu1 %v2693_v25  ;;  %v2701_v51 = vmax.f32 %v2573_v29, 0.0  ;;  %v2577_v25 = vadd.f32 %v5723_v55, %v2427_v1  ;;  %v5769_v18 = vcombine.high %v5711_v59, %v5711_v59  ;;  %v1975_v38 = vrot.slane %v1959_v35, %v5694_v15  ;;  %v5773_v31 = vpop.f32.mrf.mxu1 }
 0x2f4   :  { %2956 = vmatmul.mubr.f32.vlgmr.msra.gmra.mxu1 %v2692_v37  ;;  %v2431_v53 = vadd.f32 %v2133_v0, %v5524_v28  ;;  %v2576_v13 = vadd.f32 %v5719_v26, %v2426_v61  ;;  %v2430_v30 = vadd.f32 %v2129_v48, %v5506_v47  ;;  %v2435_v37 = vadd.f32 %v2133_v0, %v5560_v17 }
 0x2f5   :  { %2960 = vmatprep.mubr.f32.mxu1 %v2697_v5  ;;  %3674 = vmatpush1.msra.mxu1 %v5304_v56  ;;  %v1992_v34 = vcombine.low %v1975_v38, %v5754_v21  ;;  %v2700_v56 = vmax.f32 %v2572_v11, 0.0  ;;  %v2705_v28 = vmax.f32 %v2577_v25, 0.0  ;;  %v2149_v40 = vrot.slane %v5769_v18, %v6625_v10  ;;  %v5784_v20 = vpop.f32.mrf.mxu1 }
 0x2f6   :  { %3643 = vmatprep.subr.mxu1 %v6555_v41  ;;  %v2581_v2 = vadd.f32 %v5723_v55, %v2431_v53  ;;  %v2704_v5 = vmax.f32 %v2576_v13, 0.0  ;;  %v2580_v29 = vadd.f32 %v5719_v26, %v2430_v30  ;;  %v2434_v47 = vadd.f32 %v2129_v48, %v5542_v42  ;;  %v5826_v13 = vpop.f32.mrf.mxu0 }
 0x2f7   :  { %3675 = vmatpush1.msra.mxu1 %v5315_v52  ;;  %v2145_v52 = vrot.slane %v5769_v18, %v6626_v32  ;;  %v5792_v17 = vrot.slane %v1992_v34, %v5694_v15  ;;  %v2585_v35 = vadd.f32 %v5723_v55, %v2435_v37  ;;  %v2439_v0 = vadd.f32 %v2149_v40, %v5583_v63  ;;  %v5798_v42 = vpop.f32.mrf.mxu1 }
 0x2f8   :  { %2961 = vmatmul.mubr.f32.gmra.mxu1 %v2696_v45  ;;  %3644 = vmatprep.subr.mxu1 %v6555_v41  ;;  %v2709_v1 = vmax.f32 %v2581_v2, 0.0  ;;  %v1993_v45 = vcombine.high %v1975_v38, %v5754_v21  ;;  %v2708_v11 = vmax.f32 %v2580_v29, 0.0 }
 0x2f9   :  { %2965 = vmatprep.mubr.f32.mxu1 %v2701_v51  ;;  %3676 = vmatpush1.msra.mxu1 %v5323_v33  ;;  %v2584_v33 = vadd.f32 %v5719_v26, %v2434_v47  ;;  %v2438_v61 = vadd.f32 %v2145_v52, %v5572_v44  ;;  %v2713_v48 = vmax.f32 %v2585_v35, 0.0  ;;  %v2589_v63 = vadd.f32 %v5723_v55, %v2439_v0 }
 0x2fa   :  { %3645 = vmatprep.subr.mxu1 %v6555_v41  ;;  %v2443_v51 = vadd.f32 %v2149_v40, %v5600_v14  ;;  %v2165_v25 = vrot.slane %v5792_v17, %v6625_v10  ;;  %v2442_v53 = vadd.f32 %v2145_v52, %v5594_v43  ;;  %v2161_v38 = vrot.slane %v5792_v17, %v6626_v32 }
 0x2fb   :  { %3677 = vmatpush1.msra.mxu1 %v5335_v54  ;;  %v5810_v54 = vpop.f32.mrf.mxu1  ;;  %v2712_v21 = vmax.f32 %v2584_v33, 0.0  ;;  %v2588_v44 = vadd.f32 %v5719_v26, %v2438_v61  ;;  %v5818_v14 = vrot.slane %v1993_v45, %v5694_v15  ;;  %v5850_v35 = vcombine.high %v5792_v17, %v5792_v17 }
 0x2fc   :  { %2966 = vmatmul.mubr.f32.gmra.mxu1 %v2700_v56  ;;  %3646 = vmatprep.subr.mxu1 %v6555_v41  ;;  %v2593_v34 = vadd.f32 %v5723_v55, %v2443_v51  ;;  %v2447_v56 = vadd.f32 %v2165_v25, %v5621_v7  ;;  %v2451_v37 = vadd.f32 %v2165_v25, %v5638_v36 }
 0x2fd   :  { %2970 = vmatprep.mubr.f32.mxu1 %v2705_v28  ;;  %3678 = vmatpush1.msra.mxu1 %v5345_v49  ;;  %v2717_v49 = vmax.f32 %v2589_v63, 0.0  ;;  %v5824_v43 = vpop.f32.mrf.mxu1  ;;  %v2716_v30 = vmax.f32 %v2588_v44, 0.0  ;;  %v2446_v28 = vadd.f32 %v2161_v38, %v5609_v19  ;;  %v2181_v40 = vrot.slane %v5818_v14, %v6625_v10 }
 0x2fe   :  { %3647 = vmatprep.subr.mxu1 %v6555_v41  ;;  %v2721_v2 = vmax.f32 %v2593_v34, 0.0  ;;  %v2597_v7 = vadd.f32 %v5723_v55, %v2447_v56  ;;  %v2450_v47 = vadd.f32 %v2161_v38, %v5633_v60  ;;  %v2177_v36 = vrot.slane %v5818_v14, %v6626_v32  ;;  %v6629_v56 = vld [vmem:[#allocation45_spill] sm:$0xff] }
 0x2ff   :  { %3679 = vmatpush1.msra.mxu1 %v5357_v58  ;;  %v2592_v58 = vadd.f32 %v5719_v26, %v2442_v53  ;;  %v2596_v29 = vadd.f32 %v5719_v26, %v2446_v28  ;;  %v2026_v60 = vcombine.low %v5685_v57, %v5689_v24  ;;  %v2197_v63 = vrot.slane %v5850_v35, %v6625_v10 }
 0x300   :  { %2971 = vmatmul.mubr.f32.gmra.mxu1 %v2704_v5  ;;  %3648 = vmatprep.subr.mxu1 %v6555_v41  ;;  %v5839_v5 = vpop.f32.mrf.mxu0  ;;  %v2725_v52 = vmax.f32 %v2597_v7, 0.0  ;;  %v6631_v7 = vld [vmem:[#allocation2_spill] sm:$0xff] }
 0x301   :  { %2975 = vmatprep.mubr.f32.mxu1 %v2709_v1  ;;  %3680 = vmatpush1.msra.mxu1 %v5367_v27  ;;  %v5837_v27 = vpop.f32.mrf.mxu1  ;;  %v2720_v19 = vmax.f32 %v2592_v58, 0.0  ;;  %v2455_v1 = vadd.f32 %v2181_v40, %v5646_v39  ;;  %v2028_v0 = vcombine.low %v5826_v13, %v5839_v5  ;;  %v2724_v45 = vmax.f32 %v2596_v29, 0.0  ;;  %v6630_v58 = vld [vmem:[#allocation46_spill] sm:$0xff] }
 0x302   :  { %3649 = vmatprep.subr.mxu1 %v6555_v41  ;;  %v2600_v39 = vadd.f32 %v5719_v26, %v2450_v47 }
 0x303   :  { %3681 = vmatpush1.msra.mxu1 %v5379_v62  ;;  %v2601_v62 = vadd.f32 %v5723_v55, %v2451_v37  ;;  %v2605_v61 = vadd.f32 %v5723_v55, %v2455_v1  ;;  %v5897_v37 = vsub.s32 2, %v6631_v7 }
 0x304   :  { %2976 = vmatmul.mubr.f32.gmra.mxu1 %v2708_v11  ;;  %3650 = vmatprep.subr.mxu1 %v6555_v41  ;;  %v2454_v11 = vadd.f32 %v2177_v36, %v5642_v6  ;;  %v5873_v6 = vrot.slane %v2028_v0, %v5694_v15 }
 0x305   :  { %2980 = vmatprep.mubr.f32.mxu1 %v2713_v48  ;;  %3682 = vmatpush1.msra.mxu1 %v5389_v50  ;;  %v5858_v50 = vpop.f32.mrf.mxu1  ;;  %v2729_v33 = vmax.f32 %v2601_v62, 0.0  ;;  %v2459_v48 = vadd.f32 %v2181_v40, %v5654_v46  ;;  %v2728_v46 = vmax.f32 %v2600_v39, 0.0  ;;  %v2733_v53 = vmax.f32 %v2605_v61, 0.0  ;;  %v6635_v39 = vld [vmem:[#allocation48_spill] sm:$0xff] }
 0x306   :  { %3651 = vmatprep.subr.mxu1 %v6555_v41  ;;  %v2604_v25 = vadd.f32 %v5719_v26, %v2454_v11 }
 0x307   :  { %3683 = vmatpush1.msra.mxu1 %v5401_v4  ;;  %v5870_v4 = vrot.slane %v2026_v60, %v5694_v15  ;;  %v5876_v51 = vpop.f32.mrf.mxu1  ;;  %v2609_v38 = vadd.f32 %v5723_v55, %v2459_v48  ;;  %v6634_v60 = vld [vmem:[#allocation47_spill] sm:$0xff] }
 0x308   :  { %2981 = vmatmul.mubr.f32.gmra.mxu1 %v2712_v21  ;;  %3652 = vmatprep.subr.mxu1 %v6555_v41  ;;  %v6627_v21 = vld [vmem:[#allocation17_spill] sm:$0xff]  ;;  %v6636_v48 = vld [vmem:[#allocation19_spill] sm:$0xff] }
 0x309   :  { %2985 = vmatprep.mubr.f32.mxu1 %v2717_v49  ;;  %3684 = vmatpush1.msra.mxu1 %v5411_v3  ;;  %v2458_v44 = vadd.f32 %v2177_v36, %v6627_v21  ;;  %v2193_v3 = vrot.slane %v5850_v35, %v6626_v32  ;;  %v6628_v49 = vld [vmem:[#allocation18_spill] sm:$0xff]  ;;  %v5894_v28 = vpop.f32.mrf.mxu1  ;;  %v2737_v47 = vmax.f32 %v2609_v38, 0.0 }
 0x30a   :  { %3653 = vmatprep.subr.mxu1 %v6555_v41  ;;  %v2463_v34 = vadd.f32 %v2197_v63, %v6628_v49  ;;  %v6638_v49 = vld [vmem:[#allocation49_spill] sm:$0xff] }
 0x30b   :  { %3685 = vmatpush1.msra.mxu1 %v5423_v8  ;;  %v5887_v8 = vcombine.high %v5818_v14, %v5818_v14  ;;  %v2608_v40 = vadd.f32 %v5719_v26, %v2458_v44  ;;  %v5915_v11 = vpop.f32.mrf.mxu1 }
 0x30c   :  { %2986 = vmatmul.mubr.f32.gmra.mxu1 %v2716_v30  ;;  %3654 = vmatprep.subr.mxu1 %v6555_v41  ;;  %v2058_v30 = vcombine.low %v5870_v4, %v5873_v6  ;;  %v2613_v36 = vadd.f32 %v5723_v55, %v2463_v34  ;;  %v2059_v34 = vcombine.high %v5870_v4, %v5873_v6 }
 0x30d   :  { %2990 = vmatprep.mubr.f32.mxu1 %v2721_v2  ;;  %3686 = vmatpush1.msra.mxu1 %v6629_v56  ;;  %v2732_v2 = vmax.f32 %v2604_v25, 0.0  ;;  %v2213_v1 = vrot.slane %v5887_v8, %v6625_v10  ;;  %v2105_v25 = vrot.slane %v5708_v9, %v5897_v37  ;;  %v5941_v4 = vpop.f32.mrf.mxu1 }
 0x30e   :  { %3655 = vmatprep.subr.mxu1 %v6555_v41  ;;  %v5909_v0 = vrot.slane %v2058_v30, %v5694_v15  ;;  %v2741_v21 = vmax.f32 %v2613_v36, 0.0 }
 0x30f   :  { %3687 = vmatpush1.msra.mxu1 %v6630_v58 }
 0x310   :  { %2991 = vmatmul.mubr.f32.gmra.mxu1 %v2720_v19  ;;  %v6632_v19 = vld [vmem:[#allocation16_spill] sm:$0xff]  ;;  %3656 = vmatprep.subr.mxu1 %v6555_v41 }
 0x311   :  { %2995 = vmatprep.mubr.f32.mxu1 %v2725_v52  ;;  %v2462_v29 = vadd.f32 %v2193_v3, %v6632_v19  ;;  %v6633_v52 = vld [vmem:[#allocation20_spill] sm:$0xff]  ;;  %3688 = vmatpush1.msra.mxu1 %v6634_v60 }
 0x312   :  { %v2467_v62 = vadd.f32 %v2197_v63, %v6633_v52  ;;  %3657 = vmatprep.subr.mxu1 %v6555_v41  ;;  %v2466_v63 = vadd.f32 %v2193_v3, %v6636_v48  ;;  %v6639_v3 = vld [vmem:[#allocation26_spill] sm:$0xff]  ;;  %v6642_v52 = vld [vmem:[#allocation24_spill] sm:$0xff] }
 0x313   :  { %3689 = vmatpush1.msra.mxu1 %v6635_v39  ;;  %v2612_v61 = vadd.f32 %v5719_v26, %v2462_v29  ;;  %v5931_v30 = vrot.slane %v6639_v3, %v5897_v37  ;;  %v6643_v48 = vld [vmem:[#allocation6_spill] sm:$0xff] }
 0x314   :  { %2996 = vmatmul.mubr.f32.gmra.mxu1 %v2724_v45  ;;  %v5912_v45 = vsub.s32 3, %v6631_v7  ;;  %3658 = vmatprep.subr.mxu1 %v6555_v41  ;;  %v2617_v44 = vadd.f32 %v5723_v55, %v2467_v62  ;;  %v2616_v29 = vadd.f32 %v5719_v26, %v2466_v63  ;;  %v2475_v62 = vadd.f32 %v2213_v1, %v6642_v52  ;;  %v6646_v52 = vld [vmem:[#allocation27_spill] sm:$0xff] }
 0x315   :  { %3000 = vmatprep.mubr.f32.mxu1 %v2729_v33  ;;  %v2736_v33 = vmax.f32 %v2608_v40, 0.0  ;;  %3690 = vmatpush2.msra.mxu1 %v6638_v49  ;;  %v6640_v40 = vld [vmem:[#allocation5_spill] sm:$0xff]  ;;  %v2740_v19 = vmax.f32 %v2612_v61, 0.0  ;;  %v2027_v61 = vcombine.high %v5685_v57, %v5689_v24  ;;  %v5954_v63 = vrot.slane %v2059_v34, %v5694_v15  ;;  %v6644_v49 = vld [vmem:[#allocation23_spill] sm:$0xff] }
 0x316   :  { %3659 = vmatprep.subr.mxu1 %v6555_v41  ;;  %v5938_v7 = vrot.slane %v6639_v3, %v5912_v45  ;;  %v2745_v60 = vmax.f32 %v2617_v44, 0.0  ;;  %v2121_v44 = vrot.slane %v5711_v59, %v5897_v37  ;;  %v5962_v3 = vpop.f32.mrf.mxu1  ;;  %v2744_v57 = vmax.f32 %v2616_v29, 0.0 }
 0x317   :  { %3691 = vmatpush2.msra.mxu1 %v6640_v40  ;;  %v2225_v40 = vrot.slane %v5909_v0, %v6626_v32 }
 0x318   :  { %3001 = vmatmul.mubr.f32.gmra.mxu1 %v2728_v46  ;;  %v2209_v46 = vrot.slane %v5887_v8, %v6626_v32  ;;  %3660 = vmatprep.subr.mxu1 %v6555_v41 }
 0x319   :  { %3005 = vmatprep.mubr.f32.mxu1 %v2733_v53  ;;  %v6637_v53 = vld [vmem:[#allocation22_spill] sm:$0xff]  ;;  %3692 = vmatpush2.msra.mxu1 %v6643_v48 }
 0x31a   :  { %v2471_v38 = vadd.f32 %v2213_v1, %v6637_v53  ;;  %3661 = vmatprep.subr.mxu1 %v6555_v41 }
 0x31c   :  { %3006 = vmatmul.mubr.f32.gmra.mxu1 %v2732_v2  ;;  %v2109_v2 = vrot.slane %v5708_v9, %v5912_v45  ;;  %v2621_v39 = vadd.f32 %v5723_v55, %v2471_v38 }
 0x31d   :  { %3010 = vmatprep.mubr.f32.mxu1 %v2737_v47  ;;  %v6641_v47 = vld [vmem:[#allocation21_spill] sm:$0xff] }
 0x31e   :  { %v2470_v36 = vadd.f32 %v2209_v46, %v6641_v47  ;;  %v2749_v47 = vmax.f32 %v2621_v39, 0.0  ;;  %v5979_v39 = vpop.f32.mrf.mxu1 }
 0x320   :  { %v1759_v56 = vpop.f32.mrf.mxu0  ;;  %3011 = vmatmul.mubr.f32.gmra.mxu1 %v2736_v33  ;;  %v2229_v33 = vrot.slane %v5909_v0, %v6625_v10  ;;  %v2620_v34 = vadd.f32 %v5719_v26, %v2470_v36 }
 0x321   :  { %v2416_v58 = vadd.f32 %v2105_v25, %v1759_v56  ;;  %3015 = vmatprep.mubr.f32.mxu1 %v2741_v21  ;;  %v2474_v56 = vadd.f32 %v2209_v46, %v6644_v49 }
 0x322   :  { %v1761_v6 = vpop.f32.mrf.mxu0  ;;  %v2479_v46 = vadd.f32 %v2229_v33, %v6646_v52 }
 0x323   :  { %v2417_v9 = vadd.f32 %v2109_v2, %v1761_v6  ;;  %v2566_v21 = vadd.f32 %v5931_v30, %v2416_v58  ;;  %v2625_v58 = vadd.f32 %v5723_v55, %v2475_v62  ;;  %v6645_v6 = vld [vmem:[#allocation7_spill] sm:$0xff]  ;;  %v2483_v62 = vadd.f32 %v2229_v33, %v5741_v23 }
 0x324   :  { %v1765_v1 = vpop.f32.mrf.mxu0  ;;  %3016 = vmatmul.mubr.f32.gmra.mxu1 %v2740_v19  ;;  %v2245_v23 = vrot.slane %v5954_v63, %v6625_v10 }
 0x325   :  { %v2567_v53 = vadd.f32 %v5938_v7, %v2417_v9  ;;  %v2420_v38 = vadd.f32 %v2105_v25, %v1765_v1  ;;  %3020 = vmatprep.mubr.f32.mxu1 %v2745_v60  ;;  %3693 = vmatpush2.msra.mxu1 %v6645_v6  ;;  %v5972_v9 = vrot.slane %v2027_v61, %v5694_v15  ;;  %v2694_v29 = vmax.f32 %v2566_v21, 0.0 }
 0x326   :  { %v1767_v24 = vpop.f32.mrf.mxu0  ;;  %3662 = vmatprep.subr.mxu1 %v6555_v41  ;;  %v2748_v61 = vmax.f32 %v2620_v34, 0.0  ;;  %v2624_v21 = vadd.f32 %v5719_v26, %v2474_v56  ;;  %v2629_v6 = vadd.f32 %v5723_v55, %v2479_v46  ;;  %v2137_v56 = vrot.slane %v5749_v22, %v5897_v37  ;;  %v5993_v46 = vpop.f32.mrf.mxu1 }
 0x327   :  { %v2421_v19 = vadd.f32 %v2109_v2, %v1767_v24  ;;  %v2695_v25 = vmax.f32 %v2567_v53, 0.0  ;;  %v2570_v36 = vadd.f32 %v5931_v30, %v2420_v38  ;;  %v2125_v2 = vrot.slane %v5711_v59, %v5912_v45  ;;  %v6647_v38 = vld [vmem:[#allocation25_spill] sm:$0xff] }
 0x328   :  { %v1771_v60 = vpop.f32.mrf.mxu0  ;;  %3021 = vmatmul.mubr.f32.gmra.mxu1 %v2744_v57  ;;  %v2478_v49 = vadd.f32 %v2225_v40, %v6647_v38  ;;  %v2753_v57 = vmax.f32 %v2625_v58, 0.0  ;;  %v2633_v34 = vadd.f32 %v5723_v55, %v2483_v62  ;;  %v2482_v58 = vadd.f32 %v2225_v40, %v5732_v16  ;;  %v6649_v40 = vld [vmem:[#allocation8_spill] sm:$0xff] }
 0x329   :  { %v2571_v48 = vadd.f32 %v5938_v7, %v2421_v19  ;;  %v2424_v1 = vadd.f32 %v2121_v44, %v1771_v60  ;;  %3180 = vmatprep.mubr.f32.mxu0 %v2695_v25  ;;  %3025 = vmatprep.mubr.f32.mxu1 %v2749_v47  ;;  %v6648_v19 = vld [vmem:[#allocation9_spill] sm:$0xff]  ;;  %v2698_v59 = vmax.f32 %v2570_v36, 0.0  ;;  %v2752_v36 = vmax.f32 %v2624_v21, 0.0 }
 0x32a   :  { %v1773_v53 = vpop.f32.mrf.mxu0  ;;  %3181 = vmatmul.mubr.f32.vlgmr.msra.gmra.mxu0 %v2694_v29  ;;  %3694 = vmatpush2.msra.mxu1 %v6648_v19  ;;  %v6002_v16 = vcombine.high %v5909_v0, %v5909_v0  ;;  %v2029_v21 = vcombine.high %v5826_v13, %v5839_v5 }
 0x32b   :  { %v2425_v33 = vadd.f32 %v2125_v2, %v1773_v53  ;;  %v2699_v24 = vmax.f32 %v2571_v48, 0.0  ;;  %v2574_v25 = vadd.f32 %v5931_v30, %v2424_v1  ;;  %v2628_v48 = vadd.f32 %v5719_v26, %v2478_v49  ;;  %3663 = vmatprep.subr.mxu1 %v6555_v41 }
 0x32c   :  { %v1777_v47 = vpop.f32.mrf.mxu0  ;;  %3026 = vmatmul.mubr.f32.gmra.mxu1 %v2748_v61  ;;  %v2487_v1 = vadd.f32 %v2245_v23, %v5773_v31  ;;  %v2241_v53 = vrot.slane %v5954_v63, %v6626_v32  ;;  %v2757_v61 = vmax.f32 %v2629_v6, 0.0  ;;  %v6013_v6 = vpop.f32.mrf.mxu1 }
 0x32d   :  { %v2575_v52 = vadd.f32 %v5938_v7, %v2425_v33  ;;  %v2428_v29 = vadd.f32 %v2121_v44, %v1777_v47  ;;  %3185 = vmatprep.mubr.f32.mxu0 %v2699_v24  ;;  %3030 = vmatprep.mubr.f32.mxu1 %v2753_v57  ;;  %v2702_v38 = vmax.f32 %v2574_v25, 0.0  ;;  %v2141_v33 = vrot.slane %v5749_v22, %v5912_v45  ;;  %v6650_v25 = vld [vmem:[#allocation10_spill] sm:$0xff] }
 0x32e   :  { %v1779_v60 = vpop.f32.mrf.mxu0  ;;  %3186 = vmatmul.mubr.f32.gmra.mxu0 %v2698_v59  ;;  %3695 = vmatpush2.msra.mxu1 %v6649_v40  ;;  %v2632_v57 = vadd.f32 %v5719_v26, %v2482_v58  ;;  %v2756_v5 = vmax.f32 %v2628_v48, 0.0  ;;  %v2637_v19 = vadd.f32 %v5723_v55, %v2487_v1  ;;  %v2486_v59 = vadd.f32 %v2241_v53, %v5758_v12 }
 0x32f   :  { %v2429_v62 = vadd.f32 %v2125_v2, %v1779_v60  ;;  %v2703_v44 = vmax.f32 %v2575_v52, 0.0  ;;  %v2578_v31 = vadd.f32 %v5931_v30, %v2428_v29  ;;  %3664 = vmatprep.subr.mxu1 %v6555_v41  ;;  %v2491_v22 = vadd.f32 %v2245_v23, %v5798_v42 }
 0x330   :  { %v1783_v49 = vpop.f32.mrf.mxu0  ;;  %3031 = vmatmul.mubr.f32.gmra.mxu1 %v2752_v36  ;;  %v2761_v29 = vmax.f32 %v2633_v34, 0.0  ;;  %v2261_v60 = vrot.slane %v6002_v16, %v6625_v10  ;;  %v6023_v58 = vrot.slane %v2029_v21, %v5694_v15  ;;  %v2153_v12 = vrot.slane %v5769_v18, %v5897_v37 }
 0x331   :  { %v2579_v2 = vadd.f32 %v5938_v7, %v2429_v62  ;;  %v2432_v24 = vadd.f32 %v2137_v56, %v1783_v49  ;;  %3190 = vmatprep.mubr.f32.mxu0 %v2703_v44  ;;  %3035 = vmatprep.mubr.f32.mxu1 %v2757_v61  ;;  %v2706_v36 = vmax.f32 %v2578_v31, 0.0  ;;  %v2760_v34 = vmax.f32 %v2632_v57, 0.0  ;;  %v6030_v44 = vpop.f32.mrf.mxu1  ;;  %v6651_v49 = vld [vmem:[#allocation11_spill] sm:$0xff] }
 0x332   :  { %v1785_v13 = vpop.f32.mrf.mxu0  ;;  %3191 = vmatmul.mubr.f32.gmra.mxu0 %v2702_v38  ;;  %3696 = vmatpush2.msra.mxu1 %v6650_v25  ;;  %v2490_v62 = vadd.f32 %v2241_v53, %v5784_v20  ;;  %v2765_v40 = vmax.f32 %v2637_v19, 0.0  ;;  %v2636_v21 = vadd.f32 %v5719_v26, %v2486_v59  ;;  %v2641_v38 = vadd.f32 %v5723_v55, %v2491_v22 }
 0x333   :  { %v2433_v47 = vadd.f32 %v2141_v33, %v1785_v13  ;;  %v2707_v52 = vmax.f32 %v2579_v2, 0.0  ;;  %3665 = vmatprep.subr.mxu1 %v6555_v41  ;;  %v2582_v48 = vadd.f32 %v5931_v30, %v2432_v24  ;;  %v2257_v31 = vrot.slane %v6002_v16, %v6626_v32  ;;  %v6050_v22 = vpop.f32.mrf.mxu1 }
 0x334   :  { %v1789_v1 = vpop.f32.mrf.mxu0  ;;  %3036 = vmatmul.mubr.f32.gmra.mxu1 %v2756_v5  ;;  %v2495_v24 = vadd.f32 %v2261_v60, %v5824_v43  ;;  %v6040_v20 = vcombine.high %v5954_v63, %v5954_v63  ;;  %v2060_v53 = vcombine.low %v5972_v9, %v6023_v58  ;;  %v2157_v19 = vrot.slane %v5769_v18, %v5912_v45 }
 0x335   :  { %v2583_v42 = vadd.f32 %v5938_v7, %v2433_v47  ;;  %v2436_v23 = vadd.f32 %v2137_v56, %v1789_v1  ;;  %3195 = vmatprep.mubr.f32.mxu0 %v2707_v52  ;;  %3040 = vmatprep.mubr.f32.mxu1 %v2761_v29  ;;  %v2710_v57 = vmax.f32 %v2582_v48, 0.0  ;;  %v2640_v59 = vadd.f32 %v5719_v26, %v2490_v62  ;;  %v6652_v48 = vld [vmem:[#allocation13_spill] sm:$0xff] }
 0x336   :  { %v1791_v61 = vpop.f32.mrf.mxu0  ;;  %3196 = vmatmul.mubr.f32.gmra.mxu0 %v2706_v36  ;;  %3697 = vmatpush2.msra.mxu1 %v6651_v49  ;;  %v2764_v47 = vmax.f32 %v2636_v21, 0.0  ;;  %v2769_v52 = vmax.f32 %v2641_v38, 0.0  ;;  %v2494_v29 = vadd.f32 %v2257_v31, %v5810_v54  ;;  %v2499_v36 = vadd.f32 %v2261_v60, %v5858_v50  ;;  %v6067_v38 = vpop.f32.mrf.mxu1 }
 0x337   :  { %v2711_v56 = vmax.f32 %v2583_v42, 0.0  ;;  %v2437_v2 = vadd.f32 %v2141_v33, %v1791_v61  ;;  %3666 = vmatprep.subr.mxu1 %v6555_v41  ;;  %v2586_v13 = vadd.f32 %v5931_v30, %v2436_v23  ;;  %v2645_v42 = vadd.f32 %v5723_v55, %v2495_v24 }
 0x338   :  { %v1795_v5 = vpop.f32.mrf.mxu0  ;;  %3041 = vmatmul.mubr.f32.gmra.mxu1 %v2760_v34  ;;  %v2277_v23 = vrot.slane %v6040_v20, %v6625_v10  ;;  %v6060_v34 = vrot.slane %v2060_v53, %v5694_v15  ;;  %v2169_v50 = vrot.slane %v5792_v17, %v5897_v37  ;;  %v2498_v21 = vadd.f32 %v2257_v31, %v5837_v27 }
 0x339   :  { %v2587_v33 = vadd.f32 %v5938_v7, %v2437_v2  ;;  %v2440_v43 = vadd.f32 %v2153_v12, %v1795_v5  ;;  %3200 = vmatprep.mubr.f32.mxu0 %v2711_v56  ;;  %3045 = vmatprep.mubr.f32.mxu1 %v2765_v40  ;;  %v2714_v62 = vmax.f32 %v2586_v13, 0.0  ;;  %v2768_v56 = vmax.f32 %v2640_v59, 0.0 }
 0x33a   :  { %v1797_v25 = vpop.f32.mrf.mxu0  ;;  %3201 = vmatmul.mubr.f32.gmra.mxu0 %v2710_v57  ;;  %3698 = vmatpush2.msra.mxu1 %v6652_v48  ;;  %v2644_v2 = vadd.f32 %v5719_v26, %v2494_v29  ;;  %v2649_v24 = vadd.f32 %v5723_v55, %v2499_v36  ;;  %v2273_v53 = vrot.slane %v6040_v20, %v6626_v32  ;;  %v6653_v57 = vld [vmem:[#allocation12_spill] sm:$0xff]  ;;  %v2773_v5 = vmax.f32 %v2645_v42, 0.0 }
 0x33b   :  { %v2715_v18 = vmax.f32 %v2587_v33, 0.0  ;;  %v2441_v1 = vadd.f32 %v2157_v19, %v1797_v25  ;;  %3667 = vmatprep.subr.mxu1 %v6555_v41  ;;  %v2590_v61 = vadd.f32 %v5931_v30, %v2440_v43  ;;  %v2503_v33 = vadd.f32 %v2277_v23, %v5894_v28 }
 0x33c   :  { %v1801_v54 = vpop.f32.mrf.mxu0  ;;  %3046 = vmatmul.mubr.f32.gmra.mxu1 %v2764_v47  ;;  %v2061_v27 = vcombine.high %v5972_v9, %v6023_v58  ;;  %v2173_v25 = vrot.slane %v5792_v17, %v5912_v45  ;;  %v2293_v28 = vrot.slane %v6060_v34, %v6625_v10  ;;  %v2772_v9 = vmax.f32 %v2644_v2, 0.0 }
 0x33d   :  { %v2591_v60 = vadd.f32 %v5938_v7, %v2441_v1  ;;  %v2444_v40 = vadd.f32 %v2153_v12, %v1801_v54  ;;  %3205 = vmatprep.mubr.f32.mxu0 %v2715_v18  ;;  %3050 = vmatprep.mubr.f32.mxu1 %v2769_v52  ;;  %v2718_v31 = vmax.f32 %v2590_v61, 0.0  ;;  %v2777_v58 = vmax.f32 %v2649_v24, 0.0  ;;  %v6654_v18 = vld [vmem:[#allocation14_spill] sm:$0xff] }
 0x33e   :  { %v1803_v49 = vpop.f32.mrf.mxu0  ;;  %3206 = vmatmul.mubr.f32.gmra.mxu0 %v2714_v62  ;;  %3699 = vmatpush2.msra.mxu1 %v6653_v57  ;;  %v2648_v36 = vadd.f32 %v5719_v26, %v2498_v21  ;;  %v2502_v48 = vadd.f32 %v2273_v53, %v5876_v51  ;;  %v2653_v42 = vadd.f32 %v5723_v55, %v2503_v33 }
 0x33f   :  { %v2719_v13 = vmax.f32 %v2591_v60, 0.0  ;;  %v2445_v12 = vadd.f32 %v2157_v19, %v1803_v49  ;;  %3668 = vmatprep.subr.mxu1 %v6555_v41  ;;  %v2594_v43 = vadd.f32 %v5931_v30, %v2444_v40  ;;  %v6084_v19 = vpop.f32.mrf.mxu1  ;;  %v2507_v62 = vadd.f32 %v2277_v23, %v5941_v4 }
 0x340   :  { %v1807_v59 = vpop.f32.mrf.mxu0  ;;  %3051 = vmatmul.mubr.f32.gmra.mxu1 %v2768_v56  ;;  %v6093_v61 = vrot.slane %v2061_v27, %v5694_v15  ;;  %v2185_v51 = vrot.slane %v5818_v14, %v5897_v37  ;;  %v2511_v4 = vadd.f32 %v2293_v28, %v5979_v39  ;;  %v2776_v15 = vmax.f32 %v2648_v36, 0.0 }
 0x341   :  { %v2595_v47 = vadd.f32 %v5938_v7, %v2445_v12  ;;  %v2448_v52 = vadd.f32 %v2169_v50, %v1807_v59  ;;  %3210 = vmatprep.mubr.f32.mxu0 %v2719_v13  ;;  %3055 = vmatprep.mubr.f32.mxu1 %v2773_v5  ;;  %v2722_v54 = vmax.f32 %v2594_v43, 0.0  ;;  %v6100_v23 = vpop.f32.mrf.mxu1  ;;  %v2652_v2 = vadd.f32 %v5719_v26, %v2502_v48  ;;  %v6655_v13 = vld [vmem:[#allocation15_spill] sm:$0xff] }
 0x342   :  { %v1809_v29 = vpop.f32.mrf.mxu0  ;;  %3211 = vmatmul.mubr.f32.gmra.mxu0 %v2718_v31  ;;  %3700 = vmatpush2.msra.mxu1 %v6654_v18  ;;  %v2506_v24 = vadd.f32 %v2273_v53, %v5915_v11  ;;  %v2289_v57 = vrot.slane %v6060_v34, %v6626_v32  ;;  %v2781_v5 = vmax.f32 %v2653_v42, 0.0  ;;  %v2657_v33 = vadd.f32 %v5723_v55, %v2507_v62 }
 0x343   :  { %v2723_v17 = vmax.f32 %v2595_v47, 0.0  ;;  %v2449_v1 = vadd.f32 %v2173_v25, %v1809_v29  ;;  %3669 = vmatprep.subr.mxu1 %v6555_v41  ;;  %v2598_v60 = vadd.f32 %v5931_v30, %v2448_v52  ;;  %v2189_v11 = vrot.slane %v5818_v14, %v5912_v45  ;;  %v3708_v14 = vld [vmem:[%s6441_s7 + $0x198] sm:$0xff] }
 0x344   :  { %v1813_v40 = vpop.f32.mrf.mxu0  ;;  %3056 = vmatmul.mubr.f32.gmra.mxu1 %v2772_v9  ;;  %v2661_v59 = vadd.f32 %v5723_v55, %v2511_v4  ;;  %v2780_v52 = vmax.f32 %v2652_v2, 0.0  ;;  %v2656_v29 = vadd.f32 %v5719_v26, %v2506_v24  ;;  %v2510_v9 = vadd.f32 %v2289_v57, %v5962_v3 }
 0x345   :  { %v2599_v21 = vadd.f32 %v5938_v7, %v2449_v1  ;;  %v2452_v49 = vadd.f32 %v2169_v50, %v1813_v40  ;;  %3215 = vmatprep.mubr.f32.mxu0 %v2723_v17  ;;  %3060 = vmatprep.mubr.f32.mxu1 %v2777_v58  ;;  %v2726_v39 = vmax.f32 %v2598_v60, 0.0  ;;  %v2309_v58 = vrot.slane %v6093_v61, %v6625_v10 }
 0x346   :  { %v1815_v56 = vpop.f32.mrf.mxu0  ;;  %3216 = vmatmul.mubr.f32.gmra.mxu0 %v2722_v54  ;;  %3701 = vmatpush2.msra.mxu1 %v6655_v13  ;;  %v2785_v18 = vmax.f32 %v2657_v33, 0.0  ;;  %v2515_v17 = vadd.f32 %v2293_v28, %v6013_v6  ;;  %v2201_v3 = vrot.slane %v5850_v35, %v5897_v37  ;;  %v2789_v40 = vmax.f32 %v2661_v59, 0.0 }
 0x347   :  { %v2727_v12 = vmax.f32 %v2599_v21, 0.0  ;;  %v2453_v50 = vadd.f32 %v2173_v25, %v1815_v56  ;;  %3670 = vmatprep.subr.mxu1 %v6555_v41  ;;  %v2602_v27 = vadd.f32 %v5931_v30, %v2452_v49  ;;  %v6114_v25 = vpop.f32.mrf.mxu1  ;;  %v2514_v21 = vadd.f32 %v2289_v57, %v5993_v46 }
 0x348   :  { %v1819_v31 = vpop.f32.mrf.mxu0  ;;  %3061 = vmatmul.mubr.f32.gmra.mxu1 %v2776_v15  ;;  %v2784_v28 = vmax.f32 %v2656_v29, 0.0  ;;  %v2660_v4 = vadd.f32 %v5719_v26, %v2510_v9  ;;  %v2519_v56 = vadd.f32 %v2309_v58, %v6050_v22  ;;  %v2305_v15 = vrot.slane %v6093_v61, %v6626_v32 }
 0x349   :  { %v2603_v53 = vadd.f32 %v5938_v7, %v2453_v50  ;;  %v2456_v43 = vadd.f32 %v2185_v51, %v1819_v31  ;;  %3220 = vmatprep.mubr.f32.mxu0 %v2727_v12  ;;  %3065 = vmatprep.mubr.f32.mxu1 %v2781_v5  ;;  %v2730_v1 = vmax.f32 %v2602_v27, 0.0  ;;  %v6130_v49 = vpop.f32.mrf.mxu1  ;;  %v2665_v46 = vadd.f32 %v5723_v55, %v2515_v17 }
 0x34a   :  { %v1821_v47 = vpop.f32.mrf.mxu0  ;;  %3221 = vmatmul.mubr.f32.gmra.mxu0 %v2726_v39  ;;  %3702 = vmatpush2.msra.mxu1 %v3708_v14  ;;  %v6142_v57 = vcombine.high %v6060_v34, %v6060_v34  ;;  %v2205_v50 = vrot.slane %v5850_v35, %v5912_v45  ;;  %v2664_v39 = vadd.f32 %v5719_v26, %v2514_v21  ;;  %v3710_v35 = vld [vmem:[%s6441_s7 + $0x188] sm:$0xff] }
 0x34b   :  { %v2731_v36 = vmax.f32 %v2603_v53, 0.0  ;;  %v2457_v48 = vadd.f32 %v2189_v11, %v1821_v47  ;;  %3671 = vmatprep.subr.mxu1 %v6555_v41  ;;  %v2606_v42 = vadd.f32 %v5931_v30, %v2456_v43  ;;  %v1678_v27 = vpop.f32.mrf.mxu1  ;;  %v2669_v53 = vadd.f32 %v5723_v55, %v2519_v56 }
 0x34c   :  { %v1825_v62 = vpop.f32.mrf.mxu0  ;;  %3066 = vmatmul.mubr.f32.gmra.mxu1 %v2780_v52  ;;  %v2518_v43 = vadd.f32 %v2305_v15, %v6030_v44  ;;  %v2523_v59 = vadd.f32 %v2309_v58, %v6084_v19  ;;  %v2793_v29 = vmax.f32 %v2665_v46, 0.0  ;;  %v2325_v9 = vrot.slane %v6142_v57, %v6625_v10 }
 0x34d   :  { %v2607_v54 = vadd.f32 %v5938_v7, %v2457_v48  ;;  %v2460_v60 = vadd.f32 %v2185_v51, %v1825_v62  ;;  %3225 = vmatprep.mubr.f32.mxu0 %v2731_v36  ;;  %3070 = vmatprep.mubr.f32.mxu1 %v2785_v18  ;;  %v3709_v51 = vld [vmem:[%s6441_s7 + $0x190] sm:$0xff]  ;;  %v2734_v13 = vmax.f32 %v2606_v42, 0.0  ;;  %v2217_v44 = vrot.slane %v5887_v8, %v5897_v37 }
 0x34e   :  { %v1827_v6 = vpop.f32.mrf.mxu0  ;;  %3226 = vmatmul.mubr.f32.gmra.mxu0 %v2730_v1  ;;  %3703 = vmatpush2.msra.mxu1 %v3709_v51  ;;  %v2792_v18 = vmax.f32 %v2664_v39, 0.0  ;;  %v2522_v17 = vadd.f32 %v2305_v15, %v6067_v38  ;;  %v6164_v1 = vpop.f32.mrf.mxu1  ;;  %v2668_v62 = vadd.f32 %v5719_v26, %v2518_v43  ;;  %v2527_v38 = vadd.f32 %v2325_v9, %v6114_v25 }
 0x34f   :  { %v2735_v2 = vmax.f32 %v2607_v54, 0.0  ;;  %v2461_v24 = vadd.f32 %v2189_v11, %v1827_v6  ;;  %3672 = vmatprep.subr.mxu1 %v6555_v41  ;;  %v2610_v22 = vadd.f32 %v5931_v30, %v2460_v60  ;;  %v2788_v11 = vmax.f32 %v2660_v4, 0.0 }
 0x350   :  { %v1831_v12 = vpop.f32.mrf.mxu0  ;;  %3071 = vmatmul.mubr.f32.gmra.mxu1 %v2784_v28  ;;  %v2673_v54 = vadd.f32 %v5723_v55, %v2523_v59  ;;  %v2321_v60 = vrot.slane %v6142_v57, %v6626_v32  ;;  %v6176_v6 = vcombine.high %v6093_v61, %v6093_v61  ;;  %v2221_v15 = vrot.slane %v5887_v8, %v5912_v45  ;;  %v1684_v25 = vpop.f32.mrf.mxu1 }
 0x351   :  { %v2611_v5 = vadd.f32 %v5938_v7, %v2461_v24  ;;  %v2464_v33 = vadd.f32 %v2201_v3, %v1831_v12  ;;  %3230 = vmatprep.mubr.f32.mxu0 %v2735_v2  ;;  %3075 = vmatprep.mubr.f32.mxu1 %v2789_v40  ;;  %v2738_v14 = vmax.f32 %v2610_v22, 0.0  ;;  %v2672_v24 = vadd.f32 %v5719_v26, %v2522_v17 }
 0x352   :  { %v1833_v31 = vpop.f32.mrf.mxu0  ;;  %3231 = vmatmul.mubr.f32.gmra.mxu0 %v2734_v13  ;;  %3704 = vmatpush2.msra.mxu1 %v3710_v35  ;;  %v2796_v13 = vmax.f32 %v2668_v62, 0.0  ;;  %v2801_v22 = vmax.f32 %v2673_v54, 0.0  ;;  %v2526_v12 = vadd.f32 %v2321_v60, %v6100_v23  ;;  %v2677_v39 = vadd.f32 %v5723_v55, %v2527_v38  ;;  %v1688_v35 = vpop.f32.mrf.mxu1 }
 0x353   :  { %v2739_v47 = vmax.f32 %v2611_v5, 0.0  ;;  %v2465_v52 = vadd.f32 %v2205_v50, %v1833_v31  ;;  %3673 = vmatprep.subr.mxu1 %v6555_v41  ;;  %v2614_v36 = vadd.f32 %v5931_v30, %v2464_v33  ;;  %v2797_v41 = vmax.f32 %v2669_v53, 0.0 }
 0x354   :  { %v1837_v48 = vpop.f32.mrf.mxu0  ;;  %3076 = vmatmul.mubr.f32.gmra.mxu1 %v2788_v11  ;;  %v2341_v8 = vrot.slane %v6176_v6, %v6625_v10  ;;  %v2233_v23 = vrot.slane %v5909_v0, %v5897_v37 }
 0x355   :  { %v2615_v19 = vadd.f32 %v5938_v7, %v2465_v52  ;;  %v2468_v58 = vadd.f32 %v2201_v3, %v1837_v48  ;;  %3235 = vmatprep.mubr.f32.mxu0 %v2739_v47  ;;  %3080 = vmatprep.mubr.f32.mxu1 %v2793_v29  ;;  %v3711_v3 = vld [vmem:[%s6441_s7 + $0x180] sm:$0xff]  ;;  %v2742_v28 = vmax.f32 %v2614_v36, 0.0  ;;  %v2676_v52 = vadd.f32 %v5719_v26, %v2526_v12 }
 0x356   :  { %v1839_v42 = vpop.f32.mrf.mxu0  ;;  %3236 = vmatmul.mubr.f32.gmra.mxu0 %v2738_v14  ;;  %3705 = vmatpush2.msra.mxu1 %v3711_v3  ;;  %v2530_v29 = vadd.f32 %v2321_v60, %v6130_v49  ;;  %v2805_v48 = vmax.f32 %v2677_v39, 0.0  ;;  %v1690_v49 = vpop.f32.mrf.mxu1 }
 0x357   :  { %v2743_v40 = vmax.f32 %v2615_v19, 0.0  ;;  %v2469_v21 = vadd.f32 %v2205_v50, %v1839_v42  ;;  %v2618_v4 = vadd.f32 %v5931_v30, %v2468_v58  ;;  %v2531_v50 = vadd.f32 %v2325_v9, %v1678_v27 }
 0x358   :  { %v1843_v56 = vpop.f32.mrf.mxu0  ;;  %3081 = vmatmul.mubr.f32.gmra.mxu1 %v2792_v18  ;;  %v2800_v27 = vmax.f32 %v2672_v24, 0.0  ;;  %v2337_v9 = vrot.slane %v6176_v6, %v6626_v32  ;;  %v2804_v32 = vmax.f32 %v2676_v52, 0.0  ;;  %v2680_v60 = vadd.f32 %v5719_v26, %v2530_v29 }
 0x359   :  { %v2619_v51 = vadd.f32 %v5938_v7, %v2469_v21  ;;  %v2472_v2 = vadd.f32 %v2217_v44, %v1843_v56  ;;  %3240 = vmatprep.mubr.f32.mxu0 %v2743_v40  ;;  %3085 = vmatprep.mubr.f32.mxu1 %v2797_v41  ;;  %v2746_v31 = vmax.f32 %v2618_v4, 0.0  ;;  %v2681_v10 = vadd.f32 %v5723_v55, %v2531_v50 }
 0x35a   :  { %v1845_v46 = vpop.f32.mrf.mxu0  ;;  %3241 = vmatmul.mubr.f32.gmra.mxu0 %v2742_v28  ;;  %v2237_v41 = vrot.slane %v5909_v0, %v5912_v45  ;;  %v2534_v3 = vadd.f32 %v2337_v9, %v6164_v1  ;;  %v2539_v28 = vadd.f32 %v2341_v8, %v1690_v49  ;;  %v2249_v1 = vrot.slane %v5954_v63, %v5897_v37 }
 0x35b   :  { %v2747_v5 = vmax.f32 %v2619_v51, 0.0  ;;  %v2473_v33 = vadd.f32 %v2221_v15, %v1845_v46  ;;  %v2622_v11 = vadd.f32 %v5931_v30, %v2472_v2  ;;  %v2809_v54 = vmax.f32 %v2681_v10, 0.0 }
 0x35c   :  { %v1849_v53 = vpop.f32.mrf.mxu0  ;;  %3086 = vmatmul.mubr.f32.gmra.mxu1 %v2796_v13  ;;  %v2808_v24 = vmax.f32 %v2680_v60, 0.0  ;;  %v2538_v46 = vadd.f32 %v2337_v9, %v1688_v35  ;;  %v2689_v50 = vadd.f32 %v5723_v55, %v2539_v28  ;;  %v2281_v28 = vrot.slane %v6040_v20, %v5897_v37 }
 0x35d   :  { %v2623_v43 = vadd.f32 %v5938_v7, %v2473_v33  ;;  %v2476_v59 = vadd.f32 %v2217_v44, %v1849_v53  ;;  %3245 = vmatprep.mubr.f32.mxu0 %v2747_v5  ;;  %3090 = vmatprep.mubr.f32.mxu1 %v2801_v22  ;;  %v2535_v44 = vadd.f32 %v2341_v8, %v1684_v25  ;;  %v2750_v19 = vmax.f32 %v2622_v11, 0.0 }
 0x35e   :  { %v1851_v47 = vpop.f32.mrf.mxu0  ;;  %3246 = vmatmul.mubr.f32.gmra.mxu0 %v2746_v31  ;;  %v2684_v25 = vadd.f32 %v5719_v26, %v2534_v3  ;;  %v2253_v11 = vrot.slane %v5954_v63, %v5912_v45 }
 0x35f   :  { %v2751_v14 = vmax.f32 %v2623_v43, 0.0  ;;  %v2477_v36 = vadd.f32 %v2221_v15, %v1851_v47  ;;  %v2626_v58 = vadd.f32 %v5931_v30, %v2476_v59  ;;  %v2685_v38 = vadd.f32 %v5723_v55, %v2535_v44 }
 0x360   :  { %v1855_v18 = vpop.f32.mrf.mxu0  ;;  %3091 = vmatmul.mubr.f32.gmra.mxu1 %v2800_v27  ;;  %v2812_v43 = vmax.f32 %v2684_v25, 0.0  ;;  %v2688_v59 = vadd.f32 %v5719_v26, %v2538_v46  ;;  %v2817_v27 = vmax.f32 %v2689_v50, 0.0  ;;  %v2265_v26 = vrot.slane %v6002_v16, %v5897_v37 }
 0x361   :  { %v2627_v17 = vadd.f32 %v5938_v7, %v2477_v36  ;;  %v2480_v42 = vadd.f32 %v2233_v23, %v1855_v18  ;;  %3250 = vmatprep.mubr.f32.mxu0 %v2751_v14  ;;  %3095 = vmatprep.mubr.f32.mxu1 %v2805_v48  ;;  %v2754_v4 = vmax.f32 %v2626_v58, 0.0  ;;  %v2813_v12 = vmax.f32 %v2685_v38, 0.0 }
 0x362   :  { %v1857_v62 = vpop.f32.mrf.mxu0  ;;  %3251 = vmatmul.mubr.f32.gmra.mxu0 %v2750_v19  ;;  %v2816_v9 = vmax.f32 %v2688_v59, 0.0 }
 0x363   :  { %v2755_v40 = vmax.f32 %v2627_v17, 0.0  ;;  %v2481_v21 = vadd.f32 %v2237_v41, %v1857_v62  ;;  %v2630_v56 = vadd.f32 %v5931_v30, %v2480_v42  ;;  %v2269_v17 = vrot.slane %v6002_v16, %v5912_v45 }
 0x364   :  { %v1861_v15 = vpop.f32.mrf.mxu0  ;;  %3096 = vmatmul.mubr.f32.gmra.mxu1 %v2804_v32 }
 0x365   :  { %v2631_v0 = vadd.f32 %v5938_v7, %v2481_v21  ;;  %v2484_v51 = vadd.f32 %v2233_v23, %v1861_v15  ;;  %3255 = vmatprep.mubr.f32.mxu0 %v2755_v40  ;;  %3100 = vmatprep.mubr.f32.mxu1 %v2809_v54  ;;  %v2758_v5 = vmax.f32 %v2630_v56, 0.0 }
 0x366   :  { %v1863_v2 = vpop.f32.mrf.mxu0  ;;  %3256 = vmatmul.mubr.f32.gmra.mxu0 %v2754_v4 }
 0x367   :  { %v2759_v13 = vmax.f32 %v2631_v0, 0.0  ;;  %v2485_v22 = vadd.f32 %v2237_v41, %v1863_v2  ;;  %v2634_v33 = vadd.f32 %v5931_v30, %v2484_v51  ;;  %v2285_v51 = vrot.slane %v6040_v20, %v5912_v45 }
 0x368   :  { %v1867_v39 = vpop.f32.mrf.mxu0  ;;  %3101 = vmatmul.mubr.f32.gmra.mxu1 %v2808_v24 }
 0x369   :  { %v2635_v8 = vadd.f32 %v5938_v7, %v2485_v22  ;;  %v2488_v31 = vadd.f32 %v2249_v1, %v1867_v39  ;;  %3260 = vmatprep.mubr.f32.mxu0 %v2759_v13  ;;  %3105 = vmatprep.mubr.f32.mxu1 %v2813_v12  ;;  %v2762_v35 = vmax.f32 %v2634_v33, 0.0  ;;  %v2297_v39 = vrot.slane %v6060_v34, %v5897_v37 }
 0x36a   :  { %v1869_v53 = vpop.f32.mrf.mxu0  ;;  %3261 = vmatmul.mubr.f32.gmra.mxu0 %v2758_v5 }
 0x36b   :  { %v2763_v23 = vmax.f32 %v2635_v8, 0.0  ;;  %v2489_v55 = vadd.f32 %v2253_v11, %v1869_v53  ;;  %v2638_v47 = vadd.f32 %v5931_v30, %v2488_v31 }
 0x36c   :  { %v1873_v52 = vpop.f32.mrf.mxu0  ;;  %3106 = vmatmul.mubr.f32.gmra.mxu1 %v2812_v43  ;;  %v2301_v43 = vrot.slane %v6060_v34, %v5912_v45 }
 0x36d   :  { %v2639_v10 = vadd.f32 %v5938_v7, %v2489_v55  ;;  %v2492_v29 = vadd.f32 %v2249_v1, %v1873_v52  ;;  %3265 = vmatprep.mubr.f32.mxu0 %v2763_v23  ;;  %3110 = vmatprep.mubr.f32.mxu1 %v2817_v27  ;;  %v2766_v48 = vmax.f32 %v2638_v47, 0.0 }
 0x36e   :  { %v1875_v63 = vpop.f32.mrf.mxu0  ;;  %3266 = vmatmul.mubr.f32.gmra.mxu0 %v2762_v35 }
 0x36f   :  { %v2767_v14 = vmax.f32 %v2639_v10, 0.0  ;;  %v2493_v36 = vadd.f32 %v2253_v11, %v1875_v63  ;;  %v2642_v44 = vadd.f32 %v5931_v30, %v2492_v29 }
 0x370   :  { %v1879_v19 = vpop.f32.mrf.mxu0  ;;  %3111 = vmatmul.mubr.f32.gmra.mxu1 %v2816_v9 }
 0x371   :  { %v2643_v58 = vadd.f32 %v5938_v7, %v2493_v36  ;;  %v2496_v18 = vadd.f32 %v2265_v26, %v1879_v19  ;;  %3270 = vmatprep.mubr.f32.mxu0 %v2767_v14  ;;  %v2770_v62 = vmax.f32 %v2642_v44, 0.0  ;;  %v2313_v14 = vrot.slane %v6093_v61, %v5897_v37 }
 0x372   :  { %v1881_v42 = vpop.f32.mrf.mxu0  ;;  %3271 = vmatmul.mubr.f32.gmra.mxu0 %v2766_v48  ;;  %v2317_v19 = vrot.slane %v6093_v61, %v5912_v45 }
 0x373   :  { %v2771_v41 = vmax.f32 %v2643_v58, 0.0  ;;  %v2497_v49 = vadd.f32 %v2269_v17, %v1881_v42  ;;  %v2646_v32 = vadd.f32 %v5931_v30, %v2496_v18 }
 0x374   :  { %v1885_v54 = vpop.f32.mrf.mxu0 }
 0x375   :  { %v2647_v60 = vadd.f32 %v5938_v7, %v2497_v49  ;;  %v2500_v3 = vadd.f32 %v2265_v26, %v1885_v54  ;;  %3275 = vmatprep.mubr.f32.mxu0 %v2771_v41  ;;  %v2774_v16 = vmax.f32 %v2646_v32, 0.0 }
 0x376   :  { %v1887_v40 = vpop.f32.mrf.mxu0  ;;  %3276 = vmatmul.mubr.f32.gmra.mxu0 %v2770_v62 }
 0x377   :  { %v2775_v21 = vmax.f32 %v2647_v60, 0.0  ;;  %v2501_v38 = vadd.f32 %v2269_v17, %v1887_v40  ;;  %v2650_v4 = vadd.f32 %v5931_v30, %v2500_v3  ;;  %v2329_v40 = vrot.slane %v6142_v57, %v5897_v37 }
 0x378   :  { %v1891_v56 = vpop.f32.mrf.mxu0 }
 0x379   :  { %v2651_v15 = vadd.f32 %v5938_v7, %v2501_v38  ;;  %v2504_v0 = vadd.f32 %v2281_v28, %v1891_v56  ;;  %3280 = vmatprep.mubr.f32.mxu0 %v2775_v21  ;;  %v2778_v25 = vmax.f32 %v2650_v4, 0.0  ;;  %v2333_v4 = vrot.slane %v6142_v57, %v5912_v45 }
 0x37a   :  { %v1893_v2 = vpop.f32.mrf.mxu0  ;;  %3281 = vmatmul.mubr.f32.gmra.mxu0 %v2774_v16 }
 0x37b   :  { %v2779_v1 = vmax.f32 %v2651_v15, 0.0  ;;  %v2505_v24 = vadd.f32 %v2285_v51, %v1893_v2  ;;  %v2654_v46 = vadd.f32 %v5931_v30, %v2504_v0 }
 0x37c   :  { %v1897_v13 = vpop.f32.mrf.mxu0 }
 0x37d   :  { %v2655_v22 = vadd.f32 %v5938_v7, %v2505_v24  ;;  %v2508_v12 = vadd.f32 %v2281_v28, %v1897_v13  ;;  %3285 = vmatprep.mubr.f32.mxu0 %v2779_v1  ;;  %v2782_v20 = vmax.f32 %v2654_v46, 0.0 }
 0x37e   :  { %v1899_v50 = vpop.f32.mrf.mxu0  ;;  %3286 = vmatmul.mubr.f32.gmra.mxu0 %v2778_v25 }
 0x37f   :  { %v2783_v5 = vmax.f32 %v2655_v22, 0.0  ;;  %v2509_v33 = vadd.f32 %v2285_v51, %v1899_v50  ;;  %v2658_v8 = vadd.f32 %v5931_v30, %v2508_v12  ;;  %v2345_v12 = vrot.slane %v6176_v6, %v5897_v37 }
 0x380   :  { %v1903_v31 = vpop.f32.mrf.mxu0 }
 0x381   :  { %v2659_v11 = vadd.f32 %v5938_v7, %v2509_v33  ;;  %v2512_v53 = vadd.f32 %v2297_v39, %v1903_v31  ;;  %3290 = vmatprep.mubr.f32.mxu0 %v2783_v5  ;;  %v2786_v27 = vmax.f32 %v2658_v8, 0.0 }
 0x382   :  { %v1905_v59 = vpop.f32.mrf.mxu0  ;;  %3291 = vmatmul.mubr.f32.gmra.mxu0 %v2782_v20  ;;  %v2349_v20 = vrot.slane %v6176_v6, %v5912_v45 }
 0x383   :  { %v2787_v23 = vmax.f32 %v2659_v11, 0.0  ;;  %v2513_v55 = vadd.f32 %v2301_v43, %v1905_v59  ;;  %v2662_v35 = vadd.f32 %v5931_v30, %v2512_v53 }
 0x384   :  { %v1909_v47 = vpop.f32.mrf.mxu0 }
 0x385   :  { %v2663_v52 = vadd.f32 %v5938_v7, %v2513_v55  ;;  %v2516_v10 = vadd.f32 %v2297_v39, %v1909_v47  ;;  %3295 = vmatprep.mubr.f32.mxu0 %v2787_v23  ;;  %v2790_v34 = vmax.f32 %v2662_v35, 0.0 }
 0x386   :  { %v1911_v29 = vpop.f32.mrf.mxu0  ;;  %3296 = vmatmul.mubr.f32.gmra.mxu0 %v2786_v27 }
 0x387   :  { %v2791_v63 = vmax.f32 %v2663_v52, 0.0  ;;  %v2517_v9 = vadd.f32 %v2301_v43, %v1911_v29  ;;  %v2666_v36 = vadd.f32 %v5931_v30, %v2516_v10 }
 0x388   :  { %v1915_v26 = vpop.f32.mrf.mxu0 }
 0x389   :  { %v2667_v48 = vadd.f32 %v5938_v7, %v2517_v9  ;;  %v2520_v44 = vadd.f32 %v2313_v14, %v1915_v26  ;;  %3300 = vmatprep.mubr.f32.mxu0 %v2791_v63  ;;  %v2794_v42 = vmax.f32 %v2666_v36, 0.0 }
 0x38a   :  { %v1917_v58 = vpop.f32.mrf.mxu0  ;;  %3301 = vmatmul.mubr.f32.gmra.mxu0 %v2790_v34 }
 0x38b   :  { %v2795_v18 = vmax.f32 %v2667_v48, 0.0  ;;  %v2521_v17 = vadd.f32 %v2317_v19, %v1917_v58  ;;  %v2670_v41 = vadd.f32 %v5931_v30, %v2520_v44 }
 0x38c   :  { %v1921_v49 = vpop.f32.mrf.mxu0 }
 0x38d   :  { %v2671_v62 = vadd.f32 %v5938_v7, %v2521_v17  ;;  %v2524_v32 = vadd.f32 %v2313_v14, %v1921_v49  ;;  %3305 = vmatprep.mubr.f32.mxu0 %v2795_v18  ;;  %v2798_v61 = vmax.f32 %v2670_v41, 0.0 }
 0x38e   :  { %v1923_v54 = vpop.f32.mrf.mxu0  ;;  %3306 = vmatmul.mubr.f32.gmra.mxu0 %v2794_v42 }
 0x38f   :  { %v2799_v60 = vmax.f32 %v2671_v62, 0.0  ;;  %v2525_v3 = vadd.f32 %v2317_v19, %v1923_v54  ;;  %v2674_v21 = vadd.f32 %v5931_v30, %v2524_v32 }
 0x390   :  { %v1927_v38 = vpop.f32.mrf.mxu0 }
 0x391   :  { %v2675_v28 = vadd.f32 %v5938_v7, %v2525_v3  ;;  %v2528_v16 = vadd.f32 %v2329_v40, %v1927_v38  ;;  %3310 = vmatprep.mubr.f32.mxu0 %v2799_v60  ;;  %v2802_v51 = vmax.f32 %v2674_v21, 0.0  ;;  %v6283_v38 = vld [vmem:[%s6443_s8] ss:$0 sm:$0xff] }
 0x392   :  { %v1929_v56 = vpop.f32.mrf.mxu0  ;;  %3311 = vmatmul.mubr.f32.gmra.mxu0 %v2798_v61 }
 0x393   :  { %v2803_v15 = vmax.f32 %v2675_v28, 0.0  ;;  %v2529_v0 = vadd.f32 %v2333_v4, %v1929_v56  ;;  %v2678_v2 = vadd.f32 %v5931_v30, %v2528_v16 }
 0x394   :  { %v1933_v1 = vpop.f32.mrf.mxu0 }
 0x395   :  { %v2679_v24 = vadd.f32 %v5938_v7, %v2529_v0  ;;  %v2532_v25 = vadd.f32 %v2329_v40, %v1933_v1  ;;  %3315 = vmatprep.mubr.f32.mxu0 %v2803_v15  ;;  %v2806_v57 = vmax.f32 %v2678_v2, 0.0 }
 0x396   :  { %v1935_v46 = vpop.f32.mrf.mxu0  ;;  %3316 = vmatmul.mubr.f32.gmra.mxu0 %v2802_v51 }
 0x397   :  { %v2807_v13 = vmax.f32 %v2679_v24, 0.0  ;;  %v2533_v22 = vadd.f32 %v2333_v4, %v1935_v46  ;;  %v2682_v50 = vadd.f32 %v5931_v30, %v2532_v25 }
 0x398   :  { %v1939_v5 = vpop.f32.mrf.mxu0 }
 0x399   :  { %v2683_v33 = vadd.f32 %v5938_v7, %v2533_v22  ;;  %v2536_v39 = vadd.f32 %v2345_v12, %v1939_v5  ;;  %3320 = vmatprep.mubr.f32.mxu1 %v2807_v13  ;;  %v2810_v53 = vmax.f32 %v2682_v50, 0.0 }
 0x39a   :  { %v1941_v8 = vpop.f32.mrf.mxu0  ;;  %3321 = vmatmul.mubr.f32.vlgmr.msra.gmra.mxu1 %v2806_v57 }
 0x39b   :  { %v2811_v31 = vmax.f32 %v2683_v33, 0.0  ;;  %v2537_v11 = vadd.f32 %v2349_v20, %v1941_v8  ;;  %v2686_v43 = vadd.f32 %v5931_v30, %v2536_v39 }
 0x39c   :  { %v1945_v59 = vpop.f32.mrf.mxu0 }
 0x39d   :  { %v2687_v37 = vadd.f32 %v5938_v7, %v2537_v11  ;;  %v2540_v23 = vadd.f32 %v2345_v12, %v1945_v59  ;;  %3325 = vmatprep.mubr.f32.mxu1 %v2811_v31  ;;  %v2814_v47 = vmax.f32 %v2686_v43, 0.0 }
 0x39e   :  { %v1947_v55 = vpop.f32.mrf.mxu0  ;;  %3326 = vmatmul.mubr.f32.gmra.mxu1 %v2810_v53 }
 0x39f   :  { %v2815_v27 = vmax.f32 %v2687_v37, 0.0  ;;  %v2541_v35 = vadd.f32 %v2349_v20, %v1947_v55  ;;  %v2690_v52 = vadd.f32 %v5931_v30, %v2540_v23 }
 0x3a1   :  { %v2691_v45 = vadd.f32 %v5938_v7, %v2541_v35  ;;  %3330 = vmatprep.mubr.f32.mxu1 %v2815_v27  ;;  %v2818_v10 = vmax.f32 %v2690_v52, 0.0 }
 0x3a2   :  { %3331 = vmatmul.mubr.f32.gmra.mxu1 %v2814_v47 }
 0x3a3   :  { %v2819_v6 = vmax.f32 %v2691_v45, 0.0 }
 0x3a5   :  { %3335 = vmatprep.mubr.f32.mxu1 %v2819_v6 }
 0x3a6   :  { %3336 = vmatmul.mubr.f32.gmra.mxu1 %v2818_v10 }
 0x3b4   :  { %v2957_v29 = vpop.f32.mrf.mxu1 }
 0x3b5   :  { %v2958_v56 = vadd.f32 %v6283_v38, %v2957_v29 }
 0x3b6   :  { %v2959_v63 = vpop.f32.mrf.mxu1 }
 0x3b8   :  { %v2962_v9 = vpop.f32.mrf.mxu1 }
 0x3b9   :  { %v2963_v51 = vadd.f32 %v6283_v38, %v2962_v9 }
 0x3ba   :  { %v2964_v14 = vpop.f32.mrf.mxu1 }
 0x3bc   :  { %v2967_v34 = vpop.f32.mrf.mxu1 }
 0x3bd   :  { %v2968_v33 = vadd.f32 %v6283_v38, %v2967_v34 }
 0x3be   :  { %v2969_v36 = vpop.f32.mrf.mxu1 }
 0x3c0   :  { %v2972_v26 = vpop.f32.mrf.mxu1 }
 0x3c1   :  { %v2973_v31 = vadd.f32 %v6283_v38, %v2972_v26 }
 0x3c2   :  { %v2974_v48 = vpop.f32.mrf.mxu1 }
 0x3c4   :  { %v2977_v44 = vpop.f32.mrf.mxu1 }
 0x3c5   :  { %v2978_v10 = vadd.f32 %v6283_v38, %v2977_v44 }
 0x3c6   :  { %v2979_v19 = vpop.f32.mrf.mxu1 }
 0x3c8   :  { %v2982_v58 = vpop.f32.mrf.mxu1 }
 0x3c9   :  { %v2983_v14 = vadd.f32 %v6283_v38, %v2982_v58 }
 0x3ca   :  { %v2984_v30 = vpop.f32.mrf.mxu1 }
 0x3cc   :  { %v6266_v18 = vpop.f32.mrf.mxu1 }
 0x3cd   :  { %v2988_v58 = vadd.f32 %v6283_v38, %v6266_v18 }
 0x3ce   :  { %v2989_v7 = vpop.f32.mrf.mxu1 }
 0x3d0   :  { %v6268_v17 = vpop.f32.mrf.mxu1 }
 0x3d2   :  { %v2994_v42 = vpop.f32.mrf.mxu1 }
 0x3d4   :  { %v6270_v41 = vpop.f32.mrf.mxu1 }
 0x3d6   :  { %v2999_v49 = vpop.f32.mrf.mxu1 }
 0x3d8   :  { %v6272_v62 = vpop.f32.mrf.mxu1 }
 0x3da   :  { %v3004_v32 = vpop.f32.mrf.mxu1 }
 0x3dc   :  { %v6274_v54 = vpop.f32.mrf.mxu1 }
 0x3de   :  { %v3009_v60 = vpop.f32.mrf.mxu1 }
 0x3e0   :  { %v6276_v3 = vpop.f32.mrf.mxu1 }
 0x3e2   :  { %v3014_v40 = vpop.f32.mrf.mxu1 }
 0x3e4   :  { %v6278_v61 = vpop.f32.mrf.mxu1 }
 0x3e6   :  { %v3019_v21 = vpop.f32.mrf.mxu1 }
 0x3e8   :  { %v6285_v28 = vpop.f32.mrf.mxu1 }
 0x3ea   :  { %v3182_v16 = vpop.f32.mrf.mxu0  ;;  %v3024_v4 = vpop.f32.mrf.mxu1 }
 0x3eb   :  { %v3183_v2 = vadd.f32 %v3182_v16, %v2958_v56 }
 0x3ec   :  { %v3184_v15 = vpop.f32.mrf.mxu0  ;;  %v6288_v0 = vpop.f32.mrf.mxu1 }
 0x3ed   :  { %v3342_v22 = vsel %vm3341_vm9, %v3183_v2, -inf }
 0x3ee   :  { %v3187_v1 = vpop.f32.mrf.mxu0  ;;  %v3029_v24 = vpop.f32.mrf.mxu1 }
 0x3ef   :  { %v3188_v25 = vadd.f32 %v3187_v1, %v2963_v51  ;;  %v2993_v1 = vadd.f32 %v6283_v38, %v6268_v17 }
 0x3f0   :  { %v3189_v46 = vpop.f32.mrf.mxu0  ;;  %v6291_v13 = vpop.f32.mrf.mxu1 }
 0x3f1   :  { %v3343_v12 = vsel %vm3341_vm9, %v3188_v25, -inf }
 0x3f2   :  { %v3344_v57 = vmax.f32 %v3342_v22, %v3343_v12  ;;  %v3192_v50 = vpop.f32.mrf.mxu0  ;;  %v3034_v5 = vpop.f32.mrf.mxu1 }
 0x3f3   :  { %v3193_v11 = vadd.f32 %v3192_v50, %v2968_v33 }
 0x3f4   :  { %v3345_v39 = vrot.slane %v3344_v57, 4  ;;  %v3194_v20 = vpop.f32.mrf.mxu0  ;;  %v6296_v8 = vpop.f32.mrf.mxu1 }
 0x3f5   :  { %v3351_v27 = vsel %vm3341_vm9, %v3193_v11, -inf }
 0x3f6   :  { %v3346_v53 = vmax.f32 %v3344_v57, %v3345_v39  ;;  %v3197_v43 = vpop.f32.mrf.mxu0  ;;  %v3039_v59 = vpop.f32.mrf.mxu1 }
 0x3f7   :  { %v3198_v37 = vadd.f32 %v3197_v43, %v2973_v31  ;;  %v2998_v59 = vadd.f32 %v6283_v38, %v6270_v41 }
 0x3f8   :  { %v3199_v23 = vpop.f32.mrf.mxu0  ;;  %v6299_v55 = vpop.f32.mrf.mxu1  ;;  %v3347_v47 = vrot.slane %v3346_v53, 2 }
 0x3f9   :  { %v3352_v35 = vsel %vm3341_vm9, %v3198_v37, -inf }
 0x3fa   :  { %v3353_v52 = vmax.f32 %v3351_v27, %v3352_v35  ;;  %v3202_v45 = vpop.f32.mrf.mxu0  ;;  %v3044_v6 = vpop.f32.mrf.mxu1  ;;  %v3348_v36 = vmax.f32 %v3346_v53, %v3347_v47  ;;  %v3003_v47 = vadd.f32 %v6283_v38, %v6272_v62 }
 0x3fb   :  { %v3203_v34 = vadd.f32 %v3202_v45, %v2978_v10 }
 0x3fc   :  { %v3354_v29 = vrot.slane %v3353_v52, 4  ;;  %v3204_v63 = vpop.f32.mrf.mxu0  ;;  %v6304_v9 = vpop.f32.mrf.mxu1  ;;  %v3349_v60 = vrot.slane %v3348_v36, 1 }
 0x3fd   :  { %v3360_v32 = vsel %vm3341_vm9, %v3203_v34, -inf }
 0x3fe   :  { %v3355_v26 = vmax.f32 %v3353_v52, %v3354_v29  ;;  %v3207_v48 = vpop.f32.mrf.mxu0  ;;  %v3049_v19 = vpop.f32.mrf.mxu1  ;;  %v3350_v25 = vmax.f32 %v3348_v36, %v3349_v60 }
 0x3ff   :  { %v3208_v30 = vadd.f32 %v3207_v48, %v2983_v14 }
 0x400   :  { %v3356_v7 = vrot.slane %v3355_v26, 2  ;;  %v3209_v42 = vpop.f32.mrf.mxu0  ;;  %v6307_v49 = vpop.f32.mrf.mxu1 }
 0x401   :  { %v3361_v44 = vsel %vm3341_vm9, %v3208_v30, -inf  ;;  %v3008_v42 = vadd.f32 %v6283_v38, %v6274_v54 }
 0x402   :  { %v3357_v40 = vmax.f32 %v3355_v26, %v3356_v7  ;;  %v3362_v21 = vmax.f32 %v3360_v32, %v3361_v44  ;;  %v3212_v16 = vpop.f32.mrf.mxu0  ;;  %v3054_v4 = vpop.f32.mrf.mxu1 }
 0x403   :  { %v3213_v24 = vadd.f32 %v3212_v16, %v2988_v58 }
 0x404   :  { %v3358_v56 = vrot.slane %v3357_v40, 1  ;;  %v3363_v15 = vrot.slane %v3362_v21, 4  ;;  %v3214_v51 = vpop.f32.mrf.mxu0  ;;  %v6313_v2 = vpop.f32.mrf.mxu1 }
 0x405   :  { %v3369_v20 = vsel %vm3341_vm9, %v3213_v24, -inf }
 0x406   :  { %v3359_v46 = vmax.f32 %v3357_v40, %v3358_v56  ;;  %v3364_v22 = vmax.f32 %v3362_v21, %v3363_v15  ;;  %v3217_v12 = vpop.f32.mrf.mxu0  ;;  %v3059_v57 = vpop.f32.mrf.mxu1  ;;  %v3013_v21 = vadd.f32 %v6283_v38, %v6276_v3 }
 0x407   :  { %v3218_v50 = vadd.f32 %v3217_v12, %v2993_v1 }
 0x408   :  { %v3502_v5 = vsel %vm1243_vm2, %v3359_v46, %v3350_v25  ;;  %v3365_v33 = vrot.slane %v3364_v22, 2  ;;  %v3219_v39 = vpop.f32.mrf.mxu0  ;;  %v6318_v18 = vpop.f32.mrf.mxu1 }
 0x409   :  { %v3370_v31 = vsel %vm3341_vm9, %v3218_v50, -inf }
 0x40a   :  { %v3366_v11 = vmax.f32 %v3364_v22, %v3365_v33  ;;  %v3371_v53 = vmax.f32 %v3369_v20, %v3370_v31  ;;  %v3222_v17 = vpop.f32.mrf.mxu0  ;;  %v3064_v43 = vpop.f32.mrf.mxu1 }
 0x40b   :  { %v3223_v52 = vadd.f32 %v3222_v17, %v2998_v59 }
 0x40c   :  { %v3367_v37 = vrot.slane %v3366_v11, 1  ;;  %v3372_v23 = vrot.slane %v3371_v53, 4  ;;  %v3224_v27 = vpop.f32.mrf.mxu0  ;;  %v6324_v35 = vpop.f32.mrf.mxu1 }
 0x40d   :  { %v3378_v41 = vsel %vm3341_vm9, %v3223_v52, -inf }
 0x40e   :  { %v3368_v45 = vmax.f32 %v3366_v11, %v3367_v37  ;;  %v3373_v6 = vmax.f32 %v3371_v53, %v3372_v23  ;;  %v3227_v10 = vpop.f32.mrf.mxu0  ;;  %v3069_v29 = vpop.f32.mrf.mxu1  ;;  %v3023_v11 = vadd.f32 %v6283_v38, %v6285_v28 }
 0x40f   :  { %v3228_v63 = vadd.f32 %v3227_v10, %v3003_v47 }
 0x410   :  { %v3503_v14 = vsel %vm1245_vm3, %v3368_v45, %v3502_v5  ;;  %v3374_v34 = vrot.slane %v3373_v6, 2  ;;  %v3229_v36 = vpop.f32.mrf.mxu0  ;;  %v6329_v26 = vpop.f32.mrf.mxu1  ;;  %v3018_v5 = vadd.f32 %v6283_v38, %v6278_v61 }
 0x411   :  { %v3379_v48 = vsel %vm3341_vm9, %v3228_v63, -inf }
 0x412   :  { %v3375_v19 = vmax.f32 %v3373_v6, %v3374_v34  ;;  %v3380_v30 = vmax.f32 %v3378_v41, %v3379_v48  ;;  %v3232_v7 = vpop.f32.mrf.mxu0  ;;  %v3074_v62 = vpop.f32.mrf.mxu1 }
 0x413   :  { %v3233_v16 = vadd.f32 %v3232_v7, %v3008_v42 }
 0x414   :  { %v3376_v32 = vrot.slane %v3375_v19, 1  ;;  %v3381_v44 = vrot.slane %v3380_v30, 4  ;;  %v3234_v60 = vpop.f32.mrf.mxu0  ;;  %v6335_v40 = vpop.f32.mrf.mxu1 }
 0x415   :  { %v3387_v54 = vsel %vm3341_vm9, %v3233_v16, -inf }
 0x416   :  { %v3377_v4 = vmax.f32 %v3375_v19, %v3376_v32  ;;  %v3382_v58 = vmax.f32 %v3380_v30, %v3381_v44  ;;  %v3237_v56 = vpop.f32.mrf.mxu0  ;;  %v3079_v15 = vpop.f32.mrf.mxu1  ;;  %v3033_v19 = vadd.f32 %v6283_v38, %v6291_v13  ;;  %v3038_v13 = vadd.f32 %v6283_v38, %v6296_v8 }
 0x417   :  { %v3238_v51 = vadd.f32 %v3237_v56, %v3013_v21 }
 0x418   :  { %v3504_v1 = vsel %vm1247_vm4, %v3377_v4, %v3503_v14  ;;  %v3383_v24 = vrot.slane %v3382_v58, 2  ;;  %v3239_v25 = vpop.f32.mrf.mxu0  ;;  %v6340_v46 = vpop.f32.mrf.mxu1  ;;  %v3028_v14 = vadd.f32 %v6283_v38, %v6288_v0 }
 0x419   :  { %v3388_v22 = vsel %vm3341_vm9, %v3238_v51, -inf }
 0x41a   :  { %v3384_v12 = vmax.f32 %v3382_v58, %v3383_v24  ;;  %v3389_v57 = vmax.f32 %v3387_v54, %v3388_v22  ;;  %v3242_v50 = vpop.f32.mrf.mxu0  ;;  %v3084_v3 = vpop.f32.mrf.mxu1  ;;  %v3043_v22 = vadd.f32 %v6283_v38, %v6299_v55  ;;  %v3048_v55 = vadd.f32 %v6283_v38, %v6304_v9 }
 0x41b   :  { %v3243_v53 = vadd.f32 %v3242_v50, %v3018_v5 }
 0x41c   :  { %v3385_v33 = vrot.slane %v3384_v12, 1  ;;  %v3390_v39 = vrot.slane %v3389_v57, 4  ;;  %v3244_v20 = vpop.f32.mrf.mxu0  ;;  %v6346_v31 = vpop.f32.mrf.mxu1 }
 0x41d   :  { %v3396_v61 = vsel %vm3341_vm9, %v3243_v53, -inf }
 0x41e   :  { %v3386_v17 = vmax.f32 %v3384_v12, %v3385_v33  ;;  %v3391_v43 = vmax.f32 %v3389_v57, %v3390_v39  ;;  %v3247_v59 = vpop.f32.mrf.mxu0  ;;  %v3089_v37 = vpop.f32.mrf.mxu1 }
 0x41f   :  { %v3248_v23 = vadd.f32 %v3247_v59, %v3023_v11 }
 0x420   :  { %v3505_v27 = vsel %vm1249_vm5, %v3386_v17, %v3504_v1  ;;  %v3392_v47 = vrot.slane %v3391_v43, 2  ;;  %v3249_v52 = vpop.f32.mrf.mxu0  ;;  %v6351_v45 = vpop.f32.mrf.mxu1 }
 0x421   :  { %v3397_v6 = vsel %vm3341_vm9, %v3248_v23, -inf }
 0x422   :  { %v3393_v10 = vmax.f32 %v3391_v43, %v3392_v47  ;;  %v3398_v29 = vmax.f32 %v3396_v61, %v3397_v6  ;;  %v3252_v63 = vpop.f32.mrf.mxu0  ;;  %v3094_v28 = vpop.f32.mrf.mxu1  ;;  %v3053_v61 = vadd.f32 %v6283_v38, %v6307_v49 }
 0x423   :  { %v3253_v30 = vadd.f32 %v3252_v63, %v3028_v14 }
 0x424   :  { %v3394_v34 = vrot.slane %v3393_v10, 1  ;;  %v3399_v36 = vrot.slane %v3398_v29, 4  ;;  %v3254_v41 = vpop.f32.mrf.mxu0  ;;  %v6357_v48 = vpop.f32.mrf.mxu1 }
 0x425   :  { %v3405_v0 = vsel %vm3341_vm9, %v3253_v30, -inf }
 0x426   :  { %v3395_v7 = vmax.f32 %v3393_v10, %v3394_v34  ;;  %v3400_v62 = vmax.f32 %v3398_v29, %v3399_v36  ;;  %v3257_v42 = vpop.f32.mrf.mxu0  ;;  %v3099_v32 = vpop.f32.mrf.mxu1 }
 0x427   :  { %v3258_v44 = vadd.f32 %v3257_v42, %v3033_v19  ;;  %v3063_v32 = vadd.f32 %v6283_v38, %v6318_v18 }
 0x428   :  { %v3506_v60 = vsel %vm1251_vm6, %v3395_v7, %v3505_v27  ;;  %v3401_v21 = vrot.slane %v3400_v62, 2  ;;  %v3259_v16 = vpop.f32.mrf.mxu0  ;;  %v6362_v4 = vpop.f32.mrf.mxu1  ;;  %v3058_v7 = vadd.f32 %v6283_v38, %v6313_v2 }
 0x429   :  { %v3406_v58 = vsel %vm3341_vm9, %v3258_v44, -inf }
 0x42a   :  { %v3407_v56 = vmax.f32 %v3405_v0, %v3406_v58  ;;  %v3262_v15 = vpop.f32.mrf.mxu0  ;;  %v3104_v51 = vpop.f32.mrf.mxu1  ;;  %v3402_v1 = vmax.f32 %v3400_v62, %v3401_v21 }
 0x42b   :  { %v3263_v12 = vadd.f32 %v3262_v15, %v3038_v13 }
 0x42c   :  { %v3408_v24 = vrot.slane %v3407_v56, 4  ;;  %v3264_v25 = vpop.f32.mrf.mxu0  ;;  %v6368_v54 = vpop.f32.mrf.mxu1  ;;  %v3403_v5 = vrot.slane %v3402_v1, 1 }
 0x42d   :  { %v3414_v8 = vsel %vm3341_vm9, %v3263_v12, -inf  ;;  %v3068_v25 = vadd.f32 %v6283_v38, %v6324_v35 }
 0x42e   :  { %v3409_v57 = vmax.f32 %v3407_v56, %v3408_v24  ;;  %v3267_v50 = vpop.f32.mrf.mxu0  ;;  %v3109_v3 = vpop.f32.mrf.mxu1  ;;  %v3404_v23 = vmax.f32 %v3402_v1, %v3403_v5 }
 0x42f   :  { %v3268_v33 = vadd.f32 %v3267_v50, %v3043_v22 }
 0x430   :  { %v3410_v39 = vrot.slane %v3409_v57, 2  ;;  %v3269_v20 = vpop.f32.mrf.mxu0  ;;  %v6372_v11 = vpop.f32.mrf.mxu1  ;;  %v3507_v28 = vsel %vm1253_vm7, %v3404_v23, %v3506_v60 }
 0x431   :  { %v3415_v53 = vsel %vm3341_vm9, %v3268_v33, -inf }
 0x432   :  { %v3411_v17 = vmax.f32 %v3409_v57, %v3410_v39  ;;  %v3416_v43 = vmax.f32 %v3414_v8, %v3415_v53  ;;  %v3272_v59 = vpop.f32.mrf.mxu0  ;;  %v3114_v37 = vpop.f32.mrf.mxu1  ;;  %v3073_v57 = vadd.f32 %v6283_v38, %v6329_v26  ;;  %v3078_v26 = vadd.f32 %v6283_v38, %v6335_v40 }
 0x433   :  { %v3273_v6 = vadd.f32 %v3272_v59, %v3048_v55 }
 0x434   :  { %v3412_v27 = vrot.slane %v3411_v17, 1  ;;  %v3417_v47 = vrot.slane %v3416_v43, 4  ;;  %v3274_v52 = vpop.f32.mrf.mxu0 }
 0x435   :  { %v3423_v9 = vsel %vm3341_vm9, %v3273_v6, -inf  ;;  %v3083_v52 = vadd.f32 %v6283_v38, %v6340_v46 }
 0x436   :  { %v3413_v10 = vmax.f32 %v3411_v17, %v3412_v27  ;;  %v3418_v29 = vmax.f32 %v3416_v43, %v3417_v47  ;;  %v3277_v63 = vpop.f32.mrf.mxu0 }
 0x437   :  { %v3278_v14 = vadd.f32 %v3277_v63, %v3053_v61 }
 0x438   :  { %v3508_v34 = vsel %vm1255_vm8, %v3413_v10, %v3507_v28  ;;  %v3279_v36 = vpop.f32.mrf.mxu0  ;;  %v3419_v49 = vrot.slane %v3418_v29, 2 }
 0x439   :  { %3518 = vst.msk [vmem:[%s6444_s9] sm:$0xff] %vm3341_vm9, %v3508_v34  ;;  %v3424_v41 = vsel %vm3341_vm9, %v3278_v14, -inf }
 0x43a   :  { %v3425_v19 = vmax.f32 %v3423_v9, %v3424_v41  ;;  %v3282_v30 = vpop.f32.mrf.mxu0  ;;  %v3420_v60 = vmax.f32 %v3418_v29, %v3419_v49 }
 0x43b   :  { %v3283_v44 = vadd.f32 %v3282_v30, %v3058_v7 }
 0x43c   :  { %v3426_v62 = vrot.slane %v3425_v19, 4  ;;  %v3284_v42 = vpop.f32.mrf.mxu0  ;;  %v3421_v13 = vrot.slane %v3420_v60, 1 }
 0x43d   :  { %v3432_v15 = vsel %vm3341_vm9, %v3283_v44, -inf }
 0x43e   :  { %v3427_v21 = vmax.f32 %v3425_v19, %v3426_v62  ;;  %v3287_v16 = vpop.f32.mrf.mxu0  ;;  %v3422_v3 = vmax.f32 %v3420_v60, %v3421_v13  ;;  %v3088_v19 = vadd.f32 %v6283_v38, %v6346_v31  ;;  %v3093_v62 = vadd.f32 %v6283_v38, %v6351_v45 }
 0x43f   :  { %v3288_v0 = vadd.f32 %v3287_v16, %v3063_v32 }
 0x440   :  { %v3428_v58 = vrot.slane %v3427_v21, 2  ;;  %v3289_v56 = vpop.f32.mrf.mxu0 }
 0x441   :  { %v3433_v51 = vsel %vm3341_vm9, %v3288_v0, -inf }
 0x442   :  { %v3429_v1 = vmax.f32 %v3427_v21, %v3428_v58  ;;  %v3434_v24 = vmax.f32 %v3432_v15, %v3433_v51  ;;  %v3292_v2 = vpop.f32.mrf.mxu0 }
 0x443   :  { %v3293_v50 = vadd.f32 %v3292_v2, %v3068_v25  ;;  %v3103_v25 = vadd.f32 %v6283_v38, %v6362_v4 }
 0x444   :  { %v3430_v22 = vrot.slane %v3429_v1, 1  ;;  %v3435_v18 = vrot.slane %v3434_v24, 4  ;;  %v3294_v12 = vpop.f32.mrf.mxu0 }
 0x445   :  { %v3441_v43 = vsel %vm3341_vm9, %v3293_v50, -inf }
 0x446   :  { %v3431_v5 = vmax.f32 %v3429_v1, %v3430_v22  ;;  %v3436_v33 = vmax.f32 %v3434_v24, %v3435_v18  ;;  %v3297_v39 = vpop.f32.mrf.mxu0  ;;  %v3098_v1 = vadd.f32 %v6283_v38, %v6357_v48 }
 0x447   :  { %v3298_v20 = vadd.f32 %v3297_v39, %v3073_v57 }
 0x448   :  { %v3509_v8 = vsel %vm1243_vm2, %v3431_v5, %v3422_v3  ;;  %v3437_v53 = vrot.slane %v3436_v33, 2  ;;  %v3299_v17 = vpop.f32.mrf.mxu0 }
 0x449   :  { %v3442_v35 = vsel %vm3341_vm9, %v3298_v20, -inf  ;;  %v3108_v17 = vadd.f32 %v6283_v38, %v6368_v54 }
 0x44a   :  { %v3438_v59 = vmax.f32 %v3436_v33, %v3437_v53  ;;  %v3443_v37 = vmax.f32 %v3441_v43, %v3442_v35  ;;  %v3302_v55 = vpop.f32.mrf.mxu0 }
 0x44b   :  { %v3303_v61 = vadd.f32 %v3302_v55, %v3078_v26 }
 0x44c   :  { %v3439_v23 = vrot.slane %v3438_v59, 1  ;;  %v3444_v27 = vrot.slane %v3443_v37, 4  ;;  %v3304_v47 = vpop.f32.mrf.mxu0 }
 0x44d   :  { %v3450_v36 = vsel %vm3341_vm9, %v3303_v61, -inf }
 0x44e   :  { %v3440_v6 = vmax.f32 %v3438_v59, %v3439_v23  ;;  %v3445_v10 = vmax.f32 %v3443_v37, %v3444_v27  ;;  %v3307_v29 = vpop.f32.mrf.mxu0  ;;  %v3113_v59 = vadd.f32 %v6283_v38, %v6372_v11 }
 0x44f   :  { %v3308_v63 = vadd.f32 %v3307_v29, %v3083_v52 }
 0x450   :  { %v3510_v28 = vsel %vm1245_vm3, %v3440_v6, %v3509_v8  ;;  %v3446_v14 = vrot.slane %v3445_v10, 2  ;;  %v3309_v34 = vpop.f32.mrf.mxu0 }
 0x451   :  { %v3451_v9 = vsel %vm3341_vm9, %v3308_v63, -inf }
 0x452   :  { %v3447_v40 = vmax.f32 %v3445_v10, %v3446_v14  ;;  %v3452_v41 = vmax.f32 %v3450_v36, %v3451_v9  ;;  %v3312_v49 = vpop.f32.mrf.mxu0 }
 0x453   :  { %v3313_v42 = vadd.f32 %v3312_v49, %v3088_v19 }
 0x454   :  { %v3448_v46 = vrot.slane %v3447_v40, 1  ;;  %v3453_v30 = vrot.slane %v3452_v41, 4  ;;  %v3314_v7 = vpop.f32.mrf.mxu0 }
 0x455   :  { %v3459_v56 = vsel %vm3341_vm9, %v3313_v42, -inf }
 0x456   :  { %v3449_v32 = vmax.f32 %v3447_v40, %v3448_v46  ;;  %v3454_v44 = vmax.f32 %v3452_v41, %v3453_v30  ;;  %v3317_v60 = vpop.f32.mrf.mxu0 }
 0x457   :  { %v3318_v21 = vadd.f32 %v3317_v60, %v3093_v62 }
 0x458   :  { %v3511_v16 = vsel %vm1247_vm4, %v3449_v32, %v3510_v28  ;;  %v3455_v0 = vrot.slane %v3454_v44, 2  ;;  %v3319_v58 = vpop.f32.mrf.mxu0 }
 0x459   :  { %v3460_v15 = vsel %vm3341_vm9, %v3318_v21, -inf }
 0x45a   :  { %v3456_v31 = vmax.f32 %v3454_v44, %v3455_v0  ;;  %v3461_v51 = vmax.f32 %v3459_v56, %v3460_v15  ;;  %v3322_v13 = vpop.f32.mrf.mxu1 }
 0x45b   :  { %v3323_v22 = vadd.f32 %v3322_v13, %v3098_v1 }
 0x45c   :  { %v3457_v45 = vrot.slane %v3456_v31, 1  ;;  %v3462_v24 = vrot.slane %v3461_v51, 4  ;;  %v3324_v2 = vpop.f32.mrf.mxu1 }
 0x45d   :  { %v3468_v39 = vsel %vm3341_vm9, %v3323_v22, -inf }
 0x45e   :  { %v3458_v18 = vmax.f32 %v3456_v31, %v3457_v45  ;;  %v3463_v12 = vmax.f32 %v3461_v51, %v3462_v24  ;;  %v3327_v57 = vpop.f32.mrf.mxu1 }
 0x45f   :  { %v3328_v50 = vadd.f32 %v3327_v57, %v3103_v25 }
 0x460   :  { %v3512_v3 = vsel %vm1249_vm5, %v3458_v18, %v3511_v16  ;;  %v3464_v5 = vrot.slane %v3463_v12, 2  ;;  %v3329_v33 = vpop.f32.mrf.mxu1 }
 0x461   :  { %v3469_v20 = vsel %vm3341_vm9, %v3328_v50, -inf }
 0x462   :  { %v3465_v48 = vmax.f32 %v3463_v12, %v3464_v5  ;;  %v3470_v8 = vmax.f32 %v3468_v39, %v3469_v20  ;;  %v3332_v53 = vpop.f32.mrf.mxu1 }
 0x463   :  { %v3333_v37 = vadd.f32 %v3332_v53, %v3108_v17 }
 0x464   :  { %v3466_v4 = vrot.slane %v3465_v48, 1  ;;  %v3471_v43 = vrot.slane %v3470_v8, 4  ;;  %v3334_v35 = vpop.f32.mrf.mxu1 }
 0x465   :  { %v3477_v6 = vsel %vm3341_vm9, %v3333_v37, -inf }
 0x466   :  { %v3467_v55 = vmax.f32 %v3465_v48, %v3466_v4  ;;  %v3472_v26 = vmax.f32 %v3470_v8, %v3471_v43  ;;  %v3337_v23 = vpop.f32.mrf.mxu1 }
 0x467   :  { %v3338_v27 = vadd.f32 %v3337_v23, %v3113_v59 }
 0x468   :  { %v3513_v47 = vsel %vm1251_vm6, %v3467_v55, %v3512_v3  ;;  %v3473_v52 = vrot.slane %v3472_v26, 2  ;;  %v3339_v61 = vpop.f32.mrf.mxu1 }
 0x469   :  { %v3478_v10 = vsel %vm3341_vm9, %v3338_v27, -inf }
 0x46a   :  { %v3479_v54 = vmax.f32 %v3477_v6, %v3478_v10  ;;  %v3474_v29 = vmax.f32 %v3472_v26, %v3473_v52 }
 0x46c   :  { %v3480_v63 = vrot.slane %v3479_v54, 4  ;;  %v3475_v14 = vrot.slane %v3474_v29, 1 }
 0x46e   :  { %v3481_v28 = vmax.f32 %v3479_v54, %v3480_v63  ;;  %v3476_v11 = vmax.f32 %v3474_v29, %v3475_v14 }
 0x470   :  { %v3482_v34 = vrot.slane %v3481_v28, 2  ;;  %v3514_v40 = vsel %vm1253_vm7, %v3476_v11, %v3513_v47 }
 0x472   :  { %v3483_v38 = vmax.f32 %v3481_v28, %v3482_v34 }
 0x474   :  { %v3484_v36 = vrot.slane %v3483_v38, 1 }
 0x476   :  { %v3485_v9 = vmax.f32 %v3483_v38, %v3484_v36 }
 0x478   :  { %v3515_v41 = vsel %vm1255_vm8, %v3485_v9, %v3514_v40 }
 0x479   :  { %3519 = vst.msk [vmem:[%s6444_s9 + $0x8] sm:$0xff] %vm3341_vm9, %v3515_v41 }

// kernel: forward_reconstruct.18
= control target key start
LH: loop header
LB: loop body
LE: loop exit
PB: predicated region body
PF: predicated region fallthrough
CT: control target
= control target key end

     0   :  { %vm18_vm0 = vcmask 523264   ;;  %s118_s0 = inlined_call_operand.vmem [shape: f32[16,64], index: 0, kind: input, shape index: {}]   ;;  %s119_s1 = inlined_call_operand.vmem [shape: f32[1,64], index: 1, kind: input, shape index: {}]   ;;  %s120_s2 = inlined_call_operand.vmem [shape: f32[1,64], index: 2, kind: input, shape index: {}]   ;;  %s121_s3 = inlined_call_operand.vmem [shape: f32[16,64], index: 3, kind: output, shape index: {}]  }
   0x1   :  { %v14_v0 = vld [vmem:[%s118_s0] sm:$0xff]  ;;  %v15_v1 = vld [vmem:[%s118_s0 + $0x8] sm:$0xff] }
   0x2   :  { %v19_v2 = vsel %vm18_vm0, %v14_v0, 0.0  ;;  %v22_v3 = vsel %vm18_vm0, %v15_v1, 0.0  ;;  %v68_v21 = vld [vmem:[%s119_s1] ss:$0 sm:$0xff] }
   0x3   :  { %20 = vadd.xlane.f32.xlu0 %v19_v2  ;;  %v69_v23 = vld [vmem:[%s120_s2] ss:$0 sm:$0xff] }
   0x7   :  { %23 = vadd.xlane.f32.xlu0 %v22_v3 }
  0x8c   :  { %v21_v4 = vpop.xlane.xlu0 %20 }
  0x8d   :  { %v26_v5 = vmul.f32 0.015625, %v21_v4 }
  0x8f   :  { %v28_v6 = vsub.f32 %v14_v0, %v26_v5 }
  0x90   :  { %v24_v7 = vpop.xlane.xlu0 %23 }
  0x91   :  { %v27_v8 = vmul.f32 0.015625, %v24_v7  ;;  %v30_v9 = vmul.f32 %v28_v6, %v28_v6 }
  0x93   :  { %v29_v10 = vsub.f32 %v15_v1, %v27_v8  ;;  %v32_v11 = vsel %vm18_vm0, %v30_v9, 0.0 }
  0x94   :  { %33 = vadd.xlane.f32.xlu1 %v32_v11 }
  0x95   :  { %v31_v12 = vmul.f32 %v29_v10, %v29_v10 }
  0x97   :  { %v35_v13 = vsel %vm18_vm0, %v31_v12, 0.0 }
  0x98   :  { %36 = vadd.xlane.f32.xlu1 %v35_v13 }
 0x11d   :  { %v34_v14 = vpop.xlane.xlu1 %33 }
 0x11e   :  { %v38_v15 = vmul.f32 0.015625, %v34_v14 }
 0x120   :  { %v40_v16 = vadd.f32 1e-05, %v38_v15 }
 0x121   :  { %v37_v17 = vpop.xlane.xlu1 %36 }
 0x122   :  { %70 = vrsqrt.f32 %v40_v16  ;;  %v39_v18 = vmul.f32 0.015625, %v37_v17 }
 0x124   :  { %v41_v19 = vadd.f32 1e-05, %v39_v18 }
 0x126   :  { %72 = vrsqrt.f32 %v41_v19 }
 0x12f   :  { %v71_v20 = vpop.eup %70 }
 0x130   :  { %v44_v22 = vmul.f32 %v71_v20, %v28_v6 }
 0x132   :  { %v52_v24 = vmul.f32 %v68_v21, %v44_v22 }
 0x133   :  { %v73_v25 = vpop.eup %72 }
 0x134   :  { %v60_v26 = vadd.f32 %v69_v23, %v52_v24  ;;  %v45_v27 = vmul.f32 %v73_v25, %v29_v10 }
 0x136   :  { %62 = vst.msk [vmem:[%s121_s3] sm:$0xff] %vm18_vm0, %v60_v26  ;;  %v53_v28 = vmul.f32 %v68_v21, %v45_v27 }
 0x138   :  { %v61_v29 = vadd.f32 %v69_v23, %v53_v28 }
 0x13a   :  { %63 = vst.msk [vmem:[%s121_s3 + $0x8] sm:$0xff] %vm18_vm0, %v61_v29 }

// kernel: forward_reconstruct.20
= control target key start
LH: loop header
LB: loop body
LE: loop exit
PB: predicated region body
PF: predicated region fallthrough
CT: control target
= control target key end

     0   :  { %vm23_vm0 = vcmask 523264   ;;  %v182_v7 = vmov 0.0   ;;  %vm183_vm1 = vmmov 0   ;;  %vm140_vm2 = vcmask 392192   ;;  %s256_s0 = inlined_call_operand.vmem [shape: f32[8,64], index: 0, kind: input, shape index: {}]   ;;  %s257_s3 = inlined_call_operand.vmem [shape: f32[64,48], index: 3, kind: input, shape index: {}]   ;;  %s258_s1 = inlined_call_operand.vmem [shape: f32[1,64], index: 1, kind: input, shape index: {}]   ;;  %s259_s2 = inlined_call_operand.vmem [shape: f32[1,64], index: 2, kind: input, shape index: {}]   ;;  %s260_s4 = inlined_call_operand.vmem [shape: f32[1,48], index: 4, kind: input, shape index: {}]   ;;  %s261_s5 = inlined_call_operand.vmem [shape: f32[8,48], index: 5, kind: output, shape index: {}]  }
   0x1   :  { %v20_v0 = vld [vmem:[%s256_s0] sm:$0xff]  ;;  %159 = vmatprep.subr.mxu0 %v182_v7  ;;  %v59_v8 = vld [vmem:[%s257_s3 + $0x38] sm:$0xff]  ;;  %v58_v9 = vld [vmem:[%s257_s3 + $0x30] sm:$0xff]  ;;  %175 = vmatprep.mubr.msk.f32.mxu0 %vm183_vm1, %v182_v7 }
   0x2   :  { %v24_v1 = vsel %vm23_vm0, %v20_v0, 0.0  ;;  %160 = vmatpush3.msra.mxu0 %v59_v8  ;;  %v57_v10 = vld [vmem:[%s257_s3 + $0x28] sm:$0xff]  ;;  %v56_v11 = vld [vmem:[%s257_s3 + $0x20] sm:$0xff]  ;;  %v55_v12 = vld [vmem:[%s257_s3 + $0x18] sm:$0xff] }
   0x3   :  { %25 = vadd.xlane.f32.xlu0 %v24_v1  ;;  %161 = vmatprep.subr.mxu0 %v182_v7  ;;  %v54_v13 = vld [vmem:[%s257_s3 + $0x10] sm:$0xff]  ;;  %v53_v14 = vld [vmem:[%s257_s3 + $0x8] sm:$0xff]  ;;  %v52_v15 = vld [vmem:[%s257_s3] sm:$0xff] }
   0x4   :  { %162 = vmatpush3.msra.mxu0 %v58_v9  ;;  %v146_v20 = vld [vmem:[%s258_s1] ss:$0 sm:$0xff] }
   0x5   :  { %163 = vmatprep.subr.mxu0 %v182_v7  ;;  %v147_v22 = vld [vmem:[%s259_s2] ss:$0 sm:$0xff] }
   0x6   :  { %164 = vmatpush3.msra.mxu0 %v57_v10  ;;  %v148_v25 = vld [vmem:[%s260_s4] ss:$0 sm:$0xff] }
   0x7   :  { %165 = vmatprep.subr.mxu0 %v182_v7 }
   0x8   :  { %166 = vmatpush3.msra.mxu0 %v56_v11 }
   0x9   :  { %167 = vmatprep.subr.mxu0 %v182_v7 }
   0xa   :  { %168 = vmatpush3.msra.mxu0 %v55_v12 }
   0xb   :  { %169 = vmatprep.subr.mxu0 %v182_v7 }
   0xc   :  { %170 = vmatpush3.msra.mxu0 %v54_v13 }
   0xd   :  { %171 = vmatprep.subr.mxu0 %v182_v7 }
   0xe   :  { %172 = vmatpush3.msra.mxu0 %v53_v14 }
   0xf   :  { %173 = vmatprep.subr.mxu0 %v182_v7 }
  0x10   :  { %174 = vmatpush3.msra.mxu0 %v52_v15 }
  0x8c   :  { %v26_v2 = vpop.xlane.xlu0 %25 }
  0x8d   :  { %v28_v3 = vmul.f32 0.015625, %v26_v2 }
  0x8f   :  { %v29_v4 = vsub.f32 %v20_v0, %v28_v3 }
  0x91   :  { %v30_v5 = vmul.f32 %v29_v4, %v29_v4 }
  0x93   :  { %v31_v6 = vsel %vm23_vm0, %v30_v5, 0.0 }
  0x94   :  { %32 = vadd.xlane.f32.xlu0 %v31_v6 }
 0x11d   :  { %v33_v16 = vpop.xlane.xlu0 %32 }
 0x11e   :  { %v34_v17 = vmul.f32 0.015625, %v33_v16 }
 0x120   :  { %v35_v18 = vadd.f32 1e-05, %v34_v17 }
 0x122   :  { %180 = vrsqrt.f32 %v35_v18 }
 0x12f   :  { %v181_v19 = vpop.eup %180 }
 0x130   :  { %v37_v21 = vmul.f32 %v181_v19, %v29_v4 }
 0x132   :  { %v44_v23 = vmul.f32 %v146_v20, %v37_v21 }
 0x134   :  { %v51_v24 = vadd.f32 %v147_v22, %v44_v23 }
 0x136   :  { %176 = vmatmul.mubr.msk.f32.vlgmr.msra.gmra.mxu0 %vm23_vm0, %v51_v24 }
 0x1f6   :  { %v136_v26 = vpop.f32.mrf.mxu0 }
 0x1f7   :  { %v137_v27 = vadd.f32 %v148_v25, %v136_v26 }
 0x1f8   :  { %v177_v28 = vpop.f32.mrf.mxu0 }
 0x1f9   :  { %141 = vst.msk [vmem:[%s261_s5] sm:$0xff] %vm140_vm2, %v137_v27 }

// kernel: forward_reconstruct.16
= control target key start
LH: loop header
LB: loop body
LE: loop exit
PB: predicated region body
PF: predicated region fallthrough
CT: control target
= control target key end

     0   :  { %vm48_vm0 = vcmask 523264   ;;  %v2496_v30 = vmov 0.0   ;;  %v110_v47 = vlaneseq  ;;  %vm2497_vm1 = vmmov 0   ;;  %s2498_s28 = smov 64   ;;  %s2501_s29 = smov 32   ;;  %s3039_s0 = inlined_call_operand.vmem [shape: f32[2,8,64], index: 0, kind: input, shape index: {}]   ;;  %s3040_s3 = inlined_call_operand.vmem [shape: f32[64,192], index: 3, kind: input, shape index: {}]   ;;  %s3041_s1 = inlined_call_operand.vmem [shape: f32[1,64], index: 1, kind: input, shape index: {}]   ;;  %s3042_s2 = inlined_call_operand.vmem [shape: f32[1,64], index: 2, kind: input, shape index: {}]   ;;  %s3043_s4 = inlined_call_operand.vmem [shape: f32[1,192], index: 4, kind: input, shape index: {}]   ;;  %s3044_s5 = inlined_call_operand.vmem [shape: f32[64,64], index: 5, kind: input, shape index: {}]   ;;  %s3045_s6 = inlined_call_operand.vmem [shape: f32[1,64], index: 6, kind: input, shape index: {}]   ;;  %s3046_s9 = inlined_call_operand.vmem [shape: f32[64,256], index: 9, kind: input, shape index: {}]   ;;  %s3047_s7 = inlined_call_operand.vmem [shape: f32[1,64], index: 7, kind: input, shape index: {}]   ;;  %s3048_s8 = inlined_call_operand.vmem [shape: f32[1,64], index: 8, kind: input, shape index: {}]   ;;  %s3049_s11 = inlined_call_operand.vmem [shape: f32[256,64], index: 11, kind: input, shape index: {}]   ;;  %s3050_s10 = inlined_call_operand.vmem [shape: f32[1,256], index: 10, kind: input, shape index: {}]   ;;  %s3051_s12 = inlined_call_operand.vmem [shape: f32[1,64], index: 12, kind: input, shape index: {}]   ;;  %s3052_s13 = inlined_call_operand.vmem [shape: f32[2,8,64], index: 13, kind: output, shape index: {}]  }
   0x1   :  { %v2578_v0 = vld [vmem:[%s3039_s0] sm:$0xff]  ;;  %v2583_v1 = vld [vmem:[%s3039_s0 + $0x8] sm:$0xff]  ;;  %v107_v14 = vld [vmem:[%s3040_s3 + $0x78] sm:$0xff]  ;;  %190 = vmatprep.mubr.f32.mxu0 %v2496_v30  ;;  %196 = vmatprep.mubr.f32.mxu1 %v2496_v30  ;;  %vm214_vm2 = vcmask 130048   ;;  %vm368_vm3 = vcmask 64512   ;;  %s2500_s0 = smov 112  }
   0x2   :  { %v49_v2 = vsel %vm48_vm0, %v2578_v0, 0.0  ;;  %v52_v3 = vsel %vm48_vm0, %v2583_v1, 0.0  ;;  %142 = vmatprep.subr.mxu0 %v107_v14  ;;  %v106_v15 = vld [vmem:[%s3040_s3 + $0x70] sm:$0xff]  ;;  %v105_v16 = vld [vmem:[%s3040_s3 + $0x68] sm:$0xff]  ;;  %v104_v17 = vld [vmem:[%s3040_s3 + $0x60] sm:$0xff]  ;;  %2423 = vmatprep.subr.mxu1 %v107_v14  ;;  %v2663_v48 = vshrl.u32 %v110_v47, 7 }
   0x3   :  { %50 = vadd.xlane.f32.xlu0 %v49_v2  ;;  %143 = vmatpush1.msra.mxu0 %v106_v15  ;;  %v103_v18 = vld [vmem:[%s3040_s3 + $0x58] sm:$0xff]  ;;  %v102_v19 = vld [vmem:[%s3040_s3 + $0x50] sm:$0xff]  ;;  %v101_v20 = vld [vmem:[%s3040_s3 + $0x48] sm:$0xff]  ;;  %s2502_s30 = smov 96   ;;  %s2503_s22 = smov 16  }
   0x4   :  { %2431 = vmatpush1.msra.mxu1 %v106_v15  ;;  %144 = vmatprep.subr.mxu0 %v105_v16  ;;  %v100_v21 = vld [vmem:[%s3040_s3 + $0x40] sm:$0xff]  ;;  %v99_v22 = vld [vmem:[%s3040_s3 + $0x38] sm:$0xff]  ;;  %v98_v23 = vld [vmem:[%s3040_s3 + $0x30] sm:$0xff]  ;;  %v112_v49 = vsub.s32 0, %v2663_v48  ;;  %v116_v56 = vsub.s32 1, %v2663_v48  ;;  %s2504_s23 = smov 80  }
   0x5   :  { %2424 = vmatprep.subr.mxu1 %v105_v16  ;;  %145 = vmatpush1.msra.mxu0 %v104_v17  ;;  %v97_v24 = vld [vmem:[%s3040_s3 + $0x28] sm:$0xff]  ;;  %v96_v25 = vld [vmem:[%s3040_s3 + $0x20] sm:$0xff]  ;;  %v95_v26 = vld [vmem:[%s3040_s3 + $0x18] sm:$0xff] }
   0x6   :  { %2432 = vmatpush1.msra.mxu1 %v104_v17  ;;  %146 = vmatprep.subr.mxu0 %v103_v18  ;;  %v94_v27 = vld [vmem:[%s3040_s3 + $0x10] sm:$0xff]  ;;  %v93_v28 = vld [vmem:[%s3040_s3 + $0x8] sm:$0xff]  ;;  %v92_v29 = vld [vmem:[%s3040_s3] sm:$0xff] }
   0x7   :  { %53 = vadd.xlane.f32.xlu0 %v52_v3  ;;  %2425 = vmatprep.subr.mxu1 %v103_v18  ;;  %v2187_v38 = vld [vmem:[%s3041_s1] ss:$0 sm:$0xff] }
   0x8   :  { %147 = vmatpush1.msra.mxu0 %v102_v19  ;;  %2433 = vmatpush1.msra.mxu1 %v102_v19  ;;  %v2188_v40 = vld [vmem:[%s3042_s2] ss:$0 sm:$0xff] }
   0x9   :  { %148 = vmatprep.subr.mxu0 %v101_v20  ;;  %2426 = vmatprep.subr.mxu1 %v101_v20  ;;  %v108_v50 = vld [vmem:[%s3043_s4] sm:$0x3]  ;;  %s2499_s4 = smov 48  }
   0xa   :  { %149 = vmatpush1.msra.mxu0 %v100_v21  ;;  %2434 = vmatpush1.msra.mxu1 %v100_v21  ;;  %v113_v51 = vrot.slane %v108_v50, %v112_v49  ;;  %v117_v58 = vrot.slane %v108_v50, %v116_v56 }
   0xb   :  { %150 = vmatprep.subr.mxu0 %v99_v22  ;;  %2427 = vmatprep.subr.mxu1 %v99_v22 }
   0xc   :  { %151 = vmatpush1.msra.mxu0 %v98_v23  ;;  %2435 = vmatpush1.msra.mxu1 %v98_v23 }
   0xd   :  { %152 = vmatprep.subr.mxu0 %v97_v24  ;;  %2428 = vmatprep.subr.mxu1 %v97_v24 }
   0xe   :  { %153 = vmatpush1.msra.mxu0 %v96_v25  ;;  %2436 = vmatpush1.msra.mxu1 %v96_v25 }
   0xf   :  { %154 = vmatprep.subr.mxu0 %v95_v26  ;;  %2429 = vmatprep.subr.mxu1 %v95_v26 }
  0x10   :  { %155 = vmatpush1.msra.mxu0 %v94_v27  ;;  %2437 = vmatpush1.msra.mxu1 %v94_v27 }
  0x11   :  { %156 = vmatprep.subr.mxu0 %v93_v28  ;;  %2430 = vmatprep.subr.mxu1 %v93_v28 }
  0x12   :  { %157 = vmatpush1.msra.mxu0 %v92_v29  ;;  %2438 = vmatpush1.msra.mxu1 %v92_v29 }
  0x13   :  { %2315 = vmatprep.subr.mxu1 %v2496_v30  ;;  %2340 = vmatprep.subr.mxu0 %v2496_v30 }
  0x8c   :  { %v51_v4 = vpop.xlane.xlu0 %50 }
  0x8d   :  { %v56_v5 = vmul.f32 0.015625, %v51_v4 }
  0x8f   :  { %v2590_v6 = vsub.f32 %v2578_v0, %v56_v5 }
  0x90   :  { %v54_v7 = vpop.xlane.xlu0 %53 }
  0x91   :  { %v57_v8 = vmul.f32 0.015625, %v54_v7  ;;  %v60_v9 = vmul.f32 %v2590_v6, %v2590_v6 }
  0x93   :  { %v2595_v10 = vsub.f32 %v2583_v1, %v57_v8  ;;  %v62_v11 = vsel %vm48_vm0, %v60_v9, 0.0 }
  0x94   :  { %63 = vadd.xlane.f32.xlu1 %v62_v11 }
  0x95   :  { %v61_v12 = vmul.f32 %v2595_v10, %v2595_v10 }
  0x97   :  { %v65_v13 = vsel %vm48_vm0, %v61_v12, 0.0 }
  0x98   :  { %66 = vadd.xlane.f32.xlu1 %v65_v13 }
 0x11d   :  { %v64_v31 = vpop.xlane.xlu1 %63 }
 0x11e   :  { %v68_v32 = vmul.f32 0.015625, %v64_v31 }
 0x120   :  { %v70_v33 = vadd.f32 1e-05, %v68_v32 }
 0x121   :  { %v67_v34 = vpop.xlane.xlu1 %66 }
 0x122   :  { %2448 = vrsqrt.f32 %v70_v33  ;;  %v69_v35 = vmul.f32 0.015625, %v67_v34 }
 0x124   :  { %v71_v36 = vadd.f32 1e-05, %v69_v35 }
 0x126   :  { %2450 = vrsqrt.f32 %v71_v36 }
 0x12f   :  { %v2449_v37 = vpop.eup %2448 }
 0x130   :  { %v74_v39 = vmul.f32 %v2449_v37, %v2590_v6 }
 0x132   :  { %v82_v41 = vmul.f32 %v2187_v38, %v74_v39 }
 0x133   :  { %v2451_v42 = vpop.eup %2450 }
 0x134   :  { %v90_v43 = vadd.f32 %v2188_v40, %v82_v41  ;;  %v75_v44 = vmul.f32 %v2451_v42, %v2595_v10 }
 0x136   :  { %2189 = vmatmul.mubr.msk.f32.vlgmr.msra.gmra.mxu0 %vm48_vm0, %v90_v43  ;;  %v83_v45 = vmul.f32 %v2187_v38, %v75_v44 }
 0x137   :  { %2342 = vmatprep.mubr.msk.f32.mxu0 %vm2497_vm1, %v2496_v30 }
 0x138   :  { %v91_v46 = vadd.f32 %v2188_v40, %v83_v45 }
 0x13a   :  { %2190 = vmatmul.mubr.msk.f32.vlgmr.msra.gmra.mxu1 %vm48_vm0, %v91_v46 }
 0x13b   :  { %2317 = vmatprep.mubr.msk.f32.mxu1 %vm2497_vm1, %v2496_v30 }
 0x1f6   :  { %v192_v52 = vpop.f32.mrf.mxu0 }
 0x1f7   :  { %v2675_v53 = vadd.f32 %v192_v52, %v113_v51 }
 0x1f8   :  { %v194_v59 = vpop.f32.mrf.mxu0 }
 0x1f9   :  { %212 = vrot.lane.b32.xlu0 %v2675_v53, %s2498_s28  ;;  %v2692_v61 = vadd.f32 %v194_v59, %v117_v58 }
 0x1fa   :  { %v198_v54 = vpop.f32.mrf.mxu1 }
 0x1fb   :  { %v2678_v55 = vadd.f32 %v198_v54, %v113_v51 }
 0x1fc   :  { %v200_v62 = vpop.f32.mrf.mxu1 }
 0x1fd   :  { %290 = vrot.lane.b32.xlu1 %v2678_v55, %s2498_s28  ;;  %v2715_v26 = vadd.f32 %v200_v62, %v117_v58 }
 0x26b   :  { %v213_v57 = vpop.permute.xlu0 %212 }
 0x26c   :  { %2316 = vmatpush3.xpose.msk.msra.mxu1 %vm214_vm2, %v213_v57  ;;  %v204_v57 = vld [vmem:[%s3044_s5 + $0x8] sm:$0xff] }
 0x26d   :  { %2320 = vmatprep.subr.mxu1 %v2496_v30 }
 0x26f   :  { %v291_v60 = vpop.permute.xlu1 %290  ;;  %2318 = vmatmul.mubr.msk.f32.vlgmr.msra.gmra.mxu1 %vm214_vm2, %v2675_v53 }
 0x270   :  { %2321 = vmatpush3.xpose.msk.msra.mxu1 %vm214_vm2, %v291_v60  ;;  %2322 = vmatprep.mubr.msk.f32.mxu1 %vm2497_vm1, %v2496_v30 }
 0x271   :  { %2325 = vmatprep.subr.mxu1 %v2496_v30 }
 0x273   :  { %2323 = vmatmul.mubr.msk.f32.vlgmr.msra.gmra.mxu1 %vm214_vm2, %v2678_v55 }
 0x274   :  { %2326 = vmatpush3.msra.mxu1 %v2692_v61  ;;  %2327 = vmatprep.mubr.msk.f32.mxu1 %vm2497_vm1, %v2496_v30 }
 0x275   :  { %2330 = vmatprep.subr.mxu1 %v2496_v30 }
 0x32f   :  { %v285_v63 = vpop.f32.mrf.mxu1 }
 0x330   :  { %v366_v2 = vmul.f32 0.25, %v285_v63 }
 0x331   :  { %v2319_v3 = vpop.f32.mrf.mxu1 }
 0x332   :  { %v369_v4 = vsel %vm368_vm3, %v366_v2, -inf }
 0x333   :  { %370 = vmax.xlane.f32.xlu1 %v369_v4  ;;  %v362_v5 = vpop.f32.mrf.mxu1  ;;  %v203_v4 = vld [vmem:[%s3044_s5] sm:$0xff] }
 0x334   :  { %v367_v6 = vmul.f32 0.25, %v362_v5 }
 0x335   :  { %v2324_v7 = vpop.f32.mrf.mxu1 }
 0x336   :  { %v372_v8 = vsel %vm368_vm3, %v367_v6, -inf }
 0x337   :  { %373 = vmax.xlane.f32.xlu0 %v372_v8 }
 0x344   :  { %617 = vrot.lane.b32.xlu1 %v2678_v55, %s2499_s4 }
 0x348   :  { %537 = vrot.lane.b32.xlu1 %v2675_v53, %s2500_s0 }
 0x3bc   :  { %v371_v9 = vpop.xlane.xlu1 %370 }
 0x3bd   :  { %v375_v10 = vsub.f32 %v366_v2, %v371_v9 }
 0x3bf   :  { %v377_v11 = vmul.f32 1.442695, %v375_v10  ;;  %v206_v10 = vld [vmem:[%s3044_s5 + $0x18] sm:$0xff] }
 0x3c0   :  { %v618_v12 = vpop.permute.xlu1 %617  ;;  %v374_v13 = vpop.xlane.xlu0 %373 }
 0x3c1   :  { %2452 = vpow2.f32 %v377_v11  ;;  %v376_v14 = vsub.f32 %v367_v6, %v374_v13  ;;  %2341 = vmatpush3.xpose.msk.msra.mxu0 %vm214_vm2, %v618_v12  ;;  %v205_v11 = vld [vmem:[%s3044_s5 + $0x10] sm:$0xff] }
 0x3c2   :  { %2350 = vmatprep.subr.mxu0 %v2496_v30 }
 0x3c3   :  { %v379_v15 = vmul.f32 1.442695, %v376_v14 }
 0x3c4   :  { %v538_v20 = vpop.permute.xlu1 %537 }
 0x3c5   :  { %2454 = vpow2.f32 %v379_v15 }
 0x3ce   :  { %v2453_v16 = vpop.eup %2452 }
 0x3cf   :  { %v381_v17 = vsel %vm368_vm3, %v2453_v16, 0.0 }
 0x3d0   :  { %382 = vadd.xlane.f32.xlu0 %v381_v17 }
 0x3d2   :  { %v2455_v18 = vpop.eup %2454 }
 0x3d3   :  { %v384_v19 = vsel %vm368_vm3, %v2455_v18, 0.0 }
 0x3d4   :  { %385 = vadd.xlane.f32.xlu1 %v384_v19 }
 0x3e5   :  { %615 = vrot.lane.b32.xlu1 %v2678_v55, %s2500_s0 }
 0x3e6   :  { %539 = vrot.lane.b32.xlu0 %v2675_v53, %s2499_s4 }
 0x459   :  { %v383_v21 = vpop.xlane.xlu0 %382 }
 0x45a   :  { %2456 = vrcp.f32 %v383_v21 }
 0x45d   :  { %v386_v22 = vpop.xlane.xlu1 %385  ;;  %v540_v29 = vpop.permute.xlu0 %539 }
 0x45e   :  { %2458 = vrcp.f32 %v386_v22 }
 0x461   :  { %v616_v23 = vpop.permute.xlu1 %615 }
 0x462   :  { %2343 = vmatmul.mubr.msk.f32.vlgmr.msra.gmra.mxu0 %vm214_vm2, %v616_v23 }
 0x463   :  { %2352 = vmatprep.mubr.msk.f32.mxu0 %vm2497_vm1, %v2496_v30 }
 0x467   :  { %v2457_v24 = vpop.eup %2456 }
 0x468   :  { %v389_v25 = vmul.f32 %v2457_v24, %v2453_v16 }
 0x46a   :  { %2328 = vmatmul.mubr.msk.f32.vlgmr.msra.gmra.mxu1 %vm368_vm3, %v389_v25 }
 0x46b   :  { %v2459_v27 = vpop.eup %2458  ;;  %2331 = vmatpush3.msra.mxu1 %v2715_v26  ;;  %2332 = vmatprep.mubr.msk.f32.mxu1 %vm2497_vm1, %v2496_v30 }
 0x46c   :  { %2335 = vmatprep.subr.mxu1 %v2496_v30  ;;  %v390_v28 = vmul.f32 %v2459_v27, %v2455_v18 }
 0x46e   :  { %2333 = vmatmul.mubr.msk.f32.vlgmr.msra.gmra.mxu1 %vm368_vm3, %v390_v28 }
 0x46f   :  { %2336 = vmatpush3.xpose.msk.msra.mxu1 %vm214_vm2, %v540_v29  ;;  %2337 = vmatprep.mubr.msk.f32.mxu1 %vm2497_vm1, %v2496_v30 }
 0x470   :  { %2345 = vmatprep.subr.mxu1 %v2496_v30 }
 0x472   :  { %2338 = vmatmul.mubr.msk.f32.vlgmr.msra.gmra.mxu1 %vm214_vm2, %v538_v20 }
 0x473   :  { %2347 = vmatprep.mubr.msk.f32.mxu1 %vm2497_vm1, %v2496_v30 }
 0x522   :  { %v689_v31 = vpop.f32.mrf.mxu0 }
 0x523   :  { %v694_v32 = vmul.f32 0.25, %v689_v31 }
 0x524   :  { %v2344_v33 = vpop.f32.mrf.mxu0 }
 0x525   :  { %v698_v34 = vsel %vm368_vm3, %v694_v32, -inf }
 0x526   :  { %699 = vmax.xlane.f32.xlu1 %v698_v34 }
 0x52a   :  { %v460_v35 = vpop.f32.mrf.mxu1 }
 0x52c   :  { %v2329_v36 = vpop.f32.mrf.mxu1 }
 0x52e   :  { %v533_v37 = vpop.f32.mrf.mxu1 }
 0x530   :  { %v2334_v38 = vpop.f32.mrf.mxu1 }
 0x532   :  { %v611_v39 = vpop.f32.mrf.mxu1 }
 0x533   :  { %v693_v40 = vmul.f32 0.25, %v611_v39 }
 0x534   :  { %v2339_v41 = vpop.f32.mrf.mxu1 }
 0x535   :  { %v695_v42 = vsel %vm368_vm3, %v693_v40, -inf }
 0x536   :  { %696 = vmax.xlane.f32.xlu0 %v695_v42 }
 0x537   :  { %795 = vrot.lane.b32.xlu1 %v2715_v26, %s2500_s0 }
 0x53b   :  { %1035 = vrot.lane.b32.xlu1 %v2675_v53, %s2501_s29 }
 0x53f   :  { %1113 = vrot.lane.b32.xlu1 %v2678_v55, %s2501_s29 }
 0x543   :  { %1111 = vrot.lane.b32.xlu1 %v2678_v55, %s2502_s30 }
 0x5af   :  { %v700_v43 = vpop.xlane.xlu1 %699 }
 0x5b0   :  { %v702_v44 = vsub.f32 %v694_v32, %v700_v43 }
 0x5b2   :  { %v705_v45 = vmul.f32 1.442695, %v702_v44 }
 0x5b3   :  { %v796_v46 = vpop.permute.xlu1 %795 }
 0x5b4   :  { %2460 = vpow2.f32 %v705_v45  ;;  %2351 = vmatpush3.msra.mxu0 %v796_v46 }
 0x5b5   :  { %2362 = vmatprep.subr.mxu0 %v204_v57 }
 0x5b7   :  { %v1036_v62 = vpop.permute.xlu1 %1035 }
 0x5bb   :  { %v1114_v5 = vpop.permute.xlu1 %1113 }
 0x5bf   :  { %v697_v47 = vpop.xlane.xlu0 %696  ;;  %v1112_v7 = vpop.permute.xlu1 %1111 }
 0x5c0   :  { %v701_v50 = vsub.f32 %v693_v40, %v697_v47 }
 0x5c1   :  { %v2461_v51 = vpop.eup %2460 }
 0x5c2   :  { %v703_v52 = vmul.f32 1.442695, %v701_v50  ;;  %v710_v54 = vsel %vm368_vm3, %v2461_v51, 0.0 }
 0x5c3   :  { %711 = vadd.xlane.f32.xlu0 %v710_v54 }
 0x5c4   :  { %2462 = vpow2.f32 %v703_v52 }
 0x5d1   :  { %v2463_v58 = vpop.eup %2462 }
 0x5d2   :  { %v707_v59 = vsel %vm368_vm3, %v2463_v58, 0.0 }
 0x5d3   :  { %708 = vadd.xlane.f32.xlu0 %v707_v59 }
 0x5e9   :  { %718 = vrot.lane.b32.xlu0 %v2692_v61, %s2500_s0 }
 0x5ed   :  { %1033 = vrot.lane.b32.xlu0 %v2675_v53, %s2502_s30 }
 0x64c   :  { %v712_v60 = vpop.xlane.xlu0 %711 }
 0x64d   :  { %2464 = vrcp.f32 %v712_v60 }
 0x65a   :  { %v2465_v63 = vpop.eup %2464 }
 0x65b   :  { %v716_v2 = vmul.f32 %v2465_v63, %v2461_v51 }
 0x65c   :  { %v709_v3 = vpop.xlane.xlu0 %708 }
 0x65d   :  { %2466 = vrcp.f32 %v709_v3  ;;  %2353 = vmatmul.mubr.msk.f32.vlgmr.msra.gmra.mxu0 %vm368_vm3, %v716_v2 }
 0x65e   :  { %2363 = vmatpush3.msra.mxu0 %v204_v57  ;;  %2366 = vmatprep.mubr.msk.f32.mxu0 %vm214_vm2, %v460_v35  ;;  %v207_v57 = vld [vmem:[%s3044_s5 + $0x20] sm:$0xff] }
 0x65f   :  { %2364 = vmatprep.subr.mxu0 %v203_v4 }
 0x660   :  { %2365 = vmatpush3.msra.mxu0 %v203_v4  ;;  %v719_v6 = vpop.permute.xlu0 %718 }
 0x661   :  { %2374 = vmatprep.subr.mxu0 %v2496_v30  ;;  %2346 = vmatpush3.msra.mxu1 %v719_v6 }
 0x662   :  { %2367 = vmatmul.mubr.msk.f32.vlgmr.msra.gmra.mxu0 %vm214_vm2, %v533_v37  ;;  %2355 = vmatprep.subr.mxu1 %v206_v10 }
 0x663   :  { %2375 = vmatpush3.xpose.msk.msra.mxu0 %vm214_vm2, %v1114_v5  ;;  %2376 = vmatprep.mubr.msk.f32.mxu0 %vm2497_vm1, %v2496_v30 }
 0x664   :  { %2384 = vmatprep.subr.mxu0 %v2496_v30  ;;  %v1034_v22 = vpop.permute.xlu0 %1033 }
 0x666   :  { %2377 = vmatmul.mubr.msk.f32.vlgmr.msra.gmra.mxu0 %vm214_vm2, %v1112_v7 }
 0x667   :  { %2386 = vmatprep.mubr.msk.f32.mxu0 %vm2497_vm1, %v2496_v30 }
 0x66a   :  { %v2467_v8 = vpop.eup %2466 }
 0x66b   :  { %v715_v9 = vmul.f32 %v2467_v8, %v2463_v58 }
 0x66d   :  { %2348 = vmatmul.mubr.msk.f32.vlgmr.msra.gmra.mxu1 %vm368_vm3, %v715_v9 }
 0x66e   :  { %2356 = vmatpush3.msra.mxu1 %v206_v10 }
 0x66f   :  { %2357 = vmatprep.subr.mxu1 %v205_v11 }
 0x670   :  { %2358 = vmatpush3.msra.mxu1 %v205_v11 }
 0x671   :  { %2369 = vmatprep.subr.mxu1 %v2496_v30 }
 0x71d   :  { %v867_v12 = vpop.f32.mrf.mxu0 }
 0x71f   :  { %v2354_v13 = vpop.f32.mrf.mxu0 }
 0x722   :  { %v2769_v14 = vpop.f32.mrf.mxu0 }
 0x724   :  { %v2771_v15 = vpop.f32.mrf.mxu0 }
 0x726   :  { %v1185_v16 = vpop.f32.mrf.mxu0 }
 0x727   :  { %v1190_v17 = vmul.f32 0.25, %v1185_v16 }
 0x728   :  { %v2378_v18 = vpop.f32.mrf.mxu0 }
 0x729   :  { %v1194_v19 = vsel %vm368_vm3, %v1190_v17, -inf }
 0x72a   :  { %1195 = vmax.xlane.f32.xlu1 %v1194_v19 }
 0x72d   :  { %v790_v20 = vpop.f32.mrf.mxu1 }
 0x72e   :  { %2359 = vmatprep.mubr.msk.f32.mxu1 %vm214_vm2, %v790_v20 }
 0x72f   :  { %v2349_v21 = vpop.f32.mrf.mxu1  ;;  %2360 = vmatmul.mubr.msk.f32.vlgmr.msra.gmra.mxu1 %vm214_vm2, %v867_v12 }
 0x730   :  { %2370 = vmatpush3.xpose.msk.msra.mxu1 %vm214_vm2, %v1036_v62  ;;  %2371 = vmatprep.mubr.msk.f32.mxu1 %vm2497_vm1, %v2496_v30 }
 0x731   :  { %2379 = vmatprep.subr.mxu1 %v2496_v30 }
 0x733   :  { %2372 = vmatmul.mubr.msk.f32.vlgmr.msra.gmra.mxu1 %vm214_vm2, %v1034_v22 }
 0x734   :  { %2381 = vmatprep.mubr.msk.f32.mxu1 %vm2497_vm1, %v2496_v30 }
 0x73b   :  { %1289 = vrot.lane.b32.xlu1 %v2715_v26, %s2502_s30 }
 0x73f   :  { %1450 = vrot.lane.b32.xlu1 %v2675_v53, %s2503_s22 }
 0x743   :  { %1528 = vrot.lane.b32.xlu1 %v2678_v55, %s2503_s22 }
 0x747   :  { %1526 = vrot.lane.b32.xlu1 %v2678_v55, %s2504_s23 }
 0x7b3   :  { %v1196_v23 = vpop.xlane.xlu1 %1195 }
 0x7b4   :  { %v1198_v25 = vsub.f32 %v1190_v17, %v1196_v23 }
 0x7b6   :  { %v1201_v27 = vmul.f32 1.442695, %v1198_v25 }
 0x7b7   :  { %v1290_v24 = vpop.permute.xlu1 %1289 }
 0x7b8   :  { %2385 = vmatpush3.msra.mxu0 %v1290_v24  ;;  %2468 = vpow2.f32 %v1201_v27 }
 0x7b9   :  { %2396 = vmatprep.subr.mxu0 %v2496_v30 }
 0x7bb   :  { %v1451_v44 = vpop.permute.xlu1 %1450 }
 0x7bf   :  { %v1529_v63 = vpop.permute.xlu1 %1528 }
 0x7c3   :  { %v1527_v4 = vpop.permute.xlu1 %1526 }
 0x7c5   :  { %v2469_v35 = vpop.eup %2468 }
 0x7c6   :  { %v1206_v55 = vsel %vm368_vm3, %v2469_v35, 0.0 }
 0x7ef   :  { %v2790_v28 = vpop.f32.mrf.mxu1 }
 0x7f0   :  { %v1030_v10 = vadd.f32 %v2769_v14, %v2790_v28 }
 0x7f1   :  { %v2792_v29 = vpop.f32.mrf.mxu1 }
 0x7f2   :  { %v1025_v12 = vadd.f32 %v2771_v15, %v2792_v29 }
 0x7f3   :  { %v1107_v31 = vpop.f32.mrf.mxu1 }
 0x7f4   :  { %v1189_v32 = vmul.f32 0.25, %v1107_v31 }
 0x7f5   :  { %v2373_v33 = vpop.f32.mrf.mxu1 }
 0x7f6   :  { %v1191_v34 = vsel %vm368_vm3, %v1189_v32, -inf }
 0x7f7   :  { %1192 = vmax.xlane.f32.xlu0 %v1191_v34  ;;  %v209_v34 = vld [vmem:[%s3044_s5 + $0x30] sm:$0xff] }
 0x7fb   :  { %1207 = vadd.xlane.f32.xlu0 %v1206_v55 }
 0x880   :  { %v1193_v36 = vpop.xlane.xlu0 %1192 }
 0x881   :  { %v1197_v37 = vsub.f32 %v1189_v32, %v1193_v36 }
 0x883   :  { %v1199_v38 = vmul.f32 1.442695, %v1197_v37 }
 0x884   :  { %v1208_v39 = vpop.xlane.xlu0 %1207 }
 0x885   :  { %2470 = vpow2.f32 %v1199_v38 }
 0x886   :  { %2472 = vrcp.f32 %v1208_v39  ;;  %v2223_v39 = vld [vmem:[%s3045_s6] ss:$0 sm:$0xff] }
 0x892   :  { %v2471_v40 = vpop.eup %2470 }
 0x893   :  { %v2473_v41 = vpop.eup %2472  ;;  %v1203_v42 = vsel %vm368_vm3, %v2471_v40, 0.0 }
 0x894   :  { %1204 = vadd.xlane.f32.xlu0 %v1203_v42  ;;  %v1212_v43 = vmul.f32 %v2473_v41, %v2469_v35 }
 0x896   :  { %2387 = vmatmul.mubr.msk.f32.vlgmr.msra.gmra.mxu0 %vm368_vm3, %v1212_v43 }
 0x897   :  { %2397 = vmatpush3.xpose.msk.msra.mxu0 %vm214_vm2, %v1451_v44  ;;  %2398 = vmatprep.mubr.msk.f32.mxu0 %vm2497_vm1, %v2496_v30 }
 0x898   :  { %2406 = vmatprep.subr.mxu0 %v2496_v30 }
 0x8aa   :  { %1213 = vrot.lane.b32.xlu0 %v2692_v61, %s2502_s30 }
 0x8ae   :  { %1448 = vrot.lane.b32.xlu0 %v2675_v53, %s2504_s23  ;;  %v208_v53 = vld [vmem:[%s3044_s5 + $0x28] sm:$0xff] }
 0x91d   :  { %v1205_v45 = vpop.xlane.xlu0 %1204 }
 0x91e   :  { %2474 = vrcp.f32 %v1205_v45 }
 0x921   :  { %v1214_v46 = vpop.permute.xlu0 %1213 }
 0x922   :  { %2380 = vmatpush3.msra.mxu1 %v1214_v46 }
 0x923   :  { %2389 = vmatprep.subr.mxu1 %v208_v53 }
 0x925   :  { %v1449_v47 = vpop.permute.xlu0 %1448 }
 0x926   :  { %2399 = vmatmul.mubr.msk.f32.vlgmr.msra.gmra.mxu0 %vm214_vm2, %v1449_v47 }
 0x927   :  { %2408 = vmatprep.mubr.msk.f32.mxu0 %vm2497_vm1, %v2496_v30 }
 0x92b   :  { %v2475_v50 = vpop.eup %2474 }
 0x92c   :  { %v1211_v51 = vmul.f32 %v2475_v50, %v2471_v40 }
 0x92e   :  { %2382 = vmatmul.mubr.msk.f32.vlgmr.msra.gmra.mxu1 %vm368_vm3, %v1211_v51 }
 0x92f   :  { %2390 = vmatpush3.msra.mxu1 %v208_v53 }
 0x930   :  { %2391 = vmatprep.subr.mxu1 %v207_v57 }
 0x931   :  { %2392 = vmatpush3.msra.mxu1 %v207_v57 }
 0x932   :  { %2401 = vmatprep.subr.mxu1 %v2496_v30 }
 0x956   :  { %v1361_v52 = vpop.f32.mrf.mxu0 }
 0x958   :  { %v2388_v54 = vpop.f32.mrf.mxu0 }
 0x9e6   :  { %v1522_v58 = vpop.f32.mrf.mxu0 }
 0x9e7   :  { %v1604_v59 = vmul.f32 0.25, %v1522_v58 }
 0x9e8   :  { %v2400_v60 = vpop.f32.mrf.mxu0 }
 0x9e9   :  { %v1606_v62 = vsel %vm368_vm3, %v1604_v59, -inf }
 0x9ea   :  { %1607 = vmax.xlane.f32.xlu0 %v1606_v62  ;;  %v1933_v62 = vld [vmem:[%s3046_s9 + $0x78] sm:$0xff] }
 0x9ee   :  { %v1285_v2 = vpop.f32.mrf.mxu1 }
 0x9ef   :  { %2393 = vmatprep.mubr.msk.f32.mxu1 %vm214_vm2, %v1285_v2  ;;  %v1931_v2 = vld [vmem:[%s3046_s9 + $0x68] sm:$0xff] }
 0x9f0   :  { %v2383_v3 = vpop.f32.mrf.mxu1  ;;  %2394 = vmatmul.mubr.msk.f32.vlgmr.msra.gmra.mxu1 %vm214_vm2, %v1361_v52 }
 0x9f1   :  { %2402 = vmatpush3.xpose.msk.msra.mxu1 %vm214_vm2, %v1529_v63  ;;  %2403 = vmatprep.mubr.msk.f32.mxu1 %vm2497_vm1, %v2496_v30  ;;  %v1932_v63 = vld [vmem:[%s3046_s9 + $0x70] sm:$0xff]  ;;  %v1930_v3 = vld [vmem:[%s3046_s9 + $0x60] sm:$0xff] }
 0x9f2   :  { %2411 = vmatprep.subr.mxu1 %v2496_v30 }
 0x9f4   :  { %2404 = vmatmul.mubr.msk.f32.vlgmr.msra.gmra.mxu1 %vm214_vm2, %v1527_v4  ;;  %v1929_v4 = vld [vmem:[%s3046_s9 + $0x58] sm:$0xff] }
 0x9f5   :  { %2413 = vmatprep.mubr.msk.f32.mxu1 %vm2497_vm1, %v2496_v30 }
 0xa73   :  { %v1608_v5 = vpop.xlane.xlu0 %1607 }
 0xa74   :  { %v1612_v6 = vsub.f32 %v1604_v59, %v1608_v5  ;;  %v1928_v5 = vld [vmem:[%s3046_s9 + $0x50] sm:$0xff] }
 0xa76   :  { %v1614_v7 = vmul.f32 1.442695, %v1612_v6  ;;  %v1927_v6 = vld [vmem:[%s3046_s9 + $0x48] sm:$0xff] }
 0xa78   :  { %2476 = vpow2.f32 %v1614_v7  ;;  %v1926_v7 = vld [vmem:[%s3046_s9 + $0x40] sm:$0xff] }
 0xa85   :  { %v2477_v8 = vpop.eup %2476 }
 0xa86   :  { %v1618_v9 = vsel %vm368_vm3, %v2477_v8, 0.0 }
 0xa87   :  { %1619 = vadd.xlane.f32.xlu0 %v1618_v9  ;;  %v1924_v9 = vld [vmem:[%s3046_s9 + $0x30] sm:$0xff] }
 0xab0   :  { %v2395_v11 = vpop.f32.mrf.mxu1 }
 0xab1   :  { %v1447_v13 = vadd.f32 %v2395_v11, %v1030_v10  ;;  %v1923_v10 = vld [vmem:[%s3046_s9 + $0x28] sm:$0xff]  ;;  %v1922_v11 = vld [vmem:[%s3046_s9 + $0x20] sm:$0xff] }
 0xab2   :  { %v1437_v16 = vpop.f32.mrf.mxu1 }
 0xab3   :  { %v1446_v17 = vadd.f32 %v1437_v16, %v1025_v12  ;;  %v1921_v12 = vld [vmem:[%s3046_s9 + $0x18] sm:$0xff]  ;;  %v1919_v16 = vld [vmem:[%s3046_s9 + $0x8] sm:$0xff] }
 0xab4   :  { %v1600_v18 = vpop.f32.mrf.mxu1 }
 0xab5   :  { %v1605_v19 = vmul.f32 0.25, %v1600_v18 }
 0xab6   :  { %v2405_v20 = vpop.f32.mrf.mxu1 }
 0xab7   :  { %v1609_v21 = vsel %vm368_vm3, %v1605_v19, -inf }
 0xab8   :  { %1610 = vmax.xlane.f32.xlu1 %v1609_v21 }
 0xac9   :  { %1704 = vrot.lane.b32.xlu1 %v2715_v26, %s2504_s23 }
 0xb10   :  { %v1620_v27 = vpop.xlane.xlu0 %1619 }
 0xb41   :  { %v1611_v22 = vpop.xlane.xlu1 %1610 }
 0xb42   :  { %v1613_v23 = vsub.f32 %v1605_v19, %v1611_v22 }
 0xb44   :  { %v1616_v24 = vmul.f32 1.442695, %v1613_v23 }
 0xb45   :  { %v1705_v14 = vpop.permute.xlu1 %1704 }
 0xb46   :  { %2478 = vpow2.f32 %v1616_v24  ;;  %2412 = vmatpush3.msra.mxu1 %v1705_v14 }
 0xb47   :  { %2480 = vrcp.f32 %v1620_v27  ;;  %1968 = vmatprep.subr.mxu1 %v1933_v62  ;;  %v2224_v27 = vld [vmem:[%s3047_s7] ss:$0 sm:$0xff]  ;;  %v2067_v62 = vld [vmem:[%s3049_s11 + $0x10] sm:$0xff] }
 0xb53   :  { %v2479_v25 = vpop.eup %2478 }
 0xb54   :  { %v1621_v15 = vsel %vm368_vm3, %v2479_v25, 0.0  ;;  %v2481_v29 = vpop.eup %2480 }
 0xb55   :  { %1622 = vadd.xlane.f32.xlu0 %v1621_v15  ;;  %v1626_v26 = vmul.f32 %v2481_v29, %v2477_v8  ;;  %v1925_v8 = vld [vmem:[%s3046_s9 + $0x38] sm:$0xff]  ;;  %v2225_v29 = vld [vmem:[%s3048_s8] ss:$0 sm:$0xff] }
 0xb6b   :  { %1628 = vrot.lane.b32.xlu0 %v2692_v61, %s2504_s23  ;;  %v210_v61 = vld [vmem:[%s3044_s5 + $0x38] sm:$0xff] }
 0xbde   :  { %v1623_v28 = vpop.xlane.xlu0 %1622 }
 0xbdf   :  { %2482 = vrcp.f32 %v1623_v28 }
 0xbe2   :  { %v1629_v31 = vpop.permute.xlu0 %1628 }
 0xbe3   :  { %2407 = vmatpush3.msra.mxu0 %v1629_v31 }
 0xbe4   :  { %2409 = vmatmul.mubr.msk.f32.vlgmr.msra.gmra.mxu0 %vm368_vm3, %v1626_v26  ;;  %2416 = vmatprep.subr.mxu0 %v210_v61 }
 0xbe5   :  { %2417 = vmatpush3.msra.mxu0 %v210_v61  ;;  %v2080_v61 = vld [vmem:[%s3049_s11 + $0x78] sm:$0xff] }
 0xbe6   :  { %2418 = vmatprep.subr.mxu0 %v209_v34 }
 0xbe7   :  { %2419 = vmatpush3.msra.mxu0 %v209_v34  ;;  %v2095_v34 = vld [vmem:[%s3049_s11 + $0xf0] sm:$0xff] }
 0xbec   :  { %v2483_v32 = vpop.eup %2482 }
 0xbed   :  { %v1627_v33 = vmul.f32 %v2483_v32, %v2479_v25 }
 0xbef   :  { %2414 = vmatmul.mubr.msk.f32.vlgmr.msra.gmra.mxu1 %vm368_vm3, %v1627_v33  ;;  %v2096_v33 = vld [vmem:[%s3049_s11 + $0xf8] sm:$0xff] }
 0xbf0   :  { %2016 = vmatprep.mubr.f32.mxu1 %v2496_v30  ;;  %1969 = vmatpush1.msra.mxu1 %v1932_v63  ;;  %v2082_v63 = vld [vmem:[%s3049_s11 + $0x88] sm:$0xff] }
 0xbf1   :  { %1970 = vmatprep.subr.mxu1 %v1931_v2  ;;  %2277 = vmatprep.subr.mxu0 %v2096_v33  ;;  %v2066_v2 = vld [vmem:[%s3049_s11 + $0x8] sm:$0xff] }
 0xbf2   :  { %1971 = vmatpush1.msra.mxu1 %v1930_v3  ;;  %v2081_v3 = vld [vmem:[%s3049_s11 + $0x80] sm:$0xff] }
 0xbf3   :  { %1972 = vmatprep.subr.mxu1 %v1929_v4  ;;  %v2065_v4 = vld [vmem:[%s3049_s11] sm:$0xff] }
 0xbf4   :  { %1973 = vmatpush1.msra.mxu1 %v1928_v5  ;;  %v1934_v5 = vld [vmem:[%s3050_s10] sm:$0x3] }
 0xbf5   :  { %1974 = vmatprep.subr.mxu1 %v1927_v6  ;;  %v1939_v6 = vrot.slane %v1934_v5, %v112_v49 }
 0xbf6   :  { %1975 = vmatpush1.msra.mxu1 %v1926_v7  ;;  %v1943_v7 = vrot.slane %v1934_v5, %v116_v56 }
 0xbf7   :  { %1976 = vmatprep.subr.mxu1 %v1925_v8 }
 0xbf8   :  { %1977 = vmatpush1.msra.mxu1 %v1924_v9 }
 0xbf9   :  { %1978 = vmatprep.subr.mxu1 %v1923_v10 }
 0xbfa   :  { %1979 = vmatpush1.msra.mxu1 %v1922_v11 }
 0xbfb   :  { %1980 = vmatprep.subr.mxu1 %v1921_v12 }
 0xca4   :  { %v1700_v35 = vpop.f32.mrf.mxu0 }
 0xca5   :  { %2420 = vmatprep.mubr.msk.f32.mxu0 %vm214_vm2, %v1700_v35  ;;  %v2094_v35 = vld [vmem:[%s3049_s11 + $0xe8] sm:$0xff] }
 0xca6   :  { %v2410_v55 = vpop.f32.mrf.mxu0 }
 0xca7   :  { %v2078_v55 = vld [vmem:[%s3049_s11 + $0x68] sm:$0xff] }
 0xcaf   :  { %v1776_v36 = vpop.f32.mrf.mxu1 }
 0xcb0   :  { %2421 = vmatmul.mubr.msk.f32.vlgmr.msra.gmra.mxu0 %vm214_vm2, %v1776_v36  ;;  %v2093_v36 = vld [vmem:[%s3049_s11 + $0xe0] sm:$0xff] }
 0xcb1   :  { %v2415_v37 = vpop.f32.mrf.mxu1  ;;  %2278 = vmatpush3.msra.mxu0 %v2080_v61 }
 0xcb2   :  { %2279 = vmatprep.subr.mxu0 %v2095_v34  ;;  %v2077_v37 = vld [vmem:[%s3049_s11 + $0x60] sm:$0xff] }
 0xd70   :  { %v2422_v38 = vpop.f32.mrf.mxu0 }
 0xd71   :  { %v1862_v40 = vadd.f32 %v2422_v38, %v1447_v13  ;;  %v1920_v13 = vld [vmem:[%s3046_s9 + $0x10] sm:$0xff]  ;;  %v2092_v38 = vld [vmem:[%s3049_s11 + $0xd8] sm:$0xff] }
 0xd72   :  { %v1852_v41 = vpop.f32.mrf.mxu0  ;;  %1981 = vmatpush1.msra.mxu1 %v1920_v13 }
 0xd73   :  { %v1871_v42 = vadd.f32 %v2223_v39, %v1862_v40  ;;  %v1861_v43 = vadd.f32 %v1852_v41, %v1446_v17  ;;  %v1918_v17 = vld [vmem:[%s3046_s9] sm:$0xff]  ;;  %1982 = vmatprep.subr.mxu1 %v1919_v16  ;;  %v2091_v40 = vld [vmem:[%s3049_s11 + $0xd0] sm:$0xff] }
 0xd74   :  { %1983 = vmatpush1.msra.mxu1 %v1918_v17  ;;  %v2075_v41 = vld [vmem:[%s3049_s11 + $0x50] sm:$0xff] }
 0xd75   :  { %v2853_v44 = vadd.f32 %v1871_v42, %v2583_v1  ;;  %v1870_v45 = vadd.f32 %v2223_v39, %v1861_v43  ;;  %v2076_v39 = vld [vmem:[%s3049_s11 + $0x58] sm:$0xff]  ;;  %v2090_v42 = vld [vmem:[%s3049_s11 + $0xc8] sm:$0xff] }
 0xd76   :  { %v2074_v43 = vld [vmem:[%s3049_s11 + $0x48] sm:$0xff] }
 0xd77   :  { %v2856_v46 = vadd.f32 %v1870_v45, %v2578_v0  ;;  %v1879_v47 = vsel %vm48_vm0, %v2853_v44, 0.0  ;;  %v2089_v45 = vld [vmem:[%s3049_s11 + $0xc0] sm:$0xff] }
 0xd78   :  { %1880 = vadd.xlane.f32.xlu0 %v1879_v47  ;;  %v2073_v47 = vld [vmem:[%s3049_s11 + $0x40] sm:$0xff] }
 0xd79   :  { %v1876_v50 = vsel %vm48_vm0, %v2856_v46, 0.0 }
 0xd7a   :  { %1877 = vadd.xlane.f32.xlu1 %v1876_v50  ;;  %v2088_v50 = vld [vmem:[%s3049_s11 + $0xb8] sm:$0xff] }
 0xe01   :  { %v1881_v51 = vpop.xlane.xlu0 %1880 }
 0xe02   :  { %v1883_v52 = vmul.f32 0.015625, %v1881_v51  ;;  %v2072_v51 = vld [vmem:[%s3049_s11 + $0x38] sm:$0xff] }
 0xe03   :  { %v1878_v54 = vpop.xlane.xlu1 %1877 }
 0xe04   :  { %v1885_v53 = vsub.f32 %v2853_v44, %v1883_v52  ;;  %v1882_v57 = vmul.f32 0.015625, %v1878_v54  ;;  %v2087_v52 = vld [vmem:[%s3049_s11 + $0xb0] sm:$0xff] }
 0xe05   :  { %v2071_v54 = vld [vmem:[%s3049_s11 + $0x30] sm:$0xff] }
 0xe06   :  { %v1884_v1 = vsub.f32 %v2856_v46, %v1882_v57  ;;  %v1887_v58 = vmul.f32 %v1885_v53, %v1885_v53  ;;  %v2070_v57 = vld [vmem:[%s3049_s11 + $0x28] sm:$0xff] }
 0xe08   :  { %v1891_v0 = vsel %vm48_vm0, %v1887_v58, 0.0  ;;  %v1886_v59 = vmul.f32 %v1884_v1, %v1884_v1  ;;  %v2069_v58 = vld [vmem:[%s3049_s11 + $0x20] sm:$0xff] }
 0xe09   :  { %1892 = vadd.xlane.f32.xlu1 %v1891_v0  ;;  %v2084_v0 = vld [vmem:[%s3049_s11 + $0x98] sm:$0xff] }
 0xe0a   :  { %v1888_v60 = vsel %vm48_vm0, %v1886_v59, 0.0  ;;  %v2068_v59 = vld [vmem:[%s3049_s11 + $0x18] sm:$0xff] }
 0xe0b   :  { %1889 = vadd.xlane.f32.xlu0 %v1888_v60  ;;  %v2083_v60 = vld [vmem:[%s3049_s11 + $0x90] sm:$0xff] }
 0xe92   :  { %v1893_v18 = vpop.xlane.xlu1 %1892 }
 0xe93   :  { %v1895_v19 = vmul.f32 0.015625, %v1893_v18 }
 0xe94   :  { %v1890_v20 = vpop.xlane.xlu0 %1889 }
 0xe95   :  { %v1897_v21 = vadd.f32 1e-05, %v1895_v19  ;;  %v1894_v22 = vmul.f32 0.015625, %v1890_v20 }
 0xe97   :  { %2484 = vrsqrt.f32 %v1897_v21  ;;  %v1896_v23 = vadd.f32 1e-05, %v1894_v22 }
 0xe99   :  { %2486 = vrsqrt.f32 %v1896_v23 }
 0xea4   :  { %v2485_v24 = vpop.eup %2484 }
 0xea5   :  { %v1901_v15 = vmul.f32 %v2485_v24, %v1885_v53  ;;  %v2086_v53 = vld [vmem:[%s3049_s11 + $0xa8] sm:$0xff] }
 0xea6   :  { %v2487_v14 = vpop.eup %2486 }
 0xea7   :  { %v1900_v25 = vmul.f32 %v2487_v14, %v1884_v1  ;;  %v1909_v26 = vmul.f32 %v2224_v27, %v1901_v15  ;;  %v2085_v1 = vld [vmem:[%s3049_s11 + $0xa0] sm:$0xff] }
 0xea9   :  { %v1908_v28 = vmul.f32 %v2224_v27, %v1900_v25  ;;  %v1917_v32 = vadd.f32 %v2225_v29, %v1909_v26 }
 0xeab   :  { %v1916_v31 = vadd.f32 %v2225_v29, %v1908_v28 }
 0xead   :  { %2226 = vmatmul.mubr.msk.f32.vlgmr.msra.gmra.mxu1 %vm48_vm0, %v1916_v31 }
 0xeae   :  { %2022 = vmatprep.mubr.f32.mxu1 %v2496_v30  ;;  %v2079_v30 = vld [vmem:[%s3049_s11 + $0x70] sm:$0xff] }
 0xeaf   :  { %2280 = vmatpush3.msra.mxu0 %v2079_v30 }
 0xeb0   :  { %2281 = vmatprep.subr.mxu0 %v2094_v35 }
 0xeb1   :  { %2227 = vmatmul.mubr.msk.f32.gmra.mxu1 %vm48_vm0, %v1917_v32  ;;  %2282 = vmatpush3.msra.mxu0 %v2078_v55 }
 0xeb2   :  { %2283 = vmatprep.subr.mxu0 %v2093_v36 }
 0xeb3   :  { %2284 = vmatpush3.msra.mxu0 %v2077_v37 }
 0xeb4   :  { %2285 = vmatprep.subr.mxu0 %v2092_v38 }
 0xeb5   :  { %2286 = vmatpush3.msra.mxu0 %v2076_v39 }
 0xeb6   :  { %2287 = vmatprep.subr.mxu0 %v2091_v40 }
 0xeb7   :  { %2288 = vmatpush3.msra.mxu0 %v2075_v41 }
 0xeb8   :  { %2289 = vmatprep.subr.mxu0 %v2090_v42 }
 0xeb9   :  { %2290 = vmatpush3.msra.mxu0 %v2074_v43 }
 0xeba   :  { %2291 = vmatprep.subr.mxu0 %v2089_v45 }
 0xebb   :  { %2292 = vmatpush3.msra.mxu0 %v2073_v47 }
 0xebc   :  { %2293 = vmatprep.subr.mxu0 %v2088_v50 }
 0xebd   :  { %2294 = vmatpush3.msra.mxu0 %v2072_v51 }
 0xebe   :  { %2295 = vmatprep.subr.mxu0 %v2087_v52  ;;  %v2228_v52 = vld [vmem:[%s3051_s12] ss:$0 sm:$0xff] }
 0xebf   :  { %2296 = vmatpush3.msra.mxu0 %v2071_v54 }
 0xec0   :  { %2297 = vmatprep.subr.mxu0 %v2086_v53 }
 0xec1   :  { %2298 = vmatpush3.msra.mxu0 %v2070_v57 }
 0xec2   :  { %2299 = vmatprep.subr.mxu0 %v2085_v1 }
 0xec3   :  { %2300 = vmatpush3.msra.mxu0 %v2069_v58 }
 0xec4   :  { %2301 = vmatprep.subr.mxu0 %v2084_v0 }
 0xec5   :  { %2302 = vmatpush3.msra.mxu0 %v2068_v59 }
 0xec6   :  { %2303 = vmatprep.subr.mxu0 %v2083_v60 }
 0xec7   :  { %2304 = vmatpush3.msra.mxu0 %v2067_v62 }
 0xec8   :  { %2305 = vmatprep.subr.mxu0 %v2082_v63 }
 0xec9   :  { %2306 = vmatpush3.msra.mxu0 %v2066_v2 }
 0xeca   :  { %2307 = vmatprep.subr.mxu0 %v2081_v3 }
 0xecb   :  { %2308 = vmatpush3.msra.mxu0 %v2065_v4 }
 0xf6d   :  { %v2018_v8 = vpop.f32.mrf.mxu1 }
 0xf6e   :  { %v2019_v9 = vadd.f32 %v2018_v8, %v1939_v6 }
 0xf6f   :  { %v2020_v10 = vpop.f32.mrf.mxu1 }
 0xf70   :  { %v2029_v11 = vmul.f32 %v2019_v9, %v2019_v9  ;;  %v2021_v12 = vadd.f32 %v2020_v10, %v1943_v7 }
 0xf71   :  { %v2024_v13 = vpop.f32.mrf.mxu1 }
 0xf72   :  { %v2033_v16 = vmul.f32 %v2029_v11, %v2019_v9  ;;  %v2030_v17 = vmul.f32 %v2021_v12, %v2021_v12  ;;  %v2025_v18 = vadd.f32 %v2024_v13, %v1939_v6 }
 0xf73   :  { %v2026_v19 = vpop.f32.mrf.mxu1 }
 0xf74   :  { %v2037_v20 = vmul.f32 0.044715, %v2033_v16  ;;  %v2034_v21 = vmul.f32 %v2030_v17, %v2021_v12  ;;  %v2031_v22 = vmul.f32 %v2025_v18, %v2025_v18  ;;  %v2027_v23 = vadd.f32 %v2026_v19, %v1943_v7 }
 0xf76   :  { %v2041_v24 = vadd.f32 %v2037_v20, %v2019_v9  ;;  %v2038_v14 = vmul.f32 0.044715, %v2034_v21  ;;  %v2035_v49 = vmul.f32 %v2031_v22, %v2025_v18  ;;  %v2032_v25 = vmul.f32 %v2027_v23, %v2027_v23 }
 0xf78   :  { %v2045_v48 = vmul.f32 0.7978846, %v2041_v24  ;;  %v2042_v56 = vadd.f32 %v2038_v14, %v2021_v12  ;;  %v2039_v15 = vmul.f32 0.044715, %v2035_v49  ;;  %v2036_v27 = vmul.f32 %v2032_v25, %v2027_v23 }
 0xf7a   :  { %2488 = vtanh.f32 %v2045_v48  ;;  %v2046_v28 = vmul.f32 0.7978846, %v2042_v56  ;;  %v2043_v29 = vadd.f32 %v2039_v15, %v2025_v18  ;;  %v2040_v31 = vmul.f32 0.044715, %v2036_v27 }
 0xf7c   :  { %2490 = vtanh.f32 %v2046_v28  ;;  %v2047_v26 = vmul.f32 0.7978846, %v2043_v29  ;;  %v2044_v32 = vadd.f32 %v2040_v31, %v2027_v23 }
 0xf7e   :  { %2492 = vtanh.f32 %v2047_v26  ;;  %v2048_v33 = vmul.f32 0.7978846, %v2044_v32 }
 0xf80   :  { %2494 = vtanh.f32 %v2048_v33 }
 0xf87   :  { %v2489_v61 = vpop.eup %2488 }
 0xf88   :  { %v2053_v34 = vadd.f32 1.0, %v2489_v61 }
 0xf89   :  { %v2491_v30 = vpop.eup %2490 }
 0xf8a   :  { %v2054_v35 = vadd.f32 1.0, %v2491_v30  ;;  %v2057_v36 = vmul.f32 0.5, %v2053_v34 }
 0xf8b   :  { %v2493_v55 = vpop.eup %2492 }
 0xf8c   :  { %v2058_v37 = vmul.f32 0.5, %v2054_v35  ;;  %v2055_v38 = vadd.f32 1.0, %v2493_v55  ;;  %v2061_v42 = vmul.f32 %v2057_v36, %v2019_v9 }
 0xf8d   :  { %v2495_v39 = vpop.eup %2494 }
 0xf8e   :  { %v2062_v40 = vmul.f32 %v2058_v37, %v2021_v12  ;;  %v2056_v41 = vadd.f32 1.0, %v2495_v39  ;;  %v2059_v43 = vmul.f32 0.5, %v2055_v38 }
 0xf90   :  { %2168 = vmatprep.mubr.f32.mxu0 %v2062_v40  ;;  %v2060_v45 = vmul.f32 0.5, %v2056_v41  ;;  %v2063_v50 = vmul.f32 %v2059_v43, %v2025_v18 }
 0xf91   :  { %2169 = vmatmul.mubr.f32.vlgmr.msra.gmra.mxu0 %v2061_v42 }
 0xf92   :  { %v2064_v47 = vmul.f32 %v2060_v45, %v2027_v23 }
 0xf94   :  { %2173 = vmatprep.mubr.f32.mxu0 %v2064_v47 }
 0xf95   :  { %2174 = vmatmul.mubr.f32.gmra.mxu0 %v2063_v50 }
0x1051   :  { %v2309_v51 = vpop.f32.mrf.mxu0 }
0x1053   :  { %v2310_v54 = vpop.f32.mrf.mxu0 }
0x1054   :  { %v2311_v53 = vadd.f32 %v2310_v54, %v2309_v51 }
0x1055   :  { %v2312_v57 = vpop.f32.mrf.mxu0 }
0x1056   :  { %v2171_v1 = vadd.f32 %v2311_v53, %v2228_v52 }
0x1057   :  { %v2313_v58 = vpop.f32.mrf.mxu0 }
0x1058   :  { %v2179_v0 = vadd.f32 %v2171_v1, %v2856_v46  ;;  %v2314_v59 = vadd.f32 %v2313_v58, %v2312_v57 }
0x105a   :  { %2181 = vst.msk [vmem:[%s3052_s13] sm:$0xff] %vm48_vm0, %v2179_v0  ;;  %v2176_v60 = vadd.f32 %v2314_v59, %v2228_v52 }
0x105c   :  { %v2180_v62 = vadd.f32 %v2176_v60, %v2853_v44 }
0x105e   :  { %2182 = vst.msk [vmem:[%s3052_s13 + $0x8] sm:$0xff] %vm48_vm0, %v2180_v62 }

// kernel: forward_reconstruct.23
= control target key start
LH: loop header
LB: loop body
LE: loop exit
PB: predicated region body
PF: predicated region fallthrough
CT: control target
= control target key end

     0   :  { %vm59_vm0 = vcmask 23552   ;;  %vm199_vm1 = vcmask 130112   ;;  %vm1087_vm2 = vcmask 130048   ;;  %vm264_vm3 = vcmask 1041409   ;;  %s1826_s1 = inlined_call_operand.vmem [shape: f32[8,16,3], index: 1, kind: input, shape index: {}]   ;;  %s1827_s0 = inlined_call_operand.vmem [shape: f32[8,16,3], index: 0, kind: input, shape index: {}]   ;;  %s1828_s2 = inlined_call_operand.vmem [shape: f32[8,32], index: 2, kind: output, shape index: {}]  }
   0x1   :  { %v28_v0 = vld [vmem:[%s1826_s1 + $0x8] sm:$0xff]  ;;  %v30_v1 = vld [vmem:[%s1826_s1 + $0x18] sm:$0xff]  ;;  %v27_v2 = vld [vmem:[%s1826_s1] sm:$0xff]  ;;  %vm265_vm4 = vcmask 1042434   ;;  %vm267_vm5 = vcmask 1043459   ;;  %vm269_vm6 = vcmask 1044484  }
   0x2   :  { %1377 = vmatprep.subr.msk.mxu0 %vm59_vm0, %v28_v0  ;;  %1384 = vmatprep.subr.msk.mxu1 %vm59_vm0, %v30_v1  ;;  %v29_v3 = vld [vmem:[%s1826_s1 + $0x10] sm:$0xff]  ;;  %v1467_v4 = vld [vmem:[%s1827_s0] sm:$0xff]  ;;  %v108_v6 = vmul.f32 %v27_v2, %v27_v2  ;;  %v32_v9 = vld [vmem:[%s1826_s1 + $0x28] sm:$0xff]  ;;  %v111_v14 = vmul.f32 %v30_v1, %v30_v1  ;;  %v109_v15 = vmul.f32 %v28_v0, %v28_v0  ;;  %vm271_vm7 = vcmask 1045509  }
   0x3   :  { %v1472_v5 = vld [vmem:[%s1827_s0 + $0x10] sm:$0xff]  ;;  %1378 = vmatpush3.xpose.msk.msra.mxu0 %vm59_vm0, %v28_v0  ;;  %1385 = vmatpush3.xpose.msk.msra.mxu1 %vm59_vm0, %v30_v1  ;;  %v110_v7 = vmul.f32 %v29_v3, %v29_v3  ;;  %v34_v10 = vld [vmem:[%s1826_s1 + $0x38] sm:$0xff]  ;;  %v12_v12 = vld [vmem:[%s1827_s0 + $0x8] sm:$0xff]  ;;  %v113_v24 = vmul.f32 %v32_v9, %v32_v9  ;;  %v43_v39 = vmul.f32 %v1467_v4, %v1467_v4  ;;  %vm273_vm8 = vcmask 1046534  }
   0x4   :  { %1379 = vmatprep.subr.msk.mxu0 %vm59_vm0, %v27_v2  ;;  %1386 = vmatprep.subr.msk.mxu1 %vm59_vm0, %v29_v3  ;;  %v124_v8 = vsel %vm59_vm0, %v108_v6, 0.0  ;;  %v1498_v13 = vld [vmem:[%s1827_s0 + $0x18] sm:$0xff]  ;;  %v31_v16 = vld [vmem:[%s1826_s1 + $0x20] sm:$0xff]  ;;  %v33_v17 = vld [vmem:[%s1826_s1 + $0x30] sm:$0xff]  ;;  %v133_v20 = vsel %vm59_vm0, %v111_v14, 0.0  ;;  %v127_v21 = vsel %vm59_vm0, %v109_v15, 0.0  ;;  %v115_v30 = vmul.f32 %v34_v10, %v34_v10 }
   0x5   :  { %1381 = vmatprep.mubr.msk.f32.mxu0 %vm59_vm0, %v1467_v4  ;;  %1388 = vmatprep.mubr.msk.f32.mxu1 %vm59_vm0, %v1472_v5  ;;  %v130_v11 = vsel %vm59_vm0, %v110_v7, 0.0  ;;  %v1514_v18 = vld [vmem:[%s1827_s0 + $0x20] sm:$0xff]  ;;  %v1519_v19 = vld [vmem:[%s1827_s0 + $0x30] sm:$0xff]  ;;  %v36_v22 = vld [vmem:[%s1826_s1 + $0x48] sm:$0xff]  ;;  %v112_v25 = vmul.f32 %v31_v16, %v31_v16  ;;  %v139_v28 = vsel %vm59_vm0, %v113_v24, 0.0  ;;  %v114_v31 = vmul.f32 %v33_v17, %v33_v17 }
   0x6   :  { %131 = vadd.xlane.f32.xlu1 %v130_v11  ;;  %125 = vadd.xlane.f32.xlu0 %v124_v8  ;;  %v1537_v23 = vld [vmem:[%s1826_s1 + $0x58] sm:$0xff]  ;;  %v1544_v26 = vld [vmem:[%s1827_s0 + $0x28] sm:$0xff]  ;;  %v35_v32 = vld [vmem:[%s1826_s1 + $0x40] sm:$0xff]  ;;  %v145_v36 = vsel %vm59_vm0, %v115_v30, 0.0  ;;  %v44_v38 = vmul.f32 %v12_v12, %v12_v12  ;;  %v46_v46 = vmul.f32 %v1498_v13, %v1498_v13  ;;  %v45_v47 = vmul.f32 %v1472_v5, %v1472_v5 }
   0x7   :  { %1380 = vmatpush3.xpose.msk.msra.mxu0 %vm59_vm0, %v27_v2  ;;  %1387 = vmatpush3.xpose.msk.msra.mxu1 %vm59_vm0, %v29_v3  ;;  %v1549_v27 = vld [vmem:[%s1827_s0 + $0x38] sm:$0xff]  ;;  %v136_v29 = vsel %vm59_vm0, %v112_v25, 0.0  ;;  %v1566_v33 = vld [vmem:[%s1826_s1 + $0x50] sm:$0xff]  ;;  %v1574_v34 = vld [vmem:[%s1827_s0 + $0x40] sm:$0xff]  ;;  %v142_v37 = vsel %vm59_vm0, %v114_v31, 0.0  ;;  %v60_v49 = vsel %vm59_vm0, %v43_v39, 0.0  ;;  %v117_v53 = vmul.f32 %v36_v22, %v36_v22 }
   0x8   :  { %1391 = vmatprep.subr.msk.mxu0 %vm59_vm0, %v32_v9  ;;  %1398 = vmatprep.subr.msk.mxu1 %vm59_vm0, %v34_v10  ;;  %v1579_v35 = vld [vmem:[%s1827_s0 + $0x50] sm:$0xff]  ;;  %v40_v40 = vld [vmem:[%s1826_s1 + $0x68] sm:$0xff]  ;;  %v1598_v41 = vld [vmem:[%s1826_s1 + $0x78] sm:$0xff]  ;;  %v63_v45 = vsel %vm59_vm0, %v44_v38, 0.0  ;;  %v69_v52 = vsel %vm59_vm0, %v46_v46, 0.0  ;;  %v66_v54 = vsel %vm59_vm0, %v45_v47, 0.0  ;;  %v116_v55 = vmul.f32 %v35_v32, %v35_v32 }
   0x9   :  { %v20_v42 = vld [vmem:[%s1827_s0 + $0x48] sm:$0xff]  ;;  %v1609_v43 = vld [vmem:[%s1827_s0 + $0x58] sm:$0xff]  ;;  %v1617_v44 = vld [vmem:[%s1826_s1 + $0x70] sm:$0xff]  ;;  %v151_v58 = vsel %vm59_vm0, %v117_v53, 0.0  ;;  %v48_v59 = vmul.f32 %v1544_v26, %v1544_v26  ;;  %v47_v61 = vmul.f32 %v1514_v18, %v1514_v18  ;;  %v119_v63 = vmul.f32 %v1537_v23, %v1537_v23 }
   0xa   :  { %1382 = vmatmul.mubr.msk.f32.vlgmr.msra.gmra.mxu0 %vm59_vm0, %v12_v12  ;;  %1389 = vmatmul.mubr.msk.f32.vlgmr.msra.gmra.mxu1 %vm59_vm0, %v1498_v13  ;;  %v39_v48 = vld [vmem:[%s1826_s1 + $0x60] sm:$0xff]  ;;  %v1642_v51 = vld [vmem:[%s1827_s0 + $0x70] sm:$0xff]  ;;  %v26_v56 = vld [vmem:[%s1827_s0 + $0x78] sm:$0xff]  ;;  %v148_v60 = vsel %vm59_vm0, %v116_v55, 0.0  ;;  %v118_v1 = vmul.f32 %v1566_v33, %v1566_v33  ;;  %v50_v3 = vmul.f32 %v1549_v27, %v1549_v27  ;;  %v49_v5 = vmul.f32 %v1519_v19, %v1519_v19 }
   0xb   :  { %1392 = vmatpush3.xpose.msk.msra.mxu0 %vm59_vm0, %v32_v9  ;;  %1399 = vmatpush3.xpose.msk.msra.mxu1 %vm59_vm0, %v34_v10  ;;  %v1637_v50 = vld [vmem:[%s1827_s0 + $0x60] sm:$0xff]  ;;  %v24_v57 = vld [vmem:[%s1827_s0 + $0x68] sm:$0xff]  ;;  %v75_v62 = vsel %vm59_vm0, %v48_v59, 0.0  ;;  %v72_v0 = vsel %vm59_vm0, %v47_v61, 0.0  ;;  %v157_v2 = vsel %vm59_vm0, %v119_v63, 0.0  ;;  %v121_v7 = vmul.f32 %v40_v40, %v40_v40  ;;  %s1434_s0 = smov 16  }
   0xc   :  { %1393 = vmatprep.subr.msk.mxu0 %vm59_vm0, %v31_v16  ;;  %1400 = vmatprep.subr.msk.mxu1 %vm59_vm0, %v33_v17  ;;  %v154_v4 = vsel %vm59_vm0, %v118_v1, 0.0  ;;  %v81_v6 = vsel %vm59_vm0, %v50_v3, 0.0  ;;  %v78_v8 = vsel %vm59_vm0, %v49_v5, 0.0  ;;  %v120_v9 = vmul.f32 %v39_v48, %v39_v48 }
   0xd   :  { %1395 = vmatprep.mubr.msk.f32.mxu0 %vm59_vm0, %v1514_v18  ;;  %1402 = vmatprep.mubr.msk.f32.mxu1 %vm59_vm0, %v1519_v19  ;;  %v163_v10 = vsel %vm59_vm0, %v121_v7, 0.0  ;;  %v52_v11 = vmul.f32 %v20_v42, %v20_v42  ;;  %v51_v13 = vmul.f32 %v1574_v34, %v1574_v34  ;;  %v123_v15 = vmul.f32 %v1598_v41, %v1598_v41 }
   0xe   :  { %134 = vadd.xlane.f32.xlu1 %v133_v20  ;;  %128 = vadd.xlane.f32.xlu0 %v127_v21  ;;  %v160_v12 = vsel %vm59_vm0, %v120_v9, 0.0  ;;  %v54_v19 = vmul.f32 %v1609_v43, %v1609_v43  ;;  %v53_v21 = vmul.f32 %v1579_v35, %v1579_v35  ;;  %v55_v25 = vmul.f32 %v1637_v50, %v1637_v50 }
   0xf   :  { %1394 = vmatpush3.xpose.msk.msra.mxu0 %vm59_vm0, %v31_v16  ;;  %1401 = vmatpush3.xpose.msk.msra.mxu1 %vm59_vm0, %v33_v17  ;;  %v87_v14 = vsel %vm59_vm0, %v52_v11, 0.0  ;;  %v84_v16 = vsel %vm59_vm0, %v51_v13, 0.0  ;;  %v122_v17 = vmul.f32 %v1617_v44, %v1617_v44  ;;  %v169_v18 = vsel %vm59_vm0, %v123_v15, 0.0 }
  0x10   :  { %1405 = vmatprep.subr.msk.mxu0 %vm59_vm0, %v36_v22  ;;  %1412 = vmatprep.subr.msk.mxu1 %vm59_vm0, %v1537_v23  ;;  %v90_v24 = vsel %vm59_vm0, %v53_v21, 0.0  ;;  %v188_v47 = vlaneseq  ;;  %vm275_vm9 = vcmask 1047559   ;;  %vm1307_vm10 = vcmask 261120  }
  0x11   :  { %v166_v20 = vsel %vm59_vm0, %v122_v17, 0.0 }
  0x12   :  { %1396 = vmatmul.mubr.msk.f32.vlgmr.msra.gmra.mxu0 %vm59_vm0, %v1544_v26  ;;  %1403 = vmatmul.mubr.msk.f32.vlgmr.msra.gmra.mxu1 %vm59_vm0, %v1549_v27  ;;  %v58_v27 = vmul.f32 %v26_v56, %v26_v56 }
  0x13   :  { %1406 = vmatpush3.xpose.msk.msra.mxu0 %vm59_vm0, %v36_v22  ;;  %1413 = vmatpush3.xpose.msk.msra.mxu1 %vm59_vm0, %v1537_v23  ;;  %v93_v22 = vsel %vm59_vm0, %v54_v19, 0.0  ;;  %v56_v23 = vmul.f32 %v24_v57, %v24_v57 }
  0x14   :  { %140 = vadd.xlane.f32.xlu1 %v139_v28  ;;  %137 = vadd.xlane.f32.xlu0 %v136_v29  ;;  %v96_v28 = vsel %vm59_vm0, %v55_v25, 0.0  ;;  %v57_v29 = vmul.f32 %v1642_v51, %v1642_v51  ;;  %v105_v30 = vsel %vm59_vm0, %v58_v27, 0.0 }
  0x15   :  { %1407 = vmatprep.subr.msk.mxu0 %vm59_vm0, %v35_v32  ;;  %1414 = vmatprep.subr.msk.mxu1 %vm59_vm0, %v1566_v33  ;;  %v99_v26 = vsel %vm59_vm0, %v56_v23, 0.0 }
  0x16   :  { %1409 = vmatprep.mubr.msk.f32.mxu0 %vm59_vm0, %v1574_v34  ;;  %1416 = vmatprep.mubr.msk.f32.mxu1 %vm59_vm0, %v1579_v35  ;;  %v102_v31 = vsel %vm59_vm0, %v57_v29, 0.0 }
  0x17   :  { %1408 = vmatpush3.xpose.msk.msra.mxu0 %vm59_vm0, %v35_v32  ;;  %1415 = vmatpush3.xpose.msk.msra.mxu1 %vm59_vm0, %v1566_v33 }
  0x18   :  { %146 = vadd.xlane.f32.xlu1 %v145_v36  ;;  %143 = vadd.xlane.f32.xlu0 %v142_v37 }
  0x19   :  { %1419 = vmatprep.subr.msk.mxu0 %vm59_vm0, %v40_v40  ;;  %1426 = vmatprep.subr.msk.mxu1 %vm59_vm0, %v1598_v41 }
  0x1a   :  { %1410 = vmatmul.mubr.msk.f32.vlgmr.msra.gmra.mxu0 %vm59_vm0, %v20_v42  ;;  %1417 = vmatmul.mubr.msk.f32.vlgmr.msra.gmra.mxu1 %vm59_vm0, %v1609_v43 }
  0x1b   :  { %1420 = vmatpush3.xpose.msk.msra.mxu0 %vm59_vm0, %v40_v40  ;;  %1427 = vmatpush3.xpose.msk.msra.mxu1 %vm59_vm0, %v1598_v41 }
  0x1c   :  { %1428 = vmatprep.subr.msk.mxu1 %vm59_vm0, %v1617_v44  ;;  %64 = vadd.xlane.f32.xlu1 %v63_v45 }
  0x1d   :  { %1421 = vmatprep.subr.msk.mxu0 %vm59_vm0, %v39_v48  ;;  %61 = vadd.xlane.f32.xlu0 %v60_v49  ;;  %v189_v49 = vand.u32 127, %v188_v47 }
  0x1e   :  { %1423 = vmatprep.mubr.msk.f32.mxu0 %vm59_vm0, %v1637_v50  ;;  %1430 = vmatprep.mubr.msk.f32.mxu1 %vm59_vm0, %v1642_v51 }
  0x1f   :  { %1422 = vmatpush3.xpose.msk.msra.mxu0 %vm59_vm0, %v39_v48  ;;  %1429 = vmatpush3.xpose.msk.msra.mxu1 %vm59_vm0, %v1617_v44  ;;  %v194_v53 = vadd.s32 4294967288, %v189_v49 }
  0x20   :  { %70 = vadd.xlane.f32.xlu1 %v69_v52  ;;  %v191_v52 = vshrl.u32 %v188_v47, 7 }
  0x21   :  { %67 = vadd.xlane.f32.xlu0 %v66_v54 }
  0x22   :  { %1431 = vmatmul.mubr.msk.f32.vlgmr.msra.gmra.mxu1 %vm59_vm0, %v26_v56  ;;  %1424 = vmatmul.mubr.msk.f32.vlgmr.msra.gmra.mxu0 %vm59_vm0, %v24_v57  ;;  %v1718_v55 = vsub.s32 %v189_v49, %v191_v52  ;;  %v1720_v56 = vsub.s32 %v194_v53, %v191_v52 }
  0x24   :  { %152 = vadd.xlane.f32.xlu1 %v151_v58 }
  0x25   :  { %149 = vadd.xlane.f32.xlu0 %v148_v60 }
  0x28   :  { %76 = vadd.xlane.f32.xlu1 %v75_v62 }
  0x29   :  { %73 = vadd.xlane.f32.xlu0 %v72_v0 }
  0x2c   :  { %158 = vadd.xlane.f32.xlu1 %v157_v2 }
  0x2d   :  { %155 = vadd.xlane.f32.xlu0 %v154_v4 }
  0x30   :  { %82 = vadd.xlane.f32.xlu1 %v81_v6 }
  0x31   :  { %79 = vadd.xlane.f32.xlu0 %v78_v8 }
  0x34   :  { %164 = vadd.xlane.f32.xlu1 %v163_v10 }
  0x35   :  { %161 = vadd.xlane.f32.xlu0 %v160_v12 }
  0x38   :  { %88 = vadd.xlane.f32.xlu1 %v87_v14 }
  0x39   :  { %85 = vadd.xlane.f32.xlu0 %v84_v16 }
  0x3c   :  { %170 = vadd.xlane.f32.xlu1 %v169_v18 }
  0x3d   :  { %167 = vadd.xlane.f32.xlu0 %v166_v20 }
  0x40   :  { %94 = vadd.xlane.f32.xlu1 %v93_v22 }
  0x41   :  { %91 = vadd.xlane.f32.xlu0 %v90_v24 }
  0x44   :  { %100 = vadd.xlane.f32.xlu1 %v99_v26 }
  0x45   :  { %97 = vadd.xlane.f32.xlu0 %v96_v28 }
  0x48   :  { %106 = vadd.xlane.f32.xlu1 %v105_v30 }
  0x49   :  { %103 = vadd.xlane.f32.xlu0 %v102_v31 }
  0x8f   :  { %v132_v32 = vpop.xlane.xlu1 %131  ;;  %v126_v33 = vpop.xlane.xlu0 %125 }
  0x90   :  { %v204_v59 = vrot.slane %v132_v32, %v1718_v55  ;;  %v193_v60 = vrot.slane %v126_v33, %v1718_v55 }
  0x97   :  { %v135_v34 = vpop.xlane.xlu1 %134  ;;  %v129_v35 = vpop.xlane.xlu0 %128 }
  0x98   :  { %v208_v61 = vrot.slane %v135_v34, %v1720_v56  ;;  %v198_v62 = vrot.slane %v129_v35, %v1720_v56 }
  0x9a   :  { %v200_v0 = vsel %vm199_vm1, %v198_v62, %v193_v60  ;;  %v209_v1 = vsel %vm199_vm1, %v208_v61, %v204_v59 }
  0x9d   :  { %v141_v36 = vpop.xlane.xlu1 %140  ;;  %v138_v37 = vpop.xlane.xlu0 %137 }
  0x9e   :  { %v217_v3 = vrot.slane %v141_v36, %v1720_v56  ;;  %v213_v4 = vrot.slane %v138_v37, %v1718_v55 }
  0xa0   :  { %v218_v22 = vsel %vm199_vm1, %v217_v3, %v213_v4 }
  0xa1   :  { %v147_v38 = vpop.xlane.xlu1 %146  ;;  %v144_v39 = vpop.xlane.xlu0 %143 }
  0xa2   :  { %v226_v5 = vrot.slane %v147_v38, %v1720_v56  ;;  %v222_v6 = vrot.slane %v144_v39, %v1718_v55 }
  0xa4   :  { %v227_v23 = vsel %vm199_vm1, %v226_v5, %v222_v6 }
  0xa5   :  { %v65_v40 = vpop.xlane.xlu1 %64 }
  0xa6   :  { %v62_v41 = vpop.xlane.xlu0 %61  ;;  %v328_v9 = vadd.f32 %v200_v0, %v65_v40 }
  0xa7   :  { %v327_v14 = vadd.f32 %v200_v0, %v62_v41 }
  0xa9   :  { %v71_v42 = vpop.xlane.xlu1 %70 }
  0xaa   :  { %v68_v43 = vpop.xlane.xlu0 %67  ;;  %v330_v10 = vadd.f32 %v209_v1, %v71_v42 }
  0xab   :  { %v329_v15 = vadd.f32 %v209_v1, %v68_v43 }
  0xad   :  { %v1710_v44 = vpop.xlane.xlu1 %152 }
  0xae   :  { %v1712_v45 = vpop.xlane.xlu0 %149  ;;  %v235_v28 = vrot.slane %v1710_v44, %v1720_v56 }
  0xaf   :  { %v231_v30 = vrot.slane %v1712_v45, %v1718_v55 }
  0xb1   :  { %v77_v46 = vpop.xlane.xlu1 %76  ;;  %v236_v60 = vsel %vm199_vm1, %v235_v28, %v231_v30 }
  0xb2   :  { %v74_v48 = vpop.xlane.xlu0 %73  ;;  %v332_v31 = vadd.f32 %v218_v22, %v77_v46 }
  0xb3   :  { %v331_v35 = vadd.f32 %v218_v22, %v74_v48 }
  0xb5   :  { %v1714_v50 = vpop.xlane.xlu1 %158 }
  0xb6   :  { %v1716_v51 = vpop.xlane.xlu0 %155  ;;  %v244_v36 = vrot.slane %v1714_v50, %v1720_v56 }
  0xb7   :  { %v240_v37 = vrot.slane %v1716_v51, %v1718_v55 }
  0xb9   :  { %v83_v54 = vpop.xlane.xlu1 %82 }
  0xba   :  { %v80_v57 = vpop.xlane.xlu0 %79  ;;  %v334_v38 = vadd.f32 %v227_v23, %v83_v54 }
  0xbb   :  { %v333_v45 = vadd.f32 %v227_v23, %v80_v57 }
  0xbd   :  { %v1722_v58 = vpop.xlane.xlu1 %164 }
  0xbe   :  { %v1728_v63 = vpop.xlane.xlu0 %161  ;;  %v253_v46 = vrot.slane %v1722_v58, %v1720_v56 }
  0xbf   :  { %v249_v47 = vrot.slane %v1728_v63, %v1718_v55  ;;  %v245_v63 = vsel %vm199_vm1, %v244_v36, %v240_v37 }
  0xc1   :  { %v1732_v2 = vpop.xlane.xlu1 %88  ;;  %v254_v1 = vsel %vm199_vm1, %v253_v46, %v249_v47 }
  0xc2   :  { %v1738_v11 = vpop.xlane.xlu0 %85  ;;  %v336_v4 = vadd.f32 %v236_v60, %v1732_v2 }
  0xc5   :  { %v1742_v24 = vpop.xlane.xlu1 %170 }
  0xc6   :  { %v1748_v32 = vpop.xlane.xlu0 %167 }
  0xc9   :  { %v95_v51 = vpop.xlane.xlu1 %94 }
  0xca   :  { %v1383_v7 = vpop.f32.mrf.mxu0  ;;  %v1390_v8 = vpop.f32.mrf.mxu1 }
  0xcb   :  { %v1040_v12 = vmul.f32 2.0, %v1383_v7  ;;  %v1042_v13 = vmul.f32 2.0, %v1390_v8  ;;  %v92_v57 = vpop.xlane.xlu0 %91 }
  0xcc   :  { %v421_v16 = vpop.f32.mrf.mxu0  ;;  %v508_v17 = vpop.f32.mrf.mxu1 }
  0xcd   :  { %v1056_v18 = vsub.f32 %v328_v9, %v1040_v12  ;;  %v1058_v19 = vsub.f32 %v330_v10, %v1042_v13  ;;  %v1039_v20 = vmul.f32 2.0, %v421_v16  ;;  %v1041_v21 = vmul.f32 2.0, %v508_v17  ;;  %v101_v5 = vpop.xlane.xlu1 %100 }
  0xce   :  { %v335_v9 = vadd.f32 %v236_v60, %v1738_v11  ;;  %v262_v10 = vrot.slane %v1742_v24, %v1720_v56  ;;  %v258_v12 = vrot.slane %v1748_v32, %v1718_v55  ;;  %v338_v16 = vadd.f32 %v245_v63, %v95_v51 }
  0xcf   :  { %v1055_v25 = vsub.f32 %v327_v14, %v1039_v20  ;;  %v1057_v26 = vsub.f32 %v329_v15, %v1041_v21  ;;  %v1072_v27 = vmax.f32 %v1056_v18, 0.0  ;;  %v1074_v29 = vmax.f32 %v1058_v19, 0.0  ;;  %v98_v17 = vpop.xlane.xlu0 %97 }
  0xd0   :  { %v337_v20 = vadd.f32 %v245_v63, %v92_v57  ;;  %v263_v32 = vsel %vm199_vm1, %v262_v10, %v258_v12 }
  0xd1   :  { %v1091_v33 = vsel %vm1087_vm2, %v1072_v27, inf  ;;  %v1071_v34 = vmax.f32 %v1055_v25, 0.0  ;;  %v1073_v44 = vmax.f32 %v1057_v26, 0.0  ;;  %v1097_v50 = vsel %vm1087_vm2, %v1074_v29, inf }
  0xd2   :  { %v1404_v39 = vpop.f32.mrf.mxu1  ;;  %1092 = vmin.xlane.f32.xlu1 %v1091_v33  ;;  %v1397_v40 = vpop.f32.mrf.mxu0 }
  0xd3   :  { %v1046_v41 = vmul.f32 2.0, %v1404_v39  ;;  %v1044_v42 = vmul.f32 2.0, %v1397_v40  ;;  %v1088_v43 = vsel %vm1087_vm2, %v1071_v34, inf  ;;  %v1094_v58 = vsel %vm1087_vm2, %v1073_v44, inf }
  0xd4   :  { %v595_v48 = vpop.f32.mrf.mxu0  ;;  %v682_v49 = vpop.f32.mrf.mxu1  ;;  %1089 = vmin.xlane.f32.xlu0 %v1088_v43  ;;  %v1136_v13 = vmin.f32 %v1088_v43, %v1091_v33  ;;  %v1143_v21 = vmin.f32 %v1094_v58, %v1097_v50  ;;  %v339_v39 = vadd.f32 %v254_v1, %v98_v17 }
  0xd5   :  { %v1062_v52 = vsub.f32 %v334_v38, %v1046_v41  ;;  %v1060_v53 = vsub.f32 %v332_v31, %v1044_v42  ;;  %v1043_v54 = vmul.f32 2.0, %v595_v48  ;;  %v1045_v59 = vmul.f32 2.0, %v682_v49  ;;  %v107_v31 = vpop.xlane.xlu1 %106 }
  0xd6   :  { %1098 = vmin.xlane.f32.xlu1 %v1097_v50  ;;  %v1137_v29 = vrot.slane %v1136_v13, 4  ;;  %v340_v38 = vadd.f32 %v254_v1, %v101_v5  ;;  %v1144_v40 = vrot.slane %v1143_v21, 4  ;;  %v342_v42 = vadd.f32 %v263_v32, %v107_v31 }
  0xd7   :  { %v1059_v61 = vsub.f32 %v331_v35, %v1043_v54  ;;  %v1061_v62 = vsub.f32 %v333_v45, %v1045_v59  ;;  %v1076_v0 = vmax.f32 %v1060_v53, 0.0  ;;  %v1078_v3 = vmax.f32 %v1062_v52, 0.0  ;;  %v104_v35 = vpop.xlane.xlu0 %103 }
  0xd8   :  { %1095 = vmin.xlane.f32.xlu0 %v1094_v58  ;;  %v1138_v46 = vmin.f32 %v1136_v13, %v1137_v29  ;;  %v341_v48 = vadd.f32 %v263_v32, %v104_v35  ;;  %v1145_v60 = vmin.f32 %v1143_v21, %v1144_v40 }
  0xd9   :  { %v1103_v6 = vsel %vm1087_vm2, %v1076_v0, inf  ;;  %v1075_v7 = vmax.f32 %v1059_v61, 0.0  ;;  %v1077_v8 = vmax.f32 %v1061_v62, 0.0  ;;  %v1109_v23 = vsel %vm1087_vm2, %v1078_v3, inf }
  0xda   :  { %v1418_v14 = vpop.f32.mrf.mxu1  ;;  %1104 = vmin.xlane.f32.xlu1 %v1103_v6  ;;  %v1411_v15 = vpop.f32.mrf.mxu0  ;;  %v1139_v12 = vrot.slane %v1138_v46, 2  ;;  %v1146_v13 = vrot.slane %v1145_v60, 2 }
  0xdb   :  { %v1050_v2 = vmul.f32 2.0, %v1418_v14  ;;  %v1048_v18 = vmul.f32 2.0, %v1411_v15  ;;  %v1100_v19 = vsel %vm1087_vm2, %v1075_v7, inf  ;;  %v1106_v24 = vsel %vm1087_vm2, %v1077_v8, inf }
  0xdc   :  { %v769_v22 = vpop.f32.mrf.mxu0  ;;  %v856_v11 = vpop.f32.mrf.mxu1  ;;  %1101 = vmin.xlane.f32.xlu0 %v1100_v19  ;;  %v1150_v30 = vmin.f32 %v1100_v19, %v1103_v6  ;;  %v1157_v41 = vmin.f32 %v1106_v24, %v1109_v23 }
  0xdd   :  { %v1066_v25 = vsub.f32 %v338_v16, %v1050_v2  ;;  %v1064_v26 = vsub.f32 %v336_v4, %v1048_v18  ;;  %v1047_v27 = vmul.f32 2.0, %v769_v22  ;;  %v1049_v28 = vmul.f32 2.0, %v856_v11 }
  0xde   :  { %1110 = vmin.xlane.f32.xlu1 %v1109_v23  ;;  %v1151_v47 = vrot.slane %v1150_v30, 4  ;;  %v1158_v57 = vrot.slane %v1157_v41, 4  ;;  %v1140_v11 = vmin.f32 %v1138_v46, %v1139_v12 }
  0xdf   :  { %v1063_v33 = vsub.f32 %v335_v9, %v1047_v27  ;;  %v1065_v34 = vsub.f32 %v337_v20, %v1049_v28  ;;  %v1080_v36 = vmax.f32 %v1064_v26, 0.0  ;;  %v1082_v37 = vmax.f32 %v1066_v25, 0.0 }
  0xe0   :  { %1107 = vmin.xlane.f32.xlu0 %v1106_v24  ;;  %v1152_v5 = vmin.f32 %v1150_v30, %v1151_v47  ;;  %v1159_v14 = vmin.f32 %v1157_v41, %v1158_v57  ;;  %v1147_v25 = vmin.f32 %v1145_v60, %v1146_v13  ;;  %v1141_v32 = vrot.slane %v1140_v11, 1 }
  0xe1   :  { %v1115_v43 = vsel %vm1087_vm2, %v1080_v36, inf  ;;  %v1079_v44 = vmax.f32 %v1063_v33, 0.0  ;;  %v1081_v45 = vmax.f32 %v1065_v34, 0.0  ;;  %v1121_v51 = vsel %vm1087_vm2, %v1082_v37, inf }
  0xe2   :  { %v1425_v49 = vpop.f32.mrf.mxu0  ;;  %v1432_v50 = vpop.f32.mrf.mxu1  ;;  %1116 = vmin.xlane.f32.xlu1 %v1115_v43  ;;  %v1153_v18 = vrot.slane %v1152_v5, 2  ;;  %v1160_v26 = vrot.slane %v1159_v14, 2  ;;  %v1148_v34 = vrot.slane %v1147_v25, 1  ;;  %v1142_v41 = vmin.f32 %v1140_v11, %v1141_v32 }
  0xe3   :  { %v1052_v52 = vmul.f32 2.0, %v1425_v49  ;;  %v1054_v53 = vmul.f32 2.0, %v1432_v50  ;;  %v1112_v54 = vsel %vm1087_vm2, %v1079_v44, inf  ;;  %v1118_v59 = vsel %vm1087_vm2, %v1081_v45, inf }
  0xe4   :  { %v943_v61 = vpop.f32.mrf.mxu0  ;;  %v1030_v62 = vpop.f32.mrf.mxu1  ;;  %1113 = vmin.xlane.f32.xlu0 %v1112_v54  ;;  %v1164_v58 = vmin.f32 %v1112_v54, %v1115_v43  ;;  %v1171_v0 = vmin.f32 %v1118_v59, %v1121_v51  ;;  %v1154_v28 = vmin.f32 %v1152_v5, %v1153_v18  ;;  %v1161_v35 = vmin.f32 %v1159_v14, %v1160_v26 }
  0xe5   :  { %v1068_v63 = vsub.f32 %v340_v38, %v1052_v52  ;;  %v1070_v1 = vsub.f32 %v342_v42, %v1054_v53  ;;  %v1051_v3 = vmul.f32 2.0, %v943_v61  ;;  %v1053_v4 = vmul.f32 2.0, %v1030_v62 }
  0xe6   :  { %v1165_v6 = vrot.slane %v1164_v58, 4  ;;  %1122 = vmin.xlane.f32.xlu1 %v1121_v51  ;;  %v1172_v17 = vrot.slane %v1171_v0, 4  ;;  %v1155_v38 = vrot.slane %v1154_v28, 1  ;;  %v1149_v42 = vmin.f32 %v1147_v25, %v1148_v34 }
  0xe7   :  { %v1067_v7 = vsub.f32 %v339_v39, %v1051_v3  ;;  %v1069_v8 = vsub.f32 %v341_v48, %v1053_v4  ;;  %v1084_v9 = vmax.f32 %v1068_v63, 0.0  ;;  %v1086_v10 = vmax.f32 %v1070_v1, 0.0 }
  0xe8   :  { %1119 = vmin.xlane.f32.xlu0 %v1118_v59  ;;  %v1166_v19 = vmin.f32 %v1164_v58, %v1165_v6  ;;  %v1173_v27 = vmin.f32 %v1171_v0, %v1172_v17  ;;  %v1162_v43 = vrot.slane %v1161_v35, 1  ;;  %v1156_v46 = vmin.f32 %v1154_v28, %v1155_v38 }
  0xe9   :  { %v1083_v15 = vmax.f32 %v1067_v7, 0.0  ;;  %v1085_v16 = vmax.f32 %v1069_v8, 0.0  ;;  %v1127_v2 = vsel %vm1087_vm2, %v1084_v9, inf  ;;  %v1133_v21 = vsel %vm1087_vm2, %v1086_v10, inf }
  0xea   :  { %1128 = vmin.xlane.f32.xlu1 %v1127_v2  ;;  %v1167_v29 = vrot.slane %v1166_v19, 2  ;;  %v1174_v36 = vrot.slane %v1173_v27, 2  ;;  %v1296_v49 = vsel %vm264_vm3, %v1149_v42, %v1142_v41  ;;  %v1163_v50 = vmin.f32 %v1161_v35, %v1162_v43 }
  0xeb   :  { %v1124_v20 = vsel %vm1087_vm2, %v1083_v15, inf  ;;  %v1130_v22 = vsel %vm1087_vm2, %v1085_v16, inf  ;;  %v1297_v53 = vsel %vm265_vm4, %v1156_v46, %v1296_v49 }
  0xec   :  { %1125 = vmin.xlane.f32.xlu0 %v1124_v20  ;;  %v1178_v23 = vmin.f32 %v1124_v20, %v1127_v2  ;;  %v1185_v24 = vmin.f32 %v1130_v22, %v1133_v21  ;;  %v1168_v39 = vmin.f32 %v1166_v19, %v1167_v29  ;;  %v1175_v44 = vmin.f32 %v1173_v27, %v1174_v36 }
  0xed   :  { %v1298_v61 = vsel %vm267_vm5, %v1163_v50, %v1297_v53 }
  0xee   :  { %v1179_v30 = vrot.slane %v1178_v23, 4  ;;  %1134 = vmin.xlane.f32.xlu1 %v1133_v21  ;;  %v1186_v31 = vrot.slane %v1185_v24, 4  ;;  %v1169_v47 = vrot.slane %v1168_v39, 1  ;;  %v1176_v51 = vrot.slane %v1175_v44, 1 }
  0xf0   :  { %v1180_v33 = vmin.f32 %v1178_v23, %v1179_v30  ;;  %1131 = vmin.xlane.f32.xlu0 %v1130_v22  ;;  %v1187_v37 = vmin.f32 %v1185_v24, %v1186_v31  ;;  %v1170_v54 = vmin.f32 %v1168_v39, %v1169_v47  ;;  %v1177_v60 = vmin.f32 %v1175_v44, %v1176_v51 }
  0xf2   :  { %v1181_v40 = vrot.slane %v1180_v33, 2  ;;  %v1188_v45 = vrot.slane %v1187_v37, 2  ;;  %v1299_v58 = vsel %vm269_vm6, %v1170_v54, %v1298_v61 }
  0xf3   :  { %v1300_v63 = vsel %vm271_vm7, %v1177_v60, %v1299_v58 }
  0xf4   :  { %v1182_v48 = vmin.f32 %v1180_v33, %v1181_v40  ;;  %v1189_v52 = vmin.f32 %v1187_v37, %v1188_v45 }
  0xf6   :  { %v1183_v59 = vrot.slane %v1182_v48, 1  ;;  %v1190_v57 = vrot.slane %v1189_v52, 1 }
  0xf8   :  { %v1184_v62 = vmin.f32 %v1182_v48, %v1183_v59  ;;  %v1191_v0 = vmin.f32 %v1189_v52, %v1190_v57 }
  0xfa   :  { %v1301_v1 = vsel %vm273_vm8, %v1184_v62, %v1300_v63 }
  0xfb   :  { %v1302_v3 = vsel %vm275_vm9, %v1191_v0, %v1301_v1 }
 0x106   :  { %1303 = vrot.lane.b32.xlu0 %v1302_v3, %s1434_s0 }
 0x15b   :  { %v1093_v4 = vpop.xlane.xlu1 %1092 }
 0x15c   :  { %v1215_v23 = vrot.slane %v1093_v4, %v1720_v56 }
 0x15d   :  { %v1090_v5 = vpop.xlane.xlu0 %1089 }
 0x15e   :  { %v1211_v18 = vrot.slane %v1090_v5, %v1718_v55 }
 0x15f   :  { %v1099_v6 = vpop.xlane.xlu1 %1098 }
 0x160   :  { %v1224_v19 = vrot.slane %v1099_v6, %v1720_v56  ;;  %v1216_v30 = vsel %vm199_vm1, %v1215_v23, %v1211_v18 }
 0x161   :  { %v1096_v7 = vpop.xlane.xlu0 %1095 }
 0x162   :  { %v1220_v16 = vrot.slane %v1096_v7, %v1718_v55 }
 0x163   :  { %v1105_v8 = vpop.xlane.xlu1 %1104 }
 0x164   :  { %v1233_v21 = vrot.slane %v1105_v8, %v1720_v56  ;;  %v1225_v24 = vsel %vm199_vm1, %v1224_v19, %v1220_v16 }
 0x165   :  { %v1102_v9 = vpop.xlane.xlu0 %1101  ;;  %v1280_v34 = vsel %vm264_vm3, %v1225_v24, %v1216_v30 }
 0x166   :  { %v1229_v17 = vrot.slane %v1102_v9, %v1718_v55 }
 0x167   :  { %v1111_v10 = vpop.xlane.xlu1 %1110 }
 0x168   :  { %v1242_v25 = vrot.slane %v1111_v10, %v1720_v56  ;;  %v1234_v27 = vsel %vm199_vm1, %v1233_v21, %v1229_v17 }
 0x169   :  { %v1108_v12 = vpop.xlane.xlu0 %1107  ;;  %v1281_v38 = vsel %vm265_vm4, %v1234_v27, %v1280_v34 }
 0x16a   :  { %v1238_v20 = vrot.slane %v1108_v12, %v1718_v55 }
 0x16b   :  { %v1117_v13 = vpop.xlane.xlu1 %1116 }
 0x16c   :  { %v1251_v28 = vrot.slane %v1117_v13, %v1720_v56  ;;  %v1243_v31 = vsel %vm199_vm1, %v1242_v25, %v1238_v20 }
 0x16d   :  { %v1114_v14 = vpop.xlane.xlu0 %1113  ;;  %v1282_v40 = vsel %vm267_vm5, %v1243_v31, %v1281_v38 }
 0x16e   :  { %v1247_v22 = vrot.slane %v1114_v14, %v1718_v55 }
 0x16f   :  { %v1123_v15 = vpop.xlane.xlu1 %1122 }
 0x170   :  { %v1260_v32 = vrot.slane %v1123_v15, %v1720_v56  ;;  %v1252_v35 = vsel %vm199_vm1, %v1251_v28, %v1247_v22 }
 0x171   :  { %v1120_v2 = vpop.xlane.xlu0 %1119  ;;  %v1283_v43 = vsel %vm269_vm6, %v1252_v35, %v1282_v40 }
 0x172   :  { %v1256_v26 = vrot.slane %v1120_v2, %v1718_v55 }
 0x173   :  { %v1129_v11 = vpop.xlane.xlu1 %1128 }
 0x174   :  { %v1269_v36 = vrot.slane %v1129_v11, %v1720_v56  ;;  %v1261_v39 = vsel %vm199_vm1, %v1260_v32, %v1256_v26 }
 0x175   :  { %v1126_v29 = vpop.xlane.xlu0 %1125  ;;  %v1284_v46 = vsel %vm271_vm7, %v1261_v39, %v1283_v43 }
 0x176   :  { %v1265_v33 = vrot.slane %v1126_v29, %v1718_v55 }
 0x177   :  { %v1135_v37 = vpop.xlane.xlu1 %1134 }
 0x178   :  { %v1270_v41 = vsel %vm199_vm1, %v1269_v36, %v1265_v33  ;;  %v1278_v44 = vrot.slane %v1135_v37, %v1720_v56 }
 0x179   :  { %v1132_v42 = vpop.xlane.xlu0 %1131  ;;  %v1285_v48 = vsel %vm273_vm8, %v1270_v41, %v1284_v46 }
 0x17a   :  { %v1274_v45 = vrot.slane %v1132_v42, %v1718_v55 }
 0x17c   :  { %v1279_v47 = vsel %vm199_vm1, %v1278_v44, %v1274_v45 }
 0x17d   :  { %v1286_v49 = vsel %vm275_vm9, %v1279_v47, %v1285_v48  ;;  %v1304_v50 = vpop.permute.xlu0 %1303 }
 0x17e   :  { %v1306_v51 = vsel %vm1087_vm2, %v1286_v49, %v1304_v50 }
 0x17f   :  { %1308 = vst.msk [vmem:[%s1828_s2] sm:$0xff] %vm1307_vm10, %v1306_v51 }

// kernel: forward_reconstruct.21
= control target key start
LH: loop header
LB: loop body
LE: loop exit
PB: predicated region body
PF: predicated region fallthrough
CT: control target
= control target key end

     0   :  { %v598_v3 = vmov 0.0   ;;  %vm149_vm0 = vcmask 523264   ;;  %vm518_vm1 = vcmask 1043456   ;;  %s925_s1 = inlined_call_operand.vmem [shape: f32[64,1280], index: 1, kind: input, shape index: {}]   ;;  %s926_s0 = inlined_call_operand.vmem [shape: f32[4,64], index: 0, kind: input, shape index: {}]   ;;  %s927_s2 = inlined_call_operand.vmem [shape: f32[1,1280], index: 2, kind: input, shape index: {}]   ;;  %s928_s3 = inlined_call_operand.vmem [shape: f32[4,1280], index: 3, kind: output, shape index: {}]  }
   0x1   :  { %v86_v0 = vld [vmem:[%s925_s1 + $0x238] sm:$0xff]  ;;  %v85_v1 = vld [vmem:[%s925_s1 + $0x230] sm:$0xff]  ;;  %v76_v2 = vld [vmem:[%s925_s1 + $0x1e8] sm:$0xff]  ;;  %217 = vmatprep.mubr.f32.mxu0 %v598_v3  ;;  %288 = vmatprep.mubr.f32.mxu1 %v598_v3 }
   0x2   :  { %169 = vmatprep.subr.mxu0 %v86_v0  ;;  %v75_v4 = vld [vmem:[%s925_s1 + $0x1e0] sm:$0xff]  ;;  %v88_v5 = vld [vmem:[%s925_s1 + $0x248] sm:$0xff]  ;;  %v66_v6 = vld [vmem:[%s925_s1 + $0x198] sm:$0xff] }
   0x3   :  { %170 = vmatpush1.msra.mxu0 %v85_v1  ;;  %240 = vmatprep.subr.mxu1 %v88_v5  ;;  %v87_v7 = vld [vmem:[%s925_s1 + $0x240] sm:$0xff]  ;;  %v65_v8 = vld [vmem:[%s925_s1 + $0x190] sm:$0xff]  ;;  %v78_v9 = vld [vmem:[%s925_s1 + $0x1f8] sm:$0xff] }
   0x4   :  { %171 = vmatprep.subr.mxu0 %v76_v2  ;;  %241 = vmatpush1.msra.mxu1 %v87_v7  ;;  %v77_v10 = vld [vmem:[%s925_s1 + $0x1f0] sm:$0xff]  ;;  %v56_v11 = vld [vmem:[%s925_s1 + $0x148] sm:$0xff]  ;;  %v55_v13 = vld [vmem:[%s925_s1 + $0x140] sm:$0xff] }
   0x5   :  { %172 = vmatpush1.msra.mxu0 %v75_v4  ;;  %242 = vmatprep.subr.mxu1 %v78_v9  ;;  %v68_v12 = vld [vmem:[%s925_s1 + $0x1a8] sm:$0xff]  ;;  %v67_v14 = vld [vmem:[%s925_s1 + $0x1a0] sm:$0xff]  ;;  %v58_v15 = vld [vmem:[%s925_s1 + $0x158] sm:$0xff] }
   0x6   :  { %173 = vmatprep.subr.mxu0 %v66_v6  ;;  %243 = vmatpush1.msra.mxu1 %v77_v10  ;;  %v46_v16 = vld [vmem:[%s925_s1 + $0xf8] sm:$0xff]  ;;  %v57_v17 = vld [vmem:[%s925_s1 + $0x150] sm:$0xff]  ;;  %v48_v19 = vld [vmem:[%s925_s1 + $0x108] sm:$0xff] }
   0x7   :  { %174 = vmatpush1.msra.mxu0 %v65_v8  ;;  %244 = vmatprep.subr.mxu1 %v68_v12  ;;  %v45_v18 = vld [vmem:[%s925_s1 + $0xf0] sm:$0xff]  ;;  %v36_v20 = vld [vmem:[%s925_s1 + $0xa8] sm:$0xff]  ;;  %v47_v21 = vld [vmem:[%s925_s1 + $0x100] sm:$0xff] }
   0x8   :  { %175 = vmatprep.subr.mxu0 %v56_v11  ;;  %245 = vmatpush1.msra.mxu1 %v67_v14  ;;  %v35_v22 = vld [vmem:[%s925_s1 + $0xa0] sm:$0xff]  ;;  %v38_v23 = vld [vmem:[%s925_s1 + $0xb8] sm:$0xff]  ;;  %v37_v25 = vld [vmem:[%s925_s1 + $0xb0] sm:$0xff] }
   0x9   :  { %176 = vmatpush1.msra.mxu0 %v55_v13  ;;  %246 = vmatprep.subr.mxu1 %v58_v15  ;;  %v26_v24 = vld [vmem:[%s925_s1 + $0x58] sm:$0xff]  ;;  %v25_v26 = vld [vmem:[%s925_s1 + $0x50] sm:$0xff]  ;;  %v28_v27 = vld [vmem:[%s925_s1 + $0x68] sm:$0xff] }
   0xa   :  { %177 = vmatprep.subr.mxu0 %v46_v16  ;;  %247 = vmatpush1.msra.mxu1 %v57_v17  ;;  %v16_v28 = vld [vmem:[%s925_s1 + $0x8] sm:$0xff]  ;;  %v27_v29 = vld [vmem:[%s925_s1 + $0x60] sm:$0xff]  ;;  %v18_v31 = vld [vmem:[%s925_s1 + $0x18] sm:$0xff] }
   0xb   :  { %178 = vmatpush1.msra.mxu0 %v45_v18  ;;  %248 = vmatprep.subr.mxu1 %v48_v19  ;;  %v15_v30 = vld [vmem:[%s925_s1] sm:$0xff]  ;;  %v90_v33 = vld [vmem:[%s925_s1 + $0x258] sm:$0xff]  ;;  %v89_v34 = vld [vmem:[%s925_s1 + $0x250] sm:$0xff]  ;;  %v99_v18 = vlaneseq }
   0xc   :  { %179 = vmatprep.subr.mxu0 %v36_v20  ;;  %249 = vmatpush1.msra.mxu1 %v47_v21  ;;  %v717_v32 = vld [vmem:[%s926_s0] sm:$0xf]  ;;  %v17_v35 = vld [vmem:[%s925_s1 + $0x10] sm:$0xff]  ;;  %v80_v36 = vld [vmem:[%s925_s1 + $0x208] sm:$0xff] }
   0xd   :  { %180 = vmatpush1.msra.mxu0 %v35_v22  ;;  %250 = vmatprep.subr.mxu1 %v38_v23  ;;  %v79_v37 = vld [vmem:[%s925_s1 + $0x200] sm:$0xff]  ;;  %v92_v38 = vld [vmem:[%s925_s1 + $0x268] sm:$0xff]  ;;  %v70_v39 = vld [vmem:[%s925_s1 + $0x1b8] sm:$0xff]  ;;  %v100_v19 = vshrl.u32 %v99_v18, 7 }
   0xe   :  { %181 = vmatprep.subr.mxu0 %v26_v24  ;;  %251 = vmatpush1.msra.mxu1 %v37_v25  ;;  %v91_v40 = vld [vmem:[%s925_s1 + $0x260] sm:$0xff]  ;;  %v69_v41 = vld [vmem:[%s925_s1 + $0x1b0] sm:$0xff]  ;;  %v82_v42 = vld [vmem:[%s925_s1 + $0x218] sm:$0xff] }
   0xf   :  { %182 = vmatpush1.msra.mxu0 %v25_v26  ;;  %252 = vmatprep.subr.mxu1 %v28_v27  ;;  %v60_v43 = vld [vmem:[%s925_s1 + $0x168] sm:$0xff]  ;;  %v81_v44 = vld [vmem:[%s925_s1 + $0x210] sm:$0xff]  ;;  %v59_v45 = vld [vmem:[%s925_s1 + $0x160] sm:$0xff]  ;;  %v101_v20 = vsub.s32 0, %v100_v19  ;;  %v105_v21 = vsub.s32 1, %v100_v19  ;;  %v109_v26 = vsub.s32 2, %v100_v19 }
  0x10   :  { %183 = vmatprep.subr.mxu0 %v16_v28  ;;  %253 = vmatpush1.msra.mxu1 %v27_v29  ;;  %v72_v46 = vld [vmem:[%s925_s1 + $0x1c8] sm:$0xff]  ;;  %v50_v47 = vld [vmem:[%s925_s1 + $0x118] sm:$0xff]  ;;  %v71_v48 = vld [vmem:[%s925_s1 + $0x1c0] sm:$0xff] }
  0x11   :  { %184 = vmatpush1.msra.mxu0 %v15_v30  ;;  %254 = vmatprep.subr.mxu1 %v18_v31  ;;  %v49_v49 = vld [vmem:[%s925_s1 + $0x110] sm:$0xff]  ;;  %v62_v50 = vld [vmem:[%s925_s1 + $0x178] sm:$0xff]  ;;  %v40_v51 = vld [vmem:[%s925_s1 + $0xc8] sm:$0xff]  ;;  %v113_v31 = vsub.s32 3, %v100_v19 }
  0x12   :  { %588 = vmatmul.mubr.msk.f32.vlgmr.msra.gmra.mxu0 %vm149_vm0, %v717_v32  ;;  %311 = vmatprep.subr.mxu0 %v90_v33  ;;  %v61_v52 = vld [vmem:[%s925_s1 + $0x170] sm:$0xff]  ;;  %v39_v53 = vld [vmem:[%s925_s1 + $0xc0] sm:$0xff]  ;;  %v52_v54 = vld [vmem:[%s925_s1 + $0x128] sm:$0xff] }
  0x13   :  { %312 = vmatpush1.msra.mxu0 %v89_v34  ;;  %255 = vmatpush1.msra.mxu1 %v17_v35  ;;  %v30_v55 = vld [vmem:[%s925_s1 + $0x78] sm:$0xff]  ;;  %v51_v56 = vld [vmem:[%s925_s1 + $0x120] sm:$0xff]  ;;  %v29_v57 = vld [vmem:[%s925_s1 + $0x70] sm:$0xff] }
  0x14   :  { %313 = vmatprep.subr.mxu0 %v80_v36  ;;  %589 = vmatmul.mubr.msk.f32.vlgmr.msra.gmra.mxu1 %vm149_vm0, %v717_v32  ;;  %v42_v58 = vld [vmem:[%s925_s1 + $0xd8] sm:$0xff]  ;;  %v20_v59 = vld [vmem:[%s925_s1 + $0x28] sm:$0xff]  ;;  %v19_v60 = vld [vmem:[%s925_s1 + $0x20] sm:$0xff] }
  0x15   :  { %314 = vmatpush1.msra.mxu0 %v79_v37  ;;  %382 = vmatprep.subr.mxu1 %v92_v38  ;;  %v41_v61 = vld [vmem:[%s925_s1 + $0xd0] sm:$0xff]  ;;  %v32_v62 = vld [vmem:[%s925_s1 + $0x88] sm:$0xff]  ;;  %v94_v63 = vld [vmem:[%s925_s1 + $0x278] sm:$0xff]  ;;  %v117_v38 = vsub.s32 4, %v100_v19 }
  0x16   :  { %315 = vmatprep.subr.mxu0 %v70_v39  ;;  %383 = vmatpush1.msra.mxu1 %v91_v40  ;;  %v31_v0 = vld [vmem:[%s925_s1 + $0x80] sm:$0xff]  ;;  %v93_v1 = vld [vmem:[%s925_s1 + $0x270] sm:$0xff]  ;;  %v22_v2 = vld [vmem:[%s925_s1 + $0x38] sm:$0xff]  ;;  %v121_v39 = vsub.s32 5, %v100_v19 }
  0x17   :  { %316 = vmatpush1.msra.mxu0 %v69_v41  ;;  %384 = vmatprep.subr.mxu1 %v82_v42  ;;  %v84_v4 = vld [vmem:[%s925_s1 + $0x228] sm:$0xff]  ;;  %v21_v5 = vld [vmem:[%s925_s1 + $0x30] sm:$0xff]  ;;  %v83_v6 = vld [vmem:[%s925_s1 + $0x220] sm:$0xff] }
  0x18   :  { %317 = vmatprep.subr.mxu0 %v60_v43  ;;  %385 = vmatpush1.msra.mxu1 %v81_v44  ;;  %v74_v7 = vld [vmem:[%s925_s1 + $0x1d8] sm:$0xff]  ;;  %v73_v8 = vld [vmem:[%s925_s1 + $0x1d0] sm:$0xff]  ;;  %v64_v9 = vld [vmem:[%s925_s1 + $0x188] sm:$0xff] }
  0x19   :  { %318 = vmatpush1.msra.mxu0 %v59_v45  ;;  %386 = vmatprep.subr.mxu1 %v72_v46  ;;  %v63_v10 = vld [vmem:[%s925_s1 + $0x180] sm:$0xff]  ;;  %v54_v11 = vld [vmem:[%s925_s1 + $0x138] sm:$0xff]  ;;  %v53_v12 = vld [vmem:[%s925_s1 + $0x130] sm:$0xff]  ;;  %v125_v45 = vsub.s32 6, %v100_v19 }
  0x1a   :  { %319 = vmatprep.subr.mxu0 %v50_v47  ;;  %387 = vmatpush1.msra.mxu1 %v71_v48  ;;  %v44_v13 = vld [vmem:[%s925_s1 + $0xe8] sm:$0xff]  ;;  %v43_v14 = vld [vmem:[%s925_s1 + $0xe0] sm:$0xff]  ;;  %v33_v15 = vld [vmem:[%s925_s1 + $0x90] sm:$0xff] }
  0x1b   :  { %320 = vmatpush1.msra.mxu0 %v49_v49  ;;  %388 = vmatprep.subr.mxu1 %v62_v50  ;;  %v24_v16 = vld [vmem:[%s925_s1 + $0x48] sm:$0xff]  ;;  %v23_v17 = vld [vmem:[%s925_s1 + $0x40] sm:$0xff] }
  0x1c   :  { %321 = vmatprep.subr.mxu0 %v40_v51  ;;  %389 = vmatpush1.msra.mxu1 %v61_v52  ;;  %v95_v22 = vld [vmem:[%s927_s2] sm:$0xff] }
  0x1d   :  { %322 = vmatpush1.msra.mxu0 %v39_v53  ;;  %390 = vmatprep.subr.mxu1 %v52_v54  ;;  %v102_v23 = vrot.slane %v95_v22, %v101_v20  ;;  %v106_v25 = vrot.slane %v95_v22, %v105_v21  ;;  %v110_v30 = vrot.slane %v95_v22, %v109_v26  ;;  %v129_v54 = vsub.s32 7, %v100_v19 }
  0x1e   :  { %323 = vmatprep.subr.mxu0 %v30_v55  ;;  %391 = vmatpush1.msra.mxu1 %v51_v56  ;;  %v114_v36 = vrot.slane %v95_v22, %v113_v31  ;;  %v118_v44 = vrot.slane %v95_v22, %v117_v38  ;;  %v122_v47 = vrot.slane %v95_v22, %v121_v39 }
  0x1f   :  { %324 = vmatpush1.msra.mxu0 %v29_v57  ;;  %392 = vmatprep.subr.mxu1 %v42_v58  ;;  %v126_v53 = vrot.slane %v95_v22, %v125_v45 }
  0x20   :  { %325 = vmatprep.subr.mxu0 %v20_v59  ;;  %359 = vmatprep.mubr.f32.mxu0 %v598_v3 }
  0x21   :  { %326 = vmatpush1.msra.mxu0 %v19_v60  ;;  %393 = vmatpush1.msra.mxu1 %v41_v61 }
  0x22   :  { %590 = vmatmul.mubr.msk.f32.vlgmr.msra.gmra.mxu0 %vm149_vm0, %v717_v32  ;;  %394 = vmatprep.subr.mxu1 %v32_v62 }
  0x23   :  { %453 = vmatprep.subr.mxu0 %v94_v63  ;;  %395 = vmatpush1.msra.mxu1 %v31_v0  ;;  %v130_v63 = vrot.slane %v95_v22, %v129_v54 }
  0x24   :  { %454 = vmatpush1.msra.mxu0 %v93_v1  ;;  %396 = vmatprep.subr.mxu1 %v22_v2 }
  0x25   :  { %455 = vmatprep.subr.mxu0 %v84_v4  ;;  %397 = vmatpush1.msra.mxu1 %v21_v5 }
  0x26   :  { %430 = vmatprep.mubr.f32.mxu1 %v598_v3  ;;  %456 = vmatpush1.msra.mxu0 %v83_v6 }
  0x27   :  { %591 = vmatmul.mubr.msk.f32.vlgmr.msra.gmra.mxu1 %vm149_vm0, %v717_v32  ;;  %457 = vmatprep.subr.mxu0 %v74_v7  ;;  %v96_v7 = vld [vmem:[%s927_s2 + $0x8] sm:$0x3] }
  0x28   :  { %458 = vmatpush1.msra.mxu0 %v73_v8  ;;  %501 = vmatprep.mubr.f32.mxu0 %v598_v3  ;;  %v34_v3 = vld [vmem:[%s925_s1 + $0x98] sm:$0xff] }
  0x29   :  { %459 = vmatprep.subr.mxu0 %v64_v9 }
  0x2a   :  { %460 = vmatpush1.msra.mxu0 %v63_v10 }
  0x2b   :  { %461 = vmatprep.subr.mxu0 %v54_v11  ;;  %v134_v11 = vrot.slane %v96_v7, %v101_v20 }
  0x2c   :  { %462 = vmatpush1.msra.mxu0 %v53_v12  ;;  %v138_v12 = vrot.slane %v96_v7, %v105_v21 }
  0x2d   :  { %463 = vmatprep.subr.mxu0 %v44_v13 }
  0x2e   :  { %464 = vmatpush1.msra.mxu0 %v43_v14 }
  0x2f   :  { %465 = vmatprep.subr.mxu0 %v34_v3 }
  0x30   :  { %466 = vmatpush1.msra.mxu0 %v33_v15 }
  0x31   :  { %467 = vmatprep.subr.mxu0 %v24_v16 }
  0x32   :  { %468 = vmatpush1.msra.mxu0 %v23_v17 }
  0x33   :  { %592 = vmatmul.mubr.msk.f32.vlgmr.msra.gmra.mxu0 %vm149_vm0, %v717_v32 }
  0xd2   :  { %v219_v24 = vpop.f32.mrf.mxu0 }
  0xd3   :  { %v882_v28 = vadd.f32 %v219_v24, %v102_v23 }
  0xd4   :  { %v221_v27 = vpop.f32.mrf.mxu0  ;;  %v290_v32 = vpop.f32.mrf.mxu1 }
  0xd5   :  { %v884_v29 = vadd.f32 %v221_v27, %v106_v25  ;;  %v508_v33 = vmul.f32 %v882_v28, %v882_v28  ;;  %v890_v35 = vadd.f32 %v290_v32, %v110_v30 }
  0xd6   :  { %v292_v37 = vpop.f32.mrf.mxu1 }
  0xd7   :  { %v509_v34 = vmul.f32 %v884_v29, %v884_v29  ;;  %v519_v40 = vsel %vm518_vm1, %v508_v33, 0.0  ;;  %v510_v42 = vmul.f32 %v890_v35, %v890_v35  ;;  %v293_v43 = vadd.f32 %v292_v37, %v114_v36 }
  0xd9   :  { %v520_v41 = vsel %vm518_vm1, %v509_v34, 0.0  ;;  %v522_v48 = vsel %vm518_vm1, %v510_v42, 0.0  ;;  %v511_v49 = vmul.f32 %v293_v43, %v293_v43 }
  0xda   :  { %v521_v46 = vadd.f32 %v520_v41, %v519_v40 }
  0xdb   :  { %v524_v58 = vsel %vm518_vm1, %v511_v49, 0.0 }
  0xdc   :  { %v523_v55 = vadd.f32 %v522_v48, %v521_v46 }
  0xde   :  { %v525_v0 = vadd.f32 %v524_v58, %v523_v55 }
  0xe2   :  { %v361_v50 = vpop.f32.mrf.mxu0 }
  0xe3   :  { %v362_v51 = vadd.f32 %v361_v50, %v118_v44 }
  0xe4   :  { %v363_v52 = vpop.f32.mrf.mxu0 }
  0xe5   :  { %v512_v56 = vmul.f32 %v362_v51, %v362_v51  ;;  %v364_v57 = vadd.f32 %v363_v52, %v122_v47 }
  0xe7   :  { %v432_v59 = vpop.f32.mrf.mxu1  ;;  %v526_v60 = vsel %vm518_vm1, %v512_v56, 0.0  ;;  %v513_v61 = vmul.f32 %v364_v57, %v364_v57 }
  0xe8   :  { %v433_v62 = vadd.f32 %v432_v59, %v126_v53  ;;  %v527_v2 = vadd.f32 %v526_v60, %v525_v0 }
  0xe9   :  { %v434_v1 = vpop.f32.mrf.mxu1  ;;  %v528_v4 = vsel %vm518_vm1, %v513_v61, 0.0 }
  0xea   :  { %v514_v5 = vmul.f32 %v433_v62, %v433_v62  ;;  %v435_v6 = vadd.f32 %v434_v1, %v130_v63  ;;  %v529_v8 = vadd.f32 %v528_v4, %v527_v2 }
  0xec   :  { %v530_v9 = vsel %vm518_vm1, %v514_v5, 0.0  ;;  %v515_v10 = vmul.f32 %v435_v6, %v435_v6 }
  0xed   :  { %v531_v13 = vadd.f32 %v530_v9, %v529_v8 }
  0xee   :  { %v532_v3 = vsel %vm518_vm1, %v515_v10, 0.0 }
  0xef   :  { %v533_v19 = vadd.f32 %v532_v3, %v531_v13 }
  0xf3   :  { %v503_v14 = vpop.f32.mrf.mxu0 }
  0xf4   :  { %v504_v15 = vadd.f32 %v503_v14, %v134_v11 }
  0xf5   :  { %v505_v16 = vpop.f32.mrf.mxu0 }
  0xf6   :  { %v516_v17 = vmul.f32 %v504_v15, %v504_v15  ;;  %v506_v18 = vadd.f32 %v505_v16, %v138_v12 }
  0xf8   :  { %v517_v22 = vmul.f32 %v506_v18, %v506_v18  ;;  %v534_v23 = vsel %vm518_vm1, %v516_v17, 0.0 }
  0xf9   :  { %v535_v24 = vadd.f32 %v534_v23, %v533_v19 }
  0xfa   :  { %v536_v25 = vsel %vm518_vm1, %v517_v22, 0.0 }
  0xfb   :  { %v537_v26 = vadd.f32 %v536_v25, %v535_v24 }
  0xfd   :  { %538 = vadd.xlane.f32.xlu0 %v537_v26 }
 0x186   :  { %v539_v27 = vpop.xlane.xlu0 %538 }
 0x187   :  { %594 = vrsqrt.f32 %v539_v27  ;;  %vm542_vm2 = vcmp.eq.f32.partialorder %v539_v27, inf  ;;  %v545_v30 = vand.u32 2147483648, %v539_v27  ;;  %vm544_vm3 = vcmp.eq.f32.partialorder %v539_v27, 0.0 }
 0x194   :  { %v595_v20 = vpop.eup %594 }
 0x195   :  { %v541_v21 = vmul.f32 %v595_v20, %v539_v27 }
 0x197   :  { %v543_v31 = vsel %vm542_vm2, %v539_v27, %v541_v21 }
 0x198   :  { %v546_v32 = vsel %vm544_vm3, %v545_v30, %v543_v31 }
 0x199   :  { %v547_v33 = vmax.f32 %v546_v32, 1e-12 }
 0x19b   :  { %596 = vrcp.f32 %v547_v33 }
 0x1a8   :  { %v597_v34 = vpop.eup %596 }
 0x1a9   :  { %v549_v36 = vmul.f32 %v597_v34, %v882_v28  ;;  %v550_v37 = vmul.f32 %v597_v34, %v884_v29  ;;  %v551_v38 = vmul.f32 %v597_v34, %v890_v35  ;;  %v552_v39 = vmul.f32 %v597_v34, %v293_v43 }
 0x1aa   :  { %v553_v40 = vmul.f32 %v597_v34, %v362_v51  ;;  %v554_v41 = vmul.f32 %v597_v34, %v364_v57  ;;  %v555_v42 = vmul.f32 %v597_v34, %v433_v62  ;;  %v556_v44 = vmul.f32 %v597_v34, %v435_v6 }
 0x1ab   :  { %v557_v45 = vmul.f32 %v597_v34, %v504_v15  ;;  %v558_v46 = vmul.f32 %v597_v34, %v506_v18  ;;  %v569_v47 = vcombine.low %v549_v36, %v550_v37  ;;  %v570_v48 = vcombine.low %v551_v38, %v552_v39 }
 0x1ac   :  { %v571_v49 = vcombine.low %v553_v40, %v554_v41  ;;  %v572_v50 = vcombine.low %v555_v42, %v556_v44 }
 0x1ad   :  { %v573_v52 = vcombine.low %v557_v45, %v558_v46  ;;  %579 = vst [vmem:[%s928_s3] sm:$0xff] %v569_v47  ;;  %580 = vst [vmem:[%s928_s3 + $0x8] sm:$0xff] %v570_v48 }
 0x1ae   :  { %581 = vst [vmem:[%s928_s3 + $0x10] sm:$0xff] %v571_v49  ;;  %582 = vst [vmem:[%s928_s3 + $0x18] sm:$0xff] %v572_v50 }
 0x1af   :  { %583 = vst [vmem:[%s928_s3 + $0x20] sm:$0xff] %v573_v52 }

</bundles_post_ra>
